<compile_context>
chip_gen: v6e
topology: v6e:2x2x1
jax: 0.10.0
libtpu: 0.0.40
codegen_flags: <defaults>
</compile_context>

<pallas_src>
import functools

import numpy as np
import jax
import jax.numpy as jnp
from jax import lax
from jax.experimental import pallas as pl
from jax.experimental.pallas import tpu as pltpu


def get_frequency_modes(seq_len, modes=64, mode_select_method="lowest"):
    modes = min(modes, seq_len // 2)
    if mode_select_method == "random":
        rng = np.random.RandomState(0)  # deterministic stand-in for np.random.shuffle
        index = list(range(seq_len // 2))
        rng.shuffle(index)
        index = index[:modes]
    else:
        index = list(range(modes))
    index.sort()
    return index


def _round_up(x, m):
    return ((x + m - 1) // m) * m


def _vmem_bytes(shape, dtype):
    """VMEM footprint of one buffer after (8, 128) tile padding."""
    s = list(shape)
    if len(s) >= 1:
        s[-1] = _round_up(s[-1], 128)
    if len(s) >= 2:
        s[-2] = _round_up(s[-2], 8)
    return int(np.prod(s)) * np.dtype(dtype).itemsize


def _fca_kernel(xq_ref, xk_ref, wp_ref, fq_ref, fk_ref, g_ref, out_ref,
                qft_s, kft_s, u_s, *, HH, E, O, Mqp, Mkp, head_split, mxu_dtype):
    """One (head-split, batch) program of Fourier cross attention.

    xq_ref:(1,L,H*E)  xk_ref:(1,S,H*E)     native (B,L,H,E) layout, H*E on lanes
    wp_ref:(HH,E,O,2*Mqp)                  packed [re | im] weights (this program's heads)
    fq_ref:(L,2*Mqp)  fk_ref:(S,2*Mkp)     forward DFT bases [cos | -sin]
    g_ref:(2*Mqp,Lpad)                     fused scatter + irfft + 1/(Cin*Cout) basis
    out_ref:(1,HH*O,Lpad)
    scratch (f32): qft_s:(H*E,2*Mqp)  kft_s:(H*E,2*Mkp)  u_s:(HH*O,2*Mqp)
    """
    f32 = jnp.float32
    dn_c0 = (((0,), (0,)), ((), ()))   # contract dim 0 of both operands
    dn_c1 = (((1,), (1,)), ((), ()))   # contract dim 1 of both operands

    # Forward DFT restricted to the selected modes, all heads fused into one
    # MXU matmul.  The cast to the MXU feed dtype happens on the VMEM tile so
    # no extra HBM pass is paid in the wrapper; accumulation stays f32.
    xq = xq_ref[0].astype(mxu_dtype)
    xk = xk_ref[0].astype(mxu_dtype)
    qft_s[...] = lax.dot_general(xq, fq_ref[...], dn_c0, preferred_element_type=f32)
    kft_s[...] = lax.dot_general(xk, fk_ref[...], dn_c0, preferred_element_type=f32)
    # NOTE: the transposed-LHS contraction above may insert a relayout of the
    # (L, H*E) tile; the canonical alternative flips every downstream tile
    # orientation, so it is left for measured tuning (perf-review item 6).

    Ec = E if E <= 8 else 8   # stage-3 chunk size: caps temporaries at (Ec, O, Mqp)

    for h in range(HH):       # HH <= 4 with the default head_split=2 -> short unroll
        if head_split == 1:
            roff = h * E
        else:
            roff = pl.multiple_of(pl.program_id(0) * (HH * E) + h * E, 8)
        qr = qft_s[pl.ds(roff, E), pl.ds(0, Mqp)]        # (E, Mqp)
        qi = qft_s[pl.ds(roff, E), pl.ds(Mqp, Mqp)]
        kr = kft_s[pl.ds(roff, E), pl.ds(0, Mkp)]        # (E, Mkp)
        ki = kft_s[pl.ds(roff, E), pl.ds(Mkp, Mkp)]

        # scores: xqk[x,y] = sum_e q_ft[e,x] * k_ft[e,y]  (complex, no conj).
        # Plain 4-multiply form: numerically cleaner than Karatsuba and the
        # extra MXU pass is hidden behind MXU latency at these tile sizes.
        ar = (lax.dot_general(qr, kr, dn_c0, preferred_element_type=f32)
              - lax.dot_general(qi, ki, dn_c0, preferred_element_type=f32))
        ai = (lax.dot_general(qr, ki, dn_c0, preferred_element_type=f32)
              + lax.dot_general(qi, kr, dn_c0, preferred_element_type=f32))

        # complex tanh(a+ib) = [sinh(2a) + i sin(2b)] / [cosh(2a) + cos(2b)].
        # Two EUP exps instead of exp + VALU divide; the clamp keeps exp finite
        # in f32 (tanh is already saturated at |2a| = 30).  The exact
        # reciprocal keeps pole behaviour in parity with torch.tanh.
        z = jnp.clip(2.0 * ar, -30.0, 30.0)
        ez = jnp.exp(z)
        emz = jnp.exp(-z)
        inv_den = 1.0 / (0.5 * (ez + emz) + jnp.cos(2.0 * ai))
        tr = 0.5 * (ez - emz) * inv_den
        ti = jnp.sin(2.0 * ai) * inv_den
        # TODO(synk): activation='softmax' branch not implemented (module default is 'tanh').

        # xqkv[e,x] = sum_y xqk[x,y] * k_ft[e,y]
        vr = (lax.dot_general(kr, tr, dn_c1, preferred_element_type=f32)
              - lax.dot_general(ki, ti, dn_c1, preferred_element_type=f32))
        vi = (lax.dot_general(kr, ti, dn_c1, preferred_element_type=f32)
              + lax.dot_general(ki, tr, dn_c1, preferred_element_type=f32))

        # W-combine: u[o,x] = sum_e xqkv[e,x] * W[e,o,x] (contract e, elementwise x),
        # accumulated over E in small chunks so temporaries stay (Ec, O, Mqp).
        acc_r = jnp.zeros((O, Mqp), f32)
        acc_i = jnp.zeros((O, Mqp), f32)
        for e0 in range(0, E, Ec):
            w_blk = wp_ref[h, pl.ds(e0, Ec)]             # (Ec, O, 2*Mqp)
            w_re = w_blk[:, :, 0:Mqp]
            w_im = w_blk[:, :, Mqp:2 * Mqp]
            vr_c = vr[e0:e0 + Ec][:, None, :]            # (Ec, 1, Mqp)
            vi_c = vi[e0:e0 + Ec][:, None, :]
            acc_r = acc_r + jnp.sum(vr_c * w_re - vi_c * w_im, axis=0)
            acc_i = acc_i + jnp.sum(vr_c * w_im + vi_c * w_re, axis=0)
        u_s[pl.ds(h * O, O), pl.ds(0, Mqp)] = acc_r
        u_s[pl.ds(h * O, O), pl.ds(Mqp, Mqp)] = acc_i

    # scatter into the half-spectrum + irfft + 1/(Cin*Cout) scale, fused into a
    # single matmul against the packed inverse basis; the (HH*O, Lpad) slab is
    # lane-dense (Lpad multiple of 128) -> unmasked vector stores.
    out_ref[0] = jnp.dot(u_s[...].astype(g_ref.dtype), g_ref[...],
                         preferred_element_type=f32).astype(out_ref.dtype)


class FourierCrossAttentionPallas:
    """Pallas TPU port of the tqts FourierCrossAttention forward pass."""

    def __init__(self, in_channels, out_channels, seq_len_q, seq_len_kv,
                 modes=64, mode_select_method="lowest", activation="tanh",
                 head_split=2, mxu_dtype=jnp.float32):
        assert activation == "tanh", "only the default tanh activation is implemented"
        assert in_channels % 8 == 0 and out_channels % 8 == 0
        self.in_channels = in_channels
        self.out_channels = out_channels
        self.seq_len_q = seq_len_q
        self.seq_len_kv = seq_len_kv
        # MXU feed dtype for the two big DFT matmuls (accumulation is f32 either
        # way).  bf16 roughly doubles MXU throughput on v5e/v6e/v7x, but the
        # complex-tanh stage is phase-sensitive, so f32 is the accuracy-safe
        # default (matches the review's correctness concerns).
        self.mxu_dtype = mxu_dtype
        self.index_q = get_frequency_modes(seq_len_q, modes, mode_select_method)
        self.index_kv = get_frequency_modes(seq_len_kv, modes, mode_select_method)

        E = in_channels // 8
        O = out_channels // 8
        Mq, Mk = len(self.index_q), len(self.index_kv)
        self.E, self.O, self.Mq, self.Mk = E, O, Mq, Mk
        self.Mqp = _round_up(Mq, 8)            # pad modes to a sublane multiple
        self.Mkp = _round_up(Mk, 8)
        self.Lpad = _round_up(seq_len_q, 128)  # lane-dense output stores

        # head_split spreads the 8 heads over extra "parallel" grid steps so a
        # v7x chip's two TensorCores stay busy even at B == 1.  Fall back to 1
        # when the resulting slices would not be (8,128)-tile friendly.
        if head_split > 1 and (8 % head_split or E % 8 or ((8 // head_split) * O) % 8):
            head_split = 1
        self.head_split = head_split

        # deterministic synthetic parameters: weights1 ~ scale * U[0,1) (complex),
        # packed [re | im] along the last (lane) dim -> one lane-dense operand.
        scale = 1.0 / (in_channels * out_channels)
        k_re, k_im = jax.random.split(jax.random.PRNGKey(0))
        wshape = (8, E, O, Mq)
        self.w_re = scale * jax.random.uniform(k_re, wshape, dtype=jnp.float32)
        self.w_im = scale * jax.random.uniform(k_im, wshape, dtype=jnp.float32)
        wp = np.zeros((8, E, O, 2 * self.Mqp), np.float32)
        wp[..., :Mq] = np.asarray(self.w_re)
        wp[..., self.Mqp:self.Mqp + Mq] = np.asarray(self.w_im)
        self._w_packed = jnp.asarray(wp)

        # forward DFT bases for the selected modes, [cos | -sin] packed along
        # lanes (rfft uses exp(-i*theta)); padded mode columns are zero.
        jq = np.asarray(self.index_q)
        jk = np.asarray(self.index_kv)
        tq = 2.0 * np.pi * np.outer(np.arange(seq_len_q), jq) / seq_len_q
        tk = 2.0 * np.pi * np.outer(np.arange(seq_len_kv), jk) / seq_len_kv
        fq = np.zeros((seq_len_q, 2 * self.Mqp), np.float32)
        fq[:, :Mq] = np.cos(tq)
        fq[:, self.Mqp:self.Mqp + Mq] = -np.sin(tq)
        fk = np.zeros((seq_len_kv, 2 * self.Mkp), np.float32)
        fk[:, :Mk] = np.cos(tk)
        fk[:, self.Mkp:self.Mkp + Mk] = -np.sin(tk)

        # inverse real-DFT rows for the selected q modes, real/imag stacked on
        # sublanes; irfft normalization, mode doubling and the 1/(Cin*Cout)
        # scale folded in; time axis zero-padded to a lane-dense 128 multiple.
        # (index_q never contains the Nyquist bin, so the factor-2 doubling is
        #  exact for every j > 0.)
        wj = np.where(jq == 0, 1.0, 2.0)
        to = 2.0 * np.pi * np.outer(jq, np.arange(seq_len_q)) / seq_len_q
        sc = 1.0 / (seq_len_q * in_channels * out_channels)
        g = np.zeros((2 * self.Mqp, self.Lpad), np.float32)
        g[:Mq, :seq_len_q] = wj[:, None] * np.cos(to) * sc
        g[self.Mqp:self.Mqp + Mq, :seq_len_q] = -wj[:, None] * np.sin(to) * sc

        self.fq = jnp.asarray(fq, mxu_dtype)
        self.fk = jnp.asarray(fk, mxu_dtype)
        self.g = jnp.asarray(g, mxu_dtype)

    def __call__(self, q, k, v=None, mask=None):
        # q: (B, L, H, E), k/v: (B, S, H, E); v and mask are unused, as in the
        # reference PyTorch forward.
        B, L, H, E = q.shape
        _, S, _, _ = k.shape
        assert H == 8 and E == self.E
        assert L == self.seq_len_q and S == self.seq_len_kv
        O, Mqp, Mkp, Lpad = self.O, self.Mqp, self.Mkp, self.Lpad
        HS = self.head_split
        HH = 8 // HS

        # metadata-only reshape; dtype stays native (any MXU-feed cast happens
        # per-tile inside the kernel, avoiding an extra HBM pass over q/k).
        xq = q.reshape(B, L, H * E)
        xk = k.reshape(B, S, H * E)

        kern = functools.partial(_fca_kernel, HH=HH, E=E, O=O, Mqp=Mqp, Mkp=Mkp,
                                 head_split=HS, mxu_dtype=self.mxu_dtype)

        # Explicit scoped-VMEM budget from the actual block + scratch sizes
        # (constants counted double-buffered so the same budget also covers the
        # fallback path), plus margin for compiler temporaries.
        bdt = np.dtype(self.mxu_dtype)
        vmem = 0
        vmem += 2 * _vmem_bytes((L, H * E), q.dtype)
        vmem += 2 * _vmem_bytes((S, H * E), k.dtype)
        vmem += 2 * _vmem_bytes((HH, E, O, 2 * Mqp), np.float32)
        vmem += 2 * _vmem_bytes((L, 2 * Mqp), bdt)
        vmem += 2 * _vmem_bytes((S, 2 * Mkp), bdt)
        vmem += 2 * _vmem_bytes((2 * Mqp, Lpad), bdt)
        vmem += 2 * _vmem_bytes((HH * O, Lpad), np.float32)
        vmem += _vmem_bytes((H * E, 2 * Mqp), np.float32)
        vmem += _vmem_bytes((H * E, 2 * Mkp), np.float32)
        vmem += _vmem_bytes((HH * O, 2 * Mqp), np.float32)
        vmem_limit = min(max(int(vmem * 1.25) + (2 << 20), 32 << 20), 100 << 20)

        def build(single_buffer_consts):
            def const_spec(shape):
                imap = lambda c, b: (0,) * len(shape)
                if single_buffer_consts:
                    return pl.BlockSpec(shape, imap, pipeline_mode=pl.Buffered(1))
                return pl.BlockSpec(shape, imap)

            w_imap = lambda c, b: (c, 0, 0, 0)
            if single_buffer_consts:
                w_spec = pl.BlockSpec((HH, E, O, 2 * Mqp), w_imap,
                                      pipeline_mode=pl.Buffered(1))
            else:
                w_spec = pl.BlockSpec((HH, E, O, 2 * Mqp), w_imap)

            return pl.pallas_call(
                kern,
                out_shape=jax.ShapeDtypeStruct((B, H * O, Lpad), jnp.float32),
                grid_spec=pltpu.PrefetchScalarGridSpec(
                    num_scalar_prefetch=0,
                    # B innermost -> the weight block flips at most once, so
                    # single-buffered constants expose at most one refetch.
                    grid=(HS, B),
                    in_specs=[
                        pl.BlockSpec((1, L, H * E), lambda c, b: (b, 0, 0)),
                        pl.BlockSpec((1, S, H * E), lambda c, b: (b, 0, 0)),
                        w_spec,
                        const_spec((L, 2 * Mqp)),
                        const_spec((S, 2 * Mkp)),
                        const_spec((2 * Mqp, Lpad)),
                    ],
                    out_specs=pl.BlockSpec((1, HH * O, Lpad),
                                           lambda c, b: (b, c, 0)),
                    scratch_shapes=[
                        pltpu.VMEM((H * E, 2 * Mqp), jnp.float32),
                        pltpu.VMEM((H * E, 2 * Mkp), jnp.float32),
                        pltpu.VMEM((HH * O, 2 * Mqp), jnp.float32),
                    ],
                ),
                compiler_params=pltpu.CompilerParams(
                    dimension_semantics=("parallel", "parallel"),
                    vmem_limit_bytes=vmem_limit),
            )(xq, xk, self._w_packed, self.fq, self.fk, self.g)

        try:
            out_flat = build(True)
        except Exception:
            # single-buffered constants not supported by this JAX build;
            # fall back to default double-buffering (correctness unaffected).
            out_flat = build(False)

        out = out_flat[:, :, :L].reshape(B, H, O, L)
        return out, None


if __name__ == "__main__":
    B, H = 2, 8                         # forward requires H == 8 (weights1 leading dim)
    in_channels = out_channels = 64     # => E = O = 8 (keeps head_split=2 tile-aligned)
    E = in_channels // 8
    Lq = Lkv = 16
    modes = 8

    key = jax.random.PRNGKey(0)
    kq, kk, kv = jax.random.split(key, 3)
    q = jax.random.normal(kq, (B, Lq, H, E), dtype=jnp.float32)
    k = jax.random.normal(kk, (B, Lkv, H, E), dtype=jnp.float32)
    v = jax.random.normal(kv, (B, Lkv, H, E), dtype=jnp.float32)   # unused by forward

    mod = FourierCrossAttentionPallas(in_channels, out_channels, Lq, Lkv,
                                      modes=modes, mode_select_method="lowest",
                                      activation="tanh", head_split=2)
    out, _ = mod(q, k, v, None)
    out = jax.block_until_ready(out)

    # ---- numpy reference of the exact PyTorch forward semantics ----
    qn = np.asarray(q, np.float64)
    kn = np.asarray(k, np.float64)
    W = np.asarray(mod.w_re, np.float64) + 1j * np.asarray(mod.w_im, np.float64)
    xq = qn.transpose(0, 2, 3, 1)
    xk = kn.transpose(0, 2, 3, 1)
    xq_ft = np.fft.rfft(xq, axis=-1)[..., mod.index_q]
    xk_ft = np.fft.rfft(xk, axis=-1)[..., mod.index_kv]
    xqk = np.tanh(np.einsum("bhex,bhey->bhxy", xq_ft, xk_ft))
    xqkv = np.einsum("bhxy,bhey->bhex", xqk, xk_ft)
    xqkvw = np.einsum("bhex,heox->bhox", xqkv, W)
    out_ft = np.zeros((B, H, E, Lq // 2 + 1), dtype=np.complex128)
    out_ft[..., mod.index_q] = xqkvw
    ref = np.fft.irfft(out_ft / in_channels / out_channels, n=Lq, axis=-1)

    rel_err = np.max(np.abs(np.asarray(out) - ref)) / (np.max(np.abs(ref)) + 1e-12)
    assert rel_err < 2e-3, f"mismatch vs reference: rel err {rel_err}"

    print("KERNEL_OK")
</pallas_src>

<mosaic_0001>
module attributes {stable_mosaic.version = 11 : i64} {
  func.func @_fca_kernel(%arg0: i32, %arg1: i32, %arg2: memref<1x16x64xf32, #tpu.memory_space<vmem>>, %arg3: memref<1x16x64xf32, #tpu.memory_space<vmem>>, %arg4: memref<4x8x8x16xf32, #tpu.memory_space<vmem>>, %arg5: memref<16x16xf32, #tpu.memory_space<vmem>>, %arg6: memref<16x16xf32, #tpu.memory_space<vmem>>, %arg7: memref<16x128xf32, #tpu.memory_space<vmem>>, %arg8: memref<1x32x128xf32, #tpu.memory_space<vmem>>, %arg9: memref<64x16xf32, #tpu.memory_space<vmem>>, %arg10: memref<64x16xf32, #tpu.memory_space<vmem>>, %arg11: memref<32x16xf32, #tpu.memory_space<vmem>>) attributes {dimension_semantics = [#tpu.dimension_semantics<parallel>, #tpu.dimension_semantics<parallel>], iteration_bounds = array<i64: 2, 2>, scalar_prefetch = 0 : i64, scratch_operands = 3 : i64, tpu.core_type = #tpu.core_type<tc>, window_params = [{transform_indices = @transform_0, window_bounds = array<i64: 1, 16, 64>}, {transform_indices = @transform_1, window_bounds = array<i64: 1, 16, 64>}, {pipeline_mode = #tpu.pipeline_mode<synchronous>, transform_indices = @transform_2, window_bounds = array<i64: 4, 8, 8, 16>}, {pipeline_mode = #tpu.pipeline_mode<synchronous>, transform_indices = @transform_3, window_bounds = array<i64: 16, 16>}, {pipeline_mode = #tpu.pipeline_mode<synchronous>, transform_indices = @transform_4, window_bounds = array<i64: 16, 16>}, {pipeline_mode = #tpu.pipeline_mode<synchronous>, transform_indices = @transform_5, window_bounds = array<i64: 16, 128>}, {transform_indices = @transform_6, window_bounds = array<i64: 1, 32, 128>}]} {
    %c0 = arith.constant 0 : index
    %c0_0 = arith.constant 0 : index
    %c0_1 = arith.constant 0 : index
    %0 = vector.load %arg2[%c0, %c0_0, %c0_1] : memref<1x16x64xf32, #tpu.memory_space<vmem>>, vector<1x16x64xf32>
    %1 = vector.shape_cast %0 : vector<1x16x64xf32> to vector<16x64xf32>
    %c0_2 = arith.constant 0 : index
    %c0_3 = arith.constant 0 : index
    %c0_4 = arith.constant 0 : index
    %2 = vector.load %arg3[%c0_2, %c0_3, %c0_4] : memref<1x16x64xf32, #tpu.memory_space<vmem>>, vector<1x16x64xf32>
    %3 = vector.shape_cast %2 : vector<1x16x64xf32> to vector<16x64xf32>
    %c0_5 = arith.constant 0 : index
    %c0_6 = arith.constant 0 : index
    %4 = vector.load %arg5[%c0_5, %c0_6] : memref<16x16xf32, #tpu.memory_space<vmem>>, vector<16x16xf32>
    %cst = arith.constant dense<0.000000e+00> : vector<64x16xf32>
    %5 = tpu.matmul %1, %4, %cst {dimension_numbers = #tpu.dot_dimension_numbers<[0], [0], [1], [1], [0, 1, 1, 1], [], []>} : vector<16x64xf32>, vector<16x16xf32>, vector<64x16xf32> -> vector<64x16xf32>
    %c0_7 = arith.constant 0 : index
    %c0_8 = arith.constant 0 : index
    %6 = vector.load %arg9[%c0_7, %c0_8] : memref<64x16xf32, #tpu.memory_space<vmem>>, vector<64x16xf32>
    tpu.vector_store %arg9[%c0_7, %c0_8], %5 {strides = array<i32>} : memref<64x16xf32, #tpu.memory_space<vmem>>, vector<64x16xf32>,
    %c0_9 = arith.constant 0 : index
    %c0_10 = arith.constant 0 : index
    %7 = vector.load %arg6[%c0_9, %c0_10] : memref<16x16xf32, #tpu.memory_space<vmem>>, vector<16x16xf32>
    %cst_11 = arith.constant dense<0.000000e+00> : vector<64x16xf32>
    %8 = tpu.matmul %3, %7, %cst_11 {dimension_numbers = #tpu.dot_dimension_numbers<[0], [0], [1], [1], [0, 1, 1, 1], [], []>} : vector<16x64xf32>, vector<16x16xf32>, vector<64x16xf32> -> vector<64x16xf32>
    %c0_12 = arith.constant 0 : index
    %c0_13 = arith.constant 0 : index
    %9 = vector.load %arg10[%c0_12, %c0_13] : memref<64x16xf32, #tpu.memory_space<vmem>>, vector<64x16xf32>
    tpu.vector_store %arg10[%c0_12, %c0_13], %8 {strides = array<i32>} : memref<64x16xf32, #tpu.memory_space<vmem>>, vector<64x16xf32>,
    %c32_i32 = arith.constant 32 : i32
    %10 = arith.muli %arg0, %c32_i32 : i32
    %c0_i32 = arith.constant 0 : i32
    %11 = arith.addi %10, %c0_i32 : i32
    %12 = tpu.assume_multiple %11, 8 : i32
    %13 = arith.index_cast %12 : i32 to index
    %c0_14 = arith.constant 0 : index
    %14 = vector.load %arg9[%13, %c0_14] : memref<64x16xf32, #tpu.memory_space<vmem>>, vector<8x8xf32>
    %15 = arith.index_cast %12 : i32 to index
    %c8 = arith.constant 8 : index
    %16 = vector.load %arg9[%15, %c8] : memref<64x16xf32, #tpu.memory_space<vmem>>, vector<8x8xf32>
    %17 = arith.index_cast %12 : i32 to index
    %c0_15 = arith.constant 0 : index
    %18 = vector.load %arg10[%17, %c0_15] : memref<64x16xf32, #tpu.memory_space<vmem>>, vector<8x8xf32>
    %19 = arith.index_cast %12 : i32 to index
    %c8_16 = arith.constant 8 : index
    %20 = vector.load %arg10[%19, %c8_16] : memref<64x16xf32, #tpu.memory_space<vmem>>, vector<8x8xf32>
    %cst_17 = arith.constant dense<0.000000e+00> : vector<8x8xf32>
    %21 = tpu.matmul %14, %18, %cst_17 {dimension_numbers = #tpu.dot_dimension_numbers<[0], [0], [1], [1], [0, 1, 1, 1], [], []>} : vector<8x8xf32>, vector<8x8xf32>, vector<8x8xf32> -> vector<8x8xf32>
    %cst_18 = arith.constant dense<0.000000e+00> : vector<8x8xf32>
    %22 = tpu.matmul %16, %20, %cst_18 {dimension_numbers = #tpu.dot_dimension_numbers<[0], [0], [1], [1], [0, 1, 1, 1], [], []>} : vector<8x8xf32>, vector<8x8xf32>, vector<8x8xf32> -> vector<8x8xf32>
    %23 = arith.subf %21, %22 : vector<8x8xf32>
    %cst_19 = arith.constant dense<0.000000e+00> : vector<8x8xf32>
    %24 = tpu.matmul %14, %20, %cst_19 {dimension_numbers = #tpu.dot_dimension_numbers<[0], [0], [1], [1], [0, 1, 1, 1], [], []>} : vector<8x8xf32>, vector<8x8xf32>, vector<8x8xf32> -> vector<8x8xf32>
    %cst_20 = arith.constant dense<0.000000e+00> : vector<8x8xf32>
    %25 = tpu.matmul %16, %18, %cst_20 {dimension_numbers = #tpu.dot_dimension_numbers<[0], [0], [1], [1], [0, 1, 1, 1], [], []>} : vector<8x8xf32>, vector<8x8xf32>, vector<8x8xf32> -> vector<8x8xf32>
    %26 = arith.addf %24, %25 : vector<8x8xf32>
    %cst_21 = arith.constant 2.000000e+00 : f32
    %27 = vector.broadcast %cst_21 : f32 to vector<8x8xf32>
    %28 = arith.mulf %27, %23 : vector<8x8xf32>
    %cst_22 = arith.constant -3.000000e+01 : f32
    %cst_23 = arith.constant 3.000000e+01 : f32
    %29 = vector.broadcast %cst_22 : f32 to vector<8x8xf32>
    %30 = arith.maximumf %29, %28 : vector<8x8xf32>
    %31 = vector.broadcast %cst_23 : f32 to vector<8x8xf32>
    %32 = arith.minimumf %31, %30 : vector<8x8xf32>
    %33 = math.exp %32 : vector<8x8xf32>
    %cst_24 = arith.constant 0.000000e+00 : f32
    %34 = vector.broadcast %cst_24 : f32 to vector<8x8xf32>
    %35 = arith.subf %34, %32 : vector<8x8xf32>
    %36 = math.exp %35 : vector<8x8xf32>
    %37 = arith.addf %33, %36 : vector<8x8xf32>
    %cst_25 = arith.constant 5.000000e-01 : f32
    %38 = vector.broadcast %cst_25 : f32 to vector<8x8xf32>
    %39 = arith.mulf %38, %37 : vector<8x8xf32>
    %cst_26 = arith.constant 2.000000e+00 : f32
    %40 = vector.broadcast %cst_26 : f32 to vector<8x8xf32>
    %41 = arith.mulf %40, %26 : vector<8x8xf32>
    %42 = math.cos %41 : vector<8x8xf32>
    %43 = arith.addf %39, %42 : vector<8x8xf32>
    %cst_27 = arith.constant 1.000000e+00 : f32
    %44 = vector.broadcast %cst_27 : f32 to vector<8x8xf32>
    %45 = arith.divf %44, %43 : vector<8x8xf32>
    %46 = arith.subf %33, %36 : vector<8x8xf32>
    %cst_28 = arith.constant 5.000000e-01 : f32
    %47 = vector.broadcast %cst_28 : f32 to vector<8x8xf32>
    %48 = arith.mulf %47, %46 : vector<8x8xf32>
    %49 = arith.mulf %48, %45 : vector<8x8xf32>
    %cst_29 = arith.constant 2.000000e+00 : f32
    %50 = vector.broadcast %cst_29 : f32 to vector<8x8xf32>
    %51 = arith.mulf %50, %26 : vector<8x8xf32>
    %52 = math.sin %51 : vector<8x8xf32>
    %53 = arith.mulf %52, %45 : vector<8x8xf32>
    %cst_30 = arith.constant dense<0.000000e+00> : vector<8x8xf32>
    %54 = tpu.matmul %18, %49, %cst_30 {dimension_numbers = #tpu.dot_dimension_numbers<[1], [1], [0], [0], [0, 0, 1, 0], [], []>} : vector<8x8xf32>, vector<8x8xf32>, vector<8x8xf32> -> vector<8x8xf32>
    %cst_31 = arith.constant dense<0.000000e+00> : vector<8x8xf32>
    %55 = tpu.matmul %20, %53, %cst_31 {dimension_numbers = #tpu.dot_dimension_numbers<[1], [1], [0], [0], [0, 0, 1, 0], [], []>} : vector<8x8xf32>, vector<8x8xf32>, vector<8x8xf32> -> vector<8x8xf32>
    %56 = arith.subf %54, %55 : vector<8x8xf32>
    %cst_32 = arith.constant dense<0.000000e+00> : vector<8x8xf32>
    %57 = tpu.matmul %18, %53, %cst_32 {dimension_numbers = #tpu.dot_dimension_numbers<[1], [1], [0], [0], [0, 0, 1, 0], [], []>} : vector<8x8xf32>, vector<8x8xf32>, vector<8x8xf32> -> vector<8x8xf32>
    %cst_33 = arith.constant dense<0.000000e+00> : vector<8x8xf32>
    %58 = tpu.matmul %20, %49, %cst_33 {dimension_numbers = #tpu.dot_dimension_numbers<[1], [1], [0], [0], [0, 0, 1, 0], [], []>} : vector<8x8xf32>, vector<8x8xf32>, vector<8x8xf32> -> vector<8x8xf32>
    %59 = arith.addf %57, %58 : vector<8x8xf32>
    %cst_34 = arith.constant 0.000000e+00 : f32
    %60 = vector.broadcast %cst_34 : f32 to vector<8x8xf32>
    %cst_35 = arith.constant 0.000000e+00 : f32
    %61 = vector.broadcast %cst_35 : f32 to vector<8x8xf32>
    %c0_36 = arith.constant 0 : index
    %c0_37 = arith.constant 0 : index
    %c0_38 = arith.constant 0 : index
    %c0_39 = arith.constant 0 : index
    %62 = vector.load %arg4[%c0_36, %c0_37, %c0_38, %c0_39] : memref<4x8x8x16xf32, #tpu.memory_space<vmem>>, vector<1x8x8x16xf32>
    %63 = vector.shape_cast %62 : vector<1x8x8x16xf32> to vector<8x8x16xf32>
    %64 = vector.extract_strided_slice %63 {offsets = [0, 0, 0], sizes = [8, 8, 8], strides = [1, 1, 1]} : vector<8x8x16xf32> to vector<8x8x8xf32>
    %65 = vector.extract_strided_slice %63 {offsets = [0, 0, 8], sizes = [8, 8, 8], strides = [1, 1, 1]} : vector<8x8x16xf32> to vector<8x8x8xf32>
    %66 = vector.shape_cast %56 : vector<8x8xf32> to vector<8x1x8xf32>
    %67 = vector.shape_cast %59 : vector<8x8xf32> to vector<8x1x8xf32>
    %68 = vector.broadcast %66 : vector<8x1x8xf32> to vector<8x8x8xf32>
    %69 = arith.mulf %68, %64 : vector<8x8x8xf32>
    %70 = vector.broadcast %67 : vector<8x1x8xf32> to vector<8x8x8xf32>
    %71 = arith.mulf %70, %65 : vector<8x8x8xf32>
    %72 = arith.subf %69, %71 : vector<8x8x8xf32>
    %cst_40 = arith.constant dense<0.000000e+00> : vector<8x8xf32>
    %73 = vector.multi_reduction <add>, %72, %cst_40 [0] : vector<8x8x8xf32> to vector<8x8xf32>
    %74 = arith.addf %60, %73 : vector<8x8xf32>
    %75 = vector.broadcast %66 : vector<8x1x8xf32> to vector<8x8x8xf32>
    %76 = arith.mulf %75, %65 : vector<8x8x8xf32>
    %77 = vector.broadcast %67 : vector<8x1x8xf32> to vector<8x8x8xf32>
    %78 = arith.mulf %77, %64 : vector<8x8x8xf32>
    %79 = arith.addf %76, %78 : vector<8x8x8xf32>
    %cst_41 = arith.constant dense<0.000000e+00> : vector<8x8xf32>
    %80 = vector.multi_reduction <add>, %79, %cst_41 [0] : vector<8x8x8xf32> to vector<8x8xf32>
    %81 = arith.addf %61, %80 : vector<8x8xf32>
    %c0_42 = arith.constant 0 : index
    %c0_43 = arith.constant 0 : index
    %82 = vector.load %arg11[%c0_42, %c0_43] : memref<32x16xf32, #tpu.memory_space<vmem>>, vector<8x8xf32>
    tpu.vector_store %arg11[%c0_42, %c0_43], %74 {strides = array<i32>} : memref<32x16xf32, #tpu.memory_space<vmem>>, vector<8x8xf32>,
    %c0_44 = arith.constant 0 : index
    %c8_45 = arith.constant 8 : index
    %83 = vector.load %arg11[%c0_44, %c8_45] : memref<32x16xf32, #tpu.memory_space<vmem>>, vector<8x8xf32>
    tpu.vector_store %arg11[%c0_44, %c8_45], %81 {strides = array<i32>} : memref<32x16xf32, #tpu.memory_space<vmem>>, vector<8x8xf32>,
    %c32_i32_46 = arith.constant 32 : i32
    %84 = arith.muli %arg0, %c32_i32_46 : i32
    %c8_i32 = arith.constant 8 : i32
    %85 = arith.addi %84, %c8_i32 : i32
    %86 = tpu.assume_multiple %85, 8 : i32
    %87 = arith.index_cast %86 : i32 to index
    %c0_47 = arith.constant 0 : index
    %88 = vector.load %arg9[%87, %c0_47] : memref<64x16xf32, #tpu.memory_space<vmem>>, vector<8x8xf32>
    %89 = arith.index_cast %86 : i32 to index
    %c8_48 = arith.constant 8 : index
    %90 = vector.load %arg9[%89, %c8_48] : memref<64x16xf32, #tpu.memory_space<vmem>>, vector<8x8xf32>
    %91 = arith.index_cast %86 : i32 to index
    %c0_49 = arith.constant 0 : index
    %92 = vector.load %arg10[%91, %c0_49] : memref<64x16xf32, #tpu.memory_space<vmem>>, vector<8x8xf32>
    %93 = arith.index_cast %86 : i32 to index
    %c8_50 = arith.constant 8 : index
    %94 = vector.load %arg10[%93, %c8_50] : memref<64x16xf32, #tpu.memory_space<vmem>>, vector<8x8xf32>
    %cst_51 = arith.constant dense<0.000000e+00> : vector<8x8xf32>
    %95 = tpu.matmul %88, %92, %cst_51 {dimension_numbers = #tpu.dot_dimension_numbers<[0], [0], [1], [1], [0, 1, 1, 1], [], []>} : vector<8x8xf32>, vector<8x8xf32>, vector<8x8xf32> -> vector<8x8xf32>
    %cst_52 = arith.constant dense<0.000000e+00> : vector<8x8xf32>
    %96 = tpu.matmul %90, %94, %cst_52 {dimension_numbers = #tpu.dot_dimension_numbers<[0], [0], [1], [1], [0, 1, 1, 1], [], []>} : vector<8x8xf32>, vector<8x8xf32>, vector<8x8xf32> -> vector<8x8xf32>
    %97 = arith.subf %95, %96 : vector<8x8xf32>
    %cst_53 = arith.constant dense<0.000000e+00> : vector<8x8xf32>
    %98 = tpu.matmul %88, %94, %cst_53 {dimension_numbers = #tpu.dot_dimension_numbers<[0], [0], [1], [1], [0, 1, 1, 1], [], []>} : vector<8x8xf32>, vector<8x8xf32>, vector<8x8xf32> -> vector<8x8xf32>
    %cst_54 = arith.constant dense<0.000000e+00> : vector<8x8xf32>
    %99 = tpu.matmul %90, %92, %cst_54 {dimension_numbers = #tpu.dot_dimension_numbers<[0], [0], [1], [1], [0, 1, 1, 1], [], []>} : vector<8x8xf32>, vector<8x8xf32>, vector<8x8xf32> -> vector<8x8xf32>
    %100 = arith.addf %98, %99 : vector<8x8xf32>
    %cst_55 = arith.constant 2.000000e+00 : f32
    %101 = vector.broadcast %cst_55 : f32 to vector<8x8xf32>
    %102 = arith.mulf %101, %97 : vector<8x8xf32>
    %cst_56 = arith.constant -3.000000e+01 : f32
    %cst_57 = arith.constant 3.000000e+01 : f32
    %103 = vector.broadcast %cst_56 : f32 to vector<8x8xf32>
    %104 = arith.maximumf %103, %102 : vector<8x8xf32>
    %105 = vector.broadcast %cst_57 : f32 to vector<8x8xf32>
    %106 = arith.minimumf %105, %104 : vector<8x8xf32>
    %107 = math.exp %106 : vector<8x8xf32>
    %cst_58 = arith.constant 0.000000e+00 : f32
    %108 = vector.broadcast %cst_58 : f32 to vector<8x8xf32>
    %109 = arith.subf %108, %106 : vector<8x8xf32>
    %110 = math.exp %109 : vector<8x8xf32>
    %111 = arith.addf %107, %110 : vector<8x8xf32>
    %cst_59 = arith.constant 5.000000e-01 : f32
    %112 = vector.broadcast %cst_59 : f32 to vector<8x8xf32>
    %113 = arith.mulf %112, %111 : vector<8x8xf32>
    %cst_60 = arith.constant 2.000000e+00 : f32
    %114 = vector.broadcast %cst_60 : f32 to vector<8x8xf32>
    %115 = arith.mulf %114, %100 : vector<8x8xf32>
    %116 = math.cos %115 : vector<8x8xf32>
    %117 = arith.addf %113, %116 : vector<8x8xf32>
    %cst_61 = arith.constant 1.000000e+00 : f32
    %118 = vector.broadcast %cst_61 : f32 to vector<8x8xf32>
    %119 = arith.divf %118, %117 : vector<8x8xf32>
    %120 = arith.subf %107, %110 : vector<8x8xf32>
    %cst_62 = arith.constant 5.000000e-01 : f32
    %121 = vector.broadcast %cst_62 : f32 to vector<8x8xf32>
    %122 = arith.mulf %121, %120 : vector<8x8xf32>
    %123 = arith.mulf %122, %119 : vector<8x8xf32>
    %cst_63 = arith.constant 2.000000e+00 : f32
    %124 = vector.broadcast %cst_63 : f32 to vector<8x8xf32>
    %125 = arith.mulf %124, %100 : vector<8x8xf32>
    %126 = math.sin %125 : vector<8x8xf32>
    %127 = arith.mulf %126, %119 : vector<8x8xf32>
    %cst_64 = arith.constant dense<0.000000e+00> : vector<8x8xf32>
    %128 = tpu.matmul %92, %123, %cst_64 {dimension_numbers = #tpu.dot_dimension_numbers<[1], [1], [0], [0], [0, 0, 1, 0], [], []>} : vector<8x8xf32>, vector<8x8xf32>, vector<8x8xf32> -> vector<8x8xf32>
    %cst_65 = arith.constant dense<0.000000e+00> : vector<8x8xf32>
    %129 = tpu.matmul %94, %127, %cst_65 {dimension_numbers = #tpu.dot_dimension_numbers<[1], [1], [0], [0], [0, 0, 1, 0], [], []>} : vector<8x8xf32>, vector<8x8xf32>, vector<8x8xf32> -> vector<8x8xf32>
    %130 = arith.subf %128, %129 : vector<8x8xf32>
    %cst_66 = arith.constant dense<0.000000e+00> : vector<8x8xf32>
    %131 = tpu.matmul %92, %127, %cst_66 {dimension_numbers = #tpu.dot_dimension_numbers<[1], [1], [0], [0], [0, 0, 1, 0], [], []>} : vector<8x8xf32>, vector<8x8xf32>, vector<8x8xf32> -> vector<8x8xf32>
    %cst_67 = arith.constant dense<0.000000e+00> : vector<8x8xf32>
    %132 = tpu.matmul %94, %123, %cst_67 {dimension_numbers = #tpu.dot_dimension_numbers<[1], [1], [0], [0], [0, 0, 1, 0], [], []>} : vector<8x8xf32>, vector<8x8xf32>, vector<8x8xf32> -> vector<8x8xf32>
    %133 = arith.addf %131, %132 : vector<8x8xf32>
    %cst_68 = arith.constant 0.000000e+00 : f32
    %134 = vector.broadcast %cst_68 : f32 to vector<8x8xf32>
    %cst_69 = arith.constant 0.000000e+00 : f32
    %135 = vector.broadcast %cst_69 : f32 to vector<8x8xf32>
    %c1 = arith.constant 1 : index
    %c0_70 = arith.constant 0 : index
    %c0_71 = arith.constant 0 : index
    %c0_72 = arith.constant 0 : index
    %136 = vector.load %arg4[%c1, %c0_70, %c0_71, %c0_72] : memref<4x8x8x16xf32, #tpu.memory_space<vmem>>, vector<1x8x8x16xf32>
    %137 = vector.shape_cast %136 : vector<1x8x8x16xf32> to vector<8x8x16xf32>
    %138 = vector.extract_strided_slice %137 {offsets = [0, 0, 0], sizes = [8, 8, 8], strides = [1, 1, 1]} : vector<8x8x16xf32> to vector<8x8x8xf32>
    %139 = vector.extract_strided_slice %137 {offsets = [0, 0, 8], sizes = [8, 8, 8], strides = [1, 1, 1]} : vector<8x8x16xf32> to vector<8x8x8xf32>
    %140 = vector.shape_cast %130 : vector<8x8xf32> to vector<8x1x8xf32>
    %141 = vector.shape_cast %133 : vector<8x8xf32> to vector<8x1x8xf32>
    %142 = vector.broadcast %140 : vector<8x1x8xf32> to vector<8x8x8xf32>
    %143 = arith.mulf %142, %138 : vector<8x8x8xf32>
    %144 = vector.broadcast %141 : vector<8x1x8xf32> to vector<8x8x8xf32>
    %145 = arith.mulf %144, %139 : vector<8x8x8xf32>
    %146 = arith.subf %143, %145 : vector<8x8x8xf32>
    %cst_73 = arith.constant dense<0.000000e+00> : vector<8x8xf32>
    %147 = vector.multi_reduction <add>, %146, %cst_73 [0] : vector<8x8x8xf32> to vector<8x8xf32>
    %148 = arith.addf %134, %147 : vector<8x8xf32>
    %149 = vector.broadcast %140 : vector<8x1x8xf32> to vector<8x8x8xf32>
    %150 = arith.mulf %149, %139 : vector<8x8x8xf32>
    %151 = vector.broadcast %141 : vector<8x1x8xf32> to vector<8x8x8xf32>
    %152 = arith.mulf %151, %138 : vector<8x8x8xf32>
    %153 = arith.addf %150, %152 : vector<8x8x8xf32>
    %cst_74 = arith.constant dense<0.000000e+00> : vector<8x8xf32>
    %154 = vector.multi_reduction <add>, %153, %cst_74 [0] : vector<8x8x8xf32> to vector<8x8xf32>
    %155 = arith.addf %135, %154 : vector<8x8xf32>
    %c8_75 = arith.constant 8 : index
    %c0_76 = arith.constant 0 : index
    %156 = vector.load %arg11[%c8_75, %c0_76] : memref<32x16xf32, #tpu.memory_space<vmem>>, vector<8x8xf32>
    tpu.vector_store %arg11[%c8_75, %c0_76], %148 {strides = array<i32>} : memref<32x16xf32, #tpu.memory_space<vmem>>, vector<8x8xf32>,
    %c8_77 = arith.constant 8 : index
    %c8_78 = arith.constant 8 : index
    %157 = vector.load %arg11[%c8_77, %c8_78] : memref<32x16xf32, #tpu.memory_space<vmem>>, vector<8x8xf32>
    tpu.vector_store %arg11[%c8_77, %c8_78], %155 {strides = array<i32>} : memref<32x16xf32, #tpu.memory_space<vmem>>, vector<8x8xf32>,
    %c32_i32_79 = arith.constant 32 : i32
    %158 = arith.muli %arg0, %c32_i32_79 : i32
    %c16_i32 = arith.constant 16 : i32
    %159 = arith.addi %158, %c16_i32 : i32
    %160 = tpu.assume_multiple %159, 8 : i32
    %161 = arith.index_cast %160 : i32 to index
    %c0_80 = arith.constant 0 : index
    %162 = vector.load %arg9[%161, %c0_80] : memref<64x16xf32, #tpu.memory_space<vmem>>, vector<8x8xf32>
    %163 = arith.index_cast %160 : i32 to index
    %c8_81 = arith.constant 8 : index
    %164 = vector.load %arg9[%163, %c8_81] : memref<64x16xf32, #tpu.memory_space<vmem>>, vector<8x8xf32>
    %165 = arith.index_cast %160 : i32 to index
    %c0_82 = arith.constant 0 : index
    %166 = vector.load %arg10[%165, %c0_82] : memref<64x16xf32, #tpu.memory_space<vmem>>, vector<8x8xf32>
    %167 = arith.index_cast %160 : i32 to index
    %c8_83 = arith.constant 8 : index
    %168 = vector.load %arg10[%167, %c8_83] : memref<64x16xf32, #tpu.memory_space<vmem>>, vector<8x8xf32>
    %cst_84 = arith.constant dense<0.000000e+00> : vector<8x8xf32>
    %169 = tpu.matmul %162, %166, %cst_84 {dimension_numbers = #tpu.dot_dimension_numbers<[0], [0], [1], [1], [0, 1, 1, 1], [], []>} : vector<8x8xf32>, vector<8x8xf32>, vector<8x8xf32> -> vector<8x8xf32>
    %cst_85 = arith.constant dense<0.000000e+00> : vector<8x8xf32>
    %170 = tpu.matmul %164, %168, %cst_85 {dimension_numbers = #tpu.dot_dimension_numbers<[0], [0], [1], [1], [0, 1, 1, 1], [], []>} : vector<8x8xf32>, vector<8x8xf32>, vector<8x8xf32> -> vector<8x8xf32>
    %171 = arith.subf %169, %170 : vector<8x8xf32>
    %cst_86 = arith.constant dense<0.000000e+00> : vector<8x8xf32>
    %172 = tpu.matmul %162, %168, %cst_86 {dimension_numbers = #tpu.dot_dimension_numbers<[0], [0], [1], [1], [0, 1, 1, 1], [], []>} : vector<8x8xf32>, vector<8x8xf32>, vector<8x8xf32> -> vector<8x8xf32>
    %cst_87 = arith.constant dense<0.000000e+00> : vector<8x8xf32>
    %173 = tpu.matmul %164, %166, %cst_87 {dimension_numbers = #tpu.dot_dimension_numbers<[0], [0], [1], [1], [0, 1, 1, 1], [], []>} : vector<8x8xf32>, vector<8x8xf32>, vector<8x8xf32> -> vector<8x8xf32>
    %174 = arith.addf %172, %173 : vector<8x8xf32>
    %cst_88 = arith.constant 2.000000e+00 : f32
    %175 = vector.broadcast %cst_88 : f32 to vector<8x8xf32>
    %176 = arith.mulf %175, %171 : vector<8x8xf32>
    %cst_89 = arith.constant -3.000000e+01 : f32
    %cst_90 = arith.constant 3.000000e+01 : f32
    %177 = vector.broadcast %cst_89 : f32 to vector<8x8xf32>
    %178 = arith.maximumf %177, %176 : vector<8x8xf32>
    %179 = vector.broadcast %cst_90 : f32 to vector<8x8xf32>
    %180 = arith.minimumf %179, %178 : vector<8x8xf32>
    %181 = math.exp %180 : vector<8x8xf32>
    %cst_91 = arith.constant 0.000000e+00 : f32
    %182 = vector.broadcast %cst_91 : f32 to vector<8x8xf32>
    %183 = arith.subf %182, %180 : vector<8x8xf32>
    %184 = math.exp %183 : vector<8x8xf32>
    %185 = arith.addf %181, %184 : vector<8x8xf32>
    %cst_92 = arith.constant 5.000000e-01 : f32
    %186 = vector.broadcast %cst_92 : f32 to vector<8x8xf32>
    %187 = arith.mulf %186, %185 : vector<8x8xf32>
    %cst_93 = arith.constant 2.000000e+00 : f32
    %188 = vector.broadcast %cst_93 : f32 to vector<8x8xf32>
    %189 = arith.mulf %188, %174 : vector<8x8xf32>
    %190 = math.cos %189 : vector<8x8xf32>
    %191 = arith.addf %187, %190 : vector<8x8xf32>
    %cst_94 = arith.constant 1.000000e+00 : f32
    %192 = vector.broadcast %cst_94 : f32 to vector<8x8xf32>
    %193 = arith.divf %192, %191 : vector<8x8xf32>
    %194 = arith.subf %181, %184 : vector<8x8xf32>
    %cst_95 = arith.constant 5.000000e-01 : f32
    %195 = vector.broadcast %cst_95 : f32 to vector<8x8xf32>
    %196 = arith.mulf %195, %194 : vector<8x8xf32>
    %197 = arith.mulf %196, %193 : vector<8x8xf32>
    %cst_96 = arith.constant 2.000000e+00 : f32
    %198 = vector.broadcast %cst_96 : f32 to vector<8x8xf32>
    %199 = arith.mulf %198, %174 : vector<8x8xf32>
    %200 = math.sin %199 : vector<8x8xf32>
    %201 = arith.mulf %200, %193 : vector<8x8xf32>
    %cst_97 = arith.constant dense<0.000000e+00> : vector<8x8xf32>
    %202 = tpu.matmul %166, %197, %cst_97 {dimension_numbers = #tpu.dot_dimension_numbers<[1], [1], [0], [0], [0, 0, 1, 0], [], []>} : vector<8x8xf32>, vector<8x8xf32>, vector<8x8xf32> -> vector<8x8xf32>
    %cst_98 = arith.constant dense<0.000000e+00> : vector<8x8xf32>
    %203 = tpu.matmul %168, %201, %cst_98 {dimension_numbers = #tpu.dot_dimension_numbers<[1], [1], [0], [0], [0, 0, 1, 0], [], []>} : vector<8x8xf32>, vector<8x8xf32>, vector<8x8xf32> -> vector<8x8xf32>
    %204 = arith.subf %202, %203 : vector<8x8xf32>
    %cst_99 = arith.constant dense<0.000000e+00> : vector<8x8xf32>
    %205 = tpu.matmul %166, %201, %cst_99 {dimension_numbers = #tpu.dot_dimension_numbers<[1], [1], [0], [0], [0, 0, 1, 0], [], []>} : vector<8x8xf32>, vector<8x8xf32>, vector<8x8xf32> -> vector<8x8xf32>
    %cst_100 = arith.constant dense<0.000000e+00> : vector<8x8xf32>
    %206 = tpu.matmul %168, %197, %cst_100 {dimension_numbers = #tpu.dot_dimension_numbers<[1], [1], [0], [0], [0, 0, 1, 0], [], []>} : vector<8x8xf32>, vector<8x8xf32>, vector<8x8xf32> -> vector<8x8xf32>
    %207 = arith.addf %205, %206 : vector<8x8xf32>
    %cst_101 = arith.constant 0.000000e+00 : f32
    %208 = vector.broadcast %cst_101 : f32 to vector<8x8xf32>
    %cst_102 = arith.constant 0.000000e+00 : f32
    %209 = vector.broadcast %cst_102 : f32 to vector<8x8xf32>
    %c2 = arith.constant 2 : index
    %c0_103 = arith.constant 0 : index
    %c0_104 = arith.constant 0 : index
    %c0_105 = arith.constant 0 : index
    %210 = vector.load %arg4[%c2, %c0_103, %c0_104, %c0_105] : memref<4x8x8x16xf32, #tpu.memory_space<vmem>>, vector<1x8x8x16xf32>
    %211 = vector.shape_cast %210 : vector<1x8x8x16xf32> to vector<8x8x16xf32>
    %212 = vector.extract_strided_slice %211 {offsets = [0, 0, 0], sizes = [8, 8, 8], strides = [1, 1, 1]} : vector<8x8x16xf32> to vector<8x8x8xf32>
    %213 = vector.extract_strided_slice %211 {offsets = [0, 0, 8], sizes = [8, 8, 8], strides = [1, 1, 1]} : vector<8x8x16xf32> to vector<8x8x8xf32>
    %214 = vector.shape_cast %204 : vector<8x8xf32> to vector<8x1x8xf32>
    %215 = vector.shape_cast %207 : vector<8x8xf32> to vector<8x1x8xf32>
    %216 = vector.broadcast %214 : vector<8x1x8xf32> to vector<8x8x8xf32>
    %217 = arith.mulf %216, %212 : vector<8x8x8xf32>
    %218 = vector.broadcast %215 : vector<8x1x8xf32> to vector<8x8x8xf32>
    %219 = arith.mulf %218, %213 : vector<8x8x8xf32>
    %220 = arith.subf %217, %219 : vector<8x8x8xf32>
    %cst_106 = arith.constant dense<0.000000e+00> : vector<8x8xf32>
    %221 = vector.multi_reduction <add>, %220, %cst_106 [0] : vector<8x8x8xf32> to vector<8x8xf32>
    %222 = arith.addf %208, %221 : vector<8x8xf32>
    %223 = vector.broadcast %214 : vector<8x1x8xf32> to vector<8x8x8xf32>
    %224 = arith.mulf %223, %213 : vector<8x8x8xf32>
    %225 = vector.broadcast %215 : vector<8x1x8xf32> to vector<8x8x8xf32>
    %226 = arith.mulf %225, %212 : vector<8x8x8xf32>
    %227 = arith.addf %224, %226 : vector<8x8x8xf32>
    %cst_107 = arith.constant dense<0.000000e+00> : vector<8x8xf32>
    %228 = vector.multi_reduction <add>, %227, %cst_107 [0] : vector<8x8x8xf32> to vector<8x8xf32>
    %229 = arith.addf %209, %228 : vector<8x8xf32>
    %c16 = arith.constant 16 : index
    %c0_108 = arith.constant 0 : index
    %230 = vector.load %arg11[%c16, %c0_108] : memref<32x16xf32, #tpu.memory_space<vmem>>, vector<8x8xf32>
    tpu.vector_store %arg11[%c16, %c0_108], %222 {strides = array<i32>} : memref<32x16xf32, #tpu.memory_space<vmem>>, vector<8x8xf32>,
    %c16_109 = arith.constant 16 : index
    %c8_110 = arith.constant 8 : index
    %231 = vector.load %arg11[%c16_109, %c8_110] : memref<32x16xf32, #tpu.memory_space<vmem>>, vector<8x8xf32>
    tpu.vector_store %arg11[%c16_109, %c8_110], %229 {strides = array<i32>} : memref<32x16xf32, #tpu.memory_space<vmem>>, vector<8x8xf32>,
    %c32_i32_111 = arith.constant 32 : i32
    %232 = arith.muli %arg0, %c32_i32_111 : i32
    %c24_i32 = arith.constant 24 : i32
    %233 = arith.addi %232, %c24_i32 : i32
    %234 = tpu.assume_multiple %233, 8 : i32
    %235 = arith.index_cast %234 : i32 to index
    %c0_112 = arith.constant 0 : index
    %236 = vector.load %arg9[%235, %c0_112] : memref<64x16xf32, #tpu.memory_space<vmem>>, vector<8x8xf32>
    %237 = arith.index_cast %234 : i32 to index
    %c8_113 = arith.constant 8 : index
    %238 = vector.load %arg9[%237, %c8_113] : memref<64x16xf32, #tpu.memory_space<vmem>>, vector<8x8xf32>
    %239 = arith.index_cast %234 : i32 to index
    %c0_114 = arith.constant 0 : index
    %240 = vector.load %arg10[%239, %c0_114] : memref<64x16xf32, #tpu.memory_space<vmem>>, vector<8x8xf32>
    %241 = arith.index_cast %234 : i32 to index
    %c8_115 = arith.constant 8 : index
    %242 = vector.load %arg10[%241, %c8_115] : memref<64x16xf32, #tpu.memory_space<vmem>>, vector<8x8xf32>
    %cst_116 = arith.constant dense<0.000000e+00> : vector<8x8xf32>
    %243 = tpu.matmul %236, %240, %cst_116 {dimension_numbers = #tpu.dot_dimension_numbers<[0], [0], [1], [1], [0, 1, 1, 1], [], []>} : vector<8x8xf32>, vector<8x8xf32>, vector<8x8xf32> -> vector<8x8xf32>
    %cst_117 = arith.constant dense<0.000000e+00> : vector<8x8xf32>
    %244 = tpu.matmul %238, %242, %cst_117 {dimension_numbers = #tpu.dot_dimension_numbers<[0], [0], [1], [1], [0, 1, 1, 1], [], []>} : vector<8x8xf32>, vector<8x8xf32>, vector<8x8xf32> -> vector<8x8xf32>
    %245 = arith.subf %243, %244 : vector<8x8xf32>
    %cst_118 = arith.constant dense<0.000000e+00> : vector<8x8xf32>
    %246 = tpu.matmul %236, %242, %cst_118 {dimension_numbers = #tpu.dot_dimension_numbers<[0], [0], [1], [1], [0, 1, 1, 1], [], []>} : vector<8x8xf32>, vector<8x8xf32>, vector<8x8xf32> -> vector<8x8xf32>
    %cst_119 = arith.constant dense<0.000000e+00> : vector<8x8xf32>
    %247 = tpu.matmul %238, %240, %cst_119 {dimension_numbers = #tpu.dot_dimension_numbers<[0], [0], [1], [1], [0, 1, 1, 1], [], []>} : vector<8x8xf32>, vector<8x8xf32>, vector<8x8xf32> -> vector<8x8xf32>
    %248 = arith.addf %246, %247 : vector<8x8xf32>
    %cst_120 = arith.constant 2.000000e+00 : f32
    %249 = vector.broadcast %cst_120 : f32 to vector<8x8xf32>
    %250 = arith.mulf %249, %245 : vector<8x8xf32>
    %cst_121 = arith.constant -3.000000e+01 : f32
    %cst_122 = arith.constant 3.000000e+01 : f32
    %251 = vector.broadcast %cst_121 : f32 to vector<8x8xf32>
    %252 = arith.maximumf %251, %250 : vector<8x8xf32>
    %253 = vector.broadcast %cst_122 : f32 to vector<8x8xf32>
    %254 = arith.minimumf %253, %252 : vector<8x8xf32>
    %255 = math.exp %254 : vector<8x8xf32>
    %cst_123 = arith.constant 0.000000e+00 : f32
    %256 = vector.broadcast %cst_123 : f32 to vector<8x8xf32>
    %257 = arith.subf %256, %254 : vector<8x8xf32>
    %258 = math.exp %257 : vector<8x8xf32>
    %259 = arith.addf %255, %258 : vector<8x8xf32>
    %cst_124 = arith.constant 5.000000e-01 : f32
    %260 = vector.broadcast %cst_124 : f32 to vector<8x8xf32>
    %261 = arith.mulf %260, %259 : vector<8x8xf32>
    %cst_125 = arith.constant 2.000000e+00 : f32
    %262 = vector.broadcast %cst_125 : f32 to vector<8x8xf32>
    %263 = arith.mulf %262, %248 : vector<8x8xf32>
    %264 = math.cos %263 : vector<8x8xf32>
    %265 = arith.addf %261, %264 : vector<8x8xf32>
    %cst_126 = arith.constant 1.000000e+00 : f32
    %266 = vector.broadcast %cst_126 : f32 to vector<8x8xf32>
    %267 = arith.divf %266, %265 : vector<8x8xf32>
    %268 = arith.subf %255, %258 : vector<8x8xf32>
    %cst_127 = arith.constant 5.000000e-01 : f32
    %269 = vector.broadcast %cst_127 : f32 to vector<8x8xf32>
    %270 = arith.mulf %269, %268 : vector<8x8xf32>
    %271 = arith.mulf %270, %267 : vector<8x8xf32>
    %cst_128 = arith.constant 2.000000e+00 : f32
    %272 = vector.broadcast %cst_128 : f32 to vector<8x8xf32>
    %273 = arith.mulf %272, %248 : vector<8x8xf32>
    %274 = math.sin %273 : vector<8x8xf32>
    %275 = arith.mulf %274, %267 : vector<8x8xf32>
    %cst_129 = arith.constant dense<0.000000e+00> : vector<8x8xf32>
    %276 = tpu.matmul %240, %271, %cst_129 {dimension_numbers = #tpu.dot_dimension_numbers<[1], [1], [0], [0], [0, 0, 1, 0], [], []>} : vector<8x8xf32>, vector<8x8xf32>, vector<8x8xf32> -> vector<8x8xf32>
    %cst_130 = arith.constant dense<0.000000e+00> : vector<8x8xf32>
    %277 = tpu.matmul %242, %275, %cst_130 {dimension_numbers = #tpu.dot_dimension_numbers<[1], [1], [0], [0], [0, 0, 1, 0], [], []>} : vector<8x8xf32>, vector<8x8xf32>, vector<8x8xf32> -> vector<8x8xf32>
    %278 = arith.subf %276, %277 : vector<8x8xf32>
    %cst_131 = arith.constant dense<0.000000e+00> : vector<8x8xf32>
    %279 = tpu.matmul %240, %275, %cst_131 {dimension_numbers = #tpu.dot_dimension_numbers<[1], [1], [0], [0], [0, 0, 1, 0], [], []>} : vector<8x8xf32>, vector<8x8xf32>, vector<8x8xf32> -> vector<8x8xf32>
    %cst_132 = arith.constant dense<0.000000e+00> : vector<8x8xf32>
    %280 = tpu.matmul %242, %271, %cst_132 {dimension_numbers = #tpu.dot_dimension_numbers<[1], [1], [0], [0], [0, 0, 1, 0], [], []>} : vector<8x8xf32>, vector<8x8xf32>, vector<8x8xf32> -> vector<8x8xf32>
    %281 = arith.addf %279, %280 : vector<8x8xf32>
    %cst_133 = arith.constant 0.000000e+00 : f32
    %282 = vector.broadcast %cst_133 : f32 to vector<8x8xf32>
    %cst_134 = arith.constant 0.000000e+00 : f32
    %283 = vector.broadcast %cst_134 : f32 to vector<8x8xf32>
    %c3 = arith.constant 3 : index
    %c0_135 = arith.constant 0 : index
    %c0_136 = arith.constant 0 : index
    %c0_137 = arith.constant 0 : index
    %284 = vector.load %arg4[%c3, %c0_135, %c0_136, %c0_137] : memref<4x8x8x16xf32, #tpu.memory_space<vmem>>, vector<1x8x8x16xf32>
    %285 = vector.shape_cast %284 : vector<1x8x8x16xf32> to vector<8x8x16xf32>
    %286 = vector.extract_strided_slice %285 {offsets = [0, 0, 0], sizes = [8, 8, 8], strides = [1, 1, 1]} : vector<8x8x16xf32> to vector<8x8x8xf32>
    %287 = vector.extract_strided_slice %285 {offsets = [0, 0, 8], sizes = [8, 8, 8], strides = [1, 1, 1]} : vector<8x8x16xf32> to vector<8x8x8xf32>
    %288 = vector.shape_cast %278 : vector<8x8xf32> to vector<8x1x8xf32>
    %289 = vector.shape_cast %281 : vector<8x8xf32> to vector<8x1x8xf32>
    %290 = vector.broadcast %288 : vector<8x1x8xf32> to vector<8x8x8xf32>
    %291 = arith.mulf %290, %286 : vector<8x8x8xf32>
    %292 = vector.broadcast %289 : vector<8x1x8xf32> to vector<8x8x8xf32>
    %293 = arith.mulf %292, %287 : vector<8x8x8xf32>
    %294 = arith.subf %291, %293 : vector<8x8x8xf32>
    %cst_138 = arith.constant dense<0.000000e+00> : vector<8x8xf32>
    %295 = vector.multi_reduction <add>, %294, %cst_138 [0] : vector<8x8x8xf32> to vector<8x8xf32>
    %296 = arith.addf %282, %295 : vector<8x8xf32>
    %297 = vector.broadcast %288 : vector<8x1x8xf32> to vector<8x8x8xf32>
    %298 = arith.mulf %297, %287 : vector<8x8x8xf32>
    %299 = vector.broadcast %289 : vector<8x1x8xf32> to vector<8x8x8xf32>
    %300 = arith.mulf %299, %286 : vector<8x8x8xf32>
    %301 = arith.addf %298, %300 : vector<8x8x8xf32>
    %cst_139 = arith.constant dense<0.000000e+00> : vector<8x8xf32>
    %302 = vector.multi_reduction <add>, %301, %cst_139 [0] : vector<8x8x8xf32> to vector<8x8xf32>
    %303 = arith.addf %283, %302 : vector<8x8xf32>
    %c24 = arith.constant 24 : index
    %c0_140 = arith.constant 0 : index
    %304 = vector.load %arg11[%c24, %c0_140] : memref<32x16xf32, #tpu.memory_space<vmem>>, vector<8x8xf32>
    tpu.vector_store %arg11[%c24, %c0_140], %296 {strides = array<i32>} : memref<32x16xf32, #tpu.memory_space<vmem>>, vector<8x8xf32>,
    %c24_141 = arith.constant 24 : index
    %c8_142 = arith.constant 8 : index
    %305 = vector.load %arg11[%c24_141, %c8_142] : memref<32x16xf32, #tpu.memory_space<vmem>>, vector<8x8xf32>
    tpu.vector_store %arg11[%c24_141, %c8_142], %303 {strides = array<i32>} : memref<32x16xf32, #tpu.memory_space<vmem>>, vector<8x8xf32>,
    %c0_143 = arith.constant 0 : index
    %c0_144 = arith.constant 0 : index
    %306 = vector.load %arg11[%c0_143, %c0_144] : memref<32x16xf32, #tpu.memory_space<vmem>>, vector<32x16xf32>
    %c0_145 = arith.constant 0 : index
    %c0_146 = arith.constant 0 : index
    %307 = vector.load %arg7[%c0_145, %c0_146] : memref<16x128xf32, #tpu.memory_space<vmem>>, vector<16x128xf32>
    %cst_147 = arith.constant dense<0.000000e+00> : vector<32x128xf32>
    %308 = tpu.matmul %306, %307, %cst_147 {dimension_numbers = #tpu.dot_dimension_numbers<[1], [0], [0], [1], [0, 0, 1, 1], [], []>} : vector<32x16xf32>, vector<16x128xf32>, vector<32x128xf32> -> vector<32x128xf32>
    %c0_148 = arith.constant 0 : index
    %c0_149 = arith.constant 0 : index
    %c0_150 = arith.constant 0 : index
    %309 = vector.load %arg8[%c0_148, %c0_149, %c0_150] : memref<1x32x128xf32, #tpu.memory_space<vmem>>, vector<1x32x128xf32>
    %310 = vector.shape_cast %309 : vector<1x32x128xf32> to vector<32x128xf32>
    %311 = vector.shape_cast %308 : vector<32x128xf32> to vector<1x32x128xf32>
    tpu.vector_store %arg8[%c0_148, %c0_149, %c0_150], %311 {strides = array<i32>} : memref<1x32x128xf32, #tpu.memory_space<vmem>>, vector<1x32x128xf32>,
    return
  }
  func.func @transform_0(%arg0: i32, %arg1: i32) -> (i32, i32, i32) {
    %c0_i32 = arith.constant 0 : i32
    %c0_i32_0 = arith.constant 0 : i32
    %c0_i32_1 = arith.constant 0 : i32
    return %arg1, %c0_i32, %c0_i32_0 : i32, i32, i32
  }
  func.func @transform_1(%arg0: i32, %arg1: i32) -> (i32, i32, i32) {
    %c0_i32 = arith.constant 0 : i32
    %c0_i32_0 = arith.constant 0 : i32
    %c0_i32_1 = arith.constant 0 : i32
    return %arg1, %c0_i32, %c0_i32_0 : i32, i32, i32
  }
  func.func @transform_2(%arg0: i32, %arg1: i32) -> (i32, i32, i32, i32) {
    %c0_i32 = arith.constant 0 : i32
    %c0_i32_0 = arith.constant 0 : i32
    %c0_i32_1 = arith.constant 0 : i32
    %c0_i32_2 = arith.constant 0 : i32
    return %arg0, %c0_i32, %c0_i32_0, %c0_i32_1 : i32, i32, i32, i32
  }
  func.func @transform_3(%arg0: i32, %arg1: i32) -> (i32, i32) {
    %c0_i32 = arith.constant 0 : i32
    %c0_i32_0 = arith.constant 0 : i32
    %c0_i32_1 = arith.constant 0 : i32
    return %c0_i32, %c0_i32_0 : i32, i32
  }
  func.func @transform_4(%arg0: i32, %arg1: i32) -> (i32, i32) {
    %c0_i32 = arith.constant 0 : i32
    %c0_i32_0 = arith.constant 0 : i32
    %c0_i32_1 = arith.constant 0 : i32
    return %c0_i32, %c0_i32_0 : i32, i32
  }
  func.func @transform_5(%arg0: i32, %arg1: i32) -> (i32, i32) {
    %c0_i32 = arith.constant 0 : i32
    %c0_i32_0 = arith.constant 0 : i32
    %c0_i32_1 = arith.constant 0 : i32
    return %c0_i32, %c0_i32_0 : i32, i32
  }
  func.func @transform_6(%arg0: i32, %arg1: i32) -> (i32, i32, i32) {
    %c0_i32 = arith.constant 0 : i32
    %c0_i32_0 = arith.constant 0 : i32
    return %arg1, %arg0, %c0_i32 : i32, i32, i32
  }
}

module attributes {stable_mosaic.version = 11 : i64} {
  func.func @_fca_kernel(%arg0: i32, %arg1: i32, %arg2: memref<1x16x64xf32, #tpu.memory_space<vmem>>, %arg3: memref<1x16x64xf32, #tpu.memory_space<vmem>>, %arg4: memref<4x8x8x16xf32, #tpu.memory_space<vmem>>, %arg5: memref<16x16xf32, #tpu.memory_space<vmem>>, %arg6: memref<16x16xf32, #tpu.memory_space<vmem>>, %arg7: memref<16x128xf32, #tpu.memory_space<vmem>>, %arg8: memref<1x32x128xf32, #tpu.memory_space<vmem>>, %arg9: memref<64x16xf32, #tpu.memory_space<vmem>>, %arg10: memref<64x16xf32, #tpu.memory_space<vmem>>, %arg11: memref<32x16xf32, #tpu.memory_space<vmem>>) attributes {dimension_semantics = [#tpu.dimension_semantics<parallel>, #tpu.dimension_semantics<parallel>], iteration_bounds = array<i64: 2, 2>, scalar_prefetch = 0 : i64, scratch_operands = 3 : i64, tpu.core_type = #tpu.core_type<tc>, window_params = [{transform_indices = @transform_0, window_bounds = array<i64: 1, 16, 64>}, {transform_indices = @transform_1, window_bounds = array<i64: 1, 16, 64>}, {transform_indices = @transform_2, window_bounds = array<i64: 4, 8, 8, 16>}, {pipeline_mode = #tpu.pipeline_mode<synchronous>, transform_indices = @transform_3, window_bounds = array<i64: 16, 16>}, {pipeline_mode = #tpu.pipeline_mode<synchronous>, transform_indices = @transform_4, window_bounds = array<i64: 16, 16>}, {pipeline_mode = #tpu.pipeline_mode<synchronous>, transform_indices = @transform_5, window_bounds = array<i64: 16, 128>}, {transform_indices = @transform_6, window_bounds = array<i64: 1, 32, 128>}]} {
    %c0 = arith.constant 0 : index
    %c0_0 = arith.constant 0 : index
    %c0_1 = arith.constant 0 : index
    %0 = vector.load %arg2[%c0, %c0_0, %c0_1] : memref<1x16x64xf32, #tpu.memory_space<vmem>>, vector<1x16x64xf32>
    %1 = vector.shape_cast %0 : vector<1x16x64xf32> to vector<16x64xf32>
    %c0_2 = arith.constant 0 : index
    %c0_3 = arith.constant 0 : index
    %c0_4 = arith.constant 0 : index
    %2 = vector.load %arg3[%c0_2, %c0_3, %c0_4] : memref<1x16x64xf32, #tpu.memory_space<vmem>>, vector<1x16x64xf32>
    %3 = vector.shape_cast %2 : vector<1x16x64xf32> to vector<16x64xf32>
    %c0_5 = arith.constant 0 : index
    %c0_6 = arith.constant 0 : index
    %4 = vector.load %arg5[%c0_5, %c0_6] : memref<16x16xf32, #tpu.memory_space<vmem>>, vector<16x16xf32>
    %cst = arith.constant dense<0.000000e+00> : vector<64x16xf32>
    %5 = tpu.matmul %1, %4, %cst {dimension_numbers = #tpu.dot_dimension_numbers<[0], [0], [1], [1], [0, 1, 1, 1], [], []>} : vector<16x64xf32>, vector<16x16xf32>, vector<64x16xf32> -> vector<64x16xf32>
    %c0_7 = arith.constant 0 : index
    %c0_8 = arith.constant 0 : index
    %6 = vector.load %arg9[%c0_7, %c0_8] : memref<64x16xf32, #tpu.memory_space<vmem>>, vector<64x16xf32>
    tpu.vector_store %arg9[%c0_7, %c0_8], %5 {strides = array<i32>} : memref<64x16xf32, #tpu.memory_space<vmem>>, vector<64x16xf32>,
    %c0_9 = arith.constant 0 : index
    %c0_10 = arith.constant 0 : index
    %7 = vector.load %arg6[%c0_9, %c0_10] : memref<16x16xf32, #tpu.memory_space<vmem>>, vector<16x16xf32>
    %cst_11 = arith.constant dense<0.000000e+00> : vector<64x16xf32>
    %8 = tpu.matmul %3, %7, %cst_11 {dimension_numbers = #tpu.dot_dimension_numbers<[0], [0], [1], [1], [0, 1, 1, 1], [], []>} : vector<16x64xf32>, vector<16x16xf32>, vector<64x16xf32> -> vector<64x16xf32>
    %c0_12 = arith.constant 0 : index
    %c0_13 = arith.constant 0 : index
    %9 = vector.load %arg10[%c0_12, %c0_13] : memref<64x16xf32, #tpu.memory_space<vmem>>, vector<64x16xf32>
    tpu.vector_store %arg10[%c0_12, %c0_13], %8 {strides = array<i32>} : memref<64x16xf32, #tpu.memory_space<vmem>>, vector<64x16xf32>,
    %c32_i32 = arith.constant 32 : i32
    %10 = arith.muli %arg0, %c32_i32 : i32
    %c0_i32 = arith.constant 0 : i32
    %11 = arith.addi %10, %c0_i32 : i32
    %12 = tpu.assume_multiple %11, 8 : i32
    %13 = arith.index_cast %12 : i32 to index
    %c0_14 = arith.constant 0 : index
    %14 = vector.load %arg9[%13, %c0_14] : memref<64x16xf32, #tpu.memory_space<vmem>>, vector<8x8xf32>
    %15 = arith.index_cast %12 : i32 to index
    %c8 = arith.constant 8 : index
    %16 = vector.load %arg9[%15, %c8] : memref<64x16xf32, #tpu.memory_space<vmem>>, vector<8x8xf32>
    %17 = arith.index_cast %12 : i32 to index
    %c0_15 = arith.constant 0 : index
    %18 = vector.load %arg10[%17, %c0_15] : memref<64x16xf32, #tpu.memory_space<vmem>>, vector<8x8xf32>
    %19 = arith.index_cast %12 : i32 to index
    %c8_16 = arith.constant 8 : index
    %20 = vector.load %arg10[%19, %c8_16] : memref<64x16xf32, #tpu.memory_space<vmem>>, vector<8x8xf32>
    %cst_17 = arith.constant dense<0.000000e+00> : vector<8x8xf32>
    %21 = tpu.matmul %14, %18, %cst_17 {dimension_numbers = #tpu.dot_dimension_numbers<[0], [0], [1], [1], [0, 1, 1, 1], [], []>} : vector<8x8xf32>, vector<8x8xf32>, vector<8x8xf32> -> vector<8x8xf32>
    %cst_18 = arith.constant dense<0.000000e+00> : vector<8x8xf32>
    %22 = tpu.matmul %16, %20, %cst_18 {dimension_numbers = #tpu.dot_dimension_numbers<[0], [0], [1], [1], [0, 1, 1, 1], [], []>} : vector<8x8xf32>, vector<8x8xf32>, vector<8x8xf32> -> vector<8x8xf32>
    %23 = arith.subf %21, %22 : vector<8x8xf32>
    %cst_19 = arith.constant dense<0.000000e+00> : vector<8x8xf32>
    %24 = tpu.matmul %14, %20, %cst_19 {dimension_numbers = #tpu.dot_dimension_numbers<[0], [0], [1], [1], [0, 1, 1, 1], [], []>} : vector<8x8xf32>, vector<8x8xf32>, vector<8x8xf32> -> vector<8x8xf32>
    %cst_20 = arith.constant dense<0.000000e+00> : vector<8x8xf32>
    %25 = tpu.matmul %16, %18, %cst_20 {dimension_numbers = #tpu.dot_dimension_numbers<[0], [0], [1], [1], [0, 1, 1, 1], [], []>} : vector<8x8xf32>, vector<8x8xf32>, vector<8x8xf32> -> vector<8x8xf32>
    %26 = arith.addf %24, %25 : vector<8x8xf32>
    %cst_21 = arith.constant 2.000000e+00 : f32
    %27 = vector.broadcast %cst_21 : f32 to vector<8x8xf32>
    %28 = arith.mulf %27, %23 : vector<8x8xf32>
    %cst_22 = arith.constant -3.000000e+01 : f32
    %cst_23 = arith.constant 3.000000e+01 : f32
    %29 = vector.broadcast %cst_22 : f32 to vector<8x8xf32>
    %30 = arith.maximumf %29, %28 : vector<8x8xf32>
    %31 = vector.broadcast %cst_23 : f32 to vector<8x8xf32>
    %32 = arith.minimumf %31, %30 : vector<8x8xf32>
    %33 = math.exp %32 : vector<8x8xf32>
    %cst_24 = arith.constant 0.000000e+00 : f32
    %34 = vector.broadcast %cst_24 : f32 to vector<8x8xf32>
    %35 = arith.subf %34, %32 : vector<8x8xf32>
    %36 = math.exp %35 : vector<8x8xf32>
    %37 = arith.addf %33, %36 : vector<8x8xf32>
    %cst_25 = arith.constant 5.000000e-01 : f32
    %38 = vector.broadcast %cst_25 : f32 to vector<8x8xf32>
    %39 = arith.mulf %38, %37 : vector<8x8xf32>
    %cst_26 = arith.constant 2.000000e+00 : f32
    %40 = vector.broadcast %cst_26 : f32 to vector<8x8xf32>
    %41 = arith.mulf %40, %26 : vector<8x8xf32>
    %42 = math.cos %41 : vector<8x8xf32>
    %43 = arith.addf %39, %42 : vector<8x8xf32>
    %cst_27 = arith.constant 1.000000e+00 : f32
    %44 = vector.broadcast %cst_27 : f32 to vector<8x8xf32>
    %45 = arith.divf %44, %43 : vector<8x8xf32>
    %46 = arith.subf %33, %36 : vector<8x8xf32>
    %cst_28 = arith.constant 5.000000e-01 : f32
    %47 = vector.broadcast %cst_28 : f32 to vector<8x8xf32>
    %48 = arith.mulf %47, %46 : vector<8x8xf32>
    %49 = arith.mulf %48, %45 : vector<8x8xf32>
    %cst_29 = arith.constant 2.000000e+00 : f32
    %50 = vector.broadcast %cst_29 : f32 to vector<8x8xf32>
    %51 = arith.mulf %50, %26 : vector<8x8xf32>
    %52 = math.sin %51 : vector<8x8xf32>
    %53 = arith.mulf %52, %45 : vector<8x8xf32>
    %cst_30 = arith.constant dense<0.000000e+00> : vector<8x8xf32>
    %54 = tpu.matmul %18, %49, %cst_30 {dimension_numbers = #tpu.dot_dimension_numbers<[1], [1], [0], [0], [0, 0, 1, 0], [], []>} : vector<8x8xf32>, vector<8x8xf32>, vector<8x8xf32> -> vector<8x8xf32>
    %cst_31 = arith.constant dense<0.000000e+00> : vector<8x8xf32>
    %55 = tpu.matmul %20, %53, %cst_31 {dimension_numbers = #tpu.dot_dimension_numbers<[1], [1], [0], [0], [0, 0, 1, 0], [], []>} : vector<8x8xf32>, vector<8x8xf32>, vector<8x8xf32> -> vector<8x8xf32>
    %56 = arith.subf %54, %55 : vector<8x8xf32>
    %cst_32 = arith.constant dense<0.000000e+00> : vector<8x8xf32>
    %57 = tpu.matmul %18, %53, %cst_32 {dimension_numbers = #tpu.dot_dimension_numbers<[1], [1], [0], [0], [0, 0, 1, 0], [], []>} : vector<8x8xf32>, vector<8x8xf32>, vector<8x8xf32> -> vector<8x8xf32>
    %cst_33 = arith.constant dense<0.000000e+00> : vector<8x8xf32>
    %58 = tpu.matmul %20, %49, %cst_33 {dimension_numbers = #tpu.dot_dimension_numbers<[1], [1], [0], [0], [0, 0, 1, 0], [], []>} : vector<8x8xf32>, vector<8x8xf32>, vector<8x8xf32> -> vector<8x8xf32>
    %59 = arith.addf %57, %58 : vector<8x8xf32>
    %cst_34 = arith.constant 0.000000e+00 : f32
    %60 = vector.broadcast %cst_34 : f32 to vector<8x8xf32>
    %cst_35 = arith.constant 0.000000e+00 : f32
    %61 = vector.broadcast %cst_35 : f32 to vector<8x8xf32>
    %c0_36 = arith.constant 0 : index
    %c0_37 = arith.constant 0 : index
    %c0_38 = arith.constant 0 : index
    %c0_39 = arith.constant 0 : index
    %62 = vector.load %arg4[%c0_36, %c0_37, %c0_38, %c0_39] : memref<4x8x8x16xf32, #tpu.memory_space<vmem>>, vector<1x8x8x16xf32>
    %63 = vector.shape_cast %62 : vector<1x8x8x16xf32> to vector<8x8x16xf32>
    %64 = vector.extract_strided_slice %63 {offsets = [0, 0, 0], sizes = [8, 8, 8], strides = [1, 1, 1]} : vector<8x8x16xf32> to vector<8x8x8xf32>
    %65 = vector.extract_strided_slice %63 {offsets = [0, 0, 8], sizes = [8, 8, 8], strides = [1, 1, 1]} : vector<8x8x16xf32> to vector<8x8x8xf32>
    %66 = vector.shape_cast %56 : vector<8x8xf32> to vector<8x1x8xf32>
    %67 = vector.shape_cast %59 : vector<8x8xf32> to vector<8x1x8xf32>
    %68 = vector.broadcast %66 : vector<8x1x8xf32> to vector<8x8x8xf32>
    %69 = arith.mulf %68, %64 : vector<8x8x8xf32>
    %70 = vector.broadcast %67 : vector<8x1x8xf32> to vector<8x8x8xf32>
    %71 = arith.mulf %70, %65 : vector<8x8x8xf32>
    %72 = arith.subf %69, %71 : vector<8x8x8xf32>
    %cst_40 = arith.constant dense<0.000000e+00> : vector<8x8xf32>
    %73 = vector.multi_reduction <add>, %72, %cst_40 [0] : vector<8x8x8xf32> to vector<8x8xf32>
    %74 = arith.addf %60, %73 : vector<8x8xf32>
    %75 = vector.broadcast %66 : vector<8x1x8xf32> to vector<8x8x8xf32>
    %76 = arith.mulf %75, %65 : vector<8x8x8xf32>
    %77 = vector.broadcast %67 : vector<8x1x8xf32> to vector<8x8x8xf32>
    %78 = arith.mulf %77, %64 : vector<8x8x8xf32>
    %79 = arith.addf %76, %78 : vector<8x8x8xf32>
    %cst_41 = arith.constant dense<0.000000e+00> : vector<8x8xf32>
    %80 = vector.multi_reduction <add>, %79, %cst_41 [0] : vector<8x8x8xf32> to vector<8x8xf32>
    %81 = arith.addf %61, %80 : vector<8x8xf32>
    %c0_42 = arith.constant 0 : index
    %c0_43 = arith.constant 0 : index
    %82 = vector.load %arg11[%c0_42, %c0_43] : memref<32x16xf32, #tpu.memory_space<vmem>>, vector<8x8xf32>
    tpu.vector_store %arg11[%c0_42, %c0_43], %74 {strides = array<i32>} : memref<32x16xf32, #tpu.memory_space<vmem>>, vector<8x8xf32>,
    %c0_44 = arith.constant 0 : index
    %c8_45 = arith.constant 8 : index
    %83 = vector.load %arg11[%c0_44, %c8_45] : memref<32x16xf32, #tpu.memory_space<vmem>>, vector<8x8xf32>
    tpu.vector_store %arg11[%c0_44, %c8_45], %81 {strides = array<i32>} : memref<32x16xf32, #tpu.memory_space<vmem>>, vector<8x8xf32>,
    %c32_i32_46 = arith.constant 32 : i32
    %84 = arith.muli %arg0, %c32_i32_46 : i32
    %c8_i32 = arith.constant 8 : i32
    %85 = arith.addi %84, %c8_i32 : i32
    %86 = tpu.assume_multiple %85, 8 : i32
    %87 = arith.index_cast %86 : i32 to index
    %c0_47 = arith.constant 0 : index
    %88 = vector.load %arg9[%87, %c0_47] : memref<64x16xf32, #tpu.memory_space<vmem>>, vector<8x8xf32>
    %89 = arith.index_cast %86 : i32 to index
    %c8_48 = arith.constant 8 : index
    %90 = vector.load %arg9[%89, %c8_48] : memref<64x16xf32, #tpu.memory_space<vmem>>, vector<8x8xf32>
    %91 = arith.index_cast %86 : i32 to index
    %c0_49 = arith.constant 0 : index
    %92 = vector.load %arg10[%91, %c0_49] : memref<64x16xf32, #tpu.memory_space<vmem>>, vector<8x8xf32>
    %93 = arith.index_cast %86 : i32 to index
    %c8_50 = arith.constant 8 : index
    %94 = vector.load %arg10[%93, %c8_50] : memref<64x16xf32, #tpu.memory_space<vmem>>, vector<8x8xf32>
    %cst_51 = arith.constant dense<0.000000e+00> : vector<8x8xf32>
    %95 = tpu.matmul %88, %92, %cst_51 {dimension_numbers = #tpu.dot_dimension_numbers<[0], [0], [1], [1], [0, 1, 1, 1], [], []>} : vector<8x8xf32>, vector<8x8xf32>, vector<8x8xf32> -> vector<8x8xf32>
    %cst_52 = arith.constant dense<0.000000e+00> : vector<8x8xf32>
    %96 = tpu.matmul %90, %94, %cst_52 {dimension_numbers = #tpu.dot_dimension_numbers<[0], [0], [1], [1], [0, 1, 1, 1], [], []>} : vector<8x8xf32>, vector<8x8xf32>, vector<8x8xf32> -> vector<8x8xf32>
    %97 = arith.subf %95, %96 : vector<8x8xf32>
    %cst_53 = arith.constant dense<0.000000e+00> : vector<8x8xf32>
    %98 = tpu.matmul %88, %94, %cst_53 {dimension_numbers = #tpu.dot_dimension_numbers<[0], [0], [1], [1], [0, 1, 1, 1], [], []>} : vector<8x8xf32>, vector<8x8xf32>, vector<8x8xf32> -> vector<8x8xf32>
    %cst_54 = arith.constant dense<0.000000e+00> : vector<8x8xf32>
    %99 = tpu.matmul %90, %92, %cst_54 {dimension_numbers = #tpu.dot_dimension_numbers<[0], [0], [1], [1], [0, 1, 1, 1], [], []>} : vector<8x8xf32>, vector<8x8xf32>, vector<8x8xf32> -> vector<8x8xf32>
    %100 = arith.addf %98, %99 : vector<8x8xf32>
    %cst_55 = arith.constant 2.000000e+00 : f32
    %101 = vector.broadcast %cst_55 : f32 to vector<8x8xf32>
    %102 = arith.mulf %101, %97 : vector<8x8xf32>
    %cst_56 = arith.constant -3.000000e+01 : f32
    %cst_57 = arith.constant 3.000000e+01 : f32
    %103 = vector.broadcast %cst_56 : f32 to vector<8x8xf32>
    %104 = arith.maximumf %103, %102 : vector<8x8xf32>
    %105 = vector.broadcast %cst_57 : f32 to vector<8x8xf32>
    %106 = arith.minimumf %105, %104 : vector<8x8xf32>
    %107 = math.exp %106 : vector<8x8xf32>
    %cst_58 = arith.constant 0.000000e+00 : f32
    %108 = vector.broadcast %cst_58 : f32 to vector<8x8xf32>
    %109 = arith.subf %108, %106 : vector<8x8xf32>
    %110 = math.exp %109 : vector<8x8xf32>
    %111 = arith.addf %107, %110 : vector<8x8xf32>
    %cst_59 = arith.constant 5.000000e-01 : f32
    %112 = vector.broadcast %cst_59 : f32 to vector<8x8xf32>
    %113 = arith.mulf %112, %111 : vector<8x8xf32>
    %cst_60 = arith.constant 2.000000e+00 : f32
    %114 = vector.broadcast %cst_60 : f32 to vector<8x8xf32>
    %115 = arith.mulf %114, %100 : vector<8x8xf32>
    %116 = math.cos %115 : vector<8x8xf32>
    %117 = arith.addf %113, %116 : vector<8x8xf32>
    %cst_61 = arith.constant 1.000000e+00 : f32
    %118 = vector.broadcast %cst_61 : f32 to vector<8x8xf32>
    %119 = arith.divf %118, %117 : vector<8x8xf32>
    %120 = arith.subf %107, %110 : vector<8x8xf32>
    %cst_62 = arith.constant 5.000000e-01 : f32
    %121 = vector.broadcast %cst_62 : f32 to vector<8x8xf32>
    %122 = arith.mulf %121, %120 : vector<8x8xf32>
    %123 = arith.mulf %122, %119 : vector<8x8xf32>
    %cst_63 = arith.constant 2.000000e+00 : f32
    %124 = vector.broadcast %cst_63 : f32 to vector<8x8xf32>
    %125 = arith.mulf %124, %100 : vector<8x8xf32>
    %126 = math.sin %125 : vector<8x8xf32>
    %127 = arith.mulf %126, %119 : vector<8x8xf32>
    %cst_64 = arith.constant dense<0.000000e+00> : vector<8x8xf32>
    %128 = tpu.matmul %92, %123, %cst_64 {dimension_numbers = #tpu.dot_dimension_numbers<[1], [1], [0], [0], [0, 0, 1, 0], [], []>} : vector<8x8xf32>, vector<8x8xf32>, vector<8x8xf32> -> vector<8x8xf32>
    %cst_65 = arith.constant dense<0.000000e+00> : vector<8x8xf32>
    %129 = tpu.matmul %94, %127, %cst_65 {dimension_numbers = #tpu.dot_dimension_numbers<[1], [1], [0], [0], [0, 0, 1, 0], [], []>} : vector<8x8xf32>, vector<8x8xf32>, vector<8x8xf32> -> vector<8x8xf32>
    %130 = arith.subf %128, %129 : vector<8x8xf32>
    %cst_66 = arith.constant dense<0.000000e+00> : vector<8x8xf32>
    %131 = tpu.matmul %92, %127, %cst_66 {dimension_numbers = #tpu.dot_dimension_numbers<[1], [1], [0], [0], [0, 0, 1, 0], [], []>} : vector<8x8xf32>, vector<8x8xf32>, vector<8x8xf32> -> vector<8x8xf32>
    %cst_67 = arith.constant dense<0.000000e+00> : vector<8x8xf32>
    %132 = tpu.matmul %94, %123, %cst_67 {dimension_numbers = #tpu.dot_dimension_numbers<[1], [1], [0], [0], [0, 0, 1, 0], [], []>} : vector<8x8xf32>, vector<8x8xf32>, vector<8x8xf32> -> vector<8x8xf32>
    %133 = arith.addf %131, %132 : vector<8x8xf32>
    %cst_68 = arith.constant 0.000000e+00 : f32
    %134 = vector.broadcast %cst_68 : f32 to vector<8x8xf32>
    %cst_69 = arith.constant 0.000000e+00 : f32
    %135 = vector.broadcast %cst_69 : f32 to vector<8x8xf32>
    %c1 = arith.constant 1 : index
    %c0_70 = arith.constant 0 : index
    %c0_71 = arith.constant 0 : index
    %c0_72 = arith.constant 0 : index
    %136 = vector.load %arg4[%c1, %c0_70, %c0_71, %c0_72] : memref<4x8x8x16xf32, #tpu.memory_space<vmem>>, vector<1x8x8x16xf32>
    %137 = vector.shape_cast %136 : vector<1x8x8x16xf32> to vector<8x8x16xf32>
    %138 = vector.extract_strided_slice %137 {offsets = [0, 0, 0], sizes = [8, 8, 8], strides = [1, 1, 1]} : vector<8x8x16xf32> to vector<8x8x8xf32>
    %139 = vector.extract_strided_slice %137 {offsets = [0, 0, 8], sizes = [8, 8, 8], strides = [1, 1, 1]} : vector<8x8x16xf32> to vector<8x8x8xf32>
    %140 = vector.shape_cast %130 : vector<8x8xf32> to vector<8x1x8xf32>
    %141 = vector.shape_cast %133 : vector<8x8xf32> to vector<8x1x8xf32>
    %142 = vector.broadcast %140 : vector<8x1x8xf32> to vector<8x8x8xf32>
    %143 = arith.mulf %142, %138 : vector<8x8x8xf32>
    %144 = vector.broadcast %141 : vector<8x1x8xf32> to vector<8x8x8xf32>
    %145 = arith.mulf %144, %139 : vector<8x8x8xf32>
    %146 = arith.subf %143, %145 : vector<8x8x8xf32>
    %cst_73 = arith.constant dense<0.000000e+00> : vector<8x8xf32>
    %147 = vector.multi_reduction <add>, %146, %cst_73 [0] : vector<8x8x8xf32> to vector<8x8xf32>
    %148 = arith.addf %134, %147 : vector<8x8xf32>
    %149 = vector.broadcast %140 : vector<8x1x8xf32> to vector<8x8x8xf32>
    %150 = arith.mulf %149, %139 : vector<8x8x8xf32>
    %151 = vector.broadcast %141 : vector<8x1x8xf32> to vector<8x8x8xf32>
    %152 = arith.mulf %151, %138 : vector<8x8x8xf32>
    %153 = arith.addf %150, %152 : vector<8x8x8xf32>
    %cst_74 = arith.constant dense<0.000000e+00> : vector<8x8xf32>
    %154 = vector.multi_reduction <add>, %153, %cst_74 [0] : vector<8x8x8xf32> to vector<8x8xf32>
    %155 = arith.addf %135, %154 : vector<8x8xf32>
    %c8_75 = arith.constant 8 : index
    %c0_76 = arith.constant 0 : index
    %156 = vector.load %arg11[%c8_75, %c0_76] : memref<32x16xf32, #tpu.memory_space<vmem>>, vector<8x8xf32>
    tpu.vector_store %arg11[%c8_75, %c0_76], %148 {strides = array<i32>} : memref<32x16xf32, #tpu.memory_space<vmem>>, vector<8x8xf32>,
    %c8_77 = arith.constant 8 : index
    %c8_78 = arith.constant 8 : index
    %157 = vector.load %arg11[%c8_77, %c8_78] : memref<32x16xf32, #tpu.memory_space<vmem>>, vector<8x8xf32>
    tpu.vector_store %arg11[%c8_77, %c8_78], %155 {strides = array<i32>} : memref<32x16xf32, #tpu.memory_space<vmem>>, vector<8x8xf32>,
    %c32_i32_79 = arith.constant 32 : i32
    %158 = arith.muli %arg0, %c32_i32_79 : i32
    %c16_i32 = arith.constant 16 : i32
    %159 = arith.addi %158, %c16_i32 : i32
    %160 = tpu.assume_multiple %159, 8 : i32
    %161 = arith.index_cast %160 : i32 to index
    %c0_80 = arith.constant 0 : index
    %162 = vector.load %arg9[%161, %c0_80] : memref<64x16xf32, #tpu.memory_space<vmem>>, vector<8x8xf32>
    %163 = arith.index_cast %160 : i32 to index
    %c8_81 = arith.constant 8 : index
    %164 = vector.load %arg9[%163, %c8_81] : memref<64x16xf32, #tpu.memory_space<vmem>>, vector<8x8xf32>
    %165 = arith.index_cast %160 : i32 to index
    %c0_82 = arith.constant 0 : index
    %166 = vector.load %arg10[%165, %c0_82] : memref<64x16xf32, #tpu.memory_space<vmem>>, vector<8x8xf32>
    %167 = arith.index_cast %160 : i32 to index
    %c8_83 = arith.constant 8 : index
    %168 = vector.load %arg10[%167, %c8_83] : memref<64x16xf32, #tpu.memory_space<vmem>>, vector<8x8xf32>
    %cst_84 = arith.constant dense<0.000000e+00> : vector<8x8xf32>
    %169 = tpu.matmul %162, %166, %cst_84 {dimension_numbers = #tpu.dot_dimension_numbers<[0], [0], [1], [1], [0, 1, 1, 1], [], []>} : vector<8x8xf32>, vector<8x8xf32>, vector<8x8xf32> -> vector<8x8xf32>
    %cst_85 = arith.constant dense<0.000000e+00> : vector<8x8xf32>
    %170 = tpu.matmul %164, %168, %cst_85 {dimension_numbers = #tpu.dot_dimension_numbers<[0], [0], [1], [1], [0, 1, 1, 1], [], []>} : vector<8x8xf32>, vector<8x8xf32>, vector<8x8xf32> -> vector<8x8xf32>
    %171 = arith.subf %169, %170 : vector<8x8xf32>
    %cst_86 = arith.constant dense<0.000000e+00> : vector<8x8xf32>
    %172 = tpu.matmul %162, %168, %cst_86 {dimension_numbers = #tpu.dot_dimension_numbers<[0], [0], [1], [1], [0, 1, 1, 1], [], []>} : vector<8x8xf32>, vector<8x8xf32>, vector<8x8xf32> -> vector<8x8xf32>
    %cst_87 = arith.constant dense<0.000000e+00> : vector<8x8xf32>
    %173 = tpu.matmul %164, %166, %cst_87 {dimension_numbers = #tpu.dot_dimension_numbers<[0], [0], [1], [1], [0, 1, 1, 1], [], []>} : vector<8x8xf32>, vector<8x8xf32>, vector<8x8xf32> -> vector<8x8xf32>
    %174 = arith.addf %172, %173 : vector<8x8xf32>
    %cst_88 = arith.constant 2.000000e+00 : f32
    %175 = vector.broadcast %cst_88 : f32 to vector<8x8xf32>
    %176 = arith.mulf %175, %171 : vector<8x8xf32>
    %cst_89 = arith.constant -3.000000e+01 : f32
    %cst_90 = arith.constant 3.000000e+01 : f32
    %177 = vector.broadcast %cst_89 : f32 to vector<8x8xf32>
    %178 = arith.maximumf %177, %176 : vector<8x8xf32>
    %179 = vector.broadcast %cst_90 : f32 to vector<8x8xf32>
    %180 = arith.minimumf %179, %178 : vector<8x8xf32>
    %181 = math.exp %180 : vector<8x8xf32>
    %cst_91 = arith.constant 0.000000e+00 : f32
    %182 = vector.broadcast %cst_91 : f32 to vector<8x8xf32>
    %183 = arith.subf %182, %180 : vector<8x8xf32>
    %184 = math.exp %183 : vector<8x8xf32>
    %185 = arith.addf %181, %184 : vector<8x8xf32>
    %cst_92 = arith.constant 5.000000e-01 : f32
    %186 = vector.broadcast %cst_92 : f32 to vector<8x8xf32>
    %187 = arith.mulf %186, %185 : vector<8x8xf32>
    %cst_93 = arith.constant 2.000000e+00 : f32
    %188 = vector.broadcast %cst_93 : f32 to vector<8x8xf32>
    %189 = arith.mulf %188, %174 : vector<8x8xf32>
    %190 = math.cos %189 : vector<8x8xf32>
    %191 = arith.addf %187, %190 : vector<8x8xf32>
    %cst_94 = arith.constant 1.000000e+00 : f32
    %192 = vector.broadcast %cst_94 : f32 to vector<8x8xf32>
    %193 = arith.divf %192, %191 : vector<8x8xf32>
    %194 = arith.subf %181, %184 : vector<8x8xf32>
    %cst_95 = arith.constant 5.000000e-01 : f32
    %195 = vector.broadcast %cst_95 : f32 to vector<8x8xf32>
    %196 = arith.mulf %195, %194 : vector<8x8xf32>
    %197 = arith.mulf %196, %193 : vector<8x8xf32>
    %cst_96 = arith.constant 2.000000e+00 : f32
    %198 = vector.broadcast %cst_96 : f32 to vector<8x8xf32>
    %199 = arith.mulf %198, %174 : vector<8x8xf32>
    %200 = math.sin %199 : vector<8x8xf32>
    %201 = arith.mulf %200, %193 : vector<8x8xf32>
    %cst_97 = arith.constant dense<0.000000e+00> : vector<8x8xf32>
    %202 = tpu.matmul %166, %197, %cst_97 {dimension_numbers = #tpu.dot_dimension_numbers<[1], [1], [0], [0], [0, 0, 1, 0], [], []>} : vector<8x8xf32>, vector<8x8xf32>, vector<8x8xf32> -> vector<8x8xf32>
    %cst_98 = arith.constant dense<0.000000e+00> : vector<8x8xf32>
    %203 = tpu.matmul %168, %201, %cst_98 {dimension_numbers = #tpu.dot_dimension_numbers<[1], [1], [0], [0], [0, 0, 1, 0], [], []>} : vector<8x8xf32>, vector<8x8xf32>, vector<8x8xf32> -> vector<8x8xf32>
    %204 = arith.subf %202, %203 : vector<8x8xf32>
    %cst_99 = arith.constant dense<0.000000e+00> : vector<8x8xf32>
    %205 = tpu.matmul %166, %201, %cst_99 {dimension_numbers = #tpu.dot_dimension_numbers<[1], [1], [0], [0], [0, 0, 1, 0], [], []>} : vector<8x8xf32>, vector<8x8xf32>, vector<8x8xf32> -> vector<8x8xf32>
    %cst_100 = arith.constant dense<0.000000e+00> : vector<8x8xf32>
    %206 = tpu.matmul %168, %197, %cst_100 {dimension_numbers = #tpu.dot_dimension_numbers<[1], [1], [0], [0], [0, 0, 1, 0], [], []>} : vector<8x8xf32>, vector<8x8xf32>, vector<8x8xf32> -> vector<8x8xf32>
    %207 = arith.addf %205, %206 : vector<8x8xf32>
    %cst_101 = arith.constant 0.000000e+00 : f32
    %208 = vector.broadcast %cst_101 : f32 to vector<8x8xf32>
    %cst_102 = arith.constant 0.000000e+00 : f32
    %209 = vector.broadcast %cst_102 : f32 to vector<8x8xf32>
    %c2 = arith.constant 2 : index
    %c0_103 = arith.constant 0 : index
    %c0_104 = arith.constant 0 : index
    %c0_105 = arith.constant 0 : index
    %210 = vector.load %arg4[%c2, %c0_103, %c0_104, %c0_105] : memref<4x8x8x16xf32, #tpu.memory_space<vmem>>, vector<1x8x8x16xf32>
    %211 = vector.shape_cast %210 : vector<1x8x8x16xf32> to vector<8x8x16xf32>
    %212 = vector.extract_strided_slice %211 {offsets = [0, 0, 0], sizes = [8, 8, 8], strides = [1, 1, 1]} : vector<8x8x16xf32> to vector<8x8x8xf32>
    %213 = vector.extract_strided_slice %211 {offsets = [0, 0, 8], sizes = [8, 8, 8], strides = [1, 1, 1]} : vector<8x8x16xf32> to vector<8x8x8xf32>
    %214 = vector.shape_cast %204 : vector<8x8xf32> to vector<8x1x8xf32>
    %215 = vector.shape_cast %207 : vector<8x8xf32> to vector<8x1x8xf32>
    %216 = vector.broadcast %214 : vector<8x1x8xf32> to vector<8x8x8xf32>
    %217 = arith.mulf %216, %212 : vector<8x8x8xf32>
    %218 = vector.broadcast %215 : vector<8x1x8xf32> to vector<8x8x8xf32>
    %219 = arith.mulf %218, %213 : vector<8x8x8xf32>
    %220 = arith.subf %217, %219 : vector<8x8x8xf32>
    %cst_106 = arith.constant dense<0.000000e+00> : vector<8x8xf32>
    %221 = vector.multi_reduction <add>, %220, %cst_106 [0] : vector<8x8x8xf32> to vector<8x8xf32>
    %222 = arith.addf %208, %221 : vector<8x8xf32>
    %223 = vector.broadcast %214 : vector<8x1x8xf32> to vector<8x8x8xf32>
    %224 = arith.mulf %223, %213 : vector<8x8x8xf32>
    %225 = vector.broadcast %215 : vector<8x1x8xf32> to vector<8x8x8xf32>
    %226 = arith.mulf %225, %212 : vector<8x8x8xf32>
    %227 = arith.addf %224, %226 : vector<8x8x8xf32>
    %cst_107 = arith.constant dense<0.000000e+00> : vector<8x8xf32>
    %228 = vector.multi_reduction <add>, %227, %cst_107 [0] : vector<8x8x8xf32> to vector<8x8xf32>
    %229 = arith.addf %209, %228 : vector<8x8xf32>
    %c16 = arith.constant 16 : index
    %c0_108 = arith.constant 0 : index
    %230 = vector.load %arg11[%c16, %c0_108] : memref<32x16xf32, #tpu.memory_space<vmem>>, vector<8x8xf32>
    tpu.vector_store %arg11[%c16, %c0_108], %222 {strides = array<i32>} : memref<32x16xf32, #tpu.memory_space<vmem>>, vector<8x8xf32>,
    %c16_109 = arith.constant 16 : index
    %c8_110 = arith.constant 8 : index
    %231 = vector.load %arg11[%c16_109, %c8_110] : memref<32x16xf32, #tpu.memory_space<vmem>>, vector<8x8xf32>
    tpu.vector_store %arg11[%c16_109, %c8_110], %229 {strides = array<i32>} : memref<32x16xf32, #tpu.memory_space<vmem>>, vector<8x8xf32>,
    %c32_i32_111 = arith.constant 32 : i32
    %232 = arith.muli %arg0, %c32_i32_111 : i32
    %c24_i32 = arith.constant 24 : i32
    %233 = arith.addi %232, %c24_i32 : i32
    %234 = tpu.assume_multiple %233, 8 : i32
    %235 = arith.index_cast %234 : i32 to index
    %c0_112 = arith.constant 0 : index
    %236 = vector.load %arg9[%235, %c0_112] : memref<64x16xf32, #tpu.memory_space<vmem>>, vector<8x8xf32>
    %237 = arith.index_cast %234 : i32 to index
    %c8_113 = arith.constant 8 : index
    %238 = vector.load %arg9[%237, %c8_113] : memref<64x16xf32, #tpu.memory_space<vmem>>, vector<8x8xf32>
    %239 = arith.index_cast %234 : i32 to index
    %c0_114 = arith.constant 0 : index
    %240 = vector.load %arg10[%239, %c0_114] : memref<64x16xf32, #tpu.memory_space<vmem>>, vector<8x8xf32>
    %241 = arith.index_cast %234 : i32 to index
    %c8_115 = arith.constant 8 : index
    %242 = vector.load %arg10[%241, %c8_115] : memref<64x16xf32, #tpu.memory_space<vmem>>, vector<8x8xf32>
    %cst_116 = arith.constant dense<0.000000e+00> : vector<8x8xf32>
    %243 = tpu.matmul %236, %240, %cst_116 {dimension_numbers = #tpu.dot_dimension_numbers<[0], [0], [1], [1], [0, 1, 1, 1], [], []>} : vector<8x8xf32>, vector<8x8xf32>, vector<8x8xf32> -> vector<8x8xf32>
    %cst_117 = arith.constant dense<0.000000e+00> : vector<8x8xf32>
    %244 = tpu.matmul %238, %242, %cst_117 {dimension_numbers = #tpu.dot_dimension_numbers<[0], [0], [1], [1], [0, 1, 1, 1], [], []>} : vector<8x8xf32>, vector<8x8xf32>, vector<8x8xf32> -> vector<8x8xf32>
    %245 = arith.subf %243, %244 : vector<8x8xf32>
    %cst_118 = arith.constant dense<0.000000e+00> : vector<8x8xf32>
    %246 = tpu.matmul %236, %242, %cst_118 {dimension_numbers = #tpu.dot_dimension_numbers<[0], [0], [1], [1], [0, 1, 1, 1], [], []>} : vector<8x8xf32>, vector<8x8xf32>, vector<8x8xf32> -> vector<8x8xf32>
    %cst_119 = arith.constant dense<0.000000e+00> : vector<8x8xf32>
    %247 = tpu.matmul %238, %240, %cst_119 {dimension_numbers = #tpu.dot_dimension_numbers<[0], [0], [1], [1], [0, 1, 1, 1], [], []>} : vector<8x8xf32>, vector<8x8xf32>, vector<8x8xf32> -> vector<8x8xf32>
    %248 = arith.addf %246, %247 : vector<8x8xf32>
    %cst_120 = arith.constant 2.000000e+00 : f32
    %249 = vector.broadcast %cst_120 : f32 to vector<8x8xf32>
    %250 = arith.mulf %249, %245 : vector<8x8xf32>
    %cst_121 = arith.constant -3.000000e+01 : f32
    %cst_122 = arith.constant 3.000000e+01 : f32
    %251 = vector.broadcast %cst_121 : f32 to vector<8x8xf32>
    %252 = arith.maximumf %251, %250 : vector<8x8xf32>
    %253 = vector.broadcast %cst_122 : f32 to vector<8x8xf32>
    %254 = arith.minimumf %253, %252 : vector<8x8xf32>
    %255 = math.exp %254 : vector<8x8xf32>
    %cst_123 = arith.constant 0.000000e+00 : f32
    %256 = vector.broadcast %cst_123 : f32 to vector<8x8xf32>
    %257 = arith.subf %256, %254 : vector<8x8xf32>
    %258 = math.exp %257 : vector<8x8xf32>
    %259 = arith.addf %255, %258 : vector<8x8xf32>
    %cst_124 = arith.constant 5.000000e-01 : f32
    %260 = vector.broadcast %cst_124 : f32 to vector<8x8xf32>
    %261 = arith.mulf %260, %259 : vector<8x8xf32>
    %cst_125 = arith.constant 2.000000e+00 : f32
    %262 = vector.broadcast %cst_125 : f32 to vector<8x8xf32>
    %263 = arith.mulf %262, %248 : vector<8x8xf32>
    %264 = math.cos %263 : vector<8x8xf32>
    %265 = arith.addf %261, %264 : vector<8x8xf32>
    %cst_126 = arith.constant 1.000000e+00 : f32
    %266 = vector.broadcast %cst_126 : f32 to vector<8x8xf32>
    %267 = arith.divf %266, %265 : vector<8x8xf32>
    %268 = arith.subf %255, %258 : vector<8x8xf32>
    %cst_127 = arith.constant 5.000000e-01 : f32
    %269 = vector.broadcast %cst_127 : f32 to vector<8x8xf32>
    %270 = arith.mulf %269, %268 : vector<8x8xf32>
    %271 = arith.mulf %270, %267 : vector<8x8xf32>
    %cst_128 = arith.constant 2.000000e+00 : f32
    %272 = vector.broadcast %cst_128 : f32 to vector<8x8xf32>
    %273 = arith.mulf %272, %248 : vector<8x8xf32>
    %274 = math.sin %273 : vector<8x8xf32>
    %275 = arith.mulf %274, %267 : vector<8x8xf32>
    %cst_129 = arith.constant dense<0.000000e+00> : vector<8x8xf32>
    %276 = tpu.matmul %240, %271, %cst_129 {dimension_numbers = #tpu.dot_dimension_numbers<[1], [1], [0], [0], [0, 0, 1, 0], [], []>} : vector<8x8xf32>, vector<8x8xf32>, vector<8x8xf32> -> vector<8x8xf32>
    %cst_130 = arith.constant dense<0.000000e+00> : vector<8x8xf32>
    %277 = tpu.matmul %242, %275, %cst_130 {dimension_numbers = #tpu.dot_dimension_numbers<[1], [1], [0], [0], [0, 0, 1, 0], [], []>} : vector<8x8xf32>, vector<8x8xf32>, vector<8x8xf32> -> vector<8x8xf32>
    %278 = arith.subf %276, %277 : vector<8x8xf32>
    %cst_131 = arith.constant dense<0.000000e+00> : vector<8x8xf32>
    %279 = tpu.matmul %240, %275, %cst_131 {dimension_numbers = #tpu.dot_dimension_numbers<[1], [1], [0], [0], [0, 0, 1, 0], [], []>} : vector<8x8xf32>, vector<8x8xf32>, vector<8x8xf32> -> vector<8x8xf32>
    %cst_132 = arith.constant dense<0.000000e+00> : vector<8x8xf32>
    %280 = tpu.matmul %242, %271, %cst_132 {dimension_numbers = #tpu.dot_dimension_numbers<[1], [1], [0], [0], [0, 0, 1, 0], [], []>} : vector<8x8xf32>, vector<8x8xf32>, vector<8x8xf32> -> vector<8x8xf32>
    %281 = arith.addf %279, %280 : vector<8x8xf32>
    %cst_133 = arith.constant 0.000000e+00 : f32
    %282 = vector.broadcast %cst_133 : f32 to vector<8x8xf32>
    %cst_134 = arith.constant 0.000000e+00 : f32
    %283 = vector.broadcast %cst_134 : f32 to vector<8x8xf32>
    %c3 = arith.constant 3 : index
    %c0_135 = arith.constant 0 : index
    %c0_136 = arith.constant 0 : index
    %c0_137 = arith.constant 0 : index
    %284 = vector.load %arg4[%c3, %c0_135, %c0_136, %c0_137] : memref<4x8x8x16xf32, #tpu.memory_space<vmem>>, vector<1x8x8x16xf32>
    %285 = vector.shape_cast %284 : vector<1x8x8x16xf32> to vector<8x8x16xf32>
    %286 = vector.extract_strided_slice %285 {offsets = [0, 0, 0], sizes = [8, 8, 8], strides = [1, 1, 1]} : vector<8x8x16xf32> to vector<8x8x8xf32>
    %287 = vector.extract_strided_slice %285 {offsets = [0, 0, 8], sizes = [8, 8, 8], strides = [1, 1, 1]} : vector<8x8x16xf32> to vector<8x8x8xf32>
    %288 = vector.shape_cast %278 : vector<8x8xf32> to vector<8x1x8xf32>
    %289 = vector.shape_cast %281 : vector<8x8xf32> to vector<8x1x8xf32>
    %290 = vector.broadcast %288 : vector<8x1x8xf32> to vector<8x8x8xf32>
    %291 = arith.mulf %290, %286 : vector<8x8x8xf32>
    %292 = vector.broadcast %289 : vector<8x1x8xf32> to vector<8x8x8xf32>
    %293 = arith.mulf %292, %287 : vector<8x8x8xf32>
    %294 = arith.subf %291, %293 : vector<8x8x8xf32>
    %cst_138 = arith.constant dense<0.000000e+00> : vector<8x8xf32>
    %295 = vector.multi_reduction <add>, %294, %cst_138 [0] : vector<8x8x8xf32> to vector<8x8xf32>
    %296 = arith.addf %282, %295 : vector<8x8xf32>
    %297 = vector.broadcast %288 : vector<8x1x8xf32> to vector<8x8x8xf32>
    %298 = arith.mulf %297, %287 : vector<8x8x8xf32>
    %299 = vector.broadcast %289 : vector<8x1x8xf32> to vector<8x8x8xf32>
    %300 = arith.mulf %299, %286 : vector<8x8x8xf32>
    %301 = arith.addf %298, %300 : vector<8x8x8xf32>
    %cst_139 = arith.constant dense<0.000000e+00> : vector<8x8xf32>
    %302 = vector.multi_reduction <add>, %301, %cst_139 [0] : vector<8x8x8xf32> to vector<8x8xf32>
    %303 = arith.addf %283, %302 : vector<8x8xf32>
    %c24 = arith.constant 24 : index
    %c0_140 = arith.constant 0 : index
    %304 = vector.load %arg11[%c24, %c0_140] : memref<32x16xf32, #tpu.memory_space<vmem>>, vector<8x8xf32>
    tpu.vector_store %arg11[%c24, %c0_140], %296 {strides = array<i32>} : memref<32x16xf32, #tpu.memory_space<vmem>>, vector<8x8xf32>,
    %c24_141 = arith.constant 24 : index
    %c8_142 = arith.constant 8 : index
    %305 = vector.load %arg11[%c24_141, %c8_142] : memref<32x16xf32, #tpu.memory_space<vmem>>, vector<8x8xf32>
    tpu.vector_store %arg11[%c24_141, %c8_142], %303 {strides = array<i32>} : memref<32x16xf32, #tpu.memory_space<vmem>>, vector<8x8xf32>,
    %c0_143 = arith.constant 0 : index
    %c0_144 = arith.constant 0 : index
    %306 = vector.load %arg11[%c0_143, %c0_144] : memref<32x16xf32, #tpu.memory_space<vmem>>, vector<32x16xf32>
    %c0_145 = arith.constant 0 : index
    %c0_146 = arith.constant 0 : index
    %307 = vector.load %arg7[%c0_145, %c0_146] : memref<16x128xf32, #tpu.memory_space<vmem>>, vector<16x128xf32>
    %cst_147 = arith.constant dense<0.000000e+00> : vector<32x128xf32>
    %308 = tpu.matmul %306, %307, %cst_147 {dimension_numbers = #tpu.dot_dimension_numbers<[1], [0], [0], [1], [0, 0, 1, 1], [], []>} : vector<32x16xf32>, vector<16x128xf32>, vector<32x128xf32> -> vector<32x128xf32>
    %c0_148 = arith.constant 0 : index
    %c0_149 = arith.constant 0 : index
    %c0_150 = arith.constant 0 : index
    %309 = vector.load %arg8[%c0_148, %c0_149, %c0_150] : memref<1x32x128xf32, #tpu.memory_space<vmem>>, vector<1x32x128xf32>
    %310 = vector.shape_cast %309 : vector<1x32x128xf32> to vector<32x128xf32>
    %311 = vector.shape_cast %308 : vector<32x128xf32> to vector<1x32x128xf32>
    tpu.vector_store %arg8[%c0_148, %c0_149, %c0_150], %311 {strides = array<i32>} : memref<1x32x128xf32, #tpu.memory_space<vmem>>, vector<1x32x128xf32>,
    return
  }
  func.func @transform_0(%arg0: i32, %arg1: i32) -> (i32, i32, i32) {
    %c0_i32 = arith.constant 0 : i32
    %c0_i32_0 = arith.constant 0 : i32
    %c0_i32_1 = arith.constant 0 : i32
    return %arg1, %c0_i32, %c0_i32_0 : i32, i32, i32
  }
  func.func @transform_1(%arg0: i32, %arg1: i32) -> (i32, i32, i32) {
    %c0_i32 = arith.constant 0 : i32
    %c0_i32_0 = arith.constant 0 : i32
    %c0_i32_1 = arith.constant 0 : i32
    return %arg1, %c0_i32, %c0_i32_0 : i32, i32, i32
  }
  func.func @transform_2(%arg0: i32, %arg1: i32) -> (i32, i32, i32, i32) {
    %c0_i32 = arith.constant 0 : i32
    %c0_i32_0 = arith.constant 0 : i32
    %c0_i32_1 = arith.constant 0 : i32
    %c0_i32_2 = arith.constant 0 : i32
    return %arg0, %c0_i32, %c0_i32_0, %c0_i32_1 : i32, i32, i32, i32
  }
  func.func @transform_3(%arg0: i32, %arg1: i32) -> (i32, i32) {
    %c0_i32 = arith.constant 0 : i32
    %c0_i32_0 = arith.constant 0 : i32
    %c0_i32_1 = arith.constant 0 : i32
    return %c0_i32, %c0_i32_0 : i32, i32
  }
  func.func @transform_4(%arg0: i32, %arg1: i32) -> (i32, i32) {
    %c0_i32 = arith.constant 0 : i32
    %c0_i32_0 = arith.constant 0 : i32
    %c0_i32_1 = arith.constant 0 : i32
    return %c0_i32, %c0_i32_0 : i32, i32
  }
  func.func @transform_5(%arg0: i32, %arg1: i32) -> (i32, i32) {
    %c0_i32 = arith.constant 0 : i32
    %c0_i32_0 = arith.constant 0 : i32
    %c0_i32_1 = arith.constant 0 : i32
    return %c0_i32, %c0_i32_0 : i32, i32
  }
  func.func @transform_6(%arg0: i32, %arg1: i32) -> (i32, i32, i32) {
    %c0_i32 = arith.constant 0 : i32
    %c0_i32_0 = arith.constant 0 : i32
    return %arg1, %arg0, %c0_i32 : i32, i32, i32
  }
}

</mosaic_0001>

<bundles_post_ra>
// kernel: tpu_custom_call.1
= control target key start
LH: loop header
LB: loop body
LE: loop exit
PB: predicated region body
PF: predicated region fallthrough
CT: control target
= control target key end

     0   :  { %s8233_s0 = inlined_call_operand.hbm [shape: f32[2,16,64], index: 0, kind: input, shape index: {}]   ;;  %s8234_s1 = inlined_call_operand.hbm [shape: f32[2,16,64], index: 1, kind: input, shape index: {}]   ;;  %s8235_s2 = inlined_call_operand.hbm [shape: f32[8,8,8,16], index: 2, kind: input, shape index: {}]   ;;  %s8236_s3 = inlined_call_operand.hbm [shape: f32[16,16], index: 3, kind: input, shape index: {}]   ;;  %s8237_s4 = inlined_call_operand.hbm [shape: f32[16,16], index: 4, kind: input, shape index: {}]   ;;  %s8238_s5 = inlined_call_operand.hbm [shape: f32[16,128], index: 5, kind: input, shape index: {}]   ;;  %s8239_s6 = inlined_call_operand.hbm [shape: f32[2,64,128], index: 6, kind: output, shape index: {}]  }
   0x1   :  { %8281 = sst [smem:[#allocation39_spill]] %s8233_s0 }
   0x2   :  { %8282 = sst [smem:[#allocation40_spill]] %s8234_s1 }
   0x3   :  { %8283 = sst [smem:[#allocation41_spill]] %s8235_s2 }
   0x4   :  { %8284 = sst [smem:[#allocation42_spill]] %s8236_s3 }
   0x5   :  { %8285 = sst [smem:[#allocation43_spill]] %s8237_s4 }
   0x6   :  { %8286 = sst [smem:[#allocation44_spill]] %s8238_s5 }
   0x7   :  { %8287 = sst [smem:[#allocation45_spill]] %s8239_s6 }
   0x8   :  { %11 = vsyncpa [#allocation6], 0 }
   0x9   :  { %13 = vsyncpa [#allocation6 + $0x1], 0 }
   0xa   :  { %14 = vsyncpa [#allocation9], 0 }
   0xb   :  { %16 = vsyncpa [#allocation9 + $0x1], 0 }
   0xc   :  { %17 = vsyncpa [#allocation12], 0 }
   0xd   :  { %18 = vsyncpa [#allocation15], 0 }
   0xe   :  { %19 = vsyncpa [#allocation7], 0 }
   0xf   :  { %21 = vsyncpa [#allocation7 + $0x1], 0  ;;  %s6869_s21 = smov 0   ;;  %s6871_s22 = smov 0  }
  0x10   :  { %s6873_s23 = smov 0   ;;  %s6875_s24 = smov 0  }
  0x11   :  { %s6877_s25 = smov 0   ;;  %s6879_s26 = smov 0  }
  0x12   :  { %s6881_s27 = smov 0   ;;  %s6883_s28 = smov 0  }
  0x13   :  { %s6885_s29 = smov 0   ;;  %s6887_s30 = smov 0  }
  0x14   :  { %s6889_s7 = smov 0   ;;  %s6891_s8 = smov 0  }
  0x15   :  { %s6893_s9 = smov 0   ;;  %s6895_s10 = smov 0  }
  0x16 LB: > { %8288 = sst [smem:[#allocation23_spill]] %s6775_s25  ;;  %s6938_s11 = sadd.s32 4294967295, %s6811_s10   ;;  %s6811_s10 = sphi %s6895_s10, %s27_s10   ;;  %s6807_s9 = sphi %s6893_s9, %s8362_s9   ;;  %s6803_s8 = sphi %s6891_s8, %s8361_s8   ;;  %s6799_s7 = sphi %s6889_s7, %s8360_s7   ;;  %s6795_s30 = sphi %s6887_s30, %s8359_s30   ;;  %s6791_s29 = sphi %s6885_s29, %s8358_s29   ;;  %s6787_s28 = sphi %s6883_s28, %s8369_s28   ;;  %s6783_s27 = sphi %s6881_s27, %s8368_s27   ;;  %s6779_s26 = sphi %s6879_s26, %s8367_s26   ;;  %s6775_s25 = sphi %s6877_s25, %s8366_s25   ;;  %s6771_s24 = sphi %s6875_s24, %s8356_s24   ;;  %s6767_s23 = sphi %s6873_s23, %s8365_s23   ;;  %s6763_s22 = sphi %s6871_s22, %s8364_s22   ;;  %s6759_s21 = sphi %s6869_s21, %s8363_s21  }
  0x17   : > { %8289 = sst [smem:[#allocation24_spill]] %s6791_s29  ;;  %p111_p0 = scmp.ne.s32.totalorder %s6775_s25, %s6771_s24 }
  0x18   : > { %8290 = sst [smem:[#allocation25_spill]] %s6795_s30  ;;  %p8243_p1 = scmp.eq.s32.totalorder %s6938_s11, 0 }
  0x19   : > { %8291 = sst [smem:[#allocation26_spill]] %s6803_s8  ;;  %p5786_p3 = scmp.ge.s32.totalorder %s6811_s10, 1 }
  0x1a   : > { %8292 = sst [smem:[#allocation27_spill]] %s6807_s9  ;;  %p213_p4 = scmp.lt.s32.totalorder %s6811_s10, 5 }
  0x1b   : > { %p6947_p5 = por %p111_p0, %p8243_p1  ;;  %s5931_s13 = sshll.u32 %s6799_s7, 12 }
  0x1c   : > { %p6952_p6 = pnand %p5786_p3, %p213_p4  ;;  %s8295_s2 = sld [smem:[#allocation41_spill]] }
  0x1d   : > { %s8293_s12 = scalar_select %p6947_p5, 1, 0 }
  0x1e   : > { %s8294_s14 = scalar_select %p6952_p6, 1, 0 }
  0x1f   : > { %p8242_p7 = pneg %p6952_p6  ;;  %s6813_s18 = smov [#allocation10]  }
  0x20   : > { %s229_s19 = sshll.u32 %s6813_s18, 4  ;;  %s6814_s24 = smov [#allocation11]   ;;  %s6963_s19 = int_to_ptr.vmem [resolvable:$true] %s229_s19 }
  0x21   : > { %p6970_p8 = pnand %p8242_p7, %p6947_p5 }
  0x22   : > { %s6959_s17 = scalar_lea.hbm %s8295_s2, %s5931_s13  ;;  %s242_s13 = sshll.u32 %s6814_s24, 4  ;;  %s243_s13 = int_to_ptr.vmem [resolvable:$true] %s242_s13 }
  0x23   : > { %s6489_s15 = scalar_lea.hbm %s6959_s17, 4096  ;;  %p6491_p10 = pneg %p6970_p8 }
  0x24   : > { %p6490_p9 = scmp.ne.s32.totalorder %s6959_s17, %s6489_s15  ;;  %s6494_s25 = scalar_lea.hbm %s8295_s2, 8192 }
  0x25   : > { %p6495_p13 = scmp.lt.s32.totalorder %s6959_s17, %s8295_s2  ;;  %p6496_p0 = scmp.lt.s32.totalorder %s6494_s25, %s6489_s15 }
  0x26   : > { %p6492_p11 = pnand %p6491_p10, %p6490_p9 }
  0x27   : > { %p6497_p3 = por %p6496_p0, %p6495_p13 }
  0x28   : > { %p6493_p12 = pneg %p6492_p11 }
  0x2a   : > { %p6498_p4 = pnand %p6497_p3, %p6493_p12 }
  0x2c   : > { %6501 = shalt.err (!%p6498_p4)
}
  0x2d   : > { %s6502_s24 = scalar_lea.vmem %s6963_s19, 4096  ;;  %p6510_p11 = scmp.lt.s32.totalorder %s6963_s19, %s6963_s19 }
  0x2e   : > { %p6503_p2 = scmp.ne.s32.totalorder %s6963_s19, %s6502_s24  ;;  %p6511_p1 = scmp.lt.s32.totalorder %s6502_s24, %s6502_s24 }
  0x30   : > { %p6505_p7 = pnand %p6503_p2, %p6491_p10  ;;  %p6512_p5 = por %p6511_p1, %p6510_p11 }
  0x32   : > { %p6506_p9 = pneg %p6505_p7 }
  0x34   : > { %p6513_p6 = pnand %p6512_p5, %p6506_p9 }
  0x36   : > { %6516 = shalt.err (!%p6513_p6)
}
  0x37   : > { %s8248_s16 = smov 128   ;;  %s8250_s6 = smov 8  }
  0x38   : > { %6269 = dma.hbm_to_vmem [thread:$0]  (!%p6970_p8), %s6959_s17, 4096, %s6963_s19, [#allocation9], %s8248_s16, %s8248_s16, %s8250_s6  }
  0x39   : > { %p8297_p2 = scmp.eq.s32.totalorder %s6938_s11, 0  ;;  %p8298_p7 = scmp.ne.s32.totalorder %s8294_s14, 0 }
  0x3a   : > { %s6817_s30 = smov [#allocation13]   ;;  %s6528_s18 = scalar_lea.vmem %s243_s13, 256 }
  0x3b   : > { %p8299_p10 = pneg %p8298_p7  ;;  %s255_s15 = sshll.u32 %s6817_s30, 4  ;;  %s256_s15 = int_to_ptr.vmem [resolvable:$true] %s255_s15 }
  0x3c   : > { %p6529_p5 = scmp.ne.s32.totalorder %s243_s13, %s6528_s18  ;;  %p6536_p13 = scmp.lt.s32.totalorder %s243_s13, %s243_s13 }
  0x3d   : > { %p7001_p12 = pnand %p8299_p10, %p8297_p2  ;;  %p6537_p0 = scmp.lt.s32.totalorder %s6528_s18, %s6528_s18 }
  0x3f   : > { %p6519_p1 = pneg %p7001_p12  ;;  %p6538_p3 = por %p6537_p0, %p6536_p13 }
  0x41   : > { %p6531_p6 = pnand %p6529_p5, %p6519_p1 }
  0x43   : > { %p6532_p8 = pneg %p6531_p6 }
  0x45   : > { %p6539_p4 = pnand %p6538_p3, %p6532_p8 }
  0x47   : > { %6542 = shalt.err (!%p6539_p4)
}
  0x48   : > { %s8301_s3 = sld [smem:[#allocation42_spill]]  ;;  %s6818_s20 = smov [#allocation14]  }
  0x49   : > { %s268_s24 = sshll.u32 %s6818_s20, 4  ;;  %s6554_s30 = scalar_lea.vmem %s256_s15, 256  ;;  %s269_s24 = int_to_ptr.vmem [resolvable:$true] %s268_s24 }
  0x4a   : > { %p6555_p9 = scmp.ne.s32.totalorder %s256_s15, %s6554_s30  ;;  %p6562_p10 = scmp.lt.s32.totalorder %s256_s15, %s256_s15 }
  0x4b   : > { %p6563_p5 = scmp.lt.s32.totalorder %s6554_s30, %s6554_s30 }
  0x4c   : > { %p6557_p11 = pnand %p6555_p9, %p6519_p1 }
  0x4d   : > { %p6564_p6 = por %p6563_p5, %p6562_p10 }
  0x4e   : > { %6272 = dma.hbm_to_vmem [thread:$0]  (!%p7001_p12), %s8301_s3, 256, %s243_s13, [#allocation12], %s8248_s16, %s8248_s16, %s8250_s6  }
  0x4f   : > { %p6558_p2 = pneg %p6557_p11 }
  0x51   : > { %p6565_p8 = pnand %p6564_p6, %p6558_p2 }
  0x53   : > { %6568 = shalt.err (!%p6565_p8)
}
  0x54   : > { %s8302_s4 = sld [smem:[#allocation43_spill]]  ;;  %s6580_s17 = scalar_lea.vmem %s269_s24, 256 }
  0x55   : > { %p6581_p13 = scmp.ne.s32.totalorder %s269_s24, %s6580_s17  ;;  %p6588_p4 = scmp.lt.s32.totalorder %s269_s24, %s269_s24 }
  0x56   : > { %p6589_p9 = scmp.lt.s32.totalorder %s6580_s17, %s6580_s17 }
  0x57   : > { %p6583_p0 = pnand %p6581_p13, %p6519_p1 }
  0x58   : > { %p6590_p11 = por %p6589_p9, %p6588_p4 }
  0x59   : > { %p6584_p3 = pneg %p6583_p0 }
  0x5a   : > { %6275 = dma.hbm_to_vmem [thread:$0]  (!%p7001_p12), %s8302_s4, 256, %s256_s15, [#allocation12], %s8248_s16, %s8248_s16, %s8250_s6  }
  0x5b   : > { %p6591_p2 = pnand %p6590_p11, %p6584_p3 }
  0x5d   : > { %6594 = shalt.err (!%p6591_p2)
}
  0x5e   : > { %s8303_s5 = sld [smem:[#allocation44_spill]]  ;;  %s5785_s25 = sadd.s32 4294967294, %s6811_s10  }
  0x5f   : > { %s36_s15 = sadd.s32 1, %s6803_s8  ;;  %s39_s30 = sadd.s32 1, %s6807_s9 }
  0x60   : > { %p37_p1 = scmp.ge.s32.totalorder %s36_s15, 2  ;;  %s46_s13 = sadd.s32 1, %s6791_s29 }
  0x61   : > { %p53_p10 = scmp.ne.s32.totalorder %s6791_s29, %s6787_s28  ;;  %p54_p5 = scmp.eq.s32.totalorder %s6811_s10, 0 }
  0x62   : > { %s8371_s15 = smov (%p37_p1, %s36_s15), 0  ;;  %s8373_s30 = smov (!%p37_p1, %s39_s30), %s6807_s9 }
  0x63   : > { %8304 = sst [smem:[#allocation28_spill]] %s8371_s15  ;;  %s43_s18 = ssub.s32 %s6803_s8, %s8371_s15 }
  0x64   : > { %6278 = dma.hbm_to_vmem [thread:$0]  (!%p7001_p12), %s8303_s5, 256, %s269_s24, [#allocation15], %s8248_s16, %s8248_s16, %s8250_s6  }
  0x65   : > { %p7052_p12 = por %p54_p5, %p53_p10  ;;  %p41_p6 = scmp.ge.s32.totalorder %s8373_s30, 2 }
  0x66   : > { %p44_p8 = scmp.eq.s32.totalorder %s43_s18, 0  ;;  %p59_p13 = scmp.ne.s32.totalorder %s6787_s28, %s6783_s27 }
  0x67   : > { %s98_s17 = sadd.s32 1, %s6779_s26  ;;  %s8375_s30 = smov (%p41_p6, %s8373_s30), 0 }
  0x68   : > { %8306 = sst [smem:[#allocation29_spill]] %s8375_s30  ;;  %p8308_p0 = scmp.eq.s32.totalorder %s6938_s11, 0 }
  0x69   : > { %s7062_s19 = scalar_select %p44_p8, %s6791_s29, %s46_s13  }
  0x6a   : > { %p7066_p3 = por %p8308_p0, %p59_p13  ;;  %s95_s16 = ssub.s32 %s6807_s9, %s8375_s30 }
  0x6b   : > { %8307 = sst [smem:[#allocation30_spill]] %s7062_s19  ;;  %p96_p4 = scmp.eq.s32.totalorder %s95_s16, 0 }
  0x6c   : > { %s186_s6 = sor.u32 %s95_s16, %s43_s18  ;;  %s189_s27 = sadd.s32 1, %s6767_s23 }
  0x6d   : > { %p187_p9 = scmp.eq.s32.totalorder %s186_s6, 0  ;;  %p199_p11 = scmp.ne.s32.totalorder %s6767_s23, %s6763_s22 }
  0x6e   : > { %s7074_s2 = scalar_select %p96_p4, %s6779_s26, %s98_s17  }
  0x6f   : > { %s7077_s3 = scalar_select %p187_p9, %s6767_s23, %s189_s27  }
  0x70   : > { %p205_p2 = scmp.ne.s32.totalorder %s6763_s22, %s6759_s21  ;;  %p206_p1 = scmp.eq.s32.totalorder %s5785_s25, 3 }
  0x71   : > { %p6293_p10 = scmp.lt.s32.totalorder %s6811_s10, 4  ;;  %p8310_p5 = scmp.eq.s32.totalorder %s6938_s11, 3 }
  0x72   : > { %s282_s4 = sand.u32 1, %s6791_s29   ;;  %p7091_p8 = por %p206_p1, %p205_p2 }
  0x73   : > { %p7086_p6 = por %p8310_p5, %p199_p11  ;;  %s5794_s16 = sshll.u32 %s282_s4, 4 }
  0x74   : > { %s5932_s6 = sshll.u32 %s6803_s8, 8  ;;  %s8313_s0 = sld [smem:[#allocation39_spill]] }
  0x75   : > { %s286_s30 = scalar_lea.vmem [#allocation5], %s5794_s16  ;;  %p7101_p13 = pnand %p6293_p10, %p7052_p12 }
  0x76   : > { %s293_s15 = sshll.u32 %s286_s30, 4  ;;  %s8315_s1 = sld [smem:[#allocation40_spill]]  ;;  %s294_s15 = int_to_ptr.vmem [resolvable:$true] %s293_s15 }
  0x77   : > { %s283_s8 = scalar_lea.sflag [#allocation6], %s282_s4  ;;  %p6597_p0 = pneg %p7101_p13 }
  0x78   : > { %s6608_s18 = scalar_lea.vmem %s294_s15, 256  ;;  %s6819_s30 = smov [#allocation5]  }
  0x79   : > { %p6609_p4 = scmp.ne.s32.totalorder %s294_s15, %s6608_s18  ;;  %s6613_s24 = sshll.u32 %s6819_s30, 4  ;;  %s6614_s24 = int_to_ptr.vmem [resolvable:$false] %s6613_s24 }
  0x7a   : > { %s292_s27 = scalar_lea.hbm %s8313_s0, %s5932_s6  ;;  %s6615_s17 = scalar_lea.vmem %s6614_s24, 512 }
  0x7b   : > { %p6611_p9 = pnand %p6609_p4, %p6597_p0  ;;  %p6616_p11 = scmp.lt.s32.totalorder %s294_s15, %s6614_s24 }
  0x7c   : > { %s7108_s29 = scalar_lea.hbm %s8315_s1, %s5932_s6  ;;  %p6617_p2 = scmp.lt.s32.totalorder %s6615_s17, %s6608_s18 }
  0x7d   : > { %p6612_p12 = pneg %p6611_p9 }
  0x7e   : > { %p6618_p1 = por %p6617_p2, %p6616_p11 }
  0x80   : > { %p6619_p10 = pnand %p6618_p1, %p6612_p12 }
  0x82   : > { %6622 = shalt.err (!%p6619_p10)
}
  0x83   : > { %s8316_s4 = smov 8   ;;  %s8317_s9 = smov 128  }
  0x84   : > { %6282 = dma.hbm_to_vmem [thread:$0]  (!%p7101_p13), %s292_s27, 256, %s294_s15, %s283_s8, %s8317_s9, %s8317_s9, %s8316_s4  }
  0x85   : > { %s307_s19 = scalar_lea.vmem [#allocation8], %s5794_s16  ;;  %s303_s0 = sand.u32 1, %s6811_s10  }
  0x86   : > { %s314_s6 = sshll.u32 %s307_s19, 4  ;;  %s304_s30 = scalar_lea.sflag [#allocation9], %s303_s0  ;;  %s315_s6 = int_to_ptr.vmem [resolvable:$true] %s314_s6 }
  0x87   : > { %s6636_s1 = scalar_lea.vmem %s315_s6, 256  ;;  %s6820_s18 = smov [#allocation8]  }
  0x88   : > { %p6637_p5 = scmp.ne.s32.totalorder %s315_s6, %s6636_s1  ;;  %s6641_s24 = sshll.u32 %s6820_s18, 4  ;;  %s6642_s24 = int_to_ptr.vmem [resolvable:$false] %s6641_s24 }
  0x89   : > { %s6643_s17 = scalar_lea.vmem %s6642_s24, 512  ;;  %p6644_p12 = scmp.lt.s32.totalorder %s315_s6, %s6642_s24 }
  0x8a   : > { %p6639_p4 = pnand %p6637_p5, %p6597_p0  ;;  %p6645_p11 = scmp.lt.s32.totalorder %s6643_s17, %s6636_s1 }
  0x8c   : > { %p6640_p9 = pneg %p6639_p4  ;;  %p6646_p2 = por %p6645_p11, %p6644_p12 }
  0x8e   : > { %p6647_p1 = pnand %p6646_p2, %p6640_p9 }
  0x90   : > { %6650 = shalt.err (!%p6647_p1)
}
  0x91   : > { %6285 = dma.hbm_to_vmem [thread:$0]  (!%p7101_p13), %s7108_s29, 256, %s315_s6, %s304_s30, %s8317_s9, %s8317_s9, %s8316_s4  }
  0x92   : > { %326 = sbr.rel (%p8298_p7) target bundleno = 2600 (0xa28), region = 44 }
  0x97   : > { %s328_s0 = sand.u32 1, %s6787_s28  }
  0x98   : > { %s5801_s8 = sshll.u32 %s328_s0, 4  ;;  %s329_s15 = scalar_lea.sflag [#allocation6], %s328_s0 }
  0x99   : > { %s332_s16 = scalar_lea.vmem [#allocation5], %s5801_s8 }
  0x9a   : > { %6734 = dma.done.wait (%p7066_p3), %s329_s15, 256  }
  0x9b   : > { %6736 = vsyncadd (%p7066_p3), %s329_s15, 4294967040  ;;  %s337_s1 = sand.u32 1, %s6938_s11   ;;  %s341_s25 = scalar_lea.vmem [#allocation8], %s5801_s8 }
  0x9c   : > { %s338_s27 = scalar_lea.sflag [#allocation9], %s337_s1 }
  0x9d   : > { %6738 = dma.done.wait (%p7066_p3), %s338_s27, 256  }
  0x9e   : > { %6740 = vsyncadd (%p7066_p3), %s338_s27, 4294967040  ;;  %p8318_p7 = scmp.ne.s32.totalorder %s8293_s12, 0 }
  0xa0   : > { %6742 = dma.done.wait (%p8318_p7), [#allocation9], 4096  }
  0xa1   : > { %6744 = vsyncadd (%p8318_p7), [#allocation9], 4294963200  ;;  %p8319_p13 = scmp.eq.s32.totalorder %s6938_s11, 0 }
  0xa3   : > { %6746 = dma.done.wait (%p8319_p13), [#allocation12], 512   ;;  %p8320_p0 = pmov %p8319_p13 }
  0xa5   : > { %6748 = vsyncadd (%p8320_p0), [#allocation12], 4294966784  ;;  %p8321_p10 = pmov %p8320_p0 }
  0xa6   : > { %p8322_p5 = pmov %p8320_p0 }
  0xa7   : > { %6750 = dma.done.wait (%p8321_p10), [#allocation15], 256  }
  0xa8   : > { %6752 = vsyncadd (%p8322_p5), [#allocation15], 4294967040  ;;  %v393_v0 = vld [vmem:[%s332_s16] sm:$0xff]  ;;  %v398_v2 = vld [vmem:[#allocation11 + $0x8] sm:$0xff]  ;;  %vm431_vm0 = vcmask 130048   ;;  %v8257_v24 = vmov 0.0  }
  0xa9   : > { %v395_v1 = vld [vmem:[%s341_s25] sm:$0xff]  ;;  %399 = vxpose.xlu0.b32.start [1/2] (short) (narrow) %v393_v0, 64  ;;  %v394_v4 = vld [vmem:[%s332_s16 + $0x8] sm:$0xff]  ;;  %6024 = vmatprep.subr.mxu0 %v398_v2  ;;  %s5823_s29 = sshll.u32 %s6799_s7, 5  ;;  %s6822_s12 = smov 120   ;;  %vm6823_vm1 = vmmov 0  }
  0xaa   : > { %571 = vxpose.xlu1.b32.start [1/2] (short) (narrow) %v395_v1, 64  ;;  %v397_v3 = vld [vmem:[#allocation11] sm:$0xff]  ;;  %v396_v5 = vld [vmem:[%s341_s25 + $0x8] sm:$0xff]  ;;  %6226 = vmatprep.subr.mxu1 %v398_v2  ;;  %v569_v20 = vld [vmem:[#allocation13] sm:$0xff]  ;;  %s7184_s11 = scalar_lea.vmem [#allocation2], %s5823_s29  ;;  %s7193_s14 = scalar_lea.vmem [#allocation3], %s5823_s29 }
  0xab   : > { %6025 = vmatpush3.msra.mxu0 %v398_v2  ;;  %6228 = vmatpush3.msra.mxu1 %v398_v2  ;;  %v570_v6 = vld [vmem:[#allocation13 + $0x8] sm:$0xff]  ;;  %vm777_vm2 = vcmask 64512   ;;  %s6831_s20 = smov 8   ;;  %s388_s4 = sand.u32 1, %s6763_s22  }
  0xac   : > { %6026 = vmatprep.subr.mxu0 %v397_v3  ;;  %6227 = vmatprep.subr.mxu1 %v397_v3  ;;  %s5806_s9 = sshll.u32 %s388_s4, 5  ;;  %s8353_s6 = sld [smem:[#allocation25_spill]] }
  0xad   : > { %400 = vxpose.xlu0.b32.end [2/2] (short) (narrow) %v394_v4, 64  ;;  %6027 = vmatpush3.msra.mxu0 %v397_v3  ;;  %s8066_s19 = scalar_lea.vmem [#allocation16], %s5806_s9  ;;  %s5925_s30 = sshll.u32 %s6799_s7, 2 }
  0xae   : > { %572 = vxpose.xlu1.b32.end [2/2] (short) (narrow) %v396_v5, 64  ;;  %6229 = vmatpush3.msra.mxu1 %v397_v3  ;;  %s5612_s17 = sshll.u32 %s8066_s19, 4  ;;  %s8354_s16 = sld [smem:[#allocation45_spill]]  ;;  %s8146_s17 = int_to_ptr.vmem [resolvable:$true] %s5612_s17 }
  0xaf   : > { %6040 = vmatprep.subr.mxu1 %v570_v6  ;;  %6056 = vmatprep.subr.mxu0 %v8257_v24  ;;  %s8157_s7 = scalar_lea.sflag [#allocation7], %s388_s4  ;;  %s6651_s27 = scalar_lea.vmem %s8146_s17, 512 }
  0xb0   : > { %p6652_p3 = scmp.ne.s32.totalorder %s8146_s17, %s6651_s27  ;;  %s6832_s25 = smov [#allocation16]  }
  0xb1   : > { %s6655_s29 = sshll.u32 %s6832_s25, 4  ;;  %s6656_s29 = int_to_ptr.vmem [resolvable:$false] %s6655_s29 }
  0xb2   : > { %s5926_s18 = sshll.u32 %s8353_s6, 3  ;;  %p6653_p4 = pnand %p6652_p3, %p7086_p6 }
  0xb3   : > { %s5609_s24 = sadd.s32 %s5926_s18, %s5925_s30  ;;  %p6658_p12 = scmp.lt.s32.totalorder %s8146_s17, %s6656_s29 }
  0xb4   : > { %s5927_s0 = sshll.u32 %s5609_s24, 7  ;;  %p6654_p9 = pneg %p6653_p4 }
  0xb5   : > { %s8152_s1 = scalar_lea.hbm %s8354_s16, %s5927_s0 }
 0x125   : > { %v415_v7 = vpop.trf.xlu0 }
 0x126   : > { %v587_v8 = vpop.trf.xlu1  ;;  %6028 = vmatprep.mubr.msk.f32.mxu0 %vm431_vm0, %v415_v7 }
 0x129   : > { %v416_v9 = vpop.trf.xlu0 }
 0x12a   : > { %6029 = vmatmul.mubr.msk.f32.vlgmr.msra.gmra.mxu0 %vm431_vm0, %v416_v9  ;;  %v588_v10 = vpop.trf.xlu1 }
 0x12d   : > { %v417_v11 = vpop.trf.xlu0 }
 0x12e   : > { %6031 = vmatprep.mubr.msk.f32.mxu0 %vm431_vm0, %v417_v11  ;;  %v589_v13 = vpop.trf.xlu1 }
 0x131   : > { %v418_v12 = vpop.trf.xlu0 }
 0x132   : > { %6032 = vmatmul.mubr.msk.f32.gmra.mxu0 %vm431_vm0, %v418_v12  ;;  %v590_v15 = vpop.trf.xlu1 }
 0x135   : > { %v419_v14 = vpop.trf.xlu0 }
 0x136   : > { %6034 = vmatprep.mubr.msk.f32.mxu0 %vm431_vm0, %v419_v14  ;;  %v591_v18 = vpop.trf.xlu1 }
 0x139   : > { %v420_v16 = vpop.trf.xlu0 }
 0x13a   : > { %6035 = vmatmul.mubr.msk.f32.gmra.mxu0 %vm431_vm0, %v420_v16  ;;  %v592_v21 = vpop.trf.xlu1 }
 0x13b   : > { %6058 = vmatprep.mubr.msk.f32.mxu0 %vm6823_vm1, %v8257_v24 }
 0x13d   : > { %v421_v17 = vpop.trf.xlu0 }
 0x13e   : > { %6037 = vmatprep.mubr.msk.f32.mxu1 %vm431_vm0, %v421_v17  ;;  %v593_v22 = vpop.trf.xlu1  ;;  %v7259_v17 = vld [vmem:[#allocation10 + $0x8] sm:$0xff] }
 0x141   : > { %v422_v19 = vpop.trf.xlu0 }
 0x142   : > { %6038 = vmatmul.mubr.msk.f32.vlgmr.msra.gmra.mxu1 %vm431_vm0, %v422_v19  ;;  %v594_v23 = vpop.trf.xlu1  ;;  %v8265_v19 = vmov 2131351028  }
 0x143   : > { %6041 = vmatpush3.msra.mxu1 %v570_v6  ;;  %6044 = vmatprep.mubr.msk.f32.mxu1 %vm431_vm0, %v587_v8 }
 0x144   : > { %6042 = vmatprep.subr.mxu1 %v569_v20 }
 0x145   : > { %6043 = vmatpush3.msra.mxu1 %v569_v20 }
 0x146   : > { %6045 = vmatmul.mubr.msk.f32.vlgmr.msra.gmra.mxu1 %vm431_vm0, %v588_v10  ;;  %6061 = vmatprep.subr.mxu1 %v8257_v24 }
 0x147   : > { %6047 = vmatprep.mubr.msk.f32.mxu1 %vm431_vm0, %v589_v13  ;;  %v8269_v13 = vmov 683565275  }
 0x14a   : > { %6048 = vmatmul.mubr.msk.f32.gmra.mxu1 %vm431_vm0, %v590_v15  ;;  %v8267_v15 = vmov 2475754826  }
 0x14b   : > { %6050 = vmatprep.mubr.msk.f32.mxu1 %vm431_vm0, %v591_v18 }
 0x14e   : > { %6051 = vmatmul.mubr.msk.f32.gmra.mxu1 %vm431_vm0, %v592_v21 }
 0x14f   : > { %6053 = vmatprep.mubr.msk.f32.mxu1 %vm431_vm0, %v593_v22  ;;  %v8263_v22 = vmov 2102212464  }
 0x152   : > { %6054 = vmatmul.mubr.msk.f32.gmra.mxu1 %vm431_vm0, %v594_v23 }
 0x153   : > { %6063 = vmatprep.mubr.msk.f32.mxu1 %vm6823_vm1, %v8257_v24 }
 0x1ea   : > { %v6030_v25 = vpop.f32.mrf.mxu0 }
 0x1eb   : > { %562 = vst.msk [vmem:[#allocation2 + $0x8] sm:$0xff] %vm431_vm0, %v6030_v25 }
 0x1ec   : > { %v522_v26 = vpop.f32.mrf.mxu0 }
 0x1ed   : > { %561 = vst.msk [vmem:[#allocation2] sm:$0xff] %vm431_vm0, %v522_v26  ;;  %v8261_v26 = vmov 920167782  }
 0x1f2   : > { %v6033_v27 = vpop.f32.mrf.mxu0 }
 0x1f3   : > { %564 = vst.msk [vmem:[#allocation2 + $0x18] sm:$0xff] %vm431_vm0, %v6033_v27 }
 0x1f4   : > { %v532_v28 = vpop.f32.mrf.mxu0 }
 0x1f5   : > { %563 = vst.msk [vmem:[#allocation2 + $0x10] sm:$0xff] %vm431_vm0, %v532_v28 }
 0x1fa   : > { %v6036_v29 = vpop.f32.mrf.mxu0 }
 0x1fb   : > { %566 = vst.msk [vmem:[#allocation2 + $0x28] sm:$0xff] %vm431_vm0, %v6036_v29  ;;  %v8259_v29 = vmov 1326507024  }
 0x1fc   : > { %v542_v30 = vpop.f32.mrf.mxu0 }
 0x1fd   : > { %565 = vst.msk [vmem:[#allocation2 + $0x20] sm:$0xff] %vm431_vm0, %v542_v30 }
 0x202   : > { %v6039_v31 = vpop.f32.mrf.mxu1 }
 0x203   : > { %568 = vst.msk [vmem:[#allocation2 + $0x38] sm:$0xff] %vm431_vm0, %v6039_v31  ;;  %v2809_v31 = vld [vmem:[#allocation10 + $0x40] sm:$0xff] }
 0x204   : > { %v552_v32 = vpop.f32.mrf.mxu1 }
 0x205   : > { %567 = vst.msk [vmem:[#allocation2 + $0x30] sm:$0xff] %vm431_vm0, %v552_v32 }
 0x206   : > { %v6046_v33 = vpop.f32.mrf.mxu1 }
 0x207   : > { %733 = vst.msk [vmem:[#allocation3 + $0x8] sm:$0xff] %vm431_vm0, %v6046_v33 }
 0x208   : > { %v693_v34 = vpop.f32.mrf.mxu1 }
 0x209   : > { %732 = vst.msk [vmem:[#allocation3] sm:$0xff] %vm431_vm0, %v693_v34 }
 0x20a   : > { %v6049_v35 = vpop.f32.mrf.mxu1 }
 0x20b   : > { %735 = vst.msk [vmem:[#allocation3 + $0x18] sm:$0xff] %vm431_vm0, %v6049_v35 }
 0x20c   : > { %v703_v36 = vpop.f32.mrf.mxu1  ;;  %v742_v37 = vld [vmem:[%s7184_s11] sm:$0xff]  ;;  %v5846_v45 = vld [vmem:[%s7184_s11 + $0x8] sm:$0xff]  ;;  %v5871_v49 = vld [vmem:[%s7184_s11 + $0x10] sm:$0xff] }
 0x20d   : > { %734 = vst.msk [vmem:[#allocation3 + $0x10] sm:$0xff] %vm431_vm0, %v703_v36  ;;  %852 = vrot.lane.b32.xlu0 %v742_v37, %s6822_s12  ;;  %v7239_v52 = vld [vmem:[%s7184_s11 + $0x18] sm:$0xff]  ;;  %s6657_s11 = scalar_lea.vmem %s6656_s29, 1024 }
 0x20e   : > { %v6052_v38 = vpop.f32.mrf.mxu1  ;;  %p6659_p11 = scmp.lt.s32.totalorder %s6657_s11, %s6651_s27 }
 0x20f   : > { %737 = vst.msk [vmem:[#allocation3 + $0x28] sm:$0xff] %vm431_vm0, %v6052_v38 }
 0x210   : > { %v713_v39 = vpop.f32.mrf.mxu1  ;;  %p6660_p2 = por %p6659_p11, %p6658_p12 }
 0x211   : > { %736 = vst.msk [vmem:[#allocation3 + $0x20] sm:$0xff] %vm431_vm0, %v713_v39 }
 0x212   : > { %v6055_v40 = vpop.f32.mrf.mxu1  ;;  %p6661_p1 = pnand %p6660_p2, %p6654_p9 }
 0x213   : > { %739 = vst.msk [vmem:[#allocation3 + $0x38] sm:$0xff] %vm431_vm0, %v6055_v40 }
 0x214   : > { %v723_v41 = vpop.f32.mrf.mxu1 }
 0x215   : > { %738 = vst.msk [vmem:[#allocation3 + $0x30] sm:$0xff] %vm431_vm0, %v723_v41 }
 0x21c   : > { %v7196_v42 = vld [vmem:[%s7193_s14] sm:$0xff]  ;;  %v7207_v43 = vld [vmem:[%s7193_s14 + $0x8] sm:$0xff]  ;;  %v5873_v47 = vld [vmem:[%s7193_s14 + $0x10] sm:$0xff] }
 0x21d   : > { %888 = vrot.lane.b32.xlu1 %v7196_v42, %s6822_s12  ;;  %6057 = vmatpush3.msra.mxu0 %v7196_v42  ;;  %v5898_v50 = vld [vmem:[%s7193_s14 + $0x18] sm:$0xff] }
 0x21e   : > { %6066 = vmatprep.subr.mxu0 %v8257_v24 }
 0x246   : > { %745 = vxpose.xlu1.b32.start.end [1/1] (short) (narrow) %v742_v37, 8 }
 0x264   : > { %2075 = vrot.lane.b32.xlu1 %v7207_v43, %s6822_s12 }
 0x27f   : > { %v853_v44 = vpop.permute.xlu0 %852 }
 0x280   : > { %855 = vxpose.xlu0.b32.start.end [1/1] (short) (narrow) %v853_v44, 8 }
 0x28d   : > { %1933 = vxpose.xlu1.b32.start.end [1/1] (short) (narrow) %v5846_v45, 8 }
 0x28f   : > { %v7212_v46 = vpop.permute.xlu1 %888 }
 0x290   : > { %6062 = vmatpush3.msra.mxu1 %v7212_v46 }
 0x291   : > { %6071 = vmatprep.subr.mxu1 %v8257_v24 }
 0x2a9   : > { %2039 = vrot.lane.b32.xlu0 %v5846_v45, %s6822_s12 }
 0x2ab   : > { %3262 = vrot.lane.b32.xlu1 %v5873_v47, %s6822_s12  ;;  %v2810_v47 = vld [vmem:[#allocation10 + $0x48] sm:$0xff] }
 0x2c2   : > { %v761_v48 = vpop.trf.xlu1 }
 0x2c3   : > { %6059 = vmatmul.mubr.msk.f32.vlgmr.msra.gmra.mxu0 %vm777_vm2, %v761_v48 }
 0x2c4   : > { %6067 = vmatpush3.msra.mxu0 %v7196_v42  ;;  %6068 = vmatprep.mubr.msk.f32.mxu0 %vm6823_vm1, %v8257_v24 }
 0x2c5   : > { %6076 = vmatprep.subr.mxu0 %v8257_v24 }
 0x2d4   : > { %3120 = vxpose.xlu1.b32.start.end [1/1] (short) (narrow) %v5871_v49, 8 }
 0x2f2   : > { %4449 = vrot.lane.b32.xlu1 %v5898_v50, %s6822_s12 }
 0x2fc   : > { %v871_v51 = vpop.trf.xlu0 }
 0x2fd   : > { %6064 = vmatmul.mubr.msk.f32.vlgmr.msra.gmra.mxu1 %vm777_vm2, %v871_v51  ;;  %6069 = vmatmul.mubr.msk.f32.vlgmr.msra.gmra.mxu0 %vm777_vm2, %v871_v51 }
 0x2fe   : > { %6072 = vmatpush3.msra.mxu1 %v7212_v46  ;;  %6073 = vmatprep.mubr.msk.f32.mxu1 %vm6823_vm1, %v8257_v24 }
 0x2ff   : > { %6081 = vmatprep.subr.mxu1 %v8257_v24  ;;  %6078 = vmatprep.mubr.msk.f32.mxu0 %vm6823_vm1, %v8257_v24 }
 0x301   : > { %6074 = vmatmul.mubr.msk.f32.vlgmr.msra.gmra.mxu1 %vm777_vm2, %v761_v48 }
 0x302   : > { %6083 = vmatprep.mubr.msk.f32.mxu1 %vm6823_vm1, %v8257_v24 }
 0x31b   : > { %4307 = vxpose.xlu1.b32.start.end [1/1] (short) (narrow) %v7239_v52, 8  ;;  %v2040_v53 = vpop.permute.xlu0 %2039 }
 0x31c   : > { %2042 = vxpose.xlu0.b32.start.end [1/1] (short) (narrow) %v2040_v53, 8 }
 0x339   : > { %1827 = vrot.lane.b32.xlu1 %v7259_v17, %s6822_s12 }
 0x33d   : > { %3013 = vrot.lane.b32.xlu1 %v2809_v31, %s6822_s12 }
 0x341   : > { %3015 = vrot.lane.b32.xlu1 %v2810_v47, %s6822_s12 }
 0x345   : > { %3226 = vrot.lane.b32.xlu0 %v5871_v49, %s6822_s12 }
 0x383   : > { %v7243_v54 = vpop.f32.mrf.mxu0 }
 0x385   : > { %v6060_v55 = vpop.f32.mrf.mxu0 }
 0x398   : > { %v7245_v56 = vpop.trf.xlu0 }
 0x3b7   : > { %v3227_v57 = vpop.permute.xlu0 %3226 }
 0x3b8   : > { %3229 = vxpose.xlu0.b32.start.end [1/1] (short) (narrow) %v3227_v57, 8 }
 0x3bd   : > { %v7247_v58 = vpop.f32.mrf.mxu1  ;;  %v1031_v59 = vpop.f32.mrf.mxu0 }
 0x3be   : > { %v964_v60 = vsub.f32 %v7243_v54, %v7247_v58 }
 0x3bf   : > { %v6065_v61 = vpop.f32.mrf.mxu1  ;;  %v6070_v62 = vpop.f32.mrf.mxu0 }
 0x3c1   : > { %v1101_v63 = vpop.f32.mrf.mxu1 }
 0x3c2   : > { %v1102_v0 = vadd.f32 %v1101_v63, %v1031_v59 }
 0x3c3   : > { %v6075_v1 = vpop.f32.mrf.mxu1 }
 0x3c4   : > { %v7251_v2 = vmul.f32 2.0, %v1102_v0  ;;  %v7280_v0 = vld [vmem:[#allocation10 + $0x10] sm:$0xff] }
 0x3c5   : > { %1829 = vrot.lane.b32.xlu1 %v7280_v0, %s6822_s12 }
 0x3c6   : > { %v1119_v3 = vand.u32 2139095040, %v7251_v2  ;;  %v1116_v7 = vand.u32 2147483647, %v7251_v2  ;;  %vm1118_vm10 = vcmp.lt.s32.totalorder %v7251_v2, 0  ;;  %vm1208_vm15 = vweird.f32 %v7251_v2 }
 0x3c8   : > { %v1120_v4 = vshrl.u32 %v1119_v3, 23  ;;  %v1123_v10 = vand.u32 8388607, %v1116_v7  ;;  %vm1117_vm11 = vcmp.le.f32.partialorder %v1116_v7, 0.7853982 }
 0x3ca   : > { %v5829_v5 = vadd.s32 4294967169, %v1120_v4  ;;  %v1124_v32 = vor.u32 8388608, %v1123_v10  ;;  %v3997_v10 = vld [vmem:[#allocation10 + $0x88] sm:$0xff] }
 0x3cc   : > { %v1126_v6 = vadd.s32 1, %v5829_v5  ;;  %v1164_v50 = vshll.u32 %v1124_v32, 8  ;;  %v7288_v5 = vld [vmem:[#allocation10 + $0x18] sm:$0xff] }
 0x3cd   : > { %1831 = vrot.lane.b32.xlu1 %v7288_v5, %s6822_s12 }
 0x3ce   : > { %vm1127_vm3 = vcmp.gt.s32.totalorder %v1126_v6, 0 }
 0x3cf   : > { %v1128_v8 = vsel %vm1127_vm3, %v1126_v6, 0 }
 0x3d0   : > { %v1130_v9 = vand.u32 31, %v1128_v8  ;;  %v1129_v12 = vshrl.u32 %v1128_v8, 5 }
 0x3d1   : > { %4202 = vrot.lane.b32.xlu1 %v3997_v10, %s6822_s12 }
 0x3d2   : > { %v1131_v11 = vsub.s32 32, %v1130_v9  ;;  %v1133_v14 = vshll.u32 %v8269_v13, %v1130_v9  ;;  %v1136_v16 = vshll.u32 %v8267_v15, %v1130_v9  ;;  %v1139_v21 = vshll.u32 %v8265_v19, %v1130_v9 }
 0x3d3   : > { %v1142_v25 = vshll.u32 %v8263_v22, %v1130_v9  ;;  %v1145_v28 = vshll.u32 %v8261_v26, %v1130_v9  ;;  %vm1148_vm4 = vcmp.lt.s32.totalorder %v1129_v12, 1  ;;  %vm1151_vm5 = vcmp.lt.s32.totalorder %v1129_v12, 4 }
 0x3d4   : > { %v1134_v18 = vshrl.u32 %v8267_v15, %v1131_v11  ;;  %v1137_v20 = vshrl.u32 %v8265_v19, %v1131_v11  ;;  %v1140_v23 = vshrl.u32 %v8263_v22, %v1131_v11  ;;  %v1143_v27 = vshrl.u32 %v8261_v26, %v1131_v11 }
 0x3d5   : > { %v1146_v30 = vshrl.u32 %v8259_v29, %v1131_v11  ;;  %v1132_v41 = vshrl.u32 %v8269_v13, %v1131_v11  ;;  %vm1150_vm6 = vcmp.lt.s32.totalorder %v1129_v12, 3  ;;  %vm1149_vm7 = vcmp.lt.s32.totalorder %v1129_v12, 2 }
 0x3d6   : > { %v1135_v33 = vor.u32 %v1134_v18, %v1133_v14  ;;  %v1138_v34 = vor.u32 %v1137_v20, %v1136_v16  ;;  %v1141_v35 = vor.u32 %v1140_v23, %v1139_v21  ;;  %v1144_v36 = vor.u32 %v1143_v27, %v1142_v25  ;;  %v5183_v14 = vld [vmem:[#allocation10 + $0xc0] sm:$0xff] }
 0x3d7   : > { %v1147_v37 = vor.u32 %v1146_v30, %v1145_v28  ;;  %5387 = vrot.lane.b32.xlu1 %v5183_v14, %s6822_s12  ;;  %v7295_v18 = vld [vmem:[#allocation10 + $0x20] sm:$0xff]  ;;  %v1105_v27 = vmul.f32 2.0, %v964_v60  ;;  %v7303_v28 = vld [vmem:[#allocation10 + $0x28] sm:$0xff]  ;;  %v7309_v60 = vld [vmem:[#allocation10 + $0x30] sm:$0xff] }
 0x3d8   : > { %v1153_v38 = vsel %vm1151_vm5, %v1141_v35, 2102212464  ;;  %v1156_v39 = vsel %vm1148_vm4, %v1135_v33, %v1138_v34  ;;  %v1160_v40 = vsel %vm1148_vm4, %v1138_v34, %v1141_v35  ;;  %v1157_v44 = vsel %vm1151_vm5, %v1144_v36, 920167782  ;;  %v2813_v23 = vld [vmem:[#allocation10 + $0x60] sm:$0xff] }
 0x3d9   : > { %v1161_v45 = vsel %vm1151_vm5, %v1147_v37, 1326507024  ;;  %v1158_v48 = vsel %vm1150_vm6, %v1141_v35, %v1157_v44  ;;  %v1152_v51 = vsel %vm1148_vm4, %v1132_v41, %v1135_v33  ;;  %v1154_v53 = vsel %vm1150_vm6, %v1138_v34, %v1153_v38  ;;  %v2814_v38 = vld [vmem:[#allocation10 + $0x68] sm:$0xff] }
 0x3da   : > { %v1162_v49 = vsel %vm1150_vm6, %v1144_v36, %v1161_v45  ;;  %v1159_v55 = vsel %vm1149_vm7, %v1156_v39, %v1158_v48  ;;  %v1155_v1 = vsel %vm1149_vm7, %v1152_v51, %v1154_v53  ;;  %v5828_v34 = vclamps-f32 %v1105_v27, 30.0  ;;  %v2815_v48 = vld [vmem:[#allocation10 + $0x70] sm:$0xff]  ;;  %v7317_v53 = vld [vmem:[#allocation10 + $0x38] sm:$0xff] }
 0x3db   : > { %v1163_v57 = vsel %vm1149_vm7, %v1160_v40, %v1162_v49  ;;  %v7276_v62 = vmul.u32.u64.low %v1164_v50, %v1159_v55  ;;  %v7277_v63 = vmul.u32.u64.high %v1164_v50, %v1159_v55, %v7276_v62  ;;  %v1171_v4 = vmul.u32 %v1164_v50, %v1155_v1  ;;  %1833 = vrot.lane.b32.xlu1 %v7295_v18, %s6822_s12 }
 0x3dc   : > { %v7273_v59 = vmul.u32.u64.low %v1164_v50, %v1163_v57  ;;  %v7274_v61 = vmul.u32.u64.high %v1164_v50, %v1163_v57, %v7273_v59  ;;  %v1110_v54 = vsub.f32 0.0, %v5828_v34  ;;  %v1108_v49 = vmul.f32 1.442695, %v5828_v34 }
 0x3dd   : > { %v1174_v3 = vadd.s32 1, %v7277_v63 }
 0x3de   : > { %vm1173_vm8 = vc.u32 %v7274_v61, %v7276_v62  ;;  %v1172_v31 = vadd.s32 %v7276_v62, %v7274_v61  ;;  %v1111_v45 = vmul.f32 1.442695, %v1110_v54 }
 0x3df   : > { %v1175_v6 = vsel %vm1173_vm8, %v1174_v3, %v7277_v63  ;;  %3021 = vrot.lane.b32.xlu1 %v2813_v23, %s6822_s12 }
 0x3e0   : > { %v1176_v8 = vadd.s32 %v1175_v6, %v1171_v4  ;;  %6428 = vpow2.f32 %v1111_v45 }
 0x3e1   : > { %4413 = vrot.lane.b32.xlu0 %v7239_v52, %s6822_s12  ;;  %6430 = vpow2.f32 %v1108_v49 }
 0x3e2   : > { %v1177_v9 = vadd.s32 536870912, %v1176_v8 }
 0x3e3   : > { %1835 = vrot.lane.b32.xlu1 %v7303_v28, %s6822_s12 }
 0x3e4   : > { %v1178_v11 = vshrl.u32 %v1177_v9, 30 }
 0x3e6   : > { %v1179_v12 = vshll.u32 %v1178_v11, 30  ;;  %v1202_v57 = vsub.s32 4, %v1178_v11 }
 0x3e7   : > { %3023 = vrot.lane.b32.xlu1 %v2814_v38, %s6822_s12 }
 0x3e8   : > { %v1180_v52 = vsub.s32 %v1176_v8, %v1179_v12  ;;  %v1203_v59 = vsel %vm1118_vm10, %v1202_v57, %v1178_v11 }
 0x3e9   : > { %v1205_v61 = vsel %vm1117_vm11, 0, %v1203_v59 }
 0x3ea   : > { %v1182_v16 = vsub.s32 0, %v1180_v52  ;;  %v1209_v63 = vand.u32 3, %v1205_v61 }
 0x3eb   : > { %1837 = vrot.lane.b32.xlu1 %v7309_v60, %s6822_s12 }
 0x3ec   : > { %v5830_v20 = vmin.u32 %v1182_v16, %v1180_v52  ;;  %vm1214_vm12 = vcmp.eq.s32.totalorder %v1209_v63, 2  ;;  %vm1211_vm13 = vcmp.eq.s32.totalorder %v1209_v63, 0  ;;  %vm1210_vm14 = vcmp.lt.s32.totalorder %v1209_v63, 2 }
 0x3ed   : > { %v6429_v62 = vpop.eup %6428  ;;  %v1318_v16 = vadd.s32 3, %v1205_v61 }
 0x3ee   : > { %v1184_v21 = vclz %v5830_v20  ;;  %v6431_v1 = vpop.eup %6430 }
 0x3ef   : > { %3025 = vrot.lane.b32.xlu1 %v2815_v48, %s6822_s12  ;;  %v1113_v7 = vadd.f32 %v6431_v1, %v6429_v62  ;;  %v1319_v20 = vand.u32 3, %v1318_v16 }
 0x3f0   : > { %v5831_v25 = vadd.s32 4294967294, %v1184_v21 }
 0x3f1   : > { %v1114_v12 = vmul.f32 0.5, %v1113_v7  ;;  %vm1321_vm3 = vcmp.eq.s32.totalorder %v1319_v20, 0  ;;  %vm1324_vm4 = vcmp.eq.s32.totalorder %v1319_v20, 2  ;;  %vm1320_vm5 = vcmp.lt.s32.totalorder %v1319_v20, 2 }
 0x3f2   : > { %vm5832_vm9 = vcmp.lt.s32.totalorder %v5831_v25, 0 }
 0x3f3   : > { %v1187_v30 = vsel %vm5832_vm9, 0, %v5831_v25  ;;  %1839 = vrot.lane.b32.xlu1 %v7317_v53, %s6822_s12  ;;  %v1222_v25 = vsub.f32 %v6431_v1, %v6429_v62 }
 0x3f4   : > { %v1188_v32 = vsub.s32 32, %v1187_v30  ;;  %v1192_v33 = vsub.s32 4294967266, %v1187_v30  ;;  %v1189_v35 = vshll.u32 %v1180_v52, %v1187_v30 }
 0x3f5   : > { %v1223_v30 = vmul.f32 0.5, %v1222_v25 }
 0x3f6   : > { %v1190_v36 = vshrl.u32 %v1172_v31, %v1188_v32  ;;  %v1193_v37 = vadd.s32 127, %v1192_v33 }
 0x3f8   : > { %v1191_v39 = vor.u32 %v1190_v36, %v1189_v35  ;;  %v1194_v40 = vshll.u32 %v1193_v37, 23  ;;  %v7381_v36 = vld [vmem:[#allocation10 + $0x78] sm:$0xff] }
 0x3f9   : > { %3027 = vrot.lane.b32.xlu1 %v7381_v36, %s6822_s12  ;;  %v4003_v37 = vld [vmem:[#allocation10 + $0xb8] sm:$0xff] }
 0x3fa   : > { %v1195_v58 = vor.u32 4788187, %v1194_v40  ;;  %v1198_v44 = vcvt.s32.f32 %v1191_v39 }
 0x3fc   : > { %v1196_v41 = vand.u32 2147483647, %v1195_v58 }
 0x3fe   : > { %v1199_v47 = vmul.f32 %v1198_v44, %v1196_v41 }
 0x400   : > { %v1200_v50 = vxor.u32 2147483648, %v1199_v47 }
 0x402   : > { %v1201_v51 = vsel %vm1118_vm10, %v1200_v50, %v1199_v47  ;;  %v6830_v50 = vmov 1966171168  }
 0x403   : > { %v1204_v55 = vsel %vm1117_vm11, %v7251_v2, %v1201_v51  ;;  %v7341_v2 = vpop.permute.xlu1 %2075  ;;  %v1632_v51 = vunpack.c.l.s4 %v6830_v50 }
 0x404   : > { %6432 = vcosq.f32 %v1204_v55 }
 0x405   : > { %6434 = vsinq.f32 %v1204_v55  ;;  %v1634_v55 = vlaneseq  ;;  %v1633_v59 = vunpack.c.0.s8 %v1632_v51 }
 0x407   : > { %v1949_v35 = vpop.trf.xlu1  ;;  %v1635_v61 = vshrl.u32 %v1634_v55, 7 }
 0x409   : > { %v7411_v62 = vsub.s32 %v1633_v59, %v1635_v61  ;;  %v7434_v51 = vsub.s32 0, %v1635_v61 }
 0x40b   : > { %v7387_v38 = vpop.permute.xlu1 %3262 }
 0x40f   : > { %v7389_v39 = vpop.trf.xlu1 }
 0x411   : > { %v6433_v3 = vpop.eup %6432 }
 0x412   : > { %v6435_v4 = vpop.eup %6434  ;;  %v1215_v6 = vxor.u32 2147483648, %v6433_v3 }
 0x413   : > { %v1212_v8 = vxor.u32 2147483648, %v6435_v4  ;;  %v7391_v40 = vpop.permute.xlu1 %4449 }
 0x414   : > { %v1216_v9 = vsel %vm1214_vm12, %v1215_v6, %v6435_v4  ;;  %v1326_v23 = vsel %vm1324_vm4, %v1215_v6, %v6435_v4 }
 0x415   : > { %v1213_v10 = vsel %vm1211_vm13, %v6433_v3, %v1212_v8  ;;  %v1323_v21 = vsel %vm1321_vm3, %v6433_v3, %v1212_v8 }
 0x416   : > { %v1217_v14 = vsel %vm1210_vm14, %v1213_v10, %v1216_v9  ;;  %v1327_v27 = vsel %vm1320_vm5, %v1323_v21, %v1326_v23 }
 0x417   : > { %v1218_v11 = vsel %vm1208_vm15, nan, %v1217_v14  ;;  %v1328_v32 = vsel %vm1208_vm15, nan, %v1327_v27  ;;  %v7393_v54 = vpop.trf.xlu1 }
 0x418   : > { %v1219_v52 = vadd.f32 %v1218_v11, %v1114_v12 }
 0x41a   : > { %6436 = vrcp.f32 %v1219_v52 }
 0x41b   : > { %v7395_v58 = vpop.permute.xlu1 %1827 }
 0x41f   : > { %v7397_v41 = vpop.permute.xlu1 %3013 }
 0x423   : > { %v7399_v44 = vpop.permute.xlu1 %3015 }
 0x427   : > { %v6437_v31 = vpop.eup %6436 }
 0x428   : > { %v1224_v33 = vmul.f32 %v6437_v31, %v1223_v30  ;;  %v1329_v34 = vmul.f32 %v6437_v31, %v1328_v32 }
 0x42a   : > { %6077 = vmatpush3.xpose.msk.msra.mxu0 %vm777_vm2, %v1224_v33  ;;  %6082 = vmatpush3.xpose.msk.msra.mxu1 %vm777_vm2, %v1329_v34 }
 0x42b   : > { %6086 = vmatprep.subr.mxu0 %v8257_v24  ;;  %6091 = vmatprep.subr.mxu1 %v8257_v24 }
 0x42d   : > { %6079 = vmatmul.mubr.msk.f32.vlgmr.msra.gmra.mxu0 %vm777_vm2, %v7196_v42  ;;  %6084 = vmatmul.mubr.msk.f32.vlgmr.msra.gmra.mxu1 %vm777_vm2, %v7212_v46 }
 0x42e   : > { %6087 = vmatpush3.xpose.msk.msra.mxu0 %vm777_vm2, %v1224_v33  ;;  %6092 = vmatpush3.xpose.msk.msra.mxu1 %vm777_vm2, %v1329_v34 }
 0x42f   : > { %6088 = vmatprep.mubr.msk.f32.mxu0 %vm6823_vm1, %v8257_v24  ;;  %6093 = vmatprep.mubr.msk.f32.mxu1 %vm6823_vm1, %v8257_v24 }
 0x430   : > { %6096 = vmatprep.subr.mxu0 %v8257_v24  ;;  %6101 = vmatprep.subr.mxu1 %v8257_v24 }
 0x431   : > { %6089 = vmatmul.mubr.msk.f32.vlgmr.msra.gmra.mxu0 %vm777_vm2, %v7212_v46  ;;  %6094 = vmatmul.mubr.msk.f32.vlgmr.msra.gmra.mxu1 %vm777_vm2, %v7196_v42  ;;  %v7377_v46 = vld [vmem:[#allocation10] sm:$0xff] }
 0x432   : > { %6097 = vmatpush3.msra.mxu0 %v7207_v43  ;;  %6102 = vmatpush3.msra.mxu1 %v7341_v2 }
 0x433   : > { %6098 = vmatprep.mubr.msk.f32.mxu0 %vm6823_vm1, %v8257_v24  ;;  %6103 = vmatprep.mubr.msk.f32.mxu1 %vm6823_vm1, %v8257_v24 }
 0x434   : > { %6106 = vmatprep.subr.mxu0 %v8257_v24  ;;  %6111 = vmatprep.subr.mxu1 %v8257_v24  ;;  %v7375_v42 = vpop.trf.xlu0 }
 0x435   : > { %6099 = vmatmul.mubr.msk.f32.vlgmr.msra.gmra.mxu0 %vm777_vm2, %v1949_v35  ;;  %6104 = vmatmul.mubr.msk.f32.vlgmr.msra.gmra.mxu1 %vm777_vm2, %v7245_v56 }
 0x436   : > { %6107 = vmatpush3.msra.mxu0 %v7207_v43  ;;  %6112 = vmatpush3.msra.mxu1 %v7341_v2 }
 0x437   : > { %6108 = vmatprep.mubr.msk.f32.mxu0 %vm6823_vm1, %v8257_v24  ;;  %6113 = vmatprep.mubr.msk.f32.mxu1 %vm6823_vm1, %v8257_v24  ;;  %v7401_v45 = vpop.permute.xlu1 %1829 }
 0x438   : > { %6116 = vmatprep.subr.mxu0 %v8257_v24  ;;  %6121 = vmatprep.subr.mxu1 %v8257_v24 }
 0x439   : > { %6109 = vmatmul.mubr.msk.f32.vlgmr.msra.gmra.mxu0 %vm777_vm2, %v7245_v56  ;;  %6114 = vmatmul.mubr.msk.f32.vlgmr.msra.gmra.mxu1 %vm777_vm2, %v1949_v35  ;;  %v4002_v56 = vld [vmem:[#allocation10 + $0xb0] sm:$0xff] }
 0x43a   : > { %6118 = vmatprep.mubr.msk.f32.mxu0 %vm6823_vm1, %v8257_v24  ;;  %6123 = vmatprep.mubr.msk.f32.mxu1 %vm6823_vm1, %v8257_v24 }
 0x43b   : > { %4212 = vrot.lane.b32.xlu1 %v4002_v56, %s6822_s12 }
 0x43f   : > { %4214 = vrot.lane.b32.xlu1 %v4003_v37, %s6822_s12  ;;  %v7403_v47 = vpop.permute.xlu1 %1831 }
 0x443   : > { %v7405_v48 = vpop.permute.xlu1 %4202 }
 0x444   : > { %8323 = vst [vmem:[#allocation31_spill] sm:$0xff] %v7405_v48 }
 0x449   : > { %v7407_v49 = vpop.permute.xlu1 %5387 }
 0x44a   : > { %8324 = vst [vmem:[#allocation32_spill] sm:$0xff] %v7407_v49 }
 0x44d   : > { %v7409_v57 = vpop.permute.xlu1 %1833 }
 0x451   : > { %v7413_v3 = vpop.permute.xlu1 %3021 }
 0x453   : > { %v4414_v43 = vpop.permute.xlu0 %4413 }
 0x454   : > { %4416 = vxpose.xlu0.b32.start.end [1/1] (short) (narrow) %v4414_v43, 8 }
 0x455   : > { %v7420_v23 = vpop.permute.xlu1 %1835 }
 0x47d   : > { %1825 = vrot.lane.b32.xlu0 %v7377_v46, %s6822_s12 }
 0x4ed   : > { %v1401_v63 = vpop.f32.mrf.mxu0  ;;  %v1476_v1 = vpop.f32.mrf.mxu1 }
 0x4ee   : > { %v1480_v4 = vsub.f32 %v1401_v63, %v1476_v1 }
 0x4ef   : > { %v6080_v7 = vpop.f32.mrf.mxu0  ;;  %v6085_v6 = vpop.f32.mrf.mxu1 }
 0x4f0   : > { %v1630_v8 = vcombine.high %v1480_v4, %v1480_v4  ;;  %v1637_v9 = vrot.slane %v1480_v4, %v7411_v62  ;;  %v7438_v7 = vpop.permute.xlu1 %3023 }
 0x4f1   : > { %v1547_v10 = vpop.f32.mrf.mxu0  ;;  %v1617_v12 = vpop.f32.mrf.mxu1 }
 0x4f2   : > { %v1645_v14 = vcombine.high %v1637_v9, %v1637_v9  ;;  %v1653_v11 = vrot.slane %v1637_v9, %v7411_v62  ;;  %v1618_v52 = vadd.f32 %v1617_v12, %v1547_v10  ;;  %v7418_v16 = vrot.slane %v1630_v8, %v7411_v62 }
 0x4f3   : > { %v6090_v20 = vpop.f32.mrf.mxu0  ;;  %v6095_v21 = vpop.f32.mrf.mxu1 }
 0x4f4   : > { %v1667_v25 = vrot.slane %v1645_v14, %v7411_v62  ;;  %v1680_v27 = vcombine.high %v1618_v52, %v1618_v52  ;;  %v1687_v30 = vrot.slane %v1618_v52, %v7411_v62  ;;  %v1675_v33 = vcombine.high %v1653_v11, %v1653_v11 }
 0x4f5   : > { %v7424_v31 = vpop.f32.mrf.mxu0  ;;  %v7426_v32 = vpop.f32.mrf.mxu1  ;;  %v1660_v34 = vrot.slane %v7418_v16, %v7411_v62 }
 0x4f6   : > { %v7431_v35 = vrot.slane %v1680_v27, %v7411_v62  ;;  %v1695_v43 = vcombine.high %v1687_v30, %v1687_v30  ;;  %v1703_v56 = vrot.slane %v1687_v30, %v7411_v62  ;;  %v1677_v55 = vcombine.high %v1667_v25, %v1667_v25 }
 0x4f7   : > { %v6100_v37 = vpop.f32.mrf.mxu0  ;;  %v6105_v50 = vpop.f32.mrf.mxu1  ;;  %v1736_v1 = vrot.slane %v1667_v25, %v7434_v51  ;;  %v1740_v4 = vrot.slane %v1675_v33, %v7434_v51  ;;  %v1748_v9 = vrot.slane %v1660_v34, %v7434_v51  ;;  %v1676_v12 = vcombine.high %v1660_v34, %v1660_v34 }
 0x4f8   : > { %v1710_v6 = vrot.slane %v7431_v35, %v7411_v62  ;;  %v1717_v8 = vrot.slane %v1695_v43, %v7411_v62  ;;  %v1725_v10 = vcombine.high %v1703_v56, %v1703_v56  ;;  %v1646_v30 = vcombine.high %v7418_v16, %v7418_v16 }
 0x4f9   : > { %v2218_v59 = vpop.f32.mrf.mxu0  ;;  %v2288_v63 = vpop.f32.mrf.mxu1  ;;  %v1732_v33 = vrot.slane %v1653_v11, %v7434_v51  ;;  %v1744_v43 = vrot.slane %v1677_v55, %v7434_v51  ;;  %v1770_v34 = vmul.f32 %v1736_v1, %v7259_v17  ;;  %v1771_v37 = vmul.f32 %v1740_v4, %v7280_v0 }
 0x4fa   : > { %v1727_v20 = vcombine.high %v1717_v8, %v1717_v8  ;;  %v1784_v21 = vrot.slane %v1717_v8, %v7434_v51  ;;  %v1796_v25 = vrot.slane %v1710_v6, %v7434_v51  ;;  %v1726_v27 = vcombine.high %v1710_v6, %v1710_v6 }
 0x4fb   : > { %v6110_v14 = vpop.f32.mrf.mxu0  ;;  %v6115_v52 = vpop.f32.mrf.mxu1  ;;  %v1788_v50 = vrot.slane %v1725_v10, %v7434_v51  ;;  %v7458_v8 = vmul.f32 %v1748_v9, %v7295_v18  ;;  %v1882_v11 = vmul.f32 %v7395_v58, %v1736_v1  ;;  %v1883_v55 = vmul.f32 %v7401_v45, %v1740_v4 }
 0x4fc   : > { %v7455_v14 = vpop.trf.xlu0  ;;  %v1792_v6 = vrot.slane %v1727_v20, %v7434_v51  ;;  %v1756_v52 = vrot.slane %v1676_v12, %v7434_v51  ;;  %v1804_v16 = vrot.slane %v1726_v27, %v7434_v51  ;;  %v1850_v24 = vmul.f32 %v7395_v58, %v1784_v21  ;;  %v1838_v20 = vpop.permute.xlu1 %1837 }
 0x4fd   : > { %8325 = vst [vmem:[#allocation33_spill] sm:$0xff] %v7455_v14  ;;  %v7467_v61 = vmul.f32 %v7409_v57, %v1796_v25  ;;  %v1885_v10 = vmul.f32 %v7409_v57, %v1748_v9  ;;  %v1890_v29 = vmul.f32 %v1784_v21, %v7259_v17  ;;  %v1893_v26 = vmul.f32 %v1796_v25, %v7295_v18 }
 0x4fe   : > { %v1780_v12 = vrot.slane %v1703_v56, %v7434_v51  ;;  %v1772_v27 = vmul.f32 %v1744_v43, %v7288_v5  ;;  %v1696_v1 = vcombine.high %v7431_v35, %v7431_v35  ;;  %v1851_v4 = vmul.f32 %v7401_v45, %v1788_v50 }
 0x4ff   : > { %v7477_v58 = vmul.f32 %v1838_v20, %v1804_v16  ;;  %v1884_v22 = vmul.f32 %v7403_v47, %v1744_v43  ;;  %v1852_v57 = vmul.f32 %v7403_v47, %v1792_v6  ;;  %v7482_v17 = vmul.f32 %v1756_v52, %v7309_v60 }
 0x500   : > { %v1769_v18 = vmul.f32 %v1732_v33, %v7377_v46  ;;  %v1861_v56 = vsub.f32 %v7458_v8, %v7467_v61  ;;  %v1891_v9 = vmul.f32 %v1788_v50, %v7280_v0  ;;  %v1887_v21 = vmul.f32 %v1838_v20, %v1756_v52  ;;  %v1826_v25 = vpop.permute.xlu0 %1825  ;;  %v7497_v50 = vpop.permute.xlu1 %3025 }
 0x501   : > { %v1858_v35 = vsub.f32 %v1770_v34, %v1850_v24  ;;  %v1892_v45 = vmul.f32 %v1792_v6, %v7288_v5  ;;  %v1901_v19 = vadd.f32 %v1893_v26, %v1885_v10  ;;  %v1889_v43 = vmul.f32 %v1780_v12, %v7377_v46 }
 0x502   : > { %v1898_v15 = vadd.f32 %v1890_v29, %v1882_v11  ;;  %v1863_v47 = vsub.f32 %v7482_v17, %v7477_v58  ;;  %v1895_v13 = vmul.f32 %v1804_v16, %v7309_v60  ;;  %v1859_v49 = vsub.f32 %v1771_v37, %v1851_v4 }
 0x503   : > { %v1849_v48 = vmul.f32 %v1826_v25, %v1780_v12  ;;  %v1860_v14 = vsub.f32 %v1772_v27, %v1852_v57  ;;  %v1881_v61 = vmul.f32 %v1826_v25, %v1732_v33  ;;  %v2289_v8 = vadd.f32 %v2288_v63, %v2218_v59 }
 0x504   : > { %v1674_v0 = vrot.slane %v1646_v30, %v7411_v62  ;;  %v1866_v24 = vsel %vm777_vm2, %v1858_v35, 0.0  ;;  %v1899_v34 = vadd.f32 %v1891_v9, %v1883_v55  ;;  %v1724_v26 = vrot.slane %v1696_v1, %v7411_v62  ;;  %v1840_v9 = vpop.permute.xlu1 %1839 }
 0x505   : > { %v1857_v5 = vsub.f32 %v1769_v18, %v1849_v48  ;;  %v1906_v29 = vsel %vm777_vm2, %v1898_v15, 0.0  ;;  %v1897_v46 = vadd.f32 %v1889_v43, %v1881_v61  ;;  %v7499_v6 = vmul.f32 2.0, %v2289_v8 }
 0x506   : > { %v1678_v60 = vcombine.high %v1674_v0, %v1674_v0  ;;  %v1900_v37 = vadd.f32 %v1892_v45, %v1884_v22  ;;  %v1728_v59 = vcombine.high %v1724_v26, %v1724_v26  ;;  %v1752_v63 = vrot.slane %v1674_v0, %v7434_v51 }
 0x507   : > { %v1865_v33 = vsel %vm777_vm2, %v1857_v5, 0.0  ;;  %v1905_v52 = vsel %vm777_vm2, %v1897_v46, 0.0  ;;  %v2303_v48 = vand.u32 2147483647, %v7499_v6  ;;  %v1800_v16 = vrot.slane %v1724_v26, %v7434_v51 }
 0x508   : > { %v1867_v30 = vadd.f32 %v1866_v24, %v1865_v33  ;;  %v1903_v15 = vadd.f32 %v1895_v13, %v1887_v21  ;;  %v1868_v11 = vsel %vm777_vm2, %v1859_v49, 0.0  ;;  %v1907_v55 = vadd.f32 %v1906_v29, %v1905_v52  ;;  %v7524_v52 = vld [vmem:[#allocation10 + $0x50] sm:$0xff] }
 0x509   : > { %v2306_v10 = vand.u32 2139095040, %v7499_v6  ;;  %v1870_v22 = vsel %vm777_vm2, %v1860_v14, 0.0  ;;  %v1908_v20 = vsel %vm777_vm2, %v1899_v34, 0.0  ;;  %v1760_v27 = vrot.slane %v1678_v60, %v7434_v51  ;;  %3017 = vrot.lane.b32.xlu0 %v7524_v52, %s6822_s12 }
 0x50a   : > { %v1869_v12 = vadd.f32 %v1868_v11, %v1867_v30  ;;  %v1909_v1 = vadd.f32 %v1908_v20, %v1907_v55  ;;  %v2310_v57 = vand.u32 8388607, %v2303_v48  ;;  %v1808_v18 = vrot.slane %v1728_v59, %v7434_v51 }
 0x50b   : > { %v2307_v4 = vshrl.u32 %v2306_v10, 23  ;;  %v1910_v13 = vsel %vm777_vm2, %v1900_v37, 0.0  ;;  %v1774_v21 = vmul.f32 %v1752_v63, %v7303_v28  ;;  %v1854_v14 = vmul.f32 %v7420_v23, %v1800_v16 }
 0x50c   : > { %v1871_v49 = vadd.f32 %v1870_v22, %v1869_v12  ;;  %v1911_v35 = vadd.f32 %v1910_v13, %v1909_v1  ;;  %v1856_v45 = vmul.f32 %v1840_v9, %v1808_v18  ;;  %v1872_v43 = vsel %vm777_vm2, %v1861_v56, 0.0 }
 0x50d   : > { %v5854_v25 = vadd.s32 4294967169, %v2307_v4  ;;  %v1862_v61 = vsub.f32 %v1774_v21, %v1854_v14  ;;  %v1886_v0 = vmul.f32 %v7420_v23, %v1752_v63  ;;  %v1894_v24 = vmul.f32 %v1800_v16, %v7303_v28  ;;  %v3996_v16 = vld [vmem:[#allocation10 + $0x80] sm:$0xff]  ;;  %v7544_v14 = vld [vmem:[#allocation10 + $0x58] sm:$0xff] }
 0x50e   : > { %v1873_v8 = vadd.f32 %v1872_v43, %v1871_v49  ;;  %v2311_v34 = vor.u32 8388608, %v2310_v57  ;;  %v1776_v26 = vmul.f32 %v1760_v27, %v7317_v53  ;;  %v1896_v29 = vmul.f32 %v1808_v18, %v7317_v53  ;;  %4200 = vrot.lane.b32.xlu0 %v3996_v16, %s6822_s12 }
 0x50f   : > { %v2313_v5 = vadd.s32 1, %v5854_v25  ;;  %v1874_v46 = vsel %vm777_vm2, %v1862_v61, 0.0  ;;  %v1888_v60 = vmul.f32 %v1840_v9, %v1760_v27  ;;  %v1902_v37 = vadd.f32 %v1894_v24, %v1886_v0 }
 0x510   : > { %v1912_v33 = vsel %vm777_vm2, %v1901_v19, 0.0  ;;  %v1864_v56 = vsub.f32 %v1776_v26, %v1856_v45  ;;  %v1875_v59 = vadd.f32 %v1874_v46, %v1873_v8  ;;  %v1876_v53 = vsel %vm777_vm2, %v1863_v47, 0.0 }
 0x511   : > { %vm2314_vm6 = vcmp.gt.s32.totalorder %v2313_v5, 0  ;;  %v1913_v30 = vadd.f32 %v1912_v33, %v1911_v35  ;;  %v1904_v28 = vadd.f32 %v1896_v29, %v1888_v60  ;;  %v1916_v19 = vsel %vm777_vm2, %v1903_v15, 0.0 }
 0x512   : > { %v2315_v23 = vsel %vm2314_vm6, %v2313_v5, 0  ;;  %v2351_v55 = vshll.u32 %v2311_v34, 8  ;;  %v1914_v10 = vsel %vm777_vm2, %v1902_v37, 0.0  ;;  %v1877_v20 = vadd.f32 %v1876_v53, %v1875_v59  ;;  %3019 = vrot.lane.b32.xlu0 %v7544_v14, %s6822_s12 }
 0x513   : > { %v2317_v63 = vand.u32 31, %v2315_v23  ;;  %v2316_v11 = vshrl.u32 %v2315_v23, 5  ;;  %v1878_v12 = vsel %vm777_vm2, %v1864_v56, 0.0  ;;  %v1915_v27 = vadd.f32 %v1914_v10, %v1913_v30  ;;  %v5184_v56 = vld [vmem:[#allocation10 + $0xc8] sm:$0xff] }
 0x514   : > { %v8326_v1 = vmov 683565275   ;;  %v8327_v57 = vmov 2475754826   ;;  %v8328_v58 = vmov 2131351028   ;;  %v1879_v34 = vadd.f32 %v1878_v12, %v1877_v20 }
 0x515   : > { %v2318_v22 = vsub.s32 32, %v2317_v63  ;;  %v2320_v4 = vshll.u32 %v8326_v1, %v2317_v63  ;;  %v2323_v18 = vshll.u32 %v8327_v57, %v2317_v63  ;;  %v2326_v17 = vshll.u32 %v8328_v58, %v2317_v63 }
 0x516   : > { %v1918_v47 = vsel %vm777_vm2, %v1904_v28, 0.0  ;;  %v8329_v49 = vmov 2102212464   ;;  %v8330_v35 = vmov 920167782   ;;  %vm2335_vm7 = vcmp.lt.s32.totalorder %v2316_v11, 1  ;;  %5389 = vrot.lane.b32.xlu0 %v5184_v56, %s6822_s12 }
 0x517   : > { %v2321_v15 = vshrl.u32 %v8327_v57, %v2318_v22  ;;  %v2324_v13 = vshrl.u32 %v8328_v58, %v2318_v22  ;;  %v2327_v9 = vshrl.u32 %v8329_v49, %v2318_v22  ;;  %v2329_v21 = vshll.u32 %v8329_v49, %v2317_v63  ;;  %1921 = vst.msk [vmem:[#allocation4] sm:$0xff] %vm777_vm2, %v1879_v34 }
 0x518   : > { %v2330_v25 = vshrl.u32 %v8330_v35, %v2318_v22  ;;  %v2332_v45 = vshll.u32 %v8330_v35, %v2317_v63  ;;  %v8331_v43 = vmov 1326507024   ;;  %vm2338_vm8 = vcmp.lt.s32.totalorder %v2316_v11, 4 }
 0x519   : > { %v2333_v61 = vshrl.u32 %v8331_v43, %v2318_v22  ;;  %v2322_v8 = vor.u32 %v2321_v15, %v2320_v4  ;;  %v2325_v0 = vor.u32 %v2324_v13, %v2323_v18  ;;  %v2328_v24 = vor.u32 %v2327_v9, %v2326_v17  ;;  %v7564_v4 = vld [vmem:[#allocation10 + $0x90] sm:$0xff] }
 0x51a   : > { %v2331_v5 = vor.u32 %v2330_v25, %v2329_v21  ;;  %v1917_v29 = vadd.f32 %v1916_v19, %v1915_v27  ;;  %v2319_v46 = vshrl.u32 %v8326_v1, %v2318_v22  ;;  %vm2337_vm9 = vcmp.lt.s32.totalorder %v2316_v11, 3  ;;  %4204 = vrot.lane.b32.xlu0 %v7564_v4, %s6822_s12  ;;  %v5185_v17 = vld [vmem:[#allocation10 + $0xd0] sm:$0xff] }
 0x51b   : > { %v2334_v26 = vor.u32 %v2333_v61, %v2332_v45  ;;  %v2340_v60 = vsel %vm2338_vm8, %v2328_v24, 2102212464  ;;  %v2343_v37 = vsel %vm2335_vm7, %v2322_v8, %v2325_v0  ;;  %v2347_v33 = vsel %vm2335_vm7, %v2325_v0, %v2328_v24 }
 0x51c   : > { %v2344_v59 = vsel %vm2338_vm8, %v2331_v5, 920167782  ;;  %v1919_v23 = vadd.f32 %v1918_v47, %v1917_v29  ;;  %vm2336_vm10 = vcmp.lt.s32.totalorder %v2316_v11, 2  ;;  %v2339_v28 = vsel %vm2335_vm7, %v2319_v46, %v2322_v8 }
 0x51d   : > { %v2348_v30 = vsel %vm2338_vm8, %v2334_v26, 1326507024  ;;  %v2345_v53 = vsel %vm2337_vm9, %v2328_v24, %v2344_v59  ;;  %v2341_v16 = vsel %vm2337_vm9, %v2325_v0, %v2340_v60  ;;  %v8332_v34 = vsub.f32 %v7424_v31, %v7426_v32 }
 0x51e   : > { %v2349_v63 = vsel %vm2337_vm9, %v2331_v5, %v2348_v30  ;;  %v2346_v19 = vsel %vm2336_vm10, %v2343_v37, %v2345_v53  ;;  %1923 = vrot.lane.b32.xlu1 %v1919_v23, %s6831_s20  ;;  %v2342_v11 = vsel %vm2336_vm10, %v2339_v28, %v2341_v16  ;;  %5391 = vrot.lane.b32.xlu0 %v5185_v17, %s6822_s12  ;;  %vm2305_vm13 = vcmp.lt.s32.totalorder %v7499_v6, 0 }
 0x51f   : > { %v2350_v10 = vsel %vm2336_vm10, %v2347_v33, %v2349_v63  ;;  %v7561_v12 = vmul.u32.u64.low %v2351_v55, %v2346_v19  ;;  %v7562_v27 = vmul.u32.u64.high %v2351_v55, %v2346_v19, %v7561_v12  ;;  %v2358_v47 = vmul.u32 %v2351_v55, %v2342_v11 }
 0x520   : > { %v7558_v22 = vmul.u32.u64.low %v2351_v55, %v2350_v10  ;;  %v7559_v20 = vmul.u32.u64.high %v2351_v55, %v2350_v10, %v7558_v22  ;;  %v2292_v5 = vmul.f32 2.0, %v8332_v34  ;;  %vm2304_vm14 = vcmp.le.f32.partialorder %v2303_v48, 0.7853982 }
 0x521   : > { %v2361_v18 = vadd.s32 1, %v7562_v27  ;;  %vm2395_vm5 = vweird.f32 %v7499_v6  ;;  %vm1926_vm9 = vcmask 130112  }
 0x522   : > { %vm2360_vm11 = vc.u32 %v7559_v20, %v7561_v12  ;;  %v2359_v55 = vadd.s32 %v7561_v12, %v7559_v20  ;;  %v5853_v60 = vclamps-f32 %v2292_v5, 30.0 }
 0x523   : > { %v2362_v15 = vsel %vm2360_vm11, %v2361_v18, %v7562_v27 }
 0x524   : > { %v2363_v13 = vadd.s32 %v2362_v15, %v2358_v47  ;;  %v2297_v23 = vsub.f32 0.0, %v5853_v60  ;;  %v2295_v31 = vmul.f32 1.442695, %v5853_v60 }
 0x526   : > { %v2364_v9 = vadd.s32 536870912, %v2363_v13  ;;  %v2298_v16 = vmul.f32 1.442695, %v2297_v23 }
 0x528   : > { %v2365_v21 = vshrl.u32 %v2364_v9, 30  ;;  %6438 = vpow2.f32 %v2298_v16  ;;  %v5187_v16 = vld [vmem:[#allocation10 + $0xe0] sm:$0xff] }
 0x529   : > { %6440 = vpow2.f32 %v2295_v31  ;;  %v5188_v31 = vld [vmem:[#allocation10 + $0xe8] sm:$0xff] }
 0x52a   : > { %v2366_v25 = vshll.u32 %v2365_v21, 30  ;;  %v2389_v20 = vsub.s32 4, %v2365_v21 }
 0x52c   : > { %v2367_v45 = vsub.s32 %v2363_v13, %v2366_v25  ;;  %v2390_v12 = vsel %vm2305_vm13, %v2389_v20, %v2365_v21 }
 0x52d   : > { %v2392_v27 = vsel %vm2304_vm14, 0, %v2390_v12 }
 0x52e   : > { %v2369_v61 = vsub.s32 0, %v2367_v45  ;;  %v2396_v18 = vand.u32 3, %v2392_v27 }
 0x530   : > { %v5855_v8 = vmin.u32 %v2369_v61, %v2367_v45  ;;  %vm2401_vm15 = vcmp.eq.s32.totalorder %v2396_v18, 2  ;;  %vm2398_vm3 = vcmp.eq.s32.totalorder %v2396_v18, 0  ;;  %vm2397_vm4 = vcmp.lt.s32.totalorder %v2396_v18, 2 }
 0x532   : > { %v2371_v0 = vclz %v5855_v8 }
 0x534   : > { %v5856_v24 = vadd.s32 4294967294, %v2371_v0 }
 0x535   : > { %v6439_v11 = vpop.eup %6438 }
 0x536   : > { %vm5857_vm12 = vcmp.lt.s32.totalorder %v5856_v24, 0  ;;  %v6441_v17 = vpop.eup %6440 }
 0x537   : > { %v2374_v26 = vsel %vm5857_vm12, 0, %v5856_v24  ;;  %v2300_v13 = vadd.f32 %v6441_v17, %v6439_v11  ;;  %v2505_v24 = vadd.s32 3, %v2392_v27 }
 0x538   : > { %v2375_v29 = vsub.s32 32, %v2374_v26  ;;  %v2379_v46 = vsub.s32 4294967266, %v2374_v26  ;;  %v2376_v37 = vshll.u32 %v2367_v45, %v2374_v26 }
 0x539   : > { %v2301_v61 = vmul.f32 0.5, %v2300_v13  ;;  %v2506_v34 = vand.u32 3, %v2505_v24 }
 0x53a   : > { %v2377_v33 = vshrl.u32 %v2359_v55, %v2375_v29  ;;  %v2380_v56 = vadd.s32 127, %v2379_v46  ;;  %v2409_v55 = vsub.f32 %v6441_v17, %v6439_v11 }
 0x53b   : > { %vm2508_vm6 = vcmp.eq.s32.totalorder %v2506_v34, 0  ;;  %vm2511_vm7 = vcmp.eq.s32.totalorder %v2506_v34, 2  ;;  %vm2507_vm8 = vcmp.lt.s32.totalorder %v2506_v34, 2 }
 0x53c   : > { %v2378_v59 = vor.u32 %v2377_v33, %v2376_v37  ;;  %v2381_v30 = vshll.u32 %v2380_v56, 23  ;;  %v2410_v46 = vmul.f32 0.5, %v2409_v55 }
 0x53e   : > { %v2382_v28 = vor.u32 4788187, %v2381_v30  ;;  %v2385_v63 = vcvt.s32.f32 %v2378_v59  ;;  %v8333_v59 = vmov 0.0   ;;  %v6468_v30 = vld [vmem:[%s7193_s14 + $0x8] sm:$0xff] }
 0x540   : > { %v2383_v53 = vand.u32 2147483647, %v2382_v28 }
 0x542   : > { %v2386_v19 = vmul.f32 %v2385_v63, %v2383_v53  ;;  %v7642_v63 = vld [vmem:[#allocation10 + $0x98] sm:$0xff] }
 0x543   : > { %4206 = vrot.lane.b32.xlu0 %v7642_v63, %s6822_s12 }
 0x544   : > { %v2387_v32 = vxor.u32 2147483648, %v2386_v19 }
 0x546   : > { %v2388_v10 = vsel %vm2305_vm13, %v2387_v32, %v2386_v19  ;;  %v7652_v19 = vld [vmem:[#allocation10 + $0xa8] sm:$0xff]  ;;  %v5189_v32 = vld [vmem:[#allocation10 + $0xf0] sm:$0xff] }
 0x547   : > { %v2391_v22 = vsel %vm2304_vm14, %v7499_v6, %v2388_v10  ;;  %v7605_v6 = vld [vmem:[%s7193_s14 + $0x10] sm:$0xff]  ;;  %8336 = vst [vmem:[#allocation36_spill] sm:$0xff] %v7652_v19  ;;  %v5190_v10 = vld [vmem:[#allocation10 + $0xf8] sm:$0xff] }
 0x548   : > { %6442 = vcosq.f32 %v2391_v22 }
 0x549   : > { %6444 = vsinq.f32 %v2391_v22 }
 0x555   : > { %v6443_v47 = vpop.eup %6442 }
 0x556   : > { %v6445_v15 = vpop.eup %6444  ;;  %v2402_v9 = vxor.u32 2147483648, %v6443_v47 }
 0x557   : > { %v2399_v25 = vxor.u32 2147483648, %v6445_v15 }
 0x558   : > { %v2403_v48 = vsel %vm2401_vm15, %v2402_v9, %v6445_v15  ;;  %v2513_v26 = vsel %vm2511_vm7, %v2402_v9, %v6445_v15 }
 0x559   : > { %v2400_v45 = vsel %vm2398_vm3, %v6443_v47, %v2399_v25  ;;  %v2510_v5 = vsel %vm2508_vm6, %v6443_v47, %v2399_v25 }
 0x55a   : > { %v2404_v8 = vsel %vm2397_vm4, %v2400_v45, %v2403_v48  ;;  %v2514_v29 = vsel %vm2507_vm8, %v2510_v5, %v2513_v26 }
 0x55b   : > { %v2405_v21 = vsel %vm2395_vm5, nan, %v2404_v8  ;;  %v2515_v37 = vsel %vm2395_vm5, nan, %v2514_v29 }
 0x55c   : > { %v2406_v0 = vadd.f32 %v2405_v21, %v2301_v61 }
 0x55e   : > { %6446 = vrcp.f32 %v2406_v0 }
 0x56b   : > { %v6447_v60 = vpop.eup %6446 }
 0x56c   : > { %v2411_v33 = vmul.f32 %v6447_v60, %v2410_v46  ;;  %v2516_v56 = vmul.f32 %v6447_v60, %v2515_v37 }
 0x56e   : > { %6117 = vmatpush3.xpose.msk.msra.mxu0 %vm777_vm2, %v2411_v33  ;;  %6122 = vmatpush3.xpose.msk.msra.mxu1 %vm777_vm2, %v2516_v56 }
 0x56f   : > { %6126 = vmatprep.subr.mxu0 %v8333_v59  ;;  %6131 = vmatprep.subr.mxu1 %v8333_v59 }
 0x571   : > { %6119 = vmatmul.mubr.msk.f32.vlgmr.msra.gmra.mxu0 %vm777_vm2, %v6468_v30  ;;  %6124 = vmatmul.mubr.msk.f32.vlgmr.msra.gmra.mxu1 %vm777_vm2, %v7341_v2 }
 0x572   : > { %6127 = vmatpush3.xpose.msk.msra.mxu0 %vm777_vm2, %v2411_v33  ;;  %6132 = vmatpush3.xpose.msk.msra.mxu1 %vm777_vm2, %v2516_v56 }
 0x573   : > { %6128 = vmatprep.mubr.msk.f32.mxu0 %vm6823_vm1, %v8333_v59  ;;  %6133 = vmatprep.mubr.msk.f32.mxu1 %vm6823_vm1, %v8333_v59 }
 0x574   : > { %6136 = vmatprep.subr.mxu0 %v8333_v59  ;;  %6141 = vmatprep.subr.mxu1 %v8333_v59 }
 0x575   : > { %6129 = vmatmul.mubr.msk.f32.vlgmr.msra.gmra.mxu0 %vm777_vm2, %v7341_v2  ;;  %6134 = vmatmul.mubr.msk.f32.vlgmr.msra.gmra.mxu1 %vm777_vm2, %v6468_v30  ;;  %v7625_v2 = vpop.permute.xlu1 %3027 }
 0x576   : > { %6137 = vmatpush3.msra.mxu0 %v7605_v6  ;;  %6142 = vmatpush3.msra.mxu1 %v7387_v38 }
 0x577   : > { %6138 = vmatprep.mubr.msk.f32.mxu0 %vm6823_vm1, %v8333_v59  ;;  %6143 = vmatprep.mubr.msk.f32.mxu1 %vm6823_vm1, %v8333_v59 }
 0x578   : > { %6146 = vmatprep.subr.mxu0 %v8333_v59  ;;  %6151 = vmatprep.subr.mxu1 %v8333_v59 }
 0x579   : > { %6139 = vmatmul.mubr.msk.f32.vlgmr.msra.gmra.mxu0 %vm777_vm2, %v7389_v39  ;;  %6144 = vmatmul.mubr.msk.f32.vlgmr.msra.gmra.mxu1 %vm777_vm2, %v7375_v42  ;;  %v7637_v23 = vpop.permute.xlu1 %4212 }
 0x57a   : > { %6147 = vmatpush3.msra.mxu0 %v7605_v6  ;;  %6152 = vmatpush3.msra.mxu1 %v7387_v38  ;;  %8334 = vst [vmem:[#allocation34_spill] sm:$0xff] %v7637_v23 }
 0x57b   : > { %6148 = vmatprep.mubr.msk.f32.mxu0 %vm6823_vm1, %v8333_v59  ;;  %6153 = vmatprep.mubr.msk.f32.mxu1 %vm6823_vm1, %v8333_v59 }
 0x57c   : > { %6156 = vmatprep.subr.mxu0 %v8333_v59  ;;  %6161 = vmatprep.subr.mxu1 %v8333_v59 }
 0x57d   : > { %6149 = vmatmul.mubr.msk.f32.vlgmr.msra.gmra.mxu0 %vm777_vm2, %v7375_v42  ;;  %6154 = vmatmul.mubr.msk.f32.vlgmr.msra.gmra.mxu1 %vm777_vm2, %v7389_v39  ;;  %v7639_v28 = vpop.permute.xlu1 %4214  ;;  %v5186_v42 = vld [vmem:[#allocation10 + $0xd8] sm:$0xff]  ;;  %v7647_v39 = vld [vmem:[#allocation10 + $0xa0] sm:$0xff] }
 0x57e   : > { %6158 = vmatprep.mubr.msk.f32.mxu0 %vm6823_vm1, %v8333_v59  ;;  %6163 = vmatprep.mubr.msk.f32.mxu1 %vm6823_vm1, %v8333_v59  ;;  %8335 = vst [vmem:[#allocation35_spill] sm:$0xff] %v7639_v28 }
 0x57f   : > { %5393 = vrot.lane.b32.xlu0 %v5186_v42, %s6822_s12 }
 0x583   : > { %4208 = vrot.lane.b32.xlu0 %v7647_v39, %s6822_s12 }
 0x587   : > { %5395 = vrot.lane.b32.xlu0 %v5187_v16, %s6822_s12 }
 0x58b   : > { %4210 = vrot.lane.b32.xlu0 %v7652_v19, %s6822_s12  ;;  %v6474_v19 = vld [vmem:[#allocation10 + $0x70] sm:$0xff] }
 0x58f   : > { %5397 = vrot.lane.b32.xlu0 %v5188_v31, %s6822_s12 }
 0x590   : > { %v1924_v53 = vpop.permute.xlu1 %1923 }
 0x591   : > { %1927 = vst.msk [vmem:[#allocation4] sm:$0xff] %vm1926_vm9, %v1924_v53 }
 0x593   : > { %5399 = vrot.lane.b32.xlu0 %v5189_v32, %s6822_s12 }
 0x597   : > { %5401 = vrot.lane.b32.xlu0 %v5190_v10, %s6822_s12 }
 0x631   : > { %v2588_v22 = vpop.f32.mrf.mxu0  ;;  %v2663_v20 = vpop.f32.mrf.mxu1 }
 0x632   : > { %v2667_v12 = vsub.f32 %v2588_v22, %v2663_v20 }
 0x633   : > { %v6120_v27 = vpop.f32.mrf.mxu0  ;;  %v6125_v11 = vpop.f32.mrf.mxu1 }
 0x634   : > { %v2818_v18 = vcombine.high %v2667_v12, %v2667_v12  ;;  %v2825_v17 = vrot.slane %v2667_v12, %v7411_v62  ;;  %v6470_v11 = vld [vmem:[#allocation10 + $0x40] sm:$0xff] }
 0x635   : > { %v2734_v47 = vpop.f32.mrf.mxu0  ;;  %v2804_v15 = vpop.f32.mrf.mxu1 }
 0x636   : > { %v2832_v13 = vrot.slane %v2818_v18, %v7411_v62  ;;  %v2833_v9 = vcombine.high %v2825_v17, %v2825_v17  ;;  %v2805_v25 = vadd.f32 %v2804_v15, %v2734_v47  ;;  %v2841_v61 = vrot.slane %v2825_v17, %v7411_v62 }
 0x637   : > { %v6130_v48 = vpop.f32.mrf.mxu0  ;;  %v6135_v45 = vpop.f32.mrf.mxu1 }
 0x638   : > { %v2868_v8 = vcombine.high %v2805_v25, %v2805_v25  ;;  %v2875_v21 = vrot.slane %v2805_v25, %v7411_v62  ;;  %v2834_v34 = vcombine.high %v2832_v13, %v2832_v13  ;;  %v2848_v5 = vrot.slane %v2832_v13, %v7411_v62 }
 0x639   : > { %v7663_v0 = vpop.f32.mrf.mxu0  ;;  %v7665_v24 = vpop.f32.mrf.mxu1  ;;  %v7669_v26 = vrot.slane %v2833_v9, %v7411_v62  ;;  %v2920_v37 = vrot.slane %v2841_v61, %v7434_v51  ;;  %v2863_v22 = vcombine.high %v2841_v61, %v2841_v61 }
 0x63a   : > { %v2882_v55 = vrot.slane %v2868_v8, %v7411_v62  ;;  %v2883_v29 = vcombine.high %v2875_v21, %v2875_v21  ;;  %v7674_v53 = vrot.slane %v2834_v34, %v7411_v62  ;;  %v2864_v42 = vcombine.high %v2848_v5, %v2848_v5  ;;  %v6471_v8 = vld [vmem:[#allocation10 + $0x48] sm:$0xff] }
 0x63b   : > { %v6140_v46 = vpop.f32.mrf.mxu0  ;;  %v6145_v60 = vpop.f32.mrf.mxu1  ;;  %v2924_v16 = vrot.slane %v7669_v26, %v7434_v51  ;;  %v2891_v31 = vrot.slane %v2875_v21, %v7411_v62  ;;  %v2936_v27 = vrot.slane %v2848_v5, %v7434_v51  ;;  %v2957_v18 = vmul.f32 %v6470_v11, %v2920_v37 }
 0x63c   : > { %v2884_v33 = vcombine.high %v2882_v55, %v2882_v55  ;;  %v2898_v32 = vrot.slane %v2882_v55, %v7411_v62  ;;  %v7681_v10 = vrot.slane %v2883_v29, %v7411_v62  ;;  %v3069_v15 = vmul.f32 %v7397_v41, %v2920_v37  ;;  %v3018_v46 = vpop.permute.xlu0 %3017  ;;  %v6472_v60 = vld [vmem:[#allocation10 + $0x60] sm:$0xff] }
 0x63d   : > { %v3405_v56 = vpop.f32.mrf.mxu0  ;;  %v3475_v30 = vpop.f32.mrf.mxu1  ;;  %v2968_v17 = vrot.slane %v2891_v31, %v7434_v51  ;;  %v2913_v25 = vcombine.high %v2891_v31, %v2891_v31  ;;  %v2940_v45 = vrot.slane %v7674_v53, %v7434_v51  ;;  %v7698_v61 = vrot.slane %v2864_v42, %v7434_v51 }
 0x63e   : > { %v7689_v13 = vrot.slane %v2884_v33, %v7411_v62  ;;  %v2972_v9 = vrot.slane %v7681_v10, %v7434_v51  ;;  %v2958_v21 = vmul.f32 %v6471_v8, %v2924_v16  ;;  %v2914_v34 = vcombine.high %v2898_v32, %v2898_v32 }
 0x63f   : > { %v6150_v20 = vpop.f32.mrf.mxu0  ;;  %v6155_v12 = vpop.f32.mrf.mxu1  ;;  %v2928_v29 = vrot.slane %v2863_v22, %v7434_v51  ;;  %v7702_v37 = vmul.f32 %v6472_v60, %v2936_v27  ;;  %v3070_v33 = vmul.f32 %v7399_v44, %v2924_v16  ;;  %v3037_v31 = vmul.f32 %v7397_v41, %v2968_v17 }
 0x640   : > { %v3038_v5 = vmul.f32 %v7399_v44, %v2972_v9  ;;  %v3078_v55 = vmul.f32 %v6471_v8, %v2972_v9  ;;  %v3077_v20 = vmul.f32 %v6470_v11, %v2968_v17  ;;  %v2984_v42 = vrot.slane %v2898_v32, %v7434_v51  ;;  %v6473_v9 = vld [vmem:[#allocation10 + $0x68] sm:$0xff] }
 0x641   : > { %v2988_v12 = vrot.slane %v7689_v13, %v7434_v51  ;;  %v2976_v47 = vrot.slane %v2913_v25, %v7434_v51  ;;  %v3476_v48 = vadd.f32 %v3475_v30, %v3405_v56  ;;  %v2962_v8 = vmul.f32 %v6473_v9, %v2940_v45 }
 0x642   : > { %v3073_v22 = vmul.f32 %v7413_v3, %v2936_v27  ;;  %v3046_v28 = vsub.f32 %v2958_v21, %v3038_v5  ;;  %v3086_v23 = vadd.f32 %v3078_v55, %v3070_v33  ;;  %v7712_v44 = vmul.f32 %v6474_v19, %v7698_v61  ;;  %v7722_v5 = vpop.permute.xlu0 %4200 }
 0x643   : > { %v7715_v41 = vmul.f32 %v7438_v7, %v2940_v45  ;;  %v2992_v16 = vrot.slane %v2914_v34, %v7434_v51  ;;  %v2959_v32 = vmul.f32 %v2928_v29, %v7524_v52  ;;  %v3045_v11 = vsub.f32 %v2957_v18, %v3037_v31 }
 0x644   : > { %v3085_v17 = vadd.f32 %v3077_v20, %v3069_v15  ;;  %v3079_v56 = vmul.f32 %v2976_v47, %v7524_v52  ;;  %v3039_v30 = vmul.f32 %v3018_v46, %v2976_v47  ;;  %v3041_v27 = vmul.f32 %v7413_v3, %v2984_v42 }
 0x645   : > { %v3042_v25 = vmul.f32 %v7438_v7, %v2988_v12  ;;  %v3071_v21 = vmul.f32 %v3018_v46, %v2928_v29  ;;  %v7724_v55 = vmul.f32 2.0, %v3476_v48  ;;  %v3054_v45 = vsel %vm777_vm2, %v3046_v28, 0.0 }
 0x646   : > { %v3094_v34 = vsel %vm777_vm2, %v3086_v23, 0.0  ;;  %v2865_v18 = vcombine.high %v7669_v26, %v7669_v26  ;;  %v2915_v52 = vcombine.high %v7681_v10, %v7681_v10  ;;  %v7733_v47 = vmul.f32 %v7497_v50, %v2992_v16 }
 0x647   : > { %v3081_v3 = vmul.f32 %v6472_v60, %v2984_v42  ;;  %v3490_v7 = vand.u32 2147483647, %v7724_v55  ;;  %v3493_v15 = vand.u32 2139095040, %v7724_v55  ;;  %v3053_v48 = vsel %vm777_vm2, %v3045_v11, 0.0 }
 0x648   : > { %v3093_v28 = vsel %vm777_vm2, %v3085_v17, 0.0  ;;  %v3047_v29 = vsub.f32 %v2959_v32, %v3039_v30  ;;  %v3087_v23 = vadd.f32 %v3079_v56, %v3071_v21  ;;  %v3055_v46 = vadd.f32 %v3054_v45, %v3053_v48  ;;  %v3020_v30 = vpop.permute.xlu0 %3019 }
 0x649   : > { %v3095_v33 = vadd.f32 %v3094_v34, %v3093_v28  ;;  %v3494_v26 = vshrl.u32 %v3493_v15, 23  ;;  %v3497_v10 = vand.u32 8388607, %v3490_v7  ;;  %v2916_v31 = vcombine.high %v7689_v13, %v7689_v13 }
 0x64a   : > { %v3082_v60 = vmul.f32 %v6473_v9, %v2988_v12  ;;  %v2932_v20 = vrot.slane %v2865_v18, %v7434_v51  ;;  %v2980_v42 = vrot.slane %v2915_v52, %v7434_v51  ;;  %v3051_v11 = vsub.f32 %v7712_v44, %v7733_v47 }
 0x64b   : > { %v5879_v17 = vadd.s32 4294967169, %v3494_v26  ;;  %v3498_v32 = vor.u32 8388608, %v3497_v10  ;;  %v3049_v56 = vsub.f32 %v7702_v37, %v3041_v27  ;;  %v3056_v21 = vsel %vm777_vm2, %v3047_v29, 0.0 }
 0x64c   : > { %v3096_v45 = vsel %vm777_vm2, %v3087_v23, 0.0  ;;  %v3050_v34 = vsub.f32 %v2962_v8, %v3042_v25  ;;  %v3080_v13 = vmul.f32 %v2980_v42, %v7544_v14  ;;  %v3057_v12 = vadd.f32 %v3056_v21, %v3055_v46 }
 0x64d   : > { %v3097_v9 = vadd.f32 %v3096_v45, %v3095_v33  ;;  %v3500_v18 = vadd.s32 1, %v5879_v17  ;;  %v3089_v15 = vadd.f32 %v3081_v3, %v3073_v22  ;;  %v2960_v52 = vmul.f32 %v2932_v20, %v7544_v14 }
 0x64e   : > { %v3040_v48 = vmul.f32 %v3020_v30, %v2980_v42  ;;  %v3072_v28 = vmul.f32 %v3020_v30, %v2932_v20  ;;  %v8337_v37 = vcombine.high %v7674_v53, %v7674_v53  ;;  %v7756_v29 = vshll.u32 %v3498_v32, 8 }
 0x64f   : > { %vm3501_vm10 = vcmp.gt.s32.totalorder %v3500_v18, 0  ;;  %v3060_v8 = vsel %vm777_vm2, %v3049_v56, 0.0  ;;  %v2996_v25 = vrot.slane %v2916_v31, %v7434_v51  ;;  %v3062_v46 = vsel %vm777_vm2, %v3050_v34, 0.0 }
 0x650   : > { %v2948_v27 = vrot.slane %v8337_v37, %v7434_v51  ;;  %v3502_v23 = vsel %vm3501_vm10, %v3500_v18, 0  ;;  %v3048_v22 = vsub.f32 %v2960_v52, %v3040_v48  ;;  %v3088_v3 = vadd.f32 %v3080_v13, %v3072_v28 }
 0x651   : > { %v3504_v14 = vand.u32 31, %v3502_v23  ;;  %v3100_v33 = vsel %vm777_vm2, %v3089_v15, 0.0  ;;  %v3075_v26 = vmul.f32 %v7497_v50, %v7698_v61  ;;  %v3083_v53 = vmul.f32 %v6474_v19, %v2992_v16 }
 0x652   : > { %v3503_v10 = vshrl.u32 %v3502_v23, 5  ;;  %v7765_v20 = vmul.f32 %v2948_v27, %v7381_v36  ;;  %v3044_v42 = vmul.f32 %v7625_v2, %v2996_v25  ;;  %v3076_v31 = vmul.f32 %v7625_v2, %v2948_v27 }
 0x653   : > { %v3505_v17 = vsub.s32 32, %v3504_v14  ;;  %v3058_v32 = vsel %vm777_vm2, %v3048_v22, 0.0  ;;  %v3098_v56 = vsel %vm777_vm2, %v3088_v3, 0.0  ;;  %v3084_v30 = vmul.f32 %v2996_v25, %v7381_v36 }
 0x654   : > { %v3507_v21 = vshll.u32 %v8326_v1, %v3504_v14  ;;  %v3510_v50 = vshll.u32 %v8327_v57, %v3504_v14  ;;  %v3513_v19 = vshll.u32 %v8328_v58, %v3504_v14  ;;  %v3090_v61 = vadd.f32 %v3082_v60, %v7715_v41 }
 0x655   : > { %v3508_v16 = vshrl.u32 %v8327_v57, %v3505_v17  ;;  %v3511_v45 = vshrl.u32 %v8328_v58, %v3505_v17  ;;  %v3514_v2 = vshrl.u32 %v8329_v49, %v3505_v17  ;;  %v3516_v34 = vshll.u32 %v8329_v49, %v3504_v14 }
 0x656   : > { %v3517_v13 = vshrl.u32 %v8330_v35, %v3505_v17  ;;  %v3519_v36 = vshll.u32 %v8330_v35, %v3504_v14  ;;  %v3520_v18 = vshrl.u32 %v8331_v43, %v3505_v17  ;;  %vm3522_vm11 = vcmp.lt.s32.totalorder %v3503_v10, 1 }
 0x657   : > { %v3509_v15 = vor.u32 %v3508_v16, %v3507_v21  ;;  %v3512_v52 = vor.u32 %v3511_v45, %v3510_v50  ;;  %v3515_v48 = vor.u32 %v3514_v2, %v3513_v19  ;;  %v3059_v28 = vadd.f32 %v3058_v32, %v3057_v12 }
 0x658   : > { %v3518_v41 = vor.u32 %v3517_v13, %v3516_v34  ;;  %v3521_v60 = vor.u32 %v3520_v18, %v3519_v36  ;;  %vm3525_vm12 = vcmp.lt.s32.totalorder %v3503_v10, 4  ;;  %v3099_v37 = vadd.f32 %v3098_v56, %v3097_v9 }
 0x659   : > { %v3506_v27 = vshrl.u32 %v8326_v1, %v3505_v17  ;;  %v3527_v25 = vsel %vm3525_vm12, %v3515_v48, 2102212464  ;;  %v3530_v23 = vsel %vm3522_vm11, %v3509_v15, %v3512_v52  ;;  %v3534_v22 = vsel %vm3522_vm11, %v3512_v52, %v3515_v48 }
 0x65a   : > { %vm3523_vm13 = vcmp.lt.s32.totalorder %v3503_v10, 2  ;;  %vm3524_vm14 = vcmp.lt.s32.totalorder %v3503_v10, 3  ;;  %v3531_v3 = vsel %vm3525_vm12, %v3518_v41, 920167782  ;;  %v3535_v14 = vsel %vm3525_vm12, %v3521_v60, 1326507024 }
 0x65b   : > { %v3526_v21 = vsel %vm3522_vm11, %v3506_v27, %v3509_v15  ;;  %v3532_v50 = vsel %vm3524_vm14, %v3515_v48, %v3531_v3  ;;  %v3536_v19 = vsel %vm3524_vm14, %v3518_v41, %v3535_v14  ;;  %v3061_v12 = vadd.f32 %v3060_v8, %v3059_v28 }
 0x65c   : > { %v3528_v32 = vsel %vm3524_vm14, %v3512_v52, %v3527_v25  ;;  %v3533_v16 = vsel %vm3523_vm13, %v3530_v23, %v3532_v50  ;;  %v3537_v9 = vsel %vm3523_vm13, %v3534_v22, %v3536_v19  ;;  %v3101_v17 = vadd.f32 %v3100_v33, %v3099_v37 }
 0x65d   : > { %v7790_v56 = vmul.u32.u64.low %v7756_v29, %v3537_v9  ;;  %v7791_v45 = vmul.u32.u64.high %v7756_v29, %v3537_v9, %v7790_v56  ;;  %v7794_v2 = vmul.u32.u64.low %v7756_v29, %v3533_v16  ;;  %v7795_v34 = vmul.u32.u64.high %v7756_v29, %v3533_v16, %v7794_v2 }
 0x65e   : > { %v3063_v13 = vadd.f32 %v3062_v46, %v3061_v12  ;;  %v3091_v36 = vadd.f32 %v3083_v53, %v3075_v26  ;;  %v3092_v18 = vadd.f32 %v3084_v30, %v3076_v31  ;;  %v3102_v15 = vsel %vm777_vm2, %v3090_v61, 0.0 }
 0x65f   : > { %v3529_v8 = vsel %vm3523_vm13, %v3526_v21, %v3528_v32  ;;  %v3064_v33 = vsel %vm777_vm2, %v3051_v11, 0.0  ;;  %v3103_v52 = vadd.f32 %v3102_v15, %v3101_v17  ;;  %v3052_v48 = vsub.f32 %v7765_v20, %v3044_v42 }
 0x660   : > { %v3065_v28 = vadd.f32 %v3064_v33, %v3063_v13  ;;  %v3104_v41 = vsel %vm777_vm2, %v3091_v36, 0.0  ;;  %vm3547_vm15 = vc.u32 %v7791_v45, %v7794_v2  ;;  %v3548_v46 = vadd.s32 1, %v7795_v34 }
 0x661   : > { %v3105_v26 = vadd.f32 %v3104_v41, %v3103_v52  ;;  %v3545_v53 = vmul.u32 %v7756_v29, %v3529_v8  ;;  %v3106_v10 = vsel %vm777_vm2, %v3092_v18, 0.0  ;;  %v3066_v31 = vsel %vm777_vm2, %v3052_v48, 0.0 }
 0x662   : > { %v3549_v44 = vsel %vm3547_vm15, %v3548_v46, %v7795_v34  ;;  %v3067_v11 = vadd.f32 %v3066_v31, %v3065_v28  ;;  %v8338_v23 = vsub.f32 %v7663_v0, %v7665_v24  ;;  %v3546_v14 = vadd.s32 %v7794_v2, %v7791_v45 }
 0x663   : > { %v3107_v47 = vadd.f32 %v3106_v10, %v3105_v26  ;;  %v3550_v30 = vadd.s32 %v3549_v44, %v3545_v53  ;;  %vm3492_vm4 = vcmp.lt.s32.totalorder %v7724_v55, 0  ;;  %vm3491_vm5 = vcmp.le.f32.partialorder %v3490_v7, 0.7853982  ;;  %v7821_v26 = vpop.permute.xlu0 %5389 }
 0x664   : > { %3109 = vst.msk [vmem:[#allocation4 + $0x8] sm:$0xff] %vm777_vm2, %v3067_v11  ;;  %v3479_v22 = vmul.f32 2.0, %v8338_v23  ;;  %vm3582_vm10 = vweird.f32 %v7724_v55 }
 0x665   : > { %3111 = vrot.lane.b32.xlu0 %v3107_v47, %s6831_s20  ;;  %v3551_v20 = vadd.s32 536870912, %v3550_v30 }
 0x666   : > { %v5878_v19 = vclamps-f32 %v3479_v22, 30.0 }
 0x667   : > { %v3552_v42 = vshrl.u32 %v3551_v20, 30 }
 0x668   : > { %v3484_v56 = vsub.f32 0.0, %v5878_v19  ;;  %v3482_v0 = vmul.f32 1.442695, %v5878_v19 }
 0x669   : > { %v3553_v61 = vshll.u32 %v3552_v42, 30  ;;  %v3576_v8 = vsub.s32 4, %v3552_v42 }
 0x66a   : > { %v3485_v18 = vmul.f32 1.442695, %v3484_v56 }
 0x66b   : > { %v3554_v60 = vsub.s32 %v3550_v30, %v3553_v61  ;;  %v3577_v33 = vsel %vm3492_vm4, %v3576_v8, %v3552_v42  ;;  %v7826_v42 = vpop.permute.xlu0 %4204 }
 0x66c   : > { %6448 = vpow2.f32 %v3485_v18  ;;  %v3579_v52 = vsel %vm3491_vm5, 0, %v3577_v33 }
 0x66d   : > { %v3556_v37 = vsub.s32 0, %v3554_v60  ;;  %6450 = vpow2.f32 %v3482_v0  ;;  %v3583_v28 = vand.u32 3, %v3579_v52 }
 0x66f   : > { %v5880_v27 = vmin.u32 %v3556_v37, %v3554_v60  ;;  %vm3588_vm6 = vcmp.eq.s32.totalorder %v3583_v28, 2  ;;  %vm3585_vm7 = vcmp.eq.s32.totalorder %v3583_v28, 0  ;;  %vm3584_vm8 = vcmp.lt.s32.totalorder %v3583_v28, 2 }
 0x671   : > { %v3558_v29 = vclz %v5880_v27  ;;  %v7828_v27 = vpop.permute.xlu0 %5391 }
 0x673   : > { %v5881_v25 = vadd.s32 4294967294, %v3558_v29 }
 0x675   : > { %vm5882_vm3 = vcmp.lt.s32.totalorder %v5881_v25, 0  ;;  %v7830_v22 = vpop.permute.xlu0 %4206 }
 0x676   : > { %v3561_v3 = vsel %vm5882_vm3, 0, %v5881_v25 }
 0x677   : > { %v3562_v21 = vsub.s32 32, %v3561_v3  ;;  %v3566_v50 = vsub.s32 4294967266, %v3561_v3  ;;  %v3563_v12 = vshll.u32 %v3554_v60, %v3561_v3  ;;  %v3692_v60 = vadd.s32 3, %v3579_v52 }
 0x679   : > { %v3564_v32 = vshrl.u32 %v3546_v14, %v3562_v21  ;;  %v3567_v16 = vadd.s32 127, %v3566_v50  ;;  %v6449_v48 = vpop.eup %6448  ;;  %v3693_v37 = vand.u32 3, %v3692_v60 }
 0x67a   : > { %v6451_v41 = vpop.eup %6450 }
 0x67b   : > { %v3565_v9 = vor.u32 %v3564_v32, %v3563_v12  ;;  %v3568_v17 = vshll.u32 %v3567_v16, 23  ;;  %v3487_v10 = vadd.f32 %v6451_v41, %v6449_v48  ;;  %vm3695_vm11 = vcmp.eq.s32.totalorder %v3693_v37, 0  ;;  %v7834_v32 = vpop.permute.xlu0 %5393  ;;  %v7859_v16 = vld [vmem:[%s7193_s14 + $0x18] sm:$0xff] }
 0x67c   : > { %vm3698_vm12 = vcmp.eq.s32.totalorder %v3693_v37, 2  ;;  %v3596_v23 = vsub.f32 %v6451_v41, %v6449_v48  ;;  %vm3694_vm13 = vcmp.lt.s32.totalorder %v3693_v37, 2 }
 0x67d   : > { %v3569_v34 = vor.u32 4788187, %v3568_v17  ;;  %v3572_v36 = vcvt.s32.f32 %v3565_v9  ;;  %v3488_v11 = vmul.f32 0.5, %v3487_v10 }
 0x67e   : > { %v3597_v14 = vmul.f32 0.5, %v3596_v23 }
 0x67f   : > { %v3570_v13 = vand.u32 2147483647, %v3569_v34 }
 0x681   : > { %v3573_v15 = vmul.f32 %v3572_v36, %v3570_v13 }
 0x683   : > { %v3574_v24 = vxor.u32 2147483648, %v3573_v15 }
 0x685   : > { %v3575_v45 = vsel %vm3492_vm4, %v3574_v24, %v3573_v15 }
 0x686   : > { %v3578_v2 = vsel %vm3491_vm5, %v7724_v55, %v3575_v45  ;;  %v7850_v55 = vpop.permute.xlu0 %4208 }
 0x687   : > { %6452 = vcosq.f32 %v3578_v2 }
 0x688   : > { %6454 = vsinq.f32 %v3578_v2 }
 0x694   : > { %v6453_v46 = vpop.eup %6452 }
 0x695   : > { %v6455_v53 = vpop.eup %6454  ;;  %v3589_v31 = vxor.u32 2147483648, %v6453_v46 }
 0x696   : > { %v3586_v44 = vxor.u32 2147483648, %v6455_v53 }
 0x697   : > { %v3590_v7 = vsel %vm3588_vm6, %v3589_v31, %v6455_v53  ;;  %v3700_v25 = vsel %vm3698_vm12, %v3589_v31, %v6455_v53 }
 0x698   : > { %v3587_v47 = vsel %vm3585_vm7, %v6453_v46, %v3586_v44  ;;  %v3697_v29 = vsel %vm3695_vm11, %v6453_v46, %v3586_v44 }
 0x699   : > { %v3591_v30 = vsel %vm3584_vm8, %v3587_v47, %v3590_v7  ;;  %v3701_v3 = vsel %vm3694_vm13, %v3697_v29, %v3700_v25 }
 0x69a   : > { %v3592_v20 = vsel %vm3582_vm10, nan, %v3591_v30  ;;  %v3702_v50 = vsel %vm3582_vm10, nan, %v3701_v3 }
 0x69b   : > { %v3593_v61 = vadd.f32 %v3592_v20, %v3488_v11 }
 0x69d   : > { %6456 = vrcp.f32 %v3593_v61 }
 0x6aa   : > { %v6457_v21 = vpop.eup %6456 }
 0x6ab   : > { %v3598_v19 = vmul.f32 %v6457_v21, %v3597_v14  ;;  %v3703_v12 = vmul.f32 %v6457_v21, %v3702_v50 }
 0x6ad   : > { %6157 = vmatpush3.xpose.msk.msra.mxu0 %vm777_vm2, %v3598_v19  ;;  %6162 = vmatpush3.xpose.msk.msra.mxu1 %vm777_vm2, %v3703_v12 }
 0x6ae   : > { %6166 = vmatprep.subr.mxu0 %v8333_v59  ;;  %6171 = vmatprep.subr.mxu1 %v8333_v59 }
 0x6b0   : > { %6159 = vmatmul.mubr.msk.f32.vlgmr.msra.gmra.mxu0 %vm777_vm2, %v7605_v6  ;;  %6164 = vmatmul.mubr.msk.f32.vlgmr.msra.gmra.mxu1 %vm777_vm2, %v7387_v38 }
 0x6b1   : > { %6167 = vmatpush3.xpose.msk.msra.mxu0 %vm777_vm2, %v3598_v19  ;;  %6172 = vmatpush3.xpose.msk.msra.mxu1 %vm777_vm2, %v3703_v12 }
 0x6b2   : > { %6168 = vmatprep.mubr.msk.f32.mxu0 %vm6823_vm1, %v8333_v59  ;;  %6173 = vmatprep.mubr.msk.f32.mxu1 %vm6823_vm1, %v8333_v59 }
 0x6b3   : > { %6176 = vmatprep.subr.mxu0 %v8333_v59  ;;  %6181 = vmatprep.subr.mxu1 %v8333_v59 }
 0x6b4   : > { %6169 = vmatmul.mubr.msk.f32.vlgmr.msra.gmra.mxu0 %vm777_vm2, %v7387_v38  ;;  %6174 = vmatmul.mubr.msk.f32.vlgmr.msra.gmra.mxu1 %vm777_vm2, %v7605_v6  ;;  %v7869_v38 = vpop.permute.xlu0 %5395  ;;  %v8339_v6 = vld [vmem:[#allocation33_spill] sm:$0xff] }
 0x6b5   : > { %6177 = vmatpush3.msra.mxu0 %v7859_v16  ;;  %6182 = vmatpush3.msra.mxu1 %v7391_v40 }
 0x6b6   : > { %6178 = vmatprep.mubr.msk.f32.mxu0 %vm6823_vm1, %v8333_v59  ;;  %6183 = vmatprep.mubr.msk.f32.mxu1 %vm6823_vm1, %v8333_v59 }
 0x6b7   : > { %6186 = vmatprep.subr.mxu0 %v8333_v59  ;;  %6191 = vmatprep.subr.mxu1 %v8333_v59 }
 0x6b8   : > { %6179 = vmatmul.mubr.msk.f32.vlgmr.msra.gmra.mxu0 %vm777_vm2, %v7393_v54  ;;  %6184 = vmatmul.mubr.msk.f32.vlgmr.msra.gmra.mxu1 %vm777_vm2, %v8339_v6  ;;  %v7891_v9 = vpop.permute.xlu0 %4210 }
 0x6b9   : > { %6187 = vmatpush3.msra.mxu0 %v7859_v16  ;;  %6192 = vmatpush3.msra.mxu1 %v7391_v40 }
 0x6ba   : > { %6188 = vmatprep.mubr.msk.f32.mxu0 %vm6823_vm1, %v8333_v59  ;;  %6193 = vmatprep.mubr.msk.f32.mxu1 %vm6823_vm1, %v8333_v59 }
 0x6bb   : > { %6196 = vmatprep.subr.mxu0 %v8333_v59  ;;  %6201 = vmatprep.subr.mxu1 %v8333_v59 }
 0x6bc   : > { %6189 = vmatmul.mubr.msk.f32.vlgmr.msra.gmra.mxu0 %vm777_vm2, %v8339_v6  ;;  %6194 = vmatmul.mubr.msk.f32.vlgmr.msra.gmra.mxu1 %vm777_vm2, %v7393_v54  ;;  %v7893_v17 = vpop.permute.xlu0 %5397 }
 0x6bd   : > { %6198 = vmatprep.mubr.msk.f32.mxu0 %vm6823_vm1, %v8333_v59  ;;  %6203 = vmatprep.mubr.msk.f32.mxu1 %vm6823_vm1, %v8333_v59  ;;  %8340 = vst [vmem:[#allocation33_spill] sm:$0xff] %v7893_v17 }
 0x6c0   : > { %v7895_v56 = vpop.permute.xlu0 %5399 }
 0x6c1   : > { %8341 = vst [vmem:[#allocation37_spill] sm:$0xff] %v7895_v56 }
 0x6c4   : > { %v7897_v34 = vpop.permute.xlu0 %5401 }
 0x6c5   : > { %8342 = vst [vmem:[#allocation38_spill] sm:$0xff] %v7897_v34 }
 0x6d7   : > { %v3112_v13 = vpop.permute.xlu0 %3111 }
 0x6d8   : > { %3114 = vst.msk [vmem:[#allocation4 + $0x8] sm:$0xff] %vm1926_vm9, %v3112_v13 }
 0x770   : > { %v3775_v36 = vpop.f32.mrf.mxu0  ;;  %v3850_v18 = vpop.f32.mrf.mxu1 }
 0x771   : > { %v3854_v54 = vsub.f32 %v3775_v36, %v3850_v18 }
 0x772   : > { %v6160_v15 = vpop.f32.mrf.mxu0  ;;  %v6165_v0 = vpop.f32.mrf.mxu1 }
 0x773   : > { %v4005_v24 = vcombine.high %v3854_v54, %v3854_v54  ;;  %v4012_v45 = vrot.slane %v3854_v54, %v7411_v62  ;;  %v6476_v15 = vld [vmem:[#allocation10 + $0x80] sm:$0xff] }
 0x774   : > { %v3921_v2 = vpop.f32.mrf.mxu0  ;;  %v3991_v8 = vpop.f32.mrf.mxu1 }
 0x775   : > { %v4019_v33 = vrot.slane %v4005_v24, %v7411_v62  ;;  %v4020_v52 = vcombine.high %v4012_v45, %v4012_v45  ;;  %v4028_v48 = vrot.slane %v4012_v45, %v7411_v62  ;;  %v3992_v28 = vadd.f32 %v3991_v8, %v3921_v2 }
 0x776   : > { %v6170_v41 = vpop.f32.mrf.mxu0  ;;  %v6175_v46 = vpop.f32.mrf.mxu1 }
 0x777   : > { %v4021_v53 = vcombine.high %v4019_v33, %v4019_v33  ;;  %v4042_v44 = vrot.slane %v4020_v52, %v7411_v62  ;;  %v4035_v7 = vrot.slane %v4019_v33, %v7411_v62  ;;  %v4050_v47 = vcombine.high %v4028_v48, %v4028_v48  ;;  %v6477_v41 = vld [vmem:[#allocation10 + $0x88] sm:$0xff] }
 0x778   : > { %v7903_v10 = vpop.f32.mrf.mxu0  ;;  %v7905_v31 = vpop.f32.mrf.mxu1  ;;  %v4055_v11 = vcombine.high %v3992_v28, %v3992_v28  ;;  %v4062_v61 = vrot.slane %v3992_v28, %v7411_v62  ;;  %v4107_v37 = vrot.slane %v4028_v48, %v7434_v51 }
 0x779   : > { %v7911_v60 = vrot.slane %v4021_v53, %v7411_v62  ;;  %v4052_v23 = vcombine.high %v4042_v44, %v4042_v44  ;;  %v4051_v3 = vcombine.high %v4035_v7, %v4035_v7  ;;  %v4111_v14 = vrot.slane %v4042_v44, %v7434_v51 }
 0x77a   : > { %v6180_v30 = vpop.f32.mrf.mxu0  ;;  %v6185_v20 = vpop.f32.mrf.mxu1  ;;  %v4115_v21 = vrot.slane %v4050_v47, %v7434_v51  ;;  %v4069_v50 = vrot.slane %v4055_v11, %v7411_v62  ;;  %v4123_v6 = vrot.slane %v4035_v7, %v7434_v51  ;;  %v4070_v13 = vcombine.high %v4062_v61, %v4062_v61 }
 0x77b   : > { %v4078_v36 = vrot.slane %v4062_v61, %v7411_v62  ;;  %v4144_v0 = vmul.f32 %v6476_v15, %v4107_v37  ;;  %v4256_v24 = vmul.f32 %v7722_v5, %v4107_v37  ;;  %v4119_v2 = vrot.slane %v4052_v23, %v7434_v51 }
 0x77c   : > { %v4592_v29 = vpop.f32.mrf.mxu0  ;;  %v4662_v25 = vpop.f32.mrf.mxu1  ;;  %v4071_v45 = vcombine.high %v4069_v50, %v4069_v50  ;;  %v4092_v8 = vrot.slane %v4070_v13, %v7411_v62  ;;  %v4127_v48 = vrot.slane %v7911_v60, %v7434_v51  ;;  %v7930_v28 = vrot.slane %v4051_v3, %v7434_v51  ;;  %v8343_v3 = vld [vmem:[#allocation31_spill] sm:$0xff] }
 0x77d   : > { %v4100_v33 = vcombine.high %v4078_v36, %v4078_v36  ;;  %v4155_v52 = vrot.slane %v4078_v36, %v7434_v51  ;;  %v4145_v46 = vmul.f32 %v6477_v41, %v4111_v14  ;;  %v4085_v53 = vrot.slane %v4069_v50, %v7411_v62  ;;  %v8344_v36 = vld [vmem:[#allocation36_spill] sm:$0xff] }
 0x77e   : > { %v6190_v19 = vpop.f32.mrf.mxu0  ;;  %v6195_v12 = vpop.f32.mrf.mxu1  ;;  %v4102_v44 = vcombine.high %v4092_v8, %v4092_v8  ;;  %v4159_v7 = vrot.slane %v4092_v8, %v7434_v51  ;;  %v4146_v30 = vmul.f32 %v4115_v21, %v7564_v4  ;;  %v4148_v20 = vmul.f32 %v4123_v6, %v7647_v39 }
 0x77f   : > { %v4163_v47 = vrot.slane %v4100_v33, %v7434_v51  ;;  %v4224_v11 = vmul.f32 %v7722_v5, %v4155_v52  ;;  %v4099_v61 = vrot.slane %v4071_v45, %v7411_v62  ;;  %v4663_v37 = vadd.f32 %v4662_v25, %v4592_v29  ;;  %v6478_v25 = vld [vmem:[#allocation10 + $0xb0] sm:$0xff] }
 0x780   : > { %v4167_v23 = vrot.slane %v4102_v44, %v7434_v51  ;;  %v4225_v19 = vmul.f32 %v8343_v3, %v4159_v7  ;;  %v4147_v13 = vmul.f32 %v4119_v2, %v7642_v63  ;;  %v4149_v8 = vmul.f32 %v4127_v48, %v8344_v36 }
 0x781   : > { %v4226_v50 = vmul.f32 %v7826_v42, %v4163_v47  ;;  %v4232_v12 = vsub.f32 %v4144_v0, %v4224_v11  ;;  %v4257_v5 = vmul.f32 %v8343_v3, %v4111_v14  ;;  %v4171_v4 = vrot.slane %v4085_v53, %v7434_v51 }
 0x782   : > { %v4227_v33 = vmul.f32 %v7830_v22, %v4167_v23  ;;  %v4233_v18 = vsub.f32 %v4145_v46, %v4225_v19  ;;  %v4264_v29 = vmul.f32 %v6476_v15, %v4155_v52  ;;  %v7948_v44 = vmul.f32 %v6478_v25, %v7930_v28 }
 0x783   : > { %v4234_v45 = vsub.f32 %v4146_v30, %v4226_v50  ;;  %v4101_v54 = vcombine.high %v4085_v53, %v4085_v53  ;;  %v4175_v0 = vrot.slane %v4099_v61, %v7434_v51  ;;  %v4265_v11 = vmul.f32 %v6477_v41, %v4159_v7  ;;  %v6479_v53 = vld [vmem:[#allocation10 + $0x90] sm:$0xff] }
 0x784   : > { %v4258_v34 = vmul.f32 %v7826_v42, %v4115_v21  ;;  %v4240_v56 = vsel %vm777_vm2, %v4232_v12, 0.0  ;;  %v4241_v14 = vsel %vm777_vm2, %v4233_v18, 0.0  ;;  %v7954_v3 = vmul.f32 2.0, %v4663_v37 }
 0x785   : > { %v4259_v46 = vmul.f32 %v7830_v22, %v4119_v2  ;;  %v4228_v15 = vmul.f32 %v7850_v55, %v4171_v4  ;;  %v4235_v52 = vsub.f32 %v4147_v13, %v4227_v33  ;;  %v4242_v30 = vadd.f32 %v4241_v14, %v4240_v56 }
 0x786   : > { %v4243_v19 = vsel %vm777_vm2, %v4234_v45, 0.0  ;;  %v4266_v50 = vmul.f32 %v6479_v53, %v4163_v47  ;;  %v4272_v17 = vadd.f32 %v4264_v29, %v4256_v24  ;;  %v4273_v41 = vadd.f32 %v4265_v11, %v4257_v5 }
 0x787   : > { %v4260_v42 = vmul.f32 %v7850_v55, %v4123_v6  ;;  %v4179_v21 = vrot.slane %v4101_v54, %v7434_v51  ;;  %v4229_v18 = vmul.f32 %v7891_v9, %v4175_v0  ;;  %v4244_v7 = vadd.f32 %v4243_v19, %v4242_v30 }
 0x788   : > { %v4103_v37 = vcombine.high %v4099_v61, %v4099_v61  ;;  %v4267_v22 = vmul.f32 %v4167_v23, %v7642_v63  ;;  %v4281_v2 = vsel %vm777_vm2, %v4273_v41, 0.0  ;;  %v4677_v56 = vand.u32 2147483647, %v7954_v3  ;;  %v8345_v61 = vld [vmem:[#allocation34_spill] sm:$0xff] }
 0x789   : > { %v4261_v12 = vmul.f32 %v7891_v9, %v4127_v48  ;;  %v4236_v13 = vsub.f32 %v4148_v20, %v4228_v15  ;;  %v4245_v24 = vsel %vm777_vm2, %v4235_v52, 0.0  ;;  %v4268_v47 = vmul.f32 %v4171_v4, %v7647_v39  ;;  %v8347_v52 = vld [vmem:[#allocation35_spill] sm:$0xff] }
 0x78a   : > { %v4246_v55 = vadd.f32 %v4245_v24, %v4244_v7  ;;  %v4274_v6 = vadd.f32 %v4266_v50, %v4258_v34  ;;  %v4280_v54 = vsel %vm777_vm2, %v4272_v17, 0.0  ;;  %v4680_v5 = vand.u32 2139095040, %v7954_v3 }
 0x78b   : > { %v4230_v33 = vmul.f32 %v8345_v61, %v4179_v21  ;;  %v4237_v63 = vsub.f32 %v4149_v8, %v4229_v18  ;;  %v4282_v23 = vadd.f32 %v4281_v2, %v4280_v54  ;;  %v8346_v45 = vcombine.high %v7911_v60, %v7911_v60  ;;  %v6480_v18 = vld [vmem:[#allocation10 + $0xb8] sm:$0xff] }
 0x78c   : > { %v4275_v48 = vadd.f32 %v4267_v22, %v4259_v46  ;;  %v4681_v20 = vshrl.u32 %v4680_v5, 23  ;;  %v4684_v39 = vand.u32 8388607, %v4677_v56  ;;  %v4183_v34 = vrot.slane %v4103_v37, %v7434_v51 }
 0x78d   : > { %v4135_v9 = vrot.slane %v8346_v45, %v7434_v51  ;;  %v4247_v17 = vsel %vm777_vm2, %v4236_v13, 0.0  ;;  %v4269_v4 = vmul.f32 %v4175_v0, %v8344_v36  ;;  %v4276_v29 = vadd.f32 %v4268_v47, %v4260_v42 }
 0x78e   : > { %v4270_v11 = vmul.f32 %v6478_v25, %v4179_v21  ;;  %v4248_v8 = vadd.f32 %v4247_v17, %v4246_v55  ;;  %v4283_v14 = vsel %vm777_vm2, %v4274_v6, 0.0  ;;  %v5904_v15 = vadd.s32 4294967169, %v4681_v20 }
 0x78f   : > { %v4231_v60 = vmul.f32 %v8347_v52, %v4183_v34  ;;  %v4238_v46 = vsub.f32 %v7948_v44, %v4230_v33  ;;  %v4249_v30 = vsel %vm777_vm2, %v4237_v63, 0.0  ;;  %v4262_v19 = vmul.f32 %v8345_v61, %v7930_v28 }
 0x790   : > { %v4284_v53 = vadd.f32 %v4283_v14, %v4282_v23  ;;  %v4685_v50 = vor.u32 8388608, %v4684_v39  ;;  %v4687_v41 = vadd.s32 1, %v5904_v15  ;;  %v4151_v36 = vmul.f32 %v6480_v18, %v4135_v9 }
 0x791   : > { %v4285_v25 = vsel %vm777_vm2, %v4275_v48, 0.0  ;;  %v4271_v0 = vmul.f32 %v6480_v18, %v4183_v34  ;;  %v4277_v42 = vadd.f32 %v4269_v4, %v4261_v12  ;;  %v4278_v21 = vadd.f32 %v4270_v11, %v4262_v19 }
 0x792   : > { %v4286_v7 = vadd.f32 %v4285_v25, %v4284_v53  ;;  %vm4688_vm14 = vcmp.gt.s32.totalorder %v4687_v41, 0  ;;  %v4287_v37 = vsel %vm777_vm2, %v4276_v29, 0.0  ;;  %v4239_v44 = vsub.f32 %v4151_v36, %v4231_v60 }
 0x793   : > { %v4250_v22 = vadd.f32 %v4249_v30, %v4248_v8  ;;  %v4689_v2 = vsel %vm4688_vm14, %v4687_v41, 0  ;;  %v4263_v13 = vmul.f32 %v8347_v52, %v4135_v9  ;;  %v4725_v47 = vshll.u32 %v4685_v50, 8 }
 0x794   : > { %v4288_v28 = vadd.f32 %v4287_v37, %v4286_v7  ;;  %v4691_v24 = vand.u32 31, %v4689_v2  ;;  %v4690_v55 = vshrl.u32 %v4689_v2, 5  ;;  %v4289_v54 = vsel %vm777_vm2, %v4277_v42, 0.0 }
 0x795   : > { %v4279_v6 = vadd.f32 %v4271_v0, %v4263_v13  ;;  %v4251_v5 = vsel %vm777_vm2, %v4238_v46, 0.0  ;;  %v4291_v61 = vsel %vm777_vm2, %v4278_v21, 0.0  ;;  %v4253_v33 = vsel %vm777_vm2, %v4239_v44, 0.0 }
 0x796   : > { %v4692_v12 = vsub.s32 32, %v4691_v24  ;;  %v4252_v63 = vadd.f32 %v4251_v5, %v4250_v22  ;;  %v4694_v23 = vshll.u32 %v8326_v1, %v4691_v24  ;;  %v4697_v45 = vshll.u32 %v8327_v57, %v4691_v24 }
 0x797   : > { %v4700_v9 = vshll.u32 %v8328_v58, %v4691_v24  ;;  %v4290_v48 = vadd.f32 %v4289_v54, %v4288_v28  ;;  %v4703_v17 = vshll.u32 %v8329_v49, %v4691_v24  ;;  %v4706_v29 = vshll.u32 %v8330_v35, %v4691_v24 }
 0x798   : > { %v4695_v20 = vshrl.u32 %v8327_v57, %v4692_v12  ;;  %v4698_v39 = vshrl.u32 %v8328_v58, %v4692_v12  ;;  %v4701_v34 = vshrl.u32 %v8329_v49, %v4692_v12  ;;  %v4704_v4 = vshrl.u32 %v8330_v35, %v4692_v12 }
 0x799   : > { %v4707_v11 = vshrl.u32 %v8331_v43, %v4692_v12  ;;  %vm4709_vm15 = vcmp.lt.s32.totalorder %v4690_v55, 1  ;;  %vm4712_vm3 = vcmp.lt.s32.totalorder %v4690_v55, 4  ;;  %v4292_v57 = vadd.f32 %v4291_v61, %v4290_v48 }
 0x79a   : > { %v4696_v8 = vor.u32 %v4695_v20, %v4694_v23  ;;  %v4699_v14 = vor.u32 %v4698_v39, %v4697_v45  ;;  %v4702_v15 = vor.u32 %v4701_v34, %v4700_v9  ;;  %v4705_v52 = vor.u32 %v4704_v4, %v4703_v17 }
 0x79b   : > { %v4708_v60 = vor.u32 %v4707_v11, %v4706_v29  ;;  %v4254_v46 = vadd.f32 %v4253_v33, %v4252_v63  ;;  %v4693_v58 = vshrl.u32 %v8326_v1, %v4692_v12  ;;  %v4293_v19 = vsel %vm777_vm2, %v4279_v6, 0.0 }
 0x79c   : > { %v4714_v30 = vsel %vm4712_vm3, %v4702_v15, 2102212464  ;;  %v4717_v49 = vsel %vm4709_vm15, %v4696_v8, %v4699_v14  ;;  %vm4711_vm4 = vcmp.lt.s32.totalorder %v4690_v55, 3  ;;  %v4718_v35 = vsel %vm4712_vm3, %v4705_v52, 920167782 }
 0x79d   : > { %v4721_v43 = vsel %vm4709_vm15, %v4699_v14, %v4702_v15  ;;  %v4722_v53 = vsel %vm4712_vm3, %v4708_v60, 1326507024  ;;  %4296 = vst.msk [vmem:[#allocation4 + $0x10] sm:$0xff] %vm777_vm2, %v4254_v46  ;;  %vm4710_vm5 = vcmp.lt.s32.totalorder %v4690_v55, 2  ;;  %v4713_v50 = vsel %vm4709_vm15, %v4693_v58, %v4696_v8 }
 0x79e   : > { %v4719_v41 = vsel %vm4711_vm4, %v4702_v15, %v4718_v35  ;;  %v4723_v18 = vsel %vm4711_vm4, %v4705_v52, %v4722_v53  ;;  %v4715_v36 = vsel %vm4711_vm4, %v4699_v14, %v4714_v30  ;;  %v4294_v0 = vadd.f32 %v4293_v19, %v4292_v57 }
 0x79f   : > { %v4720_v25 = vsel %vm4710_vm5, %v4717_v49, %v4719_v41  ;;  %v4724_v1 = vsel %vm4710_vm5, %v4721_v43, %v4723_v18  ;;  %v4716_v44 = vsel %vm4710_vm5, %v4713_v50, %v4715_v36  ;;  %v8348_v63 = vsub.f32 %v7903_v10, %v7905_v31 }
 0x7a0   : > { %v8009_v42 = vmul.u32.u64.low %v4725_v47, %v4724_v1  ;;  %v8010_v21 = vmul.u32.u64.high %v4725_v47, %v4724_v1, %v8009_v42  ;;  %v8012_v7 = vmul.u32.u64.low %v4725_v47, %v4720_v25  ;;  %v8013_v37 = vmul.u32.u64.high %v4725_v47, %v4720_v25, %v8012_v7  ;;  %4298 = vrot.lane.b32.xlu1 %v4294_v0, %s6831_s20 }
 0x7a1   : > { %v4732_v2 = vmul.u32 %v4725_v47, %v4716_v44  ;;  %v4666_v23 = vmul.f32 2.0, %v8348_v63  ;;  %vm4679_vm8 = vcmp.lt.s32.totalorder %v7954_v3, 0  ;;  %vm4678_vm10 = vcmp.le.f32.partialorder %v4677_v56, 0.7853982 }
 0x7a2   : > { %vm4734_vm6 = vc.u32 %v8010_v21, %v8012_v7  ;;  %v4735_v22 = vadd.s32 1, %v8013_v37  ;;  %v4733_v9 = vadd.s32 %v8012_v7, %v8010_v21  ;;  %vm4769_vm14 = vweird.f32 %v7954_v3 }
 0x7a3   : > { %v5903_v20 = vclamps-f32 %v4666_v23, 30.0 }
 0x7a4   : > { %v4736_v13 = vsel %vm4734_vm6, %v4735_v22, %v8013_v37 }
 0x7a5   : > { %v4737_v28 = vadd.s32 %v4736_v13, %v4732_v2  ;;  %v4671_v11 = vsub.f32 0.0, %v5903_v20  ;;  %v4669_v10 = vmul.f32 1.442695, %v5903_v20 }
 0x7a7   : > { %v4738_v24 = vadd.s32 536870912, %v4737_v28  ;;  %v4672_v52 = vmul.f32 1.442695, %v4671_v11 }
 0x7a9   : > { %v4739_v55 = vshrl.u32 %v4738_v24, 30  ;;  %6458 = vpow2.f32 %v4672_v52 }
 0x7aa   : > { %6460 = vpow2.f32 %v4669_v10 }
 0x7ab   : > { %v4740_v6 = vshll.u32 %v4739_v55, 30  ;;  %v4763_v58 = vsub.s32 4, %v4739_v55 }
 0x7ad   : > { %v4741_v54 = vsub.s32 %v4737_v28, %v4740_v6  ;;  %v4764_v30 = vsel %vm4679_vm8, %v4763_v58, %v4739_v55 }
 0x7ae   : > { %v4766_v49 = vsel %vm4678_vm10, 0, %v4764_v30 }
 0x7af   : > { %v4743_v5 = vsub.s32 0, %v4741_v54  ;;  %v4770_v35 = vand.u32 3, %v4766_v49  ;;  %v4879_v7 = vadd.s32 3, %v4766_v49 }
 0x7b1   : > { %v5905_v12 = vmin.u32 %v4743_v5, %v4741_v54  ;;  %vm4775_vm11 = vcmp.eq.s32.totalorder %v4770_v35, 2  ;;  %vm4772_vm12 = vcmp.eq.s32.totalorder %v4770_v35, 0  ;;  %vm4771_vm13 = vcmp.lt.s32.totalorder %v4770_v35, 2  ;;  %v5494_v5 = vld [vmem:[#allocation14 + $0x8] sm:$0xff] }
 0x7b2   : > { %v4880_v37 = vand.u32 3, %v4879_v7  ;;  %v6483_v7 = vld [vmem:[#allocation10 + $0xd0] sm:$0xff] }
 0x7b3   : > { %v4745_v61 = vclz %v5905_v12  ;;  %v5489_v12 = vld [vmem:[#allocation4] sm:$0xff] }
 0x7b4   : > { %vm4882_vm15 = vcmp.eq.s32.totalorder %v4880_v37, 0  ;;  %vm4885_vm3 = vcmp.eq.s32.totalorder %v4880_v37, 2  ;;  %vm4881_vm4 = vcmp.lt.s32.totalorder %v4880_v37, 2 }
 0x7b5   : > { %v5906_v33 = vadd.s32 4294967294, %v4745_v61  ;;  %v5490_v61 = vld [vmem:[#allocation4 + $0x8] sm:$0xff] }
 0x7b6   : > { %v6459_v19 = vpop.eup %6458 }
 0x7b7   : > { %vm5907_vm7 = vcmp.lt.s32.totalorder %v5906_v33, 0  ;;  %v6461_v43 = vpop.eup %6460 }
 0x7b8   : > { %v4748_v45 = vsel %vm5907_vm7, 0, %v5906_v33  ;;  %v4674_v41 = vadd.f32 %v6461_v43, %v6459_v19  ;;  %v4783_v2 = vsub.f32 %v6461_v43, %v6459_v19 }
 0x7b9   : > { %v4749_v47 = vsub.s32 32, %v4748_v45  ;;  %v4753_v48 = vsub.s32 4294967266, %v4748_v45  ;;  %v4750_v39 = vshll.u32 %v4741_v54, %v4748_v45 }
 0x7ba   : > { %v4675_v1 = vmul.f32 0.5, %v4674_v41  ;;  %v4784_v28 = vmul.f32 0.5, %v4783_v2  ;;  %v6481_v41 = vld [vmem:[#allocation10 + $0xc0] sm:$0xff] }
 0x7bb   : > { %v4751_v34 = vshrl.u32 %v4733_v9, %v4749_v47  ;;  %v4754_v17 = vadd.s32 127, %v4753_v48 }
 0x7bd   : > { %v4752_v4 = vor.u32 %v4751_v34, %v4750_v39  ;;  %v4755_v29 = vshll.u32 %v4754_v17, 23 }
 0x7bf   : > { %v4756_v8 = vor.u32 4788187, %v4755_v29  ;;  %v4759_v15 = vcvt.s32.f32 %v4752_v4 }
 0x7c1   : > { %v4757_v14 = vand.u32 2147483647, %v4756_v8 }
 0x7c3   : > { %v4760_v60 = vmul.f32 %v4759_v15, %v4757_v14 }
 0x7c5   : > { %v4761_v31 = vxor.u32 2147483648, %v4760_v60 }
 0x7c7   : > { %v4762_v57 = vsel %vm4679_vm8, %v4761_v31, %v4760_v60 }
 0x7c8   : > { %v4765_v46 = vsel %vm4678_vm10, %v7954_v3, %v4762_v57  ;;  %v5493_v3 = vld [vmem:[#allocation14] sm:$0xff] }
 0x7c9   : > { %6462 = vcosq.f32 %v4765_v46 }
 0x7ca   : > { %6464 = vsinq.f32 %v4765_v46 }
 0x7d6   : > { %v6463_v53 = vpop.eup %6462 }
 0x7d7   : > { %v6465_v50 = vpop.eup %6464  ;;  %v4776_v18 = vxor.u32 2147483648, %v6463_v53 }
 0x7d8   : > { %v4773_v36 = vxor.u32 2147483648, %v6465_v50 }
 0x7d9   : > { %v4777_v56 = vsel %vm4775_vm11, %v4776_v18, %v6465_v50  ;;  %v4887_v22 = vsel %vm4885_vm3, %v4776_v18, %v6465_v50 }
 0x7da   : > { %v4774_v25 = vsel %vm4772_vm12, %v6463_v53, %v4773_v36  ;;  %v4884_v44 = vsel %vm4882_vm15, %v6463_v53, %v4773_v36  ;;  %v8349_v36 = vld [vmem:[#allocation32_spill] sm:$0xff] }
 0x7db   : > { %v4778_v0 = vsel %vm4771_vm13, %v4774_v25, %v4777_v56  ;;  %v4888_v13 = vsel %vm4881_vm4, %v4884_v44, %v4887_v22  ;;  %v6484_v44 = vld [vmem:[#allocation10 + $0xe0] sm:$0xff] }
 0x7dc   : > { %v4779_v42 = vsel %vm4769_vm14, nan, %v4778_v0  ;;  %v4889_v55 = vsel %vm4769_vm14, nan, %v4888_v13  ;;  %v6482_v0 = vld [vmem:[#allocation10 + $0xc8] sm:$0xff] }
 0x7dd   : > { %v4780_v21 = vadd.f32 %v4779_v42, %v4675_v1 }
 0x7df   : > { %6466 = vrcp.f32 %v4780_v21 }
 0x7ec   : > { %v6467_v24 = vpop.eup %6466 }
 0x7ed   : > { %v4785_v6 = vmul.f32 %v6467_v24, %v4784_v28  ;;  %v4890_v54 = vmul.f32 %v6467_v24, %v4889_v55  ;;  %v6485_v28 = vld [vmem:[#allocation10 + $0xd8] sm:$0xff] }
 0x7ef   : > { %6197 = vmatpush3.xpose.msk.msra.mxu0 %vm777_vm2, %v4785_v6  ;;  %6202 = vmatpush3.xpose.msk.msra.mxu1 %vm777_vm2, %v4890_v54 }
 0x7f0   : > { %6206 = vmatprep.subr.mxu0 %v8333_v59  ;;  %6211 = vmatprep.subr.mxu1 %v8333_v59 }
 0x7f2   : > { %6199 = vmatmul.mubr.msk.f32.vlgmr.msra.gmra.mxu0 %vm777_vm2, %v7859_v16  ;;  %6204 = vmatmul.mubr.msk.f32.vlgmr.msra.gmra.mxu1 %vm777_vm2, %v7391_v40 }
 0x7f3   : > { %6207 = vmatpush3.xpose.msk.msra.mxu0 %vm777_vm2, %v4785_v6  ;;  %6212 = vmatpush3.xpose.msk.msra.mxu1 %vm777_vm2, %v4890_v54 }
 0x7f4   : > { %6208 = vmatprep.mubr.msk.f32.mxu0 %vm6823_vm1, %v8333_v59  ;;  %6213 = vmatprep.mubr.msk.f32.mxu1 %vm6823_vm1, %v8333_v59 }
 0x7f5   : > { %6216 = vmatprep.subr.mxu0 %v5494_v5 }
 0x7f6   : > { %6209 = vmatmul.mubr.msk.f32.vlgmr.msra.gmra.mxu0 %vm777_vm2, %v7391_v40  ;;  %6214 = vmatmul.mubr.msk.f32.vlgmr.msra.gmra.mxu1 %vm777_vm2, %v7859_v16 }
 0x7f7   : > { %6217 = vmatpush3.msra.mxu0 %v5494_v5  ;;  %6220 = vmatprep.mubr.msk.f32.mxu0 %vm431_vm0, %v5489_v12  ;;  %v6486_v5 = vld [vmem:[#allocation10 + $0xe8] sm:$0xff] }
 0x7f8   : > { %6218 = vmatprep.subr.mxu0 %v5493_v3 }
 0x7f9   : > { %6219 = vmatpush3.msra.mxu0 %v5493_v3 }
 0x7fa   : > { %6221 = vmatmul.mubr.msk.f32.vlgmr.msra.gmra.mxu0 %vm431_vm0, %v5490_v61 }
 0x812   : > { %v4299_v59 = vpop.permute.xlu1 %4298 }
 0x813   : > { %4301 = vst.msk [vmem:[#allocation4 + $0x10] sm:$0xff] %vm1926_vm9, %v4299_v59 }
 0x81a   : > { %v5491_v33 = vld [vmem:[#allocation4 + $0x10] sm:$0xff] }
 0x81b   : > { %6223 = vmatprep.mubr.msk.f32.mxu0 %vm431_vm0, %v5491_v33  ;;  %v6487_v33 = vld [vmem:[#allocation10 + $0xf0] sm:$0xff] }
 0x8b2   : > { %v4962_v40 = vpop.f32.mrf.mxu0  ;;  %v5037_v63 = vpop.f32.mrf.mxu1 }
 0x8b3   : > { %v5041_v16 = vsub.f32 %v4962_v40, %v5037_v63 }
 0x8b4   : > { %v6200_v23 = vpop.f32.mrf.mxu0  ;;  %v6205_v45 = vpop.f32.mrf.mxu1 }
 0x8b5   : > { %v5192_v9 = vcombine.high %v5041_v16, %v5041_v16  ;;  %v5199_v47 = vrot.slane %v5041_v16, %v7411_v62 }
 0x8b6   : > { %v5108_v48 = vpop.f32.mrf.mxu0  ;;  %v5178_v20 = vpop.f32.mrf.mxu1 }
 0x8b7   : > { %v5206_v39 = vrot.slane %v5192_v9, %v7411_v62  ;;  %v5207_v34 = vcombine.high %v5199_v47, %v5199_v47  ;;  %v5215_v17 = vrot.slane %v5199_v47, %v7411_v62  ;;  %v5179_v4 = vadd.f32 %v5178_v20, %v5108_v48 }
 0x8b8   : > { %v6210_v29 = vpop.f32.mrf.mxu0  ;;  %v6215_v11 = vpop.f32.mrf.mxu1 }
 0x8b9   : > { %v5208_v8 = vcombine.high %v5206_v39, %v5206_v39  ;;  %v5222_v14 = vrot.slane %v5206_v39, %v7411_v62  ;;  %v5229_v15 = vrot.slane %v5207_v34, %v7411_v62  ;;  %v5237_v52 = vcombine.high %v5215_v17, %v5215_v17 }
 0x8ba   : > { %v6222_v60 = vpop.f32.mrf.mxu0  ;;  %v5294_v57 = vrot.slane %v5215_v17, %v7434_v51  ;;  %v5242_v30 = vcombine.high %v5179_v4, %v5179_v4  ;;  %v5249_v43 = vrot.slane %v5179_v4, %v7411_v62 }
 0x8bb   : > { %v8063_v10 = vrot.slane %v5208_v8, %v7411_v62  ;;  %v5239_v31 = vcombine.high %v5229_v15, %v5229_v15  ;;  %5593 = vst [vmem:[%s8066_s19 + $0x8] sm:$0xff] %v6222_v60  ;;  %v5238_v46 = vcombine.high %v5222_v14, %v5222_v14  ;;  %v5298_v58 = vrot.slane %v5229_v15, %v7434_v51 }
 0x8bc   : > { %v5573_v49 = vpop.f32.mrf.mxu0  ;;  %v5302_v19 = vrot.slane %v5237_v52, %v7434_v51  ;;  %v5310_v35 = vrot.slane %v5222_v14, %v7434_v51  ;;  %v5331_v18 = vmul.f32 %v6481_v41, %v5294_v57  ;;  %v5443_v56 = vmul.f32 %v8349_v36, %v5294_v57  ;;  %v8350_v14 = vld [vmem:[#allocation33_spill] sm:$0xff] }
 0x8bd   : > { %5592 = vst [vmem:[%s8066_s19] sm:$0xff] %v5573_v49  ;;  %v5306_v53 = vrot.slane %v5239_v31, %v7434_v51  ;;  %v5314_v50 = vrot.slane %v8063_v10, %v7434_v51  ;;  %v5240_v25 = vcombine.high %v8063_v10, %v8063_v10  ;;  %v8081_v1 = vrot.slane %v5238_v46, %v7434_v51 }
 0x8be   : > { %v5332_v42 = vmul.f32 %v6482_v0, %v5298_v58  ;;  %v5256_v21 = vrot.slane %v5242_v30, %v7411_v62  ;;  %v5333_v37 = vmul.f32 %v6483_v7, %v5302_v19  ;;  %v8084_v22 = vmul.f32 %v6484_v44, %v5310_v35  ;;  %v8351_v30 = vld [vmem:[#allocation37_spill] sm:$0xff] }
 0x8bf   : > { %v5257_v2 = vcombine.high %v5249_v43, %v5249_v43  ;;  %v5265_v13 = vrot.slane %v5249_v43, %v7411_v62  ;;  %v5334_v24 = vmul.f32 %v6485_v28, %v5306_v53  ;;  %v5444_v55 = vmul.f32 %v7821_v26, %v5298_v58 }
 0x8c0   : > { %v5258_v6 = vcombine.high %v5256_v21, %v5256_v21  ;;  %v5272_v54 = vrot.slane %v5256_v21, %v7411_v62  ;;  %v8089_v3 = vmul.f32 %v6486_v5, %v5314_v50  ;;  %v8094_v40 = vmul.f32 %v6487_v33, %v8081_v1 }
 0x8c1   : > { %v5279_v12 = vrot.slane %v5257_v2, %v7411_v62  ;;  %v5287_v61 = vcombine.high %v5265_v13, %v5265_v13  ;;  %v5342_v59 = vrot.slane %v5265_v13, %v7434_v51  ;;  %v5445_v20 = vmul.f32 %v7828_v27, %v5302_v19 }
 0x8c2   : > { %v5286_v63 = vrot.slane %v5258_v6, %v7411_v62  ;;  %v5288_v16 = vcombine.high %v5272_v54, %v5272_v54  ;;  %v5358_v23 = vrot.slane %v5272_v54, %v7434_v51  ;;  %v5446_v39 = vmul.f32 %v7834_v32, %v5306_v53 }
 0x8c3   : > { %v5289_v45 = vcombine.high %v5279_v12, %v5279_v12  ;;  %v5346_v9 = vrot.slane %v5279_v12, %v7434_v51  ;;  %v5350_v47 = vrot.slane %v5287_v61, %v7434_v51  ;;  %v5411_v48 = vmul.f32 %v8349_v36, %v5342_v59  ;;  %v6488_v61 = vld [vmem:[#allocation10 + $0xf8] sm:$0xff] }
 0x8c4   : > { %v5362_v34 = vrot.slane %v5286_v63, %v7434_v51  ;;  %v5366_v17 = vrot.slane %v5288_v16, %v7434_v51  ;;  %v5447_v8 = vmul.f32 %v7869_v38, %v5310_v35  ;;  %v5448_v15 = vmul.f32 %v8350_v14, %v5314_v50  ;;  %v8352_v16 = vld [vmem:[#allocation38_spill] sm:$0xff] }
 0x8c5   : > { %v5354_v62 = vrot.slane %v5289_v45, %v7434_v51  ;;  %v5412_v4 = vmul.f32 %v7821_v26, %v5346_v9  ;;  %v5413_v29 = vmul.f32 %v7828_v27, %v5350_v47  ;;  %v5419_v11 = vsub.f32 %v5331_v18, %v5411_v48 }
 0x8c6   : > { %v5415_v52 = vmul.f32 %v7869_v38, %v5358_v23  ;;  %v5416_v60 = vmul.f32 %v8350_v14, %v5362_v34  ;;  %v5451_v46 = vmul.f32 %v6481_v41, %v5342_v59  ;;  %v5290_v58 = vcombine.high %v5286_v63, %v5286_v63 }
 0x8c7   : > { %v5414_v10 = vmul.f32 %v7834_v32, %v5354_v62  ;;  %v5420_v31 = vsub.f32 %v5332_v42, %v5412_v4  ;;  %v5421_v57 = vsub.f32 %v5333_v37, %v5413_v29  ;;  %v5417_v49 = vmul.f32 %v8351_v30, %v5366_v17 }
 0x8c8   : > { %v5452_v26 = vmul.f32 %v6482_v0, %v5346_v9  ;;  %v5322_v27 = vrot.slane %v5240_v25, %v7434_v51  ;;  %v5427_v35 = vsel %vm777_vm2, %v5419_v11, 0.0  ;;  %v5453_v53 = vmul.f32 %v6483_v7, %v5350_v47 }
 0x8c9   : > { %v5422_v19 = vsub.f32 %v5334_v24, %v5414_v10  ;;  %v5428_v43 = vsel %vm777_vm2, %v5420_v31, 0.0  ;;  %v5423_v38 = vsub.f32 %v8084_v22, %v5415_v52  ;;  %v5424_v50 = vsub.f32 %v8089_v3, %v5416_v60 }
 0x8ca   : > { %v5429_v32 = vadd.f32 %v5428_v43, %v5427_v35  ;;  %v5454_v18 = vmul.f32 %v6485_v28, %v5354_v62  ;;  %v5430_v41 = vsel %vm777_vm2, %v5421_v57, 0.0  ;;  %v5455_v36 = vmul.f32 %v6484_v44, %v5358_v23 }
 0x8cb   : > { %v5459_v42 = vadd.f32 %v5451_v46, %v5443_v56  ;;  %v5460_v21 = vadd.f32 %v5452_v26, %v5444_v55  ;;  %v5432_v25 = vsel %vm777_vm2, %v5422_v19, 0.0  ;;  %v5456_v37 = vmul.f32 %v6486_v5, %v5362_v34 }
 0x8cc   : > { %v5431_v0 = vadd.f32 %v5430_v41, %v5429_v32  ;;  %v5461_v2 = vadd.f32 %v5453_v53, %v5445_v20  ;;  %v5462_v13 = vadd.f32 %v5454_v18, %v5446_v39  ;;  %v5370_v22 = vrot.slane %v5290_v58, %v7434_v51 }
 0x8cd   : > { %v5467_v24 = vsel %vm777_vm2, %v5459_v42, 0.0  ;;  %v5468_v7 = vsel %vm777_vm2, %v5460_v21, 0.0  ;;  %v5425_v6 = vsub.f32 %v8094_v40, %v5417_v49  ;;  %v5449_v56 = vmul.f32 %v8351_v30, %v8081_v1 }
 0x8ce   : > { %v5433_v28 = vadd.f32 %v5432_v25, %v5431_v0  ;;  %v5469_v54 = vadd.f32 %v5468_v7, %v5467_v24  ;;  %v5434_v44 = vsel %vm777_vm2, %v5423_v38, 0.0  ;;  %v5463_v55 = vadd.f32 %v5455_v36, %v5447_v8 }
 0x8cf   : > { %v5470_v5 = vsel %vm777_vm2, %v5461_v2, 0.0  ;;  %v5457_v3 = vmul.f32 %v6487_v33, %v5366_v17  ;;  %v5338_v59 = vmul.f32 %v6488_v61, %v5322_v27  ;;  %v5418_v23 = vmul.f32 %v8352_v16, %v5370_v22 }
 0x8d0   : > { %v5435_v12 = vadd.f32 %v5434_v44, %v5433_v28  ;;  %v5471_v63 = vadd.f32 %v5470_v5, %v5469_v54  ;;  %v5436_v51 = vsel %vm777_vm2, %v5424_v50, 0.0  ;;  %v5458_v40 = vmul.f32 %v6488_v61, %v5370_v22 }
 0x8d1   : > { %v5464_v45 = vadd.f32 %v5456_v37, %v5448_v15  ;;  %v5472_v9 = vsel %vm777_vm2, %v5462_v13, 0.0  ;;  %v5426_v1 = vsub.f32 %v5338_v59, %v5418_v23  ;;  %v5450_v20 = vmul.f32 %v8352_v16, %v5322_v27 }
 0x8d2   : > { %v5473_v47 = vadd.f32 %v5472_v9, %v5471_v63  ;;  %v5437_v48 = vadd.f32 %v5436_v51, %v5435_v12  ;;  %v5465_v39 = vadd.f32 %v5457_v3, %v5449_v56  ;;  %v5474_v33 = vsel %vm777_vm2, %v5463_v55, 0.0 }
 0x8d3   : > { %v5438_v34 = vsel %vm777_vm2, %v5425_v6, 0.0  ;;  %v5466_v4 = vadd.f32 %v5458_v40, %v5450_v20  ;;  %v5476_v29 = vsel %vm777_vm2, %v5464_v45, 0.0  ;;  %v5440_v11 = vsel %vm777_vm2, %v5426_v1, 0.0 }
 0x8d4   : > { %v5475_v17 = vadd.f32 %v5474_v33, %v5473_v47  ;;  %v5439_v62 = vadd.f32 %v5438_v34, %v5437_v48  ;;  %v5478_v15 = vsel %vm777_vm2, %v5465_v39, 0.0 }
 0x8d5   : > { %v5480_v60 = vsel %vm777_vm2, %v5466_v4, 0.0 }
 0x8d6   : > { %v5477_v8 = vadd.f32 %v5476_v29, %v5475_v17  ;;  %v5441_v14 = vadd.f32 %v5440_v11, %v5439_v62 }
 0x8d8   : > { %v5479_v52 = vadd.f32 %v5478_v15, %v5477_v8  ;;  %5483 = vst.msk [vmem:[#allocation4 + $0x18] sm:$0xff] %vm777_vm2, %v5441_v14 }
 0x8da   : > { %v5481_v10 = vadd.f32 %v5480_v60, %v5479_v52 }
 0x8dc   : > { %5485 = vrot.lane.b32.xlu0 %v5481_v10, %s6831_s20 }
 0x94e   : > { %v5486_v31 = vpop.permute.xlu0 %5485 }
 0x94f   : > { %5488 = vst.msk [vmem:[#allocation4 + $0x18] sm:$0xff] %vm1926_vm9, %v5486_v31 }
 0x956   : > { %v5492_v57 = vld [vmem:[#allocation4 + $0x18] sm:$0xff] }
 0x957   : > { %6224 = vmatmul.mubr.msk.f32.gmra.mxu0 %vm431_vm0, %v5492_v57 }
 0xa17   : > { %v6225_v46 = vpop.f32.mrf.mxu0 }
 0xa18   : > { %5595 = vst [vmem:[%s8066_s19 + $0x18] sm:$0xff] %v6225_v46 }
 0xa19   : > { %v5583_v58 = vpop.f32.mrf.mxu0 }
 0xa1a   : > { %5594 = vst [vmem:[%s8066_s19 + $0x10] sm:$0xff] %v5583_v58 }
 0xa1b   : > { %6664 = shalt.err (!%p6661_p1)
}
 0xa1c   : > { %s6665_s12 = scalar_lea.hbm %s8152_s1, 512  ;;  %s6669_s9 = scalar_lea.hbm %s8354_s16, 2048 }
 0xa1d   : > { %p6666_p7 = scmp.ne.s32.totalorder %s8152_s1, %s6665_s12  ;;  %p6670_p10 = scmp.lt.s32.totalorder %s8152_s1, %s8354_s16 }
 0xa1e   : > { %p6671_p5 = scmp.lt.s32.totalorder %s6669_s9, %s6665_s12 }
 0xa1f   : > { %p6667_p13 = pnand %p6666_p7, %p7086_p6 }
 0xa20   : > { %p6672_p3 = por %p6671_p5, %p6670_p10 }
 0xa21   : > { %p6668_p0 = pneg %p6667_p13 }
 0xa23   : > { %p6673_p4 = pnand %p6672_p3, %p6668_p0 }
 0xa25   : > { %6676 = shalt.err (!%p6673_p4)
}
 0xa26   : > { %s6833_s30 = smov 128  }
 0xa27   : > { %6264 = dma.vmem_to_hbm [thread:$0]  (%p7086_p6), %s8146_s17, 512, %s8152_s1, %s8157_s7, %s6833_s30, %s6833_s30, %s6831_s20  }
 0xa28 PF: > { %p6297_p9 = scmp.ge.s32.totalorder %s6811_s10, 2  ;;  %s5627_s18 = sand.u32 1, %s6759_s21  }
 0xa29   : > { %s5628_s24 = scalar_lea.sflag [#allocation7], %s5627_s18 }
 0xa2a   : > { %p6287_p12 = pnand %p6297_p9, %p7091_p8 }
 0xa2c   : > { %p6288_p11 = pneg %p6287_p12 }
 0xa2e   : > { %6754 = dma.done.wait (%p6288_p11), %s5628_s24, 512  }
 0xa2f   : > { %6756 = vsyncadd (%p6288_p11), %s5628_s24, 4294966784  ;;  %s27_s10 = sadd.s32 1, %s6811_s10   ;;  %s8356_s24 = sld [smem:[#allocation23_spill]] }
 0xa30   : > { %p8186_p2 = scmp.ge.s32.totalorder %s27_s10, 6   ;;  %s8357_s20 = sld [smem:[#allocation24_spill]] }
 0xa31   : > { %s8358_s29 = sld [smem:[#allocation30_spill]]  ;;  %s8363_s21 = smov %s6763_s22 }
 0xa32   : > { %s8359_s30 = sld [smem:[#allocation26_spill]]  ;;  %s8364_s22 = smov %s6767_s23 }
 0xa33   : > { %s8360_s7 = sld [smem:[#allocation27_spill]]  ;;  %s8365_s23 = smov %s7077_s3 }
 0xa34   : > { %s8361_s8 = sld [smem:[#allocation28_spill]]  ;;  %s8366_s25 = smov %s6779_s26 }
 0xa35   : > { %s8362_s9 = sld [smem:[#allocation29_spill]]  ;;  %s8367_s26 = smov %s7074_s2 }
 0xa36   : > { %s8368_s27 = smov %s6787_s28  ;;  %s8369_s28 = smov %s8357_s20 }
 0xa37   :  { %26 = sbr.rel (!%p8186_p2) target bundleno = 22 (0x16), region = 130 }
 0xa3c   :  { %5633 = vsyncpa [#allocation6], 1 }
 0xa3d   :  { %5635 = vsyncpa [#allocation6 + $0x1], 1 }
 0xa3e   :  { %5636 = vsyncpa [#allocation9], 1 }
 0xa3f   :  { %5638 = vsyncpa [#allocation9 + $0x1], 1 }
 0xa40   :  { %5639 = vsyncpa [#allocation12], 1 }
 0xa41   :  { %5640 = vsyncpa [#allocation15], 1 }
 0xa42   :  { %5641 = vsyncpa [#allocation7], 1 }
 0xa43   :  { %5643 = vsyncpa [#allocation7 + $0x1], 1 }

// kernel: tpu_custom_call.1
= control target key start
LH: loop header
LB: loop body
LE: loop exit
PB: predicated region body
PF: predicated region fallthrough
CT: control target
= control target key end

     0   :  { %s8333_s0 = inlined_call_operand.hbm [shape: f32[2,16,64], index: 0, kind: input, shape index: {}]   ;;  %s8334_s1 = inlined_call_operand.hbm [shape: f32[2,16,64], index: 1, kind: input, shape index: {}]   ;;  %s8335_s2 = inlined_call_operand.hbm [shape: f32[8,8,8,16], index: 2, kind: input, shape index: {}]   ;;  %s8336_s3 = inlined_call_operand.hbm [shape: f32[16,16], index: 3, kind: input, shape index: {}]   ;;  %s8337_s4 = inlined_call_operand.hbm [shape: f32[16,16], index: 4, kind: input, shape index: {}]   ;;  %s8338_s5 = inlined_call_operand.hbm [shape: f32[16,128], index: 5, kind: input, shape index: {}]   ;;  %s8339_s6 = inlined_call_operand.hbm [shape: f32[2,64,128], index: 6, kind: output, shape index: {}]  }
   0x1   :  { %8388 = sst [smem:[#allocation43_spill]] %s8334_s1 }
   0x2   :  { %8389 = sst [smem:[#allocation44_spill]] %s8336_s3 }
   0x3   :  { %8390 = sst [smem:[#allocation45_spill]] %s8337_s4 }
   0x4   :  { %8391 = sst [smem:[#allocation46_spill]] %s8339_s6 }
   0x5   :  { %11 = vsyncpa [#allocation6], 0 }
   0x6   :  { %13 = vsyncpa [#allocation6 + $0x1], 0 }
   0x7   :  { %14 = vsyncpa [#allocation9], 0 }
   0x8   :  { %16 = vsyncpa [#allocation9 + $0x1], 0 }
   0x9   :  { %17 = vsyncpa [#allocation12], 0 }
   0xa   :  { %18 = vsyncpa [#allocation15], 0 }
   0xb   :  { %19 = vsyncpa [#allocation7], 0 }
   0xc   :  { %21 = vsyncpa [#allocation7 + $0x1], 0  ;;  %s6918_s21 = smov 0   ;;  %s6920_s22 = smov 0  }
   0xd   :  { %s6922_s23 = smov 0   ;;  %s6924_s24 = smov 0  }
   0xe   :  { %s6926_s25 = smov 0   ;;  %s6928_s26 = smov 0  }
   0xf   :  { %s6930_s27 = smov 0   ;;  %s6932_s28 = smov 0  }
  0x10   :  { %s6934_s29 = smov 0   ;;  %s6936_s30 = smov 0  }
  0x11   :  { %s6938_s7 = smov 0   ;;  %s6940_s8 = smov 0  }
  0x12   :  { %s6942_s9 = smov 0   ;;  %s6944_s10 = smov 0  }
  0x13 LB: > { %8392 = sst [smem:[#allocation23_spill]] %s6808_s21  ;;  %s6985_s11 = sadd.s32 4294967295, %s6860_s10   ;;  %s6860_s10 = sphi %s6944_s10, %s27_s10   ;;  %s6856_s9 = sphi %s6942_s9, %s8484_s9   ;;  %s6852_s8 = sphi %s6940_s8, %s8483_s8   ;;  %s6848_s7 = sphi %s6938_s7, %s8482_s7   ;;  %s6844_s30 = sphi %s6936_s30, %s8481_s30   ;;  %s6840_s29 = sphi %s6934_s29, %s8480_s29   ;;  %s6836_s28 = sphi %s6932_s28, %s8479_s28   ;;  %s6832_s27 = sphi %s6930_s27, %s8478_s27   ;;  %s6828_s26 = sphi %s6928_s26, %s8477_s26   ;;  %s6824_s25 = sphi %s6926_s25, %s8476_s25   ;;  %s6820_s24 = sphi %s6924_s24, %s8475_s24   ;;  %s6816_s23 = sphi %s6922_s23, %s8471_s23   ;;  %s6812_s22 = sphi %s6920_s22, %s8470_s22   ;;  %s6808_s21 = sphi %s6918_s21, %s8469_s21  }
  0x14   : > { %8393 = sst [smem:[#allocation24_spill]] %s6812_s22  ;;  %s5809_s12 = sadd.s32 4294967294, %s6860_s10  }
  0x15   : > { %8394 = sst [smem:[#allocation25_spill]] %s6816_s23  ;;  %p59_p0 = scmp.ne.s32.totalorder %s6836_s28, %s6832_s27 }
  0x16   : > { %8395 = sst [smem:[#allocation26_spill]] %s6844_s30  ;;  %p8359_p1 = scmp.eq.s32.totalorder %s6985_s11, 0 }
  0x17   : > { %8396 = sst [smem:[#allocation27_spill]] %s6848_s7  ;;  %p111_p2 = scmp.ne.s32.totalorder %s6824_s25, %s6820_s24 }
  0x18   : > { %p199_p3 = scmp.ne.s32.totalorder %s6816_s23, %s6812_s22  ;;  %p6995_p4 = por %p8359_p1, %p59_p0 }
  0x19   : > { %p200_p5 = scmp.eq.s32.totalorder %s6985_s11, 3  ;;  %p7002_p6 = por %p111_p2, %p8359_p1 }
  0x1a   : > { %p205_p7 = scmp.ne.s32.totalorder %s6812_s22, %s6808_s21  ;;  %p206_p9 = scmp.eq.s32.totalorder %s5809_s12, 3 }
  0x1b   : > { %s8398_s14 = scalar_select %p7002_p6, 1, 0 }
  0x1c   : > { %p7008_p8 = por %p200_p5, %p199_p3  ;;  %p5810_p10 = scmp.ge.s32.totalorder %s6860_s10, 1 }
  0x1d   : > { %8399 = sst [smem:[#allocation28_spill]] %s8398_s14  ;;  %p213_p11 = scmp.lt.s32.totalorder %s6860_s10, 5 }
  0x1e   : > { %s8400_s15 = scalar_select %p7008_p8, 1, 0 }
  0x1f   : > { %p7014_p12 = por %p206_p9, %p205_p7  ;;  %p7018_p13 = pnand %p5810_p10, %p213_p11 }
  0x20   : > { %8401 = sst [smem:[#allocation29_spill]] %s8400_s15  ;;  %s6862_s18 = smov [#allocation11]  }
  0x21   : > { %s8402_s16 = scalar_select %p7014_p12, 1, 0 }
  0x22   : > { %s225_s19 = sshll.u32 %s6862_s18, 4  ;;  %p6316_p0 = pneg %p7018_p13  ;;  %s226_s19 = int_to_ptr.vmem [resolvable:$true] %s225_s19 }
  0x23   : > { %8403 = sst [smem:[#allocation30_spill]] %s8402_s16  ;;  %s6549_s24 = scalar_lea.vmem %s226_s19, 256 }
  0x24   : > { %p7026_p2 = pnand %p6316_p0, %p8359_p1  ;;  %p6550_p5 = scmp.ne.s32.totalorder %s226_s19, %s6549_s24 }
  0x25   : > { %p6557_p10 = scmp.lt.s32.totalorder %s226_s19, %s226_s19  ;;  %p6558_p11 = scmp.lt.s32.totalorder %s6549_s24, %s6549_s24 }
  0x26   : > { %p6540_p3 = pneg %p7026_p2 }
  0x27   : > { %p6559_p12 = por %p6558_p11, %p6557_p10 }
  0x28   : > { %p6552_p7 = pnand %p6550_p5, %p6540_p3 }
  0x2a   : > { %p6553_p9 = pneg %p6552_p7 }
  0x2c   : > { %p6560_p8 = pnand %p6559_p12, %p6553_p9 }
  0x2e   : > { %6563 = shalt.err (!%p6560_p8)
}
  0x2f   : > { %s8346_s27 = smov 128   ;;  %s8348_s12 = smov 8  }
  0x30   : > { %s8406_s3 = sld [smem:[#allocation44_spill]]  ;;  %s36_s16 = sadd.s32 1, %s6852_s8 }
  0x31   : > { %s39_s21 = sadd.s32 1, %s6856_s9  ;;  %p37_p8 = scmp.ge.s32.totalorder %s36_s16, 2 }
  0x32   : > { %s46_s6 = sadd.s32 1, %s6840_s29  ;;  %p53_p12 = scmp.ne.s32.totalorder %s6840_s29, %s6836_s28 }
  0x33   : > { %p8361_p0 = scmp.eq.s32.totalorder %s6860_s10, 0  ;;  %s8486_s16 = smov (%p37_p8, %s36_s16), 0 }
  0x34   : > { %8407 = sst [smem:[#allocation31_spill]] %s8486_s16  ;;  %s8488_s21 = smov (!%p37_p8, %s39_s21), %s6856_s9 }
  0x35   : > { %s43_s15 = ssub.s32 %s6852_s8, %s8486_s16  ;;  %p7056_p5 = por %p8361_p0, %p53_p12 }
  0x36   : > { %6319 = dma.hbm_to_vmem [thread:$0]  (!%p7026_p2), %s8406_s3, 256, %s226_s19, [#allocation12], %s8346_s27, %s8346_s27, %s8348_s12  }
  0x37   : > { %p41_p7 = scmp.ge.s32.totalorder %s8488_s21, 2  ;;  %p44_p9 = scmp.eq.s32.totalorder %s43_s15, 0 }
  0x38   : > { %s189_s18 = sadd.s32 1, %s6816_s23  ;;  %p8360_p10 = scmp.lt.s32.totalorder %s6860_s10, 4 }
  0x39   : > { %s8490_s21 = smov (%p41_p7, %s8488_s21), 0  ;;  %s8354_s12 = sand.u32 1, %s6840_s29  }
  0x3a   : > { %8409 = sst [smem:[#allocation32_spill]] %s8490_s21  ;;  %s7069_s27 = ssub.s32 %s6856_s9, %s8490_s21 }
  0x3b   : > { %s7065_s24 = scalar_select %p44_p9, %s6840_s29, %s46_s6  }
  0x3c   : > { %s186_s3 = sor.u32 %s7069_s27, %s43_s15  ;;  %s7076_s16 = sshll.u32 %s8354_s12, 4 }
  0x3d   : > { %8410 = sst [smem:[#allocation33_spill]] %s7065_s24  ;;  %p187_p8 = scmp.eq.s32.totalorder %s186_s3, 0 }
  0x3e   : > { %s8362_s30 = sshll.u32 %s6852_s8, 8  ;;  %p7083_p12 = pnand %p8360_p10, %p7056_p5 }
  0x3f   : > { %s7088_s6 = scalar_select %p187_p8, %s6816_s23, %s189_s18  }
  0x40   : > { %s286_s21 = sand.u32 1, %s6860_s10   ;;  %s8413_s1 = sld [smem:[#allocation43_spill]] }
  0x41   : > { %8412 = sst [smem:[#allocation34_spill]] %s7088_s6  ;;  %s290_s12 = scalar_lea.vmem [#allocation8], %s7076_s16 }
  0x42   : > { %s297_s7 = sshll.u32 %s290_s12, 4  ;;  %s7097_s14 = scalar_lea.sflag [#allocation9], %s286_s21  ;;  %s298_s7 = int_to_ptr.vmem [resolvable:$true] %s297_s7 }
  0x43   : > { %p8363_p5 = pneg %p7083_p12  ;;  %s6577_s19 = scalar_lea.vmem %s298_s7, 256 }
  0x44   : > { %p6578_p7 = scmp.ne.s32.totalorder %s298_s7, %s6577_s19  ;;  %s6865_s18 = smov [#allocation8]  }
  0x45   : > { %s6582_s6 = sshll.u32 %s6865_s18, 4  ;;  %s6583_s6 = int_to_ptr.vmem [resolvable:$false] %s6582_s6 }
  0x46   : > { %s296_s3 = scalar_lea.hbm %s8413_s1, %s8362_s30  ;;  %p6580_p9 = pnand %p6578_p7, %p8363_p5 }
  0x47   : > { %s6584_s23 = scalar_lea.vmem %s6583_s6, 512  ;;  %p6585_p1 = scmp.lt.s32.totalorder %s298_s7, %s6583_s6 }
  0x48   : > { %p6581_p8 = pneg %p6580_p9  ;;  %p6586_p10 = scmp.lt.s32.totalorder %s6584_s23, %s6577_s19 }
  0x4a   : > { %p6587_p0 = por %p6586_p10, %p6585_p1 }
  0x4c   : > { %p6588_p11 = pnand %p6587_p0, %p6581_p8 }
  0x4e   : > { %6591 = shalt.err (!%p6588_p11)
}
  0x4f   : > { %s8414_s21 = smov 8   ;;  %s8415_s12 = smov 128  }
  0x50   : > { %6332 = dma.hbm_to_vmem [thread:$0]  (!%p7083_p12), %s296_s3, 256, %s298_s7, %s7097_s14, %s8415_s12, %s8415_s12, %s8414_s21  }
  0x51   : > { %s6866_s24 = smov [#allocation13]   ;;  %s6867_s30 = smov [#allocation14]  }
  0x52   : > { %s238_s15 = sshll.u32 %s6866_s24, 4  ;;  %s251_s18 = sshll.u32 %s6867_s30, 4  ;;  %s239_s15 = int_to_ptr.vmem [resolvable:$true] %s238_s15  ;;  %s252_s18 = int_to_ptr.vmem [resolvable:$true] %s251_s18 }
  0x53   : > { %s6603_s1 = scalar_lea.vmem %s239_s15, 256  ;;  %p6611_p10 = scmp.lt.s32.totalorder %s239_s15, %s239_s15 }
  0x54   : > { %p6604_p7 = scmp.ne.s32.totalorder %s239_s15, %s6603_s1  ;;  %p6612_p11 = scmp.lt.s32.totalorder %s6603_s1, %s6603_s1 }
  0x56   : > { %p6606_p1 = pnand %p6604_p7, %p6540_p3  ;;  %p6613_p9 = por %p6612_p11, %p6611_p10 }
  0x58   : > { %p6607_p0 = pneg %p6606_p1 }
  0x5a   : > { %p6614_p8 = pnand %p6613_p9, %p6607_p0 }
  0x5c   : > { %6617 = shalt.err (!%p6614_p8)
}
  0x5d   : > { %s8416_s4 = sld [smem:[#allocation45_spill]]  ;;  %s6629_s30 = scalar_lea.vmem %s252_s18, 256 }
  0x5e   : > { %p6630_p5 = scmp.ne.s32.totalorder %s252_s18, %s6629_s30  ;;  %p6637_p10 = scmp.lt.s32.totalorder %s252_s18, %s252_s18 }
  0x5f   : > { %p6638_p0 = scmp.lt.s32.totalorder %s6629_s30, %s6629_s30 }
  0x60   : > { %p6632_p7 = pnand %p6630_p5, %p6540_p3 }
  0x61   : > { %p6639_p11 = por %p6638_p0, %p6637_p10 }
  0x62   : > { %p6633_p1 = pneg %p6632_p7 }
  0x63   : > { %6322 = dma.hbm_to_vmem [thread:$0]  (!%p7026_p2), %s8416_s4, 256, %s239_s15, [#allocation12], %s8415_s12, %s8415_s12, %s8414_s21  }
  0x64   : > { %p6640_p9 = pnand %p6639_p11, %p6633_p1 }
  0x66   : > { %6643 = shalt.err (!%p6640_p9)
}
  0x67   : > { %6325 = dma.hbm_to_vmem [thread:$0]  (!%p7026_p2), %s8338_s5, 256, %s252_s18, [#allocation15], %s8415_s12, %s8415_s12, %s8414_s21  }
  0x68   : > { %s8417_s3 = sshll.u32 %s6852_s8, 8  ;;  %s269_s23 = scalar_lea.vmem [#allocation5], %s7076_s16 }
  0x69   : > { %s275_s15 = scalar_lea.hbm %s8333_s0, %s8417_s3  ;;  %s276_s7 = sshll.u32 %s269_s23, 4  ;;  %s277_s7 = int_to_ptr.vmem [resolvable:$true] %s276_s7 }
  0x6a   : > { %s8418_s20 = sand.u32 1, %s6840_s29   ;;  %s6657_s4 = scalar_lea.vmem %s277_s7, 256 }
  0x6b   : > { %s266_s30 = scalar_lea.sflag [#allocation6], %s8418_s20  ;;  %p6658_p3 = scmp.ne.s32.totalorder %s277_s7, %s6657_s4 }
  0x6c   : > { %p8419_p5 = pneg %p7083_p12  ;;  %s6868_s1 = smov [#allocation5]  }
  0x6d   : > { %s6662_s6 = sshll.u32 %s6868_s1, 4  ;;  %s6663_s6 = int_to_ptr.vmem [resolvable:$false] %s6662_s6 }
  0x6e   : > { %p6660_p8 = pnand %p6658_p3, %p8419_p5  ;;  %s6664_s18 = scalar_lea.vmem %s6663_s6, 512 }
  0x6f   : > { %p6665_p2 = scmp.lt.s32.totalorder %s277_s7, %s6663_s6  ;;  %p6666_p1 = scmp.lt.s32.totalorder %s6664_s18, %s6657_s4 }
  0x70   : > { %p6661_p7 = pneg %p6660_p8 }
  0x71   : > { %p6667_p10 = por %p6666_p1, %p6665_p2 }
  0x73   : > { %p6668_p0 = pnand %p6667_p10, %p6661_p7 }
  0x75   : > { %6671 = shalt.err (!%p6668_p0)
}
  0x76   : > { %6329 = dma.hbm_to_vmem [thread:$0]  (!%p7083_p12), %s275_s15, 256, %s277_s7, %s266_s30, %s8415_s12, %s8415_s12, %s8414_s21  }
  0x77   : > { %s98_s16 = sadd.s32 1, %s6828_s26  ;;  %p105_p11 = scmp.ne.s32.totalorder %s6828_s26, %s6824_s25 }
  0x78   : > { %p8420_p9 = scmp.eq.s32.totalorder %s7069_s27, 0  ;;  %p8421_p3 = scmp.eq.s32.totalorder %s6860_s10, 0 }
  0x79   : > { %s309_s22 = sand.u32 1, %s6828_s26   ;;  %s5983_s19 = sshll.u32 %s6856_s9, 12 }
  0x7a   : > { %s7154_s4 = scalar_select %p8420_p9, %s6828_s26, %s98_s16  }
  0x7b   : > { %p107_p5 = por %p105_p11, %p8421_p3  ;;  %s5821_s3 = sshll.u32 %s309_s22, 8 }
  0x7c   : > { %s318_s20 = scalar_lea.hbm %s8335_s2, %s5983_s19  ;;  %s311_s1 = scalar_lea.vmem [#allocation10], %s5821_s3 }
  0x7d   : > { %s319_s6 = sshll.u32 %s311_s1, 4  ;;  %p8422_p8 = scmp.lt.s32.totalorder %s6860_s10, 4  ;;  %s320_s6 = int_to_ptr.vmem [resolvable:$true] %s319_s6 }
  0x7e   : > { %s6685_s27 = scalar_lea.vmem %s320_s6, 4096  ;;  %s6869_s15 = smov [#allocation10]  }
  0x7f   : > { %p7165_p7 = pnand %p8422_p8, %p107_p5  ;;  %p6686_p2 = scmp.ne.s32.totalorder %s320_s6, %s6685_s27 }
  0x80   : > { %s6690_s7 = sshll.u32 %s6869_s15, 4  ;;  %s6691_s7 = int_to_ptr.vmem [resolvable:$false] %s6690_s7 }
  0x81   : > { %p6674_p12 = pneg %p7165_p7  ;;  %s6692_s30 = scalar_lea.vmem %s6691_s7, 8192 }
  0x82   : > { %p6693_p0 = scmp.lt.s32.totalorder %s320_s6, %s6691_s7  ;;  %p6694_p11 = scmp.lt.s32.totalorder %s6692_s30, %s6685_s27 }
  0x83   : > { %p6688_p1 = pnand %p6686_p2, %p6674_p12 }
  0x84   : > { %p6695_p9 = por %p6694_p11, %p6693_p0 }
  0x85   : > { %p6689_p10 = pneg %p6688_p1 }
  0x87   : > { %p6696_p3 = pnand %p6695_p9, %p6689_p10 }
  0x89   : > { %6699 = shalt.err (!%p6696_p3)
}
  0x8a   : > { %6335 = dma.hbm_to_vmem [thread:$0]  (!%p7165_p7), %s318_s20, 4096, %s320_s6, %s7097_s14, %s8415_s12, %s8415_s12, %s8414_s21  }
  0x8b   : > { %331 = sbr.rel (%p7018_p13) target bundleno = 2594 (0xa22), region = 44 }
  0x90   : > { %s333_s16 = sand.u32 1, %s6836_s28  }
  0x91   : > { %s5826_s22 = sshll.u32 %s333_s16, 4  ;;  %s334_s3 = scalar_lea.sflag [#allocation6], %s333_s16 }
  0x92   : > { %s337_s19 = scalar_lea.vmem [#allocation5], %s5826_s22 }
  0x93   : > { %6783 = dma.done.wait (%p6995_p4), %s334_s3, 256  }
  0x94   : > { %6785 = vsyncadd (%p6995_p4), %s334_s3, 4294967040  ;;  %s342_s24 = sand.u32 1, %s6985_s11   ;;  %s346_s1 = scalar_lea.vmem [#allocation8], %s5826_s22 }
  0x95   : > { %s343_s23 = scalar_lea.sflag [#allocation9], %s342_s24 }
  0x96   : > { %6787 = dma.done.wait (%p6995_p4), %s343_s23, 256  }
  0x97   : > { %6789 = vsyncadd (%p6995_p4), %s343_s23, 4294967040  ;;  %s353_s17 = sand.u32 1, %s6824_s25  }
  0x98   : > { %s5828_s21 = sshll.u32 %s353_s17, 8 }
  0x99   : > { %s7190_s12 = scalar_lea.vmem [#allocation10], %s5828_s21 }
  0x9a   : > { %6791 = dma.done.wait (%p7002_p6), %s343_s23, 4096  }
  0x9b   : > { %6793 = vsyncadd (%p7002_p6), %s343_s23, 4294963200  ;;  %p8425_p13 = scmp.eq.s32.totalorder %s6985_s11, 0 }
  0x9d   : > { %6795 = dma.done.wait (%p8425_p13), [#allocation12], 512   ;;  %p8426_p5 = pmov %p8425_p13 }
  0x9f   : > { %6797 = vsyncadd (%p8426_p5), [#allocation12], 4294966784  ;;  %p8427_p8 = pmov %p8426_p5 }
  0xa0   : > { %p8428_p4 = pmov %p8426_p5 }
  0xa1   : > { %6799 = dma.done.wait (%p8427_p8), [#allocation15], 256  }
  0xa2   : > { %6801 = vsyncadd (%p8428_p4), [#allocation15], 4294967040  ;;  %v408_v0 = vld [vmem:[%s337_s19] sm:$0xff]  ;;  %v413_v2 = vld [vmem:[#allocation11 + $0x8] sm:$0xff]  ;;  %vm446_vm0 = vcmask 130048   ;;  %v8364_v24 = vmov 0.0  }
  0xa3   : > { %v410_v1 = vld [vmem:[%s346_s1] sm:$0xff]  ;;  %414 = vxpose.xlu0.b32.start [1/2] (short) (narrow) %v408_v0, 64  ;;  %v409_v4 = vld [vmem:[%s337_s19 + $0x8] sm:$0xff]  ;;  %6074 = vmatprep.subr.mxu0 %v413_v2  ;;  %s8429_s11 = sld [smem:[#allocation27_spill]]  ;;  %s6871_s6 = smov 120   ;;  %vm6872_vm1 = vmmov 0  }
  0xa4   : > { %586 = vxpose.xlu1.b32.start [1/2] (short) (narrow) %v410_v1, 64  ;;  %v412_v3 = vld [vmem:[#allocation11] sm:$0xff]  ;;  %v411_v5 = vld [vmem:[%s346_s1 + $0x8] sm:$0xff]  ;;  %6276 = vmatprep.subr.mxu1 %v413_v2  ;;  %v584_v20 = vld [vmem:[#allocation13] sm:$0xff]  ;;  %vm792_vm2 = vcmask 64512   ;;  %s6880_s27 = smov 8  }
  0xa5   : > { %6075 = vmatpush3.msra.mxu0 %v413_v2  ;;  %6278 = vmatpush3.msra.mxu1 %v413_v2  ;;  %v585_v6 = vld [vmem:[#allocation13 + $0x8] sm:$0xff]  ;;  %s8456_s15 = sld [smem:[#allocation24_spill]] }
  0xa6   : > { %6076 = vmatprep.subr.mxu0 %v412_v3  ;;  %6277 = vmatprep.subr.mxu1 %v412_v3  ;;  %s8461_s22 = sld [smem:[#allocation26_spill]] }
  0xa7   : > { %415 = vxpose.xlu0.b32.end [2/2] (short) (narrow) %v409_v4, 64  ;;  %6077 = vmatpush3.msra.mxu0 %v412_v3  ;;  %s8462_s3 = sld [smem:[#allocation29_spill]] }
  0xa8   : > { %587 = vxpose.xlu1.b32.end [2/2] (short) (narrow) %v411_v5, 64  ;;  %6279 = vmatpush3.msra.mxu1 %v412_v3 }
  0xa9   : > { %6090 = vmatprep.subr.mxu1 %v585_v6  ;;  %6106 = vmatprep.subr.mxu0 %v8364_v24  ;;  %s5849_s13 = sshll.u32 %s8429_s11, 5  ;;  %s5975_s19 = sshll.u32 %s8429_s11, 2 }
  0xaa   : > { %s7234_s20 = scalar_lea.vmem [#allocation2], %s5849_s13  ;;  %s7243_s18 = scalar_lea.vmem [#allocation3], %s5849_s13 }
  0xab   : > { %s403_s7 = sand.u32 1, %s8456_s15  }
  0xac   : > { %s5832_s30 = sshll.u32 %s403_s7, 5  ;;  %s5976_s24 = sshll.u32 %s8461_s22, 3 }
  0xad   : > { %s8158_s16 = scalar_lea.vmem [#allocation16], %s5832_s30  ;;  %s5624_s23 = sadd.s32 %s5976_s24, %s5975_s19 }
  0xae   : > { %s5627_s1 = sshll.u32 %s8158_s16, 4  ;;  %s5977_s14 = sshll.u32 %s5624_s23, 7  ;;  %s8246_s1 = int_to_ptr.vmem [resolvable:$true] %s5627_s1 }
  0xaf   : > { %s8257_s11 = scalar_lea.sflag [#allocation7], %s403_s7  ;;  %p8464_p7 = scmp.ne.s32.totalorder %s8462_s3, 0 }
 0x11f   : > { %v430_v7 = vpop.trf.xlu0 }
 0x120   : > { %v602_v8 = vpop.trf.xlu1  ;;  %6078 = vmatprep.mubr.msk.f32.mxu0 %vm446_vm0, %v430_v7 }
 0x123   : > { %v431_v9 = vpop.trf.xlu0 }
 0x124   : > { %6079 = vmatmul.mubr.msk.f32.vlgmr.msra.gmra.mxu0 %vm446_vm0, %v431_v9  ;;  %v603_v10 = vpop.trf.xlu1 }
 0x127   : > { %v432_v11 = vpop.trf.xlu0 }
 0x128   : > { %6081 = vmatprep.mubr.msk.f32.mxu0 %vm446_vm0, %v432_v11  ;;  %v604_v13 = vpop.trf.xlu1 }
 0x12b   : > { %v433_v12 = vpop.trf.xlu0 }
 0x12c   : > { %6082 = vmatmul.mubr.msk.f32.gmra.mxu0 %vm446_vm0, %v433_v12  ;;  %v605_v15 = vpop.trf.xlu1 }
 0x12f   : > { %v434_v14 = vpop.trf.xlu0 }
 0x130   : > { %6084 = vmatprep.mubr.msk.f32.mxu0 %vm446_vm0, %v434_v14  ;;  %v606_v18 = vpop.trf.xlu1 }
 0x133   : > { %v435_v16 = vpop.trf.xlu0 }
 0x134   : > { %6085 = vmatmul.mubr.msk.f32.gmra.mxu0 %vm446_vm0, %v435_v16  ;;  %v607_v21 = vpop.trf.xlu1 }
 0x135   : > { %6108 = vmatprep.mubr.msk.f32.mxu0 %vm6872_vm1, %v8364_v24 }
 0x137   : > { %v436_v17 = vpop.trf.xlu0 }
 0x138   : > { %6087 = vmatprep.mubr.msk.f32.mxu1 %vm446_vm0, %v436_v17  ;;  %v608_v22 = vpop.trf.xlu1  ;;  %v7310_v17 = vld [vmem:[%s7190_s12 + $0x8] sm:$0xff] }
 0x13b   : > { %v437_v19 = vpop.trf.xlu0 }
 0x13c   : > { %6088 = vmatmul.mubr.msk.f32.vlgmr.msra.gmra.mxu1 %vm446_vm0, %v437_v19  ;;  %v609_v23 = vpop.trf.xlu1  ;;  %v8372_v19 = vmov 2131351028  }
 0x13d   : > { %6091 = vmatpush3.msra.mxu1 %v585_v6  ;;  %6094 = vmatprep.mubr.msk.f32.mxu1 %vm446_vm0, %v602_v8 }
 0x13e   : > { %6092 = vmatprep.subr.mxu1 %v584_v20 }
 0x13f   : > { %6093 = vmatpush3.msra.mxu1 %v584_v20 }
 0x140   : > { %6095 = vmatmul.mubr.msk.f32.vlgmr.msra.gmra.mxu1 %vm446_vm0, %v603_v10  ;;  %6111 = vmatprep.subr.mxu1 %v8364_v24 }
 0x141   : > { %6097 = vmatprep.mubr.msk.f32.mxu1 %vm446_vm0, %v604_v13  ;;  %v8376_v13 = vmov 683565275  }
 0x144   : > { %6098 = vmatmul.mubr.msk.f32.gmra.mxu1 %vm446_vm0, %v605_v15  ;;  %v8374_v15 = vmov 2475754826  }
 0x145   : > { %6100 = vmatprep.mubr.msk.f32.mxu1 %vm446_vm0, %v606_v18 }
 0x148   : > { %6101 = vmatmul.mubr.msk.f32.gmra.mxu1 %vm446_vm0, %v607_v21 }
 0x149   : > { %6103 = vmatprep.mubr.msk.f32.mxu1 %vm446_vm0, %v608_v22  ;;  %v8370_v22 = vmov 2102212464  }
 0x14c   : > { %6104 = vmatmul.mubr.msk.f32.gmra.mxu1 %vm446_vm0, %v609_v23 }
 0x14d   : > { %6113 = vmatprep.mubr.msk.f32.mxu1 %vm6872_vm1, %v8364_v24 }
 0x1e4   : > { %v6080_v25 = vpop.f32.mrf.mxu0 }
 0x1e5   : > { %577 = vst.msk [vmem:[#allocation2 + $0x8] sm:$0xff] %vm446_vm0, %v6080_v25 }
 0x1e6   : > { %v537_v26 = vpop.f32.mrf.mxu0 }
 0x1e7   : > { %576 = vst.msk [vmem:[#allocation2] sm:$0xff] %vm446_vm0, %v537_v26  ;;  %v8368_v26 = vmov 920167782  }
 0x1ec   : > { %v6083_v27 = vpop.f32.mrf.mxu0 }
 0x1ed   : > { %579 = vst.msk [vmem:[#allocation2 + $0x18] sm:$0xff] %vm446_vm0, %v6083_v27 }
 0x1ee   : > { %v547_v28 = vpop.f32.mrf.mxu0 }
 0x1ef   : > { %578 = vst.msk [vmem:[#allocation2 + $0x10] sm:$0xff] %vm446_vm0, %v547_v28 }
 0x1f4   : > { %v6086_v29 = vpop.f32.mrf.mxu0 }
 0x1f5   : > { %581 = vst.msk [vmem:[#allocation2 + $0x28] sm:$0xff] %vm446_vm0, %v6086_v29  ;;  %v8366_v29 = vmov 1326507024  }
 0x1f6   : > { %v557_v30 = vpop.f32.mrf.mxu0 }
 0x1f7   : > { %580 = vst.msk [vmem:[#allocation2 + $0x20] sm:$0xff] %vm446_vm0, %v557_v30 }
 0x1fc   : > { %v6089_v31 = vpop.f32.mrf.mxu1 }
 0x1fd   : > { %583 = vst.msk [vmem:[#allocation2 + $0x38] sm:$0xff] %vm446_vm0, %v6089_v31  ;;  %v5896_v31 = vld [vmem:[%s7190_s12 + $0x40] sm:$0xff] }
 0x1fe   : > { %v567_v32 = vpop.f32.mrf.mxu1 }
 0x1ff   : > { %582 = vst.msk [vmem:[#allocation2 + $0x30] sm:$0xff] %vm446_vm0, %v567_v32 }
 0x200   : > { %v6096_v33 = vpop.f32.mrf.mxu1 }
 0x201   : > { %748 = vst.msk [vmem:[#allocation3 + $0x8] sm:$0xff] %vm446_vm0, %v6096_v33 }
 0x202   : > { %v708_v34 = vpop.f32.mrf.mxu1 }
 0x203   : > { %747 = vst.msk [vmem:[#allocation3] sm:$0xff] %vm446_vm0, %v708_v34 }
 0x204   : > { %v6099_v35 = vpop.f32.mrf.mxu1 }
 0x205   : > { %750 = vst.msk [vmem:[#allocation3 + $0x18] sm:$0xff] %vm446_vm0, %v6099_v35 }
 0x206   : > { %v718_v36 = vpop.f32.mrf.mxu1  ;;  %v757_v37 = vld [vmem:[%s7234_s20] sm:$0xff]  ;;  %v5872_v45 = vld [vmem:[%s7234_s20 + $0x8] sm:$0xff]  ;;  %v5905_v49 = vld [vmem:[%s7234_s20 + $0x10] sm:$0xff] }
 0x207   : > { %749 = vst.msk [vmem:[#allocation3 + $0x10] sm:$0xff] %vm446_vm0, %v718_v36  ;;  %867 = vrot.lane.b32.xlu0 %v757_v37, %s6871_s6  ;;  %v7289_v52 = vld [vmem:[%s7234_s20 + $0x18] sm:$0xff]  ;;  %s6700_s20 = scalar_lea.vmem %s8246_s1, 512 }
 0x208   : > { %v6102_v38 = vpop.f32.mrf.mxu1  ;;  %p6701_p6 = scmp.ne.s32.totalorder %s8246_s1, %s6700_s20 }
 0x209   : > { %752 = vst.msk [vmem:[#allocation3 + $0x28] sm:$0xff] %vm446_vm0, %v6102_v38 }
 0x20a   : > { %v728_v39 = vpop.f32.mrf.mxu1  ;;  %p6702_p12 = pnand %p6701_p6, %p8464_p7 }
 0x20b   : > { %751 = vst.msk [vmem:[#allocation3 + $0x20] sm:$0xff] %vm446_vm0, %v728_v39 }
 0x20c   : > { %v6105_v40 = vpop.f32.mrf.mxu1  ;;  %p6703_p2 = pneg %p6702_p12 }
 0x20d   : > { %754 = vst.msk [vmem:[#allocation3 + $0x38] sm:$0xff] %vm446_vm0, %v6105_v40 }
 0x20e   : > { %v738_v41 = vpop.f32.mrf.mxu1 }
 0x20f   : > { %753 = vst.msk [vmem:[#allocation3 + $0x30] sm:$0xff] %vm446_vm0, %v738_v41 }
 0x216   : > { %v7246_v42 = vld [vmem:[%s7243_s18] sm:$0xff]  ;;  %v7257_v43 = vld [vmem:[%s7243_s18 + $0x8] sm:$0xff]  ;;  %v5907_v47 = vld [vmem:[%s7243_s18 + $0x10] sm:$0xff] }
 0x217   : > { %903 = vrot.lane.b32.xlu1 %v7246_v42, %s6871_s6  ;;  %6107 = vmatpush3.msra.mxu0 %v7246_v42  ;;  %v5940_v50 = vld [vmem:[%s7243_s18 + $0x18] sm:$0xff] }
 0x218   : > { %6116 = vmatprep.subr.mxu0 %v8364_v24 }
 0x240   : > { %760 = vxpose.xlu1.b32.start.end [1/1] (short) (narrow) %v757_v37, 8 }
 0x25e   : > { %2090 = vrot.lane.b32.xlu1 %v7257_v43, %s6871_s6 }
 0x279   : > { %v868_v44 = vpop.permute.xlu0 %867 }
 0x27a   : > { %870 = vxpose.xlu0.b32.start.end [1/1] (short) (narrow) %v868_v44, 8 }
 0x287   : > { %1948 = vxpose.xlu1.b32.start.end [1/1] (short) (narrow) %v5872_v45, 8 }
 0x289   : > { %v7262_v46 = vpop.permute.xlu1 %903 }
 0x28a   : > { %6112 = vmatpush3.msra.mxu1 %v7262_v46 }
 0x28b   : > { %6121 = vmatprep.subr.mxu1 %v8364_v24 }
 0x2a3   : > { %2054 = vrot.lane.b32.xlu0 %v5872_v45, %s6871_s6 }
 0x2a5   : > { %3277 = vrot.lane.b32.xlu1 %v5907_v47, %s6871_s6  ;;  %v5897_v47 = vld [vmem:[%s7190_s12 + $0x48] sm:$0xff] }
 0x2bc   : > { %v776_v48 = vpop.trf.xlu1 }
 0x2bd   : > { %6109 = vmatmul.mubr.msk.f32.vlgmr.msra.gmra.mxu0 %vm792_vm2, %v776_v48 }
 0x2be   : > { %6117 = vmatpush3.msra.mxu0 %v7246_v42  ;;  %6118 = vmatprep.mubr.msk.f32.mxu0 %vm6872_vm1, %v8364_v24 }
 0x2bf   : > { %6126 = vmatprep.subr.mxu0 %v8364_v24 }
 0x2ce   : > { %3135 = vxpose.xlu1.b32.start.end [1/1] (short) (narrow) %v5905_v49, 8 }
 0x2ec   : > { %4464 = vrot.lane.b32.xlu1 %v5940_v50, %s6871_s6 }
 0x2f6   : > { %v886_v51 = vpop.trf.xlu0 }
 0x2f7   : > { %6114 = vmatmul.mubr.msk.f32.vlgmr.msra.gmra.mxu1 %vm792_vm2, %v886_v51  ;;  %6119 = vmatmul.mubr.msk.f32.vlgmr.msra.gmra.mxu0 %vm792_vm2, %v886_v51 }
 0x2f8   : > { %6122 = vmatpush3.msra.mxu1 %v7262_v46  ;;  %6123 = vmatprep.mubr.msk.f32.mxu1 %vm6872_vm1, %v8364_v24 }
 0x2f9   : > { %6131 = vmatprep.subr.mxu1 %v8364_v24  ;;  %6128 = vmatprep.mubr.msk.f32.mxu0 %vm6872_vm1, %v8364_v24 }
 0x2fb   : > { %6124 = vmatmul.mubr.msk.f32.vlgmr.msra.gmra.mxu1 %vm792_vm2, %v776_v48 }
 0x2fc   : > { %6133 = vmatprep.mubr.msk.f32.mxu1 %vm6872_vm1, %v8364_v24 }
 0x315   : > { %4322 = vxpose.xlu1.b32.start.end [1/1] (short) (narrow) %v7289_v52, 8  ;;  %v2055_v53 = vpop.permute.xlu0 %2054 }
 0x316   : > { %2057 = vxpose.xlu0.b32.start.end [1/1] (short) (narrow) %v2055_v53, 8 }
 0x333   : > { %1842 = vrot.lane.b32.xlu1 %v7310_v17, %s6871_s6 }
 0x337   : > { %3028 = vrot.lane.b32.xlu1 %v5896_v31, %s6871_s6 }
 0x33b   : > { %3030 = vrot.lane.b32.xlu1 %v5897_v47, %s6871_s6 }
 0x33f   : > { %3241 = vrot.lane.b32.xlu0 %v5905_v49, %s6871_s6 }
 0x37d   : > { %v7293_v54 = vpop.f32.mrf.mxu0 }
 0x37f   : > { %v6110_v55 = vpop.f32.mrf.mxu0 }
 0x392   : > { %v7295_v56 = vpop.trf.xlu0 }
 0x3b1   : > { %v3242_v57 = vpop.permute.xlu0 %3241 }
 0x3b2   : > { %3244 = vxpose.xlu0.b32.start.end [1/1] (short) (narrow) %v3242_v57, 8 }
 0x3b7   : > { %v7297_v58 = vpop.f32.mrf.mxu1  ;;  %v1046_v59 = vpop.f32.mrf.mxu0 }
 0x3b8   : > { %v979_v60 = vsub.f32 %v7293_v54, %v7297_v58 }
 0x3b9   : > { %v6115_v61 = vpop.f32.mrf.mxu1  ;;  %v6120_v62 = vpop.f32.mrf.mxu0 }
 0x3bb   : > { %v1116_v63 = vpop.f32.mrf.mxu1 }
 0x3bc   : > { %v1117_v0 = vadd.f32 %v1116_v63, %v1046_v59 }
 0x3bd   : > { %v6125_v1 = vpop.f32.mrf.mxu1 }
 0x3be   : > { %v7301_v2 = vmul.f32 2.0, %v1117_v0  ;;  %v7334_v0 = vld [vmem:[%s7190_s12 + $0x10] sm:$0xff] }
 0x3bf   : > { %1844 = vrot.lane.b32.xlu1 %v7334_v0, %s6871_s6 }
 0x3c0   : > { %v1134_v3 = vand.u32 2139095040, %v7301_v2  ;;  %v1131_v7 = vand.u32 2147483647, %v7301_v2  ;;  %vm1133_vm10 = vcmp.lt.s32.totalorder %v7301_v2, 0  ;;  %vm1223_vm15 = vweird.f32 %v7301_v2 }
 0x3c2   : > { %v1135_v4 = vshrl.u32 %v1134_v3, 23  ;;  %v1138_v10 = vand.u32 8388607, %v1131_v7  ;;  %vm1132_vm11 = vcmp.le.f32.partialorder %v1131_v7, 0.7853982 }
 0x3c4   : > { %v5855_v5 = vadd.s32 4294967169, %v1135_v4  ;;  %v1139_v32 = vor.u32 8388608, %v1138_v10  ;;  %v5930_v10 = vld [vmem:[%s7190_s12 + $0x88] sm:$0xff] }
 0x3c6   : > { %v1141_v6 = vadd.s32 1, %v5855_v5  ;;  %v1179_v50 = vshll.u32 %v1139_v32, 8  ;;  %v7343_v5 = vld [vmem:[%s7190_s12 + $0x18] sm:$0xff] }
 0x3c7   : > { %1846 = vrot.lane.b32.xlu1 %v7343_v5, %s6871_s6 }
 0x3c8   : > { %vm1142_vm3 = vcmp.gt.s32.totalorder %v1141_v6, 0 }
 0x3c9   : > { %v1143_v8 = vsel %vm1142_vm3, %v1141_v6, 0 }
 0x3ca   : > { %v1145_v9 = vand.u32 31, %v1143_v8  ;;  %v1144_v12 = vshrl.u32 %v1143_v8, 5 }
 0x3cb   : > { %4217 = vrot.lane.b32.xlu1 %v5930_v10, %s6871_s6 }
 0x3cc   : > { %v1146_v11 = vsub.s32 32, %v1145_v9  ;;  %v1148_v14 = vshll.u32 %v8376_v13, %v1145_v9  ;;  %v1151_v16 = vshll.u32 %v8374_v15, %v1145_v9  ;;  %v1154_v21 = vshll.u32 %v8372_v19, %v1145_v9 }
 0x3cd   : > { %v1157_v25 = vshll.u32 %v8370_v22, %v1145_v9  ;;  %v1160_v28 = vshll.u32 %v8368_v26, %v1145_v9  ;;  %vm1163_vm4 = vcmp.lt.s32.totalorder %v1144_v12, 1  ;;  %vm1166_vm5 = vcmp.lt.s32.totalorder %v1144_v12, 4 }
 0x3ce   : > { %v1149_v18 = vshrl.u32 %v8374_v15, %v1146_v11  ;;  %v1152_v20 = vshrl.u32 %v8372_v19, %v1146_v11  ;;  %v1155_v23 = vshrl.u32 %v8370_v22, %v1146_v11  ;;  %v1158_v27 = vshrl.u32 %v8368_v26, %v1146_v11 }
 0x3cf   : > { %v1161_v30 = vshrl.u32 %v8366_v29, %v1146_v11  ;;  %v1147_v41 = vshrl.u32 %v8376_v13, %v1146_v11  ;;  %vm1165_vm6 = vcmp.lt.s32.totalorder %v1144_v12, 3  ;;  %vm1164_vm7 = vcmp.lt.s32.totalorder %v1144_v12, 2  ;;  %v5962_v12 = vld [vmem:[%s7190_s12 + $0xc0] sm:$0xff] }
 0x3d0   : > { %v1150_v33 = vor.u32 %v1149_v18, %v1148_v14  ;;  %v1153_v34 = vor.u32 %v1152_v20, %v1151_v16  ;;  %v1156_v35 = vor.u32 %v1155_v23, %v1154_v21  ;;  %v1159_v36 = vor.u32 %v1158_v27, %v1157_v25  ;;  %5402 = vrot.lane.b32.xlu1 %v5962_v12, %s6871_s6  ;;  %v7353_v18 = vld [vmem:[%s7190_s12 + $0x20] sm:$0xff] }
 0x3d1   : > { %v1162_v37 = vor.u32 %v1161_v30, %v1160_v28  ;;  %v5900_v23 = vld [vmem:[%s7190_s12 + $0x60] sm:$0xff]  ;;  %v1120_v27 = vmul.f32 2.0, %v979_v60  ;;  %v7363_v28 = vld [vmem:[%s7190_s12 + $0x28] sm:$0xff] }
 0x3d2   : > { %v1168_v38 = vsel %vm1166_vm5, %v1156_v35, 2102212464  ;;  %v1171_v39 = vsel %vm1163_vm4, %v1150_v33, %v1153_v34  ;;  %v1175_v40 = vsel %vm1163_vm4, %v1153_v34, %v1156_v35  ;;  %v1172_v44 = vsel %vm1166_vm5, %v1159_v36, 920167782 }
 0x3d3   : > { %v1176_v45 = vsel %vm1166_vm5, %v1162_v37, 1326507024  ;;  %v1173_v48 = vsel %vm1165_vm6, %v1156_v35, %v1172_v44  ;;  %v1167_v51 = vsel %vm1163_vm4, %v1147_v41, %v1150_v33  ;;  %v1169_v53 = vsel %vm1165_vm6, %v1153_v34, %v1168_v38  ;;  %v5901_v38 = vld [vmem:[%s7190_s12 + $0x68] sm:$0xff] }
 0x3d4   : > { %v1177_v49 = vsel %vm1165_vm6, %v1159_v36, %v1176_v45  ;;  %v1174_v55 = vsel %vm1164_vm7, %v1171_v39, %v1173_v48  ;;  %v1170_v1 = vsel %vm1164_vm7, %v1167_v51, %v1169_v53  ;;  %1848 = vrot.lane.b32.xlu1 %v7353_v18, %s6871_s6  ;;  %v5854_v34 = vclamps-f32 %v1120_v27, 30.0  ;;  %v5902_v48 = vld [vmem:[%s7190_s12 + $0x70] sm:$0xff]  ;;  %v7381_v53 = vld [vmem:[%s7190_s12 + $0x38] sm:$0xff] }
 0x3d5   : > { %v1178_v57 = vsel %vm1164_vm7, %v1175_v40, %v1177_v49  ;;  %v7329_v62 = vmul.u32.u64.low %v1179_v50, %v1174_v55  ;;  %v7330_v63 = vmul.u32.u64.high %v1179_v50, %v1174_v55, %v7329_v62  ;;  %v1186_v4 = vmul.u32 %v1179_v50, %v1170_v1  ;;  %v7371_v40 = vld [vmem:[%s7190_s12 + $0x30] sm:$0xff] }
 0x3d6   : > { %v7326_v59 = vmul.u32.u64.low %v1179_v50, %v1178_v57  ;;  %v7327_v61 = vmul.u32.u64.high %v1179_v50, %v1178_v57, %v7326_v59  ;;  %v1125_v60 = vsub.f32 0.0, %v5854_v34  ;;  %v1123_v49 = vmul.f32 1.442695, %v5854_v34 }
 0x3d7   : > { %v1189_v3 = vadd.s32 1, %v7330_v63 }
 0x3d8   : > { %vm1188_vm8 = vc.u32 %v7327_v61, %v7329_v62  ;;  %3036 = vrot.lane.b32.xlu1 %v5900_v23, %s6871_s6  ;;  %v1187_v31 = vadd.s32 %v7329_v62, %v7327_v61  ;;  %v1126_v45 = vmul.f32 1.442695, %v1125_v60 }
 0x3d9   : > { %v1190_v6 = vsel %vm1188_vm8, %v1189_v3, %v7330_v63 }
 0x3da   : > { %v1191_v8 = vadd.s32 %v1190_v6, %v1186_v4  ;;  %6477 = vpow2.f32 %v1126_v45 }
 0x3db   : > { %4428 = vrot.lane.b32.xlu0 %v7289_v52, %s6871_s6  ;;  %6479 = vpow2.f32 %v1123_v49 }
 0x3dc   : > { %v1192_v9 = vadd.s32 536870912, %v1191_v8  ;;  %1850 = vrot.lane.b32.xlu1 %v7363_v28, %s6871_s6 }
 0x3de   : > { %v1193_v11 = vshrl.u32 %v1192_v9, 30 }
 0x3e0   : > { %v1194_v52 = vshll.u32 %v1193_v11, 30  ;;  %3038 = vrot.lane.b32.xlu1 %v5901_v38, %s6871_s6  ;;  %v1217_v57 = vsub.s32 4, %v1193_v11 }
 0x3e2   : > { %v1195_v14 = vsub.s32 %v1191_v8, %v1194_v52  ;;  %v1218_v59 = vsel %vm1133_vm10, %v1217_v57, %v1193_v11 }
 0x3e3   : > { %v1220_v61 = vsel %vm1132_vm11, 0, %v1218_v59 }
 0x3e4   : > { %v1197_v16 = vsub.s32 0, %v1195_v14  ;;  %1852 = vrot.lane.b32.xlu1 %v7371_v40, %s6871_s6  ;;  %v1224_v63 = vand.u32 3, %v1220_v61 }
 0x3e6   : > { %v5856_v20 = vmin.u32 %v1197_v16, %v1195_v14  ;;  %vm1229_vm12 = vcmp.eq.s32.totalorder %v1224_v63, 2  ;;  %vm1226_vm13 = vcmp.eq.s32.totalorder %v1224_v63, 0  ;;  %vm1225_vm14 = vcmp.lt.s32.totalorder %v1224_v63, 2 }
 0x3e7   : > { %v6478_v62 = vpop.eup %6477  ;;  %v1333_v16 = vadd.s32 3, %v1220_v61 }
 0x3e8   : > { %v1199_v21 = vclz %v5856_v20  ;;  %3040 = vrot.lane.b32.xlu1 %v5902_v48, %s6871_s6  ;;  %v6480_v1 = vpop.eup %6479 }
 0x3e9   : > { %v1128_v7 = vadd.f32 %v6480_v1, %v6478_v62  ;;  %v1334_v20 = vand.u32 3, %v1333_v16 }
 0x3ea   : > { %v5857_v25 = vadd.s32 4294967294, %v1199_v21 }
 0x3eb   : > { %v1129_v52 = vmul.f32 0.5, %v1128_v7  ;;  %vm1336_vm3 = vcmp.eq.s32.totalorder %v1334_v20, 0  ;;  %vm1339_vm4 = vcmp.eq.s32.totalorder %v1334_v20, 2  ;;  %vm1335_vm5 = vcmp.lt.s32.totalorder %v1334_v20, 2 }
 0x3ec   : > { %vm5858_vm9 = vcmp.lt.s32.totalorder %v5857_v25, 0  ;;  %1854 = vrot.lane.b32.xlu1 %v7381_v53, %s6871_s6 }
 0x3ed   : > { %v1202_v30 = vsel %vm5858_vm9, 0, %v5857_v25  ;;  %v1237_v25 = vsub.f32 %v6480_v1, %v6478_v62 }
 0x3ee   : > { %v1203_v32 = vsub.s32 32, %v1202_v30  ;;  %v1207_v33 = vsub.s32 4294967266, %v1202_v30  ;;  %v1204_v35 = vshll.u32 %v1195_v14, %v1202_v30 }
 0x3ef   : > { %v1238_v30 = vmul.f32 0.5, %v1237_v25 }
 0x3f0   : > { %v1205_v36 = vshrl.u32 %v1187_v31, %v1203_v32  ;;  %v1208_v37 = vadd.s32 127, %v1207_v33 }
 0x3f2   : > { %v1206_v54 = vor.u32 %v1205_v36, %v1204_v35  ;;  %v1209_v58 = vshll.u32 %v1208_v37, 23  ;;  %v7447_v36 = vld [vmem:[%s7190_s12 + $0x78] sm:$0xff] }
 0x3f3   : > { %3042 = vrot.lane.b32.xlu1 %v7447_v36, %s6871_s6  ;;  %v5936_v37 = vld [vmem:[%s7190_s12 + $0xb8] sm:$0xff] }
 0x3f4   : > { %v1210_v39 = vor.u32 4788187, %v1209_v58  ;;  %v1213_v44 = vcvt.s32.f32 %v1206_v54 }
 0x3f6   : > { %v1211_v41 = vand.u32 2147483647, %v1210_v39 }
 0x3f8   : > { %v1214_v47 = vmul.f32 %v1213_v44, %v1211_v41 }
 0x3fa   : > { %v1215_v50 = vxor.u32 2147483648, %v1214_v47 }
 0x3fc   : > { %v1216_v51 = vsel %vm1133_vm10, %v1215_v50, %v1214_v47  ;;  %v6879_v50 = vmov 1966171168  }
 0x3fd   : > { %v1219_v55 = vsel %vm1132_vm11, %v7301_v2, %v1216_v51  ;;  %v7405_v2 = vpop.permute.xlu1 %2090  ;;  %v1647_v51 = vunpack.c.l.s4 %v6879_v50 }
 0x3fe   : > { %6481 = vcosq.f32 %v1219_v55 }
 0x3ff   : > { %6483 = vsinq.f32 %v1219_v55  ;;  %v1649_v55 = vlaneseq  ;;  %v1648_v59 = vunpack.c.0.s8 %v1647_v51 }
 0x401   : > { %v1964_v35 = vpop.trf.xlu1  ;;  %v1650_v61 = vshrl.u32 %v1649_v55, 7 }
 0x403   : > { %v7479_v62 = vsub.s32 %v1648_v59, %v1650_v61  ;;  %v7502_v51 = vsub.s32 0, %v1650_v61 }
 0x405   : > { %v7455_v38 = vpop.permute.xlu1 %3277 }
 0x409   : > { %v7457_v54 = vpop.trf.xlu1 }
 0x40b   : > { %v6482_v3 = vpop.eup %6481 }
 0x40c   : > { %v6484_v4 = vpop.eup %6483  ;;  %v1230_v6 = vxor.u32 2147483648, %v6482_v3 }
 0x40d   : > { %v1227_v8 = vxor.u32 2147483648, %v6484_v4  ;;  %v7459_v58 = vpop.permute.xlu1 %4464 }
 0x40e   : > { %v1231_v9 = vsel %vm1229_vm12, %v1230_v6, %v6484_v4  ;;  %v1341_v23 = vsel %vm1339_vm4, %v1230_v6, %v6484_v4 }
 0x40f   : > { %v1228_v10 = vsel %vm1226_vm13, %v6482_v3, %v1227_v8  ;;  %v1338_v21 = vsel %vm1336_vm3, %v6482_v3, %v1227_v8 }
 0x410   : > { %v1232_v12 = vsel %vm1225_vm14, %v1228_v10, %v1231_v9  ;;  %v1342_v27 = vsel %vm1335_vm5, %v1338_v21, %v1341_v23 }
 0x411   : > { %v1233_v11 = vsel %vm1223_vm15, nan, %v1232_v12  ;;  %v1343_v32 = vsel %vm1223_vm15, nan, %v1342_v27  ;;  %v7461_v60 = vpop.trf.xlu1 }
 0x412   : > { %v1234_v14 = vadd.f32 %v1233_v11, %v1129_v52 }
 0x414   : > { %6485 = vrcp.f32 %v1234_v14 }
 0x415   : > { %v7463_v39 = vpop.permute.xlu1 %1842 }
 0x419   : > { %v7465_v41 = vpop.permute.xlu1 %3028 }
 0x41d   : > { %v7467_v44 = vpop.permute.xlu1 %3030 }
 0x421   : > { %v6486_v31 = vpop.eup %6485 }
 0x422   : > { %v1239_v33 = vmul.f32 %v6486_v31, %v1238_v30  ;;  %v1344_v34 = vmul.f32 %v6486_v31, %v1343_v32 }
 0x424   : > { %6127 = vmatpush3.xpose.msk.msra.mxu0 %vm792_vm2, %v1239_v33  ;;  %6132 = vmatpush3.xpose.msk.msra.mxu1 %vm792_vm2, %v1344_v34 }
 0x425   : > { %6136 = vmatprep.subr.mxu0 %v8364_v24  ;;  %6141 = vmatprep.subr.mxu1 %v8364_v24 }
 0x427   : > { %6129 = vmatmul.mubr.msk.f32.vlgmr.msra.gmra.mxu0 %vm792_vm2, %v7246_v42  ;;  %6134 = vmatmul.mubr.msk.f32.vlgmr.msra.gmra.mxu1 %vm792_vm2, %v7262_v46 }
 0x428   : > { %6137 = vmatpush3.xpose.msk.msra.mxu0 %vm792_vm2, %v1239_v33  ;;  %6142 = vmatpush3.xpose.msk.msra.mxu1 %vm792_vm2, %v1344_v34 }
 0x429   : > { %6138 = vmatprep.mubr.msk.f32.mxu0 %vm6872_vm1, %v8364_v24  ;;  %6143 = vmatprep.mubr.msk.f32.mxu1 %vm6872_vm1, %v8364_v24 }
 0x42a   : > { %6146 = vmatprep.subr.mxu0 %v8364_v24  ;;  %6151 = vmatprep.subr.mxu1 %v8364_v24 }
 0x42b   : > { %6139 = vmatmul.mubr.msk.f32.vlgmr.msra.gmra.mxu0 %vm792_vm2, %v7262_v46  ;;  %6144 = vmatmul.mubr.msk.f32.vlgmr.msra.gmra.mxu1 %vm792_vm2, %v7246_v42  ;;  %v7442_v46 = vld [vmem:[%s7190_s12] sm:$0xff] }
 0x42c   : > { %6147 = vmatpush3.msra.mxu0 %v7257_v43  ;;  %6152 = vmatpush3.msra.mxu1 %v7405_v2 }
 0x42d   : > { %6148 = vmatprep.mubr.msk.f32.mxu0 %vm6872_vm1, %v8364_v24  ;;  %6153 = vmatprep.mubr.msk.f32.mxu1 %vm6872_vm1, %v8364_v24 }
 0x42e   : > { %6156 = vmatprep.subr.mxu0 %v8364_v24  ;;  %6161 = vmatprep.subr.mxu1 %v8364_v24  ;;  %v7439_v42 = vpop.trf.xlu0 }
 0x42f   : > { %6149 = vmatmul.mubr.msk.f32.vlgmr.msra.gmra.mxu0 %vm792_vm2, %v1964_v35  ;;  %6154 = vmatmul.mubr.msk.f32.vlgmr.msra.gmra.mxu1 %vm792_vm2, %v7295_v56 }
 0x430   : > { %6157 = vmatpush3.msra.mxu0 %v7257_v43  ;;  %6162 = vmatpush3.msra.mxu1 %v7405_v2 }
 0x431   : > { %6158 = vmatprep.mubr.msk.f32.mxu0 %vm6872_vm1, %v8364_v24  ;;  %6163 = vmatprep.mubr.msk.f32.mxu1 %vm6872_vm1, %v8364_v24  ;;  %v7469_v45 = vpop.permute.xlu1 %1844 }
 0x432   : > { %6166 = vmatprep.subr.mxu0 %v8364_v24  ;;  %6171 = vmatprep.subr.mxu1 %v8364_v24 }
 0x433   : > { %6159 = vmatmul.mubr.msk.f32.vlgmr.msra.gmra.mxu0 %vm792_vm2, %v7295_v56  ;;  %6164 = vmatmul.mubr.msk.f32.vlgmr.msra.gmra.mxu1 %vm792_vm2, %v1964_v35  ;;  %v5935_v56 = vld [vmem:[%s7190_s12 + $0xb0] sm:$0xff] }
 0x434   : > { %6168 = vmatprep.mubr.msk.f32.mxu0 %vm6872_vm1, %v8364_v24  ;;  %6173 = vmatprep.mubr.msk.f32.mxu1 %vm6872_vm1, %v8364_v24 }
 0x435   : > { %4227 = vrot.lane.b32.xlu1 %v5935_v56, %s6871_s6 }
 0x439   : > { %4229 = vrot.lane.b32.xlu1 %v5936_v37, %s6871_s6  ;;  %v7471_v47 = vpop.permute.xlu1 %1846 }
 0x43d   : > { %v7473_v48 = vpop.permute.xlu1 %4217 }
 0x43e   : > { %8430 = vst [vmem:[#allocation35_spill] sm:$0xff] %v7473_v48 }
 0x442   : > { %v7475_v49 = vpop.permute.xlu1 %5402 }
 0x443   : > { %8431 = vst [vmem:[#allocation36_spill] sm:$0xff] %v7475_v49 }
 0x446   : > { %v7477_v57 = vpop.permute.xlu1 %1848 }
 0x44a   : > { %v7481_v3 = vpop.permute.xlu1 %3036 }
 0x44d   : > { %v4429_v43 = vpop.permute.xlu0 %4428 }
 0x44e   : > { %4431 = vxpose.xlu0.b32.start.end [1/1] (short) (narrow) %v4429_v43, 8  ;;  %v7488_v23 = vpop.permute.xlu1 %1850 }
 0x477   : > { %1840 = vrot.lane.b32.xlu0 %v7442_v46, %s6871_s6 }
 0x4e7   : > { %v1416_v63 = vpop.f32.mrf.mxu0  ;;  %v1491_v1 = vpop.f32.mrf.mxu1 }
 0x4e8   : > { %v1495_v4 = vsub.f32 %v1416_v63, %v1491_v1 }
 0x4e9   : > { %v6130_v7 = vpop.f32.mrf.mxu0  ;;  %v6135_v6 = vpop.f32.mrf.mxu1 }
 0x4ea   : > { %v1645_v8 = vcombine.high %v1495_v4, %v1495_v4  ;;  %v1652_v9 = vrot.slane %v1495_v4, %v7479_v62  ;;  %v7506_v7 = vpop.permute.xlu1 %3038 }
 0x4eb   : > { %v1562_v10 = vpop.f32.mrf.mxu0  ;;  %v1632_v52 = vpop.f32.mrf.mxu1 }
 0x4ec   : > { %v1660_v12 = vcombine.high %v1652_v9, %v1652_v9  ;;  %v1668_v11 = vrot.slane %v1652_v9, %v7479_v62  ;;  %v1633_v14 = vadd.f32 %v1632_v52, %v1562_v10  ;;  %v7486_v16 = vrot.slane %v1645_v8, %v7479_v62 }
 0x4ed   : > { %v6140_v20 = vpop.f32.mrf.mxu0  ;;  %v6145_v21 = vpop.f32.mrf.mxu1 }
 0x4ee   : > { %v1682_v25 = vrot.slane %v1660_v12, %v7479_v62  ;;  %v1695_v27 = vcombine.high %v1633_v14, %v1633_v14  ;;  %v1702_v30 = vrot.slane %v1633_v14, %v7479_v62  ;;  %v1690_v33 = vcombine.high %v1668_v11, %v1668_v11 }
 0x4ef   : > { %v7492_v31 = vpop.f32.mrf.mxu0  ;;  %v7494_v32 = vpop.f32.mrf.mxu1  ;;  %v1675_v34 = vrot.slane %v7486_v16, %v7479_v62 }
 0x4f0   : > { %v7499_v35 = vrot.slane %v1695_v27, %v7479_v62  ;;  %v1710_v43 = vcombine.high %v1702_v30, %v1702_v30  ;;  %v1718_v56 = vrot.slane %v1702_v30, %v7479_v62  ;;  %v1692_v55 = vcombine.high %v1682_v25, %v1682_v25 }
 0x4f1   : > { %v6150_v37 = vpop.f32.mrf.mxu0  ;;  %v6155_v50 = vpop.f32.mrf.mxu1  ;;  %v1751_v1 = vrot.slane %v1682_v25, %v7502_v51  ;;  %v1755_v4 = vrot.slane %v1690_v33, %v7502_v51  ;;  %v1763_v9 = vrot.slane %v1675_v34, %v7502_v51  ;;  %v1691_v52 = vcombine.high %v1675_v34, %v1675_v34 }
 0x4f2   : > { %v1725_v6 = vrot.slane %v7499_v35, %v7479_v62  ;;  %v1732_v8 = vrot.slane %v1710_v43, %v7479_v62  ;;  %v1740_v10 = vcombine.high %v1718_v56, %v1718_v56  ;;  %v1661_v30 = vcombine.high %v7486_v16, %v7486_v16 }
 0x4f3   : > { %v2233_v59 = vpop.f32.mrf.mxu0  ;;  %v2303_v63 = vpop.f32.mrf.mxu1  ;;  %v1747_v33 = vrot.slane %v1668_v11, %v7502_v51  ;;  %v1759_v43 = vrot.slane %v1692_v55, %v7502_v51  ;;  %v1785_v34 = vmul.f32 %v1751_v1, %v7310_v17  ;;  %v1786_v37 = vmul.f32 %v1755_v4, %v7334_v0 }
 0x4f4   : > { %v1742_v20 = vcombine.high %v1732_v8, %v1732_v8  ;;  %v1799_v21 = vrot.slane %v1732_v8, %v7502_v51  ;;  %v1811_v25 = vrot.slane %v1725_v6, %v7502_v51  ;;  %v1741_v27 = vcombine.high %v1725_v6, %v1725_v6 }
 0x4f5   : > { %v6160_v12 = vpop.f32.mrf.mxu0  ;;  %v6165_v14 = vpop.f32.mrf.mxu1  ;;  %v1803_v50 = vrot.slane %v1740_v10, %v7502_v51  ;;  %v7526_v8 = vmul.f32 %v1763_v9, %v7353_v18  ;;  %v1897_v11 = vmul.f32 %v7463_v39, %v1751_v1  ;;  %v1898_v55 = vmul.f32 %v7469_v45, %v1755_v4 }
 0x4f6   : > { %v7523_v12 = vpop.trf.xlu0  ;;  %v1807_v6 = vrot.slane %v1742_v20, %v7502_v51  ;;  %v1771_v14 = vrot.slane %v1691_v52, %v7502_v51  ;;  %v1819_v16 = vrot.slane %v1741_v27, %v7502_v51  ;;  %v1865_v24 = vmul.f32 %v7463_v39, %v1799_v21  ;;  %v1853_v20 = vpop.permute.xlu1 %1852 }
 0x4f7   : > { %8432 = vst [vmem:[#allocation37_spill] sm:$0xff] %v7523_v12  ;;  %v7535_v61 = vmul.f32 %v7477_v57, %v1811_v25  ;;  %v1900_v10 = vmul.f32 %v7477_v57, %v1763_v9  ;;  %v1905_v29 = vmul.f32 %v1799_v21, %v7310_v17  ;;  %v1908_v26 = vmul.f32 %v1811_v25, %v7353_v18 }
 0x4f8   : > { %v1795_v52 = vrot.slane %v1718_v56, %v7502_v51  ;;  %v1787_v27 = vmul.f32 %v1759_v43, %v7343_v5  ;;  %v1711_v1 = vcombine.high %v7499_v35, %v7499_v35  ;;  %v1866_v4 = vmul.f32 %v7469_v45, %v1803_v50 }
 0x4f9   : > { %v7545_v39 = vmul.f32 %v1853_v20, %v1819_v16  ;;  %v1899_v22 = vmul.f32 %v7471_v47, %v1759_v43  ;;  %v1867_v57 = vmul.f32 %v7471_v47, %v1807_v6  ;;  %v7550_v17 = vmul.f32 %v1771_v14, %v7371_v40 }
 0x4fa   : > { %v1784_v18 = vmul.f32 %v1747_v33, %v7442_v46  ;;  %v1876_v56 = vsub.f32 %v7526_v8, %v7535_v61  ;;  %v1906_v9 = vmul.f32 %v1803_v50, %v7334_v0  ;;  %v1902_v21 = vmul.f32 %v1853_v20, %v1771_v14  ;;  %v1841_v25 = vpop.permute.xlu0 %1840  ;;  %v7565_v50 = vpop.permute.xlu1 %3040 }
 0x4fb   : > { %v1873_v35 = vsub.f32 %v1785_v34, %v1865_v24  ;;  %v1907_v45 = vmul.f32 %v1807_v6, %v7343_v5  ;;  %v1916_v19 = vadd.f32 %v1908_v26, %v1900_v10  ;;  %v1904_v43 = vmul.f32 %v1795_v52, %v7442_v46 }
 0x4fc   : > { %v1913_v15 = vadd.f32 %v1905_v29, %v1897_v11  ;;  %v1878_v47 = vsub.f32 %v7550_v17, %v7545_v39  ;;  %v1910_v13 = vmul.f32 %v1819_v16, %v7371_v40  ;;  %v1874_v49 = vsub.f32 %v1786_v37, %v1866_v4 }
 0x4fd   : > { %v1864_v48 = vmul.f32 %v1841_v25, %v1795_v52  ;;  %v1875_v12 = vsub.f32 %v1787_v27, %v1867_v57  ;;  %v1896_v61 = vmul.f32 %v1841_v25, %v1747_v33  ;;  %v2304_v8 = vadd.f32 %v2303_v63, %v2233_v59 }
 0x4fe   : > { %v1689_v0 = vrot.slane %v1661_v30, %v7479_v62  ;;  %v1881_v24 = vsel %vm792_vm2, %v1873_v35, 0.0  ;;  %v1914_v34 = vadd.f32 %v1906_v9, %v1898_v55  ;;  %v1739_v26 = vrot.slane %v1711_v1, %v7479_v62  ;;  %v1855_v9 = vpop.permute.xlu1 %1854 }
 0x4ff   : > { %v1872_v5 = vsub.f32 %v1784_v18, %v1864_v48  ;;  %v1921_v29 = vsel %vm792_vm2, %v1913_v15, 0.0  ;;  %v1912_v46 = vadd.f32 %v1904_v43, %v1896_v61  ;;  %v7567_v6 = vmul.f32 2.0, %v2304_v8 }
 0x500   : > { %v1693_v40 = vcombine.high %v1689_v0, %v1689_v0  ;;  %v1915_v37 = vadd.f32 %v1907_v45, %v1899_v22  ;;  %v1743_v59 = vcombine.high %v1739_v26, %v1739_v26  ;;  %v1767_v63 = vrot.slane %v1689_v0, %v7502_v51 }
 0x501   : > { %v1880_v33 = vsel %vm792_vm2, %v1872_v5, 0.0  ;;  %v1920_v14 = vsel %vm792_vm2, %v1912_v46, 0.0  ;;  %v2318_v48 = vand.u32 2147483647, %v7567_v6  ;;  %v1815_v16 = vrot.slane %v1739_v26, %v7502_v51 }
 0x502   : > { %v1882_v30 = vadd.f32 %v1881_v24, %v1880_v33  ;;  %v1918_v15 = vadd.f32 %v1910_v13, %v1902_v21  ;;  %v1883_v11 = vsel %vm792_vm2, %v1874_v49, 0.0  ;;  %v1922_v55 = vadd.f32 %v1921_v29, %v1920_v14 }
 0x503   : > { %v2321_v10 = vand.u32 2139095040, %v7567_v6  ;;  %v1885_v22 = vsel %vm792_vm2, %v1875_v12, 0.0  ;;  %v1923_v20 = vsel %vm792_vm2, %v1914_v34, 0.0  ;;  %v1775_v27 = vrot.slane %v1693_v40, %v7502_v51 }
 0x504   : > { %v1884_v52 = vadd.f32 %v1883_v11, %v1882_v30  ;;  %v1924_v1 = vadd.f32 %v1923_v20, %v1922_v55  ;;  %v2325_v57 = vand.u32 8388607, %v2318_v48  ;;  %v1823_v18 = vrot.slane %v1743_v59, %v7502_v51 }
 0x505   : > { %v2322_v4 = vshrl.u32 %v2321_v10, 23  ;;  %v1925_v13 = vsel %vm792_vm2, %v1915_v37, 0.0  ;;  %v1789_v21 = vmul.f32 %v1767_v63, %v7363_v28  ;;  %v1869_v12 = vmul.f32 %v7488_v23, %v1815_v16 }
 0x506   : > { %v1886_v49 = vadd.f32 %v1885_v22, %v1884_v52  ;;  %v1926_v35 = vadd.f32 %v1925_v13, %v1924_v1  ;;  %v1871_v45 = vmul.f32 %v1855_v9, %v1823_v18  ;;  %v1887_v43 = vsel %vm792_vm2, %v1876_v56, 0.0 }
 0x507   : > { %v5880_v25 = vadd.s32 4294967169, %v2322_v4  ;;  %v1877_v61 = vsub.f32 %v1789_v21, %v1869_v12  ;;  %v1901_v0 = vmul.f32 %v7488_v23, %v1767_v63  ;;  %v1909_v24 = vmul.f32 %v1815_v16, %v7363_v28  ;;  %v7593_v23 = vld [vmem:[%s7190_s12 + $0x50] sm:$0xff]  ;;  %v5929_v16 = vld [vmem:[%s7190_s12 + $0x80] sm:$0xff]  ;;  %v7615_v12 = vld [vmem:[%s7190_s12 + $0x58] sm:$0xff] }
 0x508   : > { %v1888_v8 = vadd.f32 %v1887_v43, %v1886_v49  ;;  %v2326_v34 = vor.u32 8388608, %v2325_v57  ;;  %v1791_v26 = vmul.f32 %v1775_v27, %v7381_v53  ;;  %v1911_v29 = vmul.f32 %v1823_v18, %v7381_v53  ;;  %3032 = vrot.lane.b32.xlu0 %v7593_v23, %s6871_s6 }
 0x509   : > { %v2328_v5 = vadd.s32 1, %v5880_v25  ;;  %v1889_v46 = vsel %vm792_vm2, %v1877_v61, 0.0  ;;  %v1903_v40 = vmul.f32 %v1855_v9, %v1775_v27  ;;  %v1917_v37 = vadd.f32 %v1909_v24, %v1901_v0 }
 0x50a   : > { %v1927_v56 = vsel %vm792_vm2, %v1916_v19, 0.0  ;;  %v1879_v33 = vsub.f32 %v1791_v26, %v1871_v45  ;;  %v1890_v59 = vadd.f32 %v1889_v46, %v1888_v8  ;;  %v1891_v53 = vsel %vm792_vm2, %v1878_v47, 0.0 }
 0x50b   : > { %vm2329_vm6 = vcmp.gt.s32.totalorder %v2328_v5, 0  ;;  %v1928_v30 = vadd.f32 %v1927_v56, %v1926_v35  ;;  %v1919_v63 = vadd.f32 %v1911_v29, %v1903_v40  ;;  %v1931_v19 = vsel %vm792_vm2, %v1918_v15, 0.0 }
 0x50c   : > { %v2330_v28 = vsel %vm2329_vm6, %v2328_v5, 0  ;;  %v2366_v55 = vshll.u32 %v2326_v34, 8  ;;  %v1929_v10 = vsel %vm792_vm2, %v1917_v37, 0.0  ;;  %v1892_v20 = vadd.f32 %v1891_v53, %v1890_v59  ;;  %4215 = vrot.lane.b32.xlu0 %v5929_v16, %s6871_s6 }
 0x50d   : > { %v2332_v14 = vand.u32 31, %v2330_v28  ;;  %v2331_v11 = vshrl.u32 %v2330_v28, 5  ;;  %v1893_v52 = vsel %vm792_vm2, %v1879_v33, 0.0  ;;  %v1930_v27 = vadd.f32 %v1929_v10, %v1928_v30  ;;  %v5963_v33 = vld [vmem:[%s7190_s12 + $0xc8] sm:$0xff] }
 0x50e   : > { %v8433_v1 = vmov 683565275   ;;  %v8434_v57 = vmov 2475754826   ;;  %v8435_v17 = vmov 2131351028   ;;  %v1894_v34 = vadd.f32 %v1893_v52, %v1892_v20 }
 0x50f   : > { %v2333_v22 = vsub.s32 32, %v2332_v14  ;;  %v2335_v4 = vshll.u32 %v8433_v1, %v2332_v14  ;;  %v2338_v39 = vshll.u32 %v8434_v57, %v2332_v14  ;;  %v2341_v47 = vshll.u32 %v8435_v17, %v2332_v14 }
 0x510   : > { %v1933_v18 = vsel %vm792_vm2, %v1919_v63, 0.0  ;;  %v8436_v49 = vmov 2102212464   ;;  %v8437_v35 = vmov 920167782   ;;  %vm2350_vm7 = vcmp.lt.s32.totalorder %v2331_v11, 1  ;;  %3034 = vrot.lane.b32.xlu0 %v7615_v12, %s6871_s6 }
 0x511   : > { %v2336_v15 = vshrl.u32 %v8434_v57, %v2333_v22  ;;  %v2339_v13 = vshrl.u32 %v8435_v17, %v2333_v22  ;;  %v2342_v9 = vshrl.u32 %v8436_v49, %v2333_v22  ;;  %v2344_v21 = vshll.u32 %v8436_v49, %v2332_v14  ;;  %1936 = vst.msk [vmem:[#allocation4] sm:$0xff] %vm792_vm2, %v1894_v34 }
 0x512   : > { %v2345_v25 = vshrl.u32 %v8437_v35, %v2333_v22  ;;  %v2347_v45 = vshll.u32 %v8437_v35, %v2332_v14  ;;  %v8438_v43 = vmov 1326507024   ;;  %vm2353_vm8 = vcmp.lt.s32.totalorder %v2331_v11, 4 }
 0x513   : > { %v2348_v61 = vshrl.u32 %v8438_v43, %v2333_v22  ;;  %v2337_v8 = vor.u32 %v2336_v15, %v2335_v4  ;;  %v2340_v0 = vor.u32 %v2339_v13, %v2338_v39  ;;  %v2343_v24 = vor.u32 %v2342_v9, %v2341_v47  ;;  %v7637_v4 = vld [vmem:[%s7190_s12 + $0x90] sm:$0xff] }
 0x514   : > { %v2346_v5 = vor.u32 %v2345_v25, %v2344_v21  ;;  %v1932_v29 = vadd.f32 %v1931_v19, %v1930_v27  ;;  %v2334_v46 = vshrl.u32 %v8433_v1, %v2333_v22  ;;  %vm2352_vm9 = vcmp.lt.s32.totalorder %v2331_v11, 3  ;;  %5404 = vrot.lane.b32.xlu0 %v5963_v33, %s6871_s6  ;;  %v5964_v47 = vld [vmem:[%s7190_s12 + $0xd0] sm:$0xff] }
 0x515   : > { %v2349_v26 = vor.u32 %v2348_v61, %v2347_v45  ;;  %v2355_v40 = vsel %vm2353_vm8, %v2343_v24, 2102212464  ;;  %v2358_v37 = vsel %vm2350_vm7, %v2337_v8, %v2340_v0  ;;  %v2362_v56 = vsel %vm2350_vm7, %v2340_v0, %v2343_v24 }
 0x516   : > { %v2359_v59 = vsel %vm2353_vm8, %v2346_v5, 920167782  ;;  %v1934_v28 = vadd.f32 %v1933_v18, %v1932_v29  ;;  %vm2351_vm10 = vcmp.lt.s32.totalorder %v2331_v11, 2  ;;  %v2354_v63 = vsel %vm2350_vm7, %v2334_v46, %v2337_v8 }
 0x517   : > { %v2363_v30 = vsel %vm2353_vm8, %v2349_v26, 1326507024  ;;  %v2360_v53 = vsel %vm2352_vm9, %v2343_v24, %v2359_v59  ;;  %v2356_v16 = vsel %vm2352_vm9, %v2340_v0, %v2355_v40  ;;  %v8439_v34 = vsub.f32 %v7492_v31, %v7494_v32 }
 0x518   : > { %v2364_v14 = vsel %vm2352_vm9, %v2346_v5, %v2363_v30  ;;  %v2361_v19 = vsel %vm2351_vm10, %v2358_v37, %v2360_v53  ;;  %1938 = vrot.lane.b32.xlu1 %v1934_v28, %s6880_s27  ;;  %v2357_v11 = vsel %vm2351_vm10, %v2354_v63, %v2356_v16  ;;  %4219 = vrot.lane.b32.xlu0 %v7637_v4, %s6871_s6  ;;  %vm2320_vm13 = vcmp.lt.s32.totalorder %v7567_v6, 0 }
 0x519   : > { %v2365_v10 = vsel %vm2351_vm10, %v2362_v56, %v2364_v14  ;;  %v7633_v52 = vmul.u32.u64.low %v2366_v55, %v2361_v19  ;;  %v7634_v27 = vmul.u32.u64.high %v2366_v55, %v2361_v19, %v7633_v52  ;;  %v2373_v18 = vmul.u32 %v2366_v55, %v2357_v11 }
 0x51a   : > { %v7630_v22 = vmul.u32.u64.low %v2366_v55, %v2365_v10  ;;  %v7631_v20 = vmul.u32.u64.high %v2366_v55, %v2365_v10, %v7630_v22  ;;  %v2307_v5 = vmul.f32 2.0, %v8439_v34  ;;  %vm2319_vm14 = vcmp.le.f32.partialorder %v2318_v48, 0.7853982 }
 0x51b   : > { %v2376_v39 = vadd.s32 1, %v7634_v27  ;;  %vm2410_vm5 = vweird.f32 %v7567_v6  ;;  %vm1941_vm9 = vcmask 130112  }
 0x51c   : > { %vm2375_vm11 = vc.u32 %v7631_v20, %v7633_v52  ;;  %5406 = vrot.lane.b32.xlu0 %v5964_v47, %s6871_s6  ;;  %v2374_v55 = vadd.s32 %v7633_v52, %v7631_v20  ;;  %v5879_v40 = vclamps-f32 %v2307_v5, 30.0 }
 0x51d   : > { %v2377_v15 = vsel %vm2375_vm11, %v2376_v39, %v7634_v27 }
 0x51e   : > { %v2378_v13 = vadd.s32 %v2377_v15, %v2373_v18  ;;  %v2312_v28 = vsub.f32 0.0, %v5879_v40  ;;  %v2310_v31 = vmul.f32 1.442695, %v5879_v40 }
 0x520   : > { %v2379_v9 = vadd.s32 536870912, %v2378_v13  ;;  %v2313_v16 = vmul.f32 1.442695, %v2312_v28 }
 0x522   : > { %v2380_v21 = vshrl.u32 %v2379_v9, 30  ;;  %6487 = vpow2.f32 %v2313_v16  ;;  %v5966_v16 = vld [vmem:[%s7190_s12 + $0xe0] sm:$0xff] }
 0x523   : > { %6489 = vpow2.f32 %v2310_v31  ;;  %v5967_v31 = vld [vmem:[%s7190_s12 + $0xe8] sm:$0xff] }
 0x524   : > { %v2381_v25 = vshll.u32 %v2380_v21, 30  ;;  %v2404_v20 = vsub.s32 4, %v2380_v21 }
 0x526   : > { %v2382_v45 = vsub.s32 %v2378_v13, %v2381_v25  ;;  %v2405_v52 = vsel %vm2320_vm13, %v2404_v20, %v2380_v21 }
 0x527   : > { %v2407_v27 = vsel %vm2319_vm14, 0, %v2405_v52 }
 0x528   : > { %v2384_v61 = vsub.s32 0, %v2382_v45  ;;  %v2411_v39 = vand.u32 3, %v2407_v27 }
 0x52a   : > { %v5881_v8 = vmin.u32 %v2384_v61, %v2382_v45  ;;  %vm2416_vm15 = vcmp.eq.s32.totalorder %v2411_v39, 2  ;;  %vm2413_vm3 = vcmp.eq.s32.totalorder %v2411_v39, 0  ;;  %vm2412_vm4 = vcmp.lt.s32.totalorder %v2411_v39, 2 }
 0x52c   : > { %v2386_v0 = vclz %v5881_v8 }
 0x52e   : > { %v5882_v24 = vadd.s32 4294967294, %v2386_v0 }
 0x52f   : > { %v6488_v11 = vpop.eup %6487 }
 0x530   : > { %vm5883_vm12 = vcmp.lt.s32.totalorder %v5882_v24, 0  ;;  %v6490_v47 = vpop.eup %6489 }
 0x531   : > { %v2389_v26 = vsel %vm5883_vm12, 0, %v5882_v24  ;;  %v2315_v13 = vadd.f32 %v6490_v47, %v6488_v11  ;;  %v2520_v24 = vadd.s32 3, %v2407_v27 }
 0x532   : > { %v2390_v29 = vsub.s32 32, %v2389_v26  ;;  %v2394_v46 = vsub.s32 4294967266, %v2389_v26  ;;  %v2391_v37 = vshll.u32 %v2382_v45, %v2389_v26 }
 0x533   : > { %v2316_v61 = vmul.f32 0.5, %v2315_v13  ;;  %v2521_v34 = vand.u32 3, %v2520_v24 }
 0x534   : > { %v2392_v56 = vshrl.u32 %v2374_v55, %v2390_v29  ;;  %v2395_v33 = vadd.s32 127, %v2394_v46  ;;  %v2424_v55 = vsub.f32 %v6490_v47, %v6488_v11 }
 0x535   : > { %vm2523_vm6 = vcmp.eq.s32.totalorder %v2521_v34, 0  ;;  %vm2526_vm7 = vcmp.eq.s32.totalorder %v2521_v34, 2  ;;  %vm2522_vm8 = vcmp.lt.s32.totalorder %v2521_v34, 2 }
 0x536   : > { %v2393_v59 = vor.u32 %v2392_v56, %v2391_v37  ;;  %v2396_v30 = vshll.u32 %v2395_v33, 23  ;;  %v2425_v46 = vmul.f32 0.5, %v2424_v55 }
 0x538   : > { %v2397_v63 = vor.u32 4788187, %v2396_v30  ;;  %v2400_v14 = vcvt.s32.f32 %v2393_v59  ;;  %v8440_v59 = vmov 0.0   ;;  %v6517_v30 = vld [vmem:[%s7243_s18 + $0x8] sm:$0xff] }
 0x53a   : > { %v2398_v53 = vand.u32 2147483647, %v2397_v63 }
 0x53c   : > { %v2401_v19 = vmul.f32 %v2400_v14, %v2398_v53  ;;  %v7724_v14 = vld [vmem:[%s7190_s12 + $0xa0] sm:$0xff] }
 0x53e   : > { %v2402_v32 = vxor.u32 2147483648, %v2401_v19 }
 0x540   : > { %v2403_v10 = vsel %vm2320_vm13, %v2402_v32, %v2401_v19  ;;  %v7731_v19 = vld [vmem:[%s7190_s12 + $0xa8] sm:$0xff]  ;;  %v5968_v32 = vld [vmem:[%s7190_s12 + $0xf0] sm:$0xff] }
 0x541   : > { %v2406_v22 = vsel %vm2319_vm14, %v7567_v6, %v2403_v10  ;;  %v7679_v6 = vld [vmem:[%s7243_s18 + $0x10] sm:$0xff]  ;;  %8443 = vst [vmem:[#allocation40_spill] sm:$0xff] %v7731_v19  ;;  %v5969_v10 = vld [vmem:[%s7190_s12 + $0xf8] sm:$0xff] }
 0x542   : > { %6491 = vcosq.f32 %v2406_v22 }
 0x543   : > { %6493 = vsinq.f32 %v2406_v22 }
 0x54f   : > { %v6492_v18 = vpop.eup %6491 }
 0x550   : > { %v6494_v15 = vpop.eup %6493  ;;  %v2417_v9 = vxor.u32 2147483648, %v6492_v18 }
 0x551   : > { %v2414_v25 = vxor.u32 2147483648, %v6494_v15 }
 0x552   : > { %v2418_v48 = vsel %vm2416_vm15, %v2417_v9, %v6494_v15  ;;  %v2528_v26 = vsel %vm2526_vm7, %v2417_v9, %v6494_v15 }
 0x553   : > { %v2415_v45 = vsel %vm2413_vm3, %v6492_v18, %v2414_v25  ;;  %v2525_v5 = vsel %vm2523_vm6, %v6492_v18, %v2414_v25 }
 0x554   : > { %v2419_v8 = vsel %vm2412_vm4, %v2415_v45, %v2418_v48  ;;  %v2529_v29 = vsel %vm2522_vm8, %v2525_v5, %v2528_v26 }
 0x555   : > { %v2420_v21 = vsel %vm2410_vm5, nan, %v2419_v8  ;;  %v2530_v37 = vsel %vm2410_vm5, nan, %v2529_v29 }
 0x556   : > { %v2421_v0 = vadd.f32 %v2420_v21, %v2316_v61 }
 0x558   : > { %6495 = vrcp.f32 %v2421_v0 }
 0x565   : > { %v6496_v40 = vpop.eup %6495 }
 0x566   : > { %v2426_v56 = vmul.f32 %v6496_v40, %v2425_v46  ;;  %v2531_v33 = vmul.f32 %v6496_v40, %v2530_v37 }
 0x568   : > { %6167 = vmatpush3.xpose.msk.msra.mxu0 %vm792_vm2, %v2426_v56  ;;  %6172 = vmatpush3.xpose.msk.msra.mxu1 %vm792_vm2, %v2531_v33 }
 0x569   : > { %6176 = vmatprep.subr.mxu0 %v8440_v59  ;;  %6181 = vmatprep.subr.mxu1 %v8440_v59 }
 0x56b   : > { %6169 = vmatmul.mubr.msk.f32.vlgmr.msra.gmra.mxu0 %vm792_vm2, %v6517_v30  ;;  %6174 = vmatmul.mubr.msk.f32.vlgmr.msra.gmra.mxu1 %vm792_vm2, %v7405_v2 }
 0x56c   : > { %6177 = vmatpush3.xpose.msk.msra.mxu0 %vm792_vm2, %v2426_v56  ;;  %6182 = vmatpush3.xpose.msk.msra.mxu1 %vm792_vm2, %v2531_v33 }
 0x56d   : > { %6178 = vmatprep.mubr.msk.f32.mxu0 %vm6872_vm1, %v8440_v59  ;;  %6183 = vmatprep.mubr.msk.f32.mxu1 %vm6872_vm1, %v8440_v59 }
 0x56e   : > { %6186 = vmatprep.subr.mxu0 %v8440_v59  ;;  %6191 = vmatprep.subr.mxu1 %v8440_v59 }
 0x56f   : > { %6179 = vmatmul.mubr.msk.f32.vlgmr.msra.gmra.mxu0 %vm792_vm2, %v7405_v2  ;;  %6184 = vmatmul.mubr.msk.f32.vlgmr.msra.gmra.mxu1 %vm792_vm2, %v6517_v30  ;;  %v7699_v2 = vpop.permute.xlu1 %3042 }
 0x570   : > { %6187 = vmatpush3.msra.mxu0 %v7679_v6  ;;  %6192 = vmatpush3.msra.mxu1 %v7455_v38 }
 0x571   : > { %6188 = vmatprep.mubr.msk.f32.mxu0 %vm6872_vm1, %v8440_v59  ;;  %6193 = vmatprep.mubr.msk.f32.mxu1 %vm6872_vm1, %v8440_v59 }
 0x572   : > { %6196 = vmatprep.subr.mxu0 %v8440_v59  ;;  %6201 = vmatprep.subr.mxu1 %v8440_v59 }
 0x573   : > { %6189 = vmatmul.mubr.msk.f32.vlgmr.msra.gmra.mxu0 %vm792_vm2, %v7457_v54  ;;  %6194 = vmatmul.mubr.msk.f32.vlgmr.msra.gmra.mxu1 %vm792_vm2, %v7439_v42  ;;  %v7711_v28 = vpop.permute.xlu1 %4227 }
 0x574   : > { %6197 = vmatpush3.msra.mxu0 %v7679_v6  ;;  %6202 = vmatpush3.msra.mxu1 %v7455_v38  ;;  %8441 = vst [vmem:[#allocation38_spill] sm:$0xff] %v7711_v28 }
 0x575   : > { %6198 = vmatprep.mubr.msk.f32.mxu0 %vm6872_vm1, %v8440_v59  ;;  %6203 = vmatprep.mubr.msk.f32.mxu1 %vm6872_vm1, %v8440_v59 }
 0x576   : > { %6206 = vmatprep.subr.mxu0 %v8440_v59  ;;  %6211 = vmatprep.subr.mxu1 %v8440_v59 }
 0x577   : > { %6199 = vmatmul.mubr.msk.f32.vlgmr.msra.gmra.mxu0 %vm792_vm2, %v7439_v42  ;;  %6204 = vmatmul.mubr.msk.f32.vlgmr.msra.gmra.mxu1 %vm792_vm2, %v7457_v54  ;;  %v7713_v63 = vpop.permute.xlu1 %4229  ;;  %v7717_v42 = vld [vmem:[%s7190_s12 + $0x98] sm:$0xff] }
 0x578   : > { %6208 = vmatprep.mubr.msk.f32.mxu0 %vm6872_vm1, %v8440_v59  ;;  %6213 = vmatprep.mubr.msk.f32.mxu1 %vm6872_vm1, %v8440_v59  ;;  %8442 = vst [vmem:[#allocation39_spill] sm:$0xff] %v7713_v63  ;;  %v5965_v54 = vld [vmem:[%s7190_s12 + $0xd8] sm:$0xff] }
 0x579   : > { %4221 = vrot.lane.b32.xlu0 %v7717_v42, %s6871_s6 }
 0x57d   : > { %5408 = vrot.lane.b32.xlu0 %v5965_v54, %s6871_s6 }
 0x581   : > { %4223 = vrot.lane.b32.xlu0 %v7724_v14, %s6871_s6 }
 0x585   : > { %5410 = vrot.lane.b32.xlu0 %v5966_v16, %s6871_s6 }
 0x589   : > { %4225 = vrot.lane.b32.xlu0 %v7731_v19, %s6871_s6  ;;  %v6523_v19 = vld [vmem:[%s7190_s12 + $0x70] sm:$0xff] }
 0x58a   : > { %v1939_v53 = vpop.permute.xlu1 %1938 }
 0x58b   : > { %1942 = vst.msk [vmem:[#allocation4] sm:$0xff] %vm1941_vm9, %v1939_v53 }
 0x58d   : > { %5412 = vrot.lane.b32.xlu0 %v5967_v31, %s6871_s6 }
 0x591   : > { %5414 = vrot.lane.b32.xlu0 %v5968_v32, %s6871_s6 }
 0x595   : > { %5416 = vrot.lane.b32.xlu0 %v5969_v10, %s6871_s6  ;;  %s6881_s6 = smov [#allocation16]  }
 0x62b   : > { %v2603_v22 = vpop.f32.mrf.mxu0  ;;  %v2678_v20 = vpop.f32.mrf.mxu1 }
 0x62c   : > { %v2682_v52 = vsub.f32 %v2603_v22, %v2678_v20 }
 0x62d   : > { %v6170_v27 = vpop.f32.mrf.mxu0  ;;  %v6175_v11 = vpop.f32.mrf.mxu1 }
 0x62e   : > { %v2833_v39 = vcombine.high %v2682_v52, %v2682_v52  ;;  %v2840_v47 = vrot.slane %v2682_v52, %v7479_v62  ;;  %v6519_v11 = vld [vmem:[%s7190_s12 + $0x40] sm:$0xff] }
 0x62f   : > { %v2749_v18 = vpop.f32.mrf.mxu0  ;;  %v2819_v15 = vpop.f32.mrf.mxu1 }
 0x630   : > { %v2847_v13 = vrot.slane %v2833_v39, %v7479_v62  ;;  %v2848_v9 = vcombine.high %v2840_v47, %v2840_v47  ;;  %v2820_v25 = vadd.f32 %v2819_v15, %v2749_v18  ;;  %v2856_v61 = vrot.slane %v2840_v47, %v7479_v62 }
 0x631   : > { %v6180_v48 = vpop.f32.mrf.mxu0  ;;  %v6185_v45 = vpop.f32.mrf.mxu1 }
 0x632   : > { %v2883_v8 = vcombine.high %v2820_v25, %v2820_v25  ;;  %v2890_v21 = vrot.slane %v2820_v25, %v7479_v62  ;;  %v2849_v34 = vcombine.high %v2847_v13, %v2847_v13  ;;  %v2863_v5 = vrot.slane %v2847_v13, %v7479_v62 }
 0x633   : > { %v7745_v0 = vpop.f32.mrf.mxu0  ;;  %v7747_v24 = vpop.f32.mrf.mxu1  ;;  %v7751_v26 = vrot.slane %v2848_v9, %v7479_v62  ;;  %v2935_v37 = vrot.slane %v2856_v61, %v7502_v51  ;;  %v2878_v22 = vcombine.high %v2856_v61, %v2856_v61 }
 0x634   : > { %v2897_v55 = vrot.slane %v2883_v8, %v7479_v62  ;;  %v2898_v29 = vcombine.high %v2890_v21, %v2890_v21  ;;  %v7756_v53 = vrot.slane %v2849_v34, %v7479_v62  ;;  %v2879_v54 = vcombine.high %v2863_v5, %v2863_v5  ;;  %v6520_v8 = vld [vmem:[%s7190_s12 + $0x48] sm:$0xff] }
 0x635   : > { %v6190_v46 = vpop.f32.mrf.mxu0  ;;  %v6195_v40 = vpop.f32.mrf.mxu1  ;;  %v2939_v16 = vrot.slane %v7751_v26, %v7502_v51  ;;  %v2906_v31 = vrot.slane %v2890_v21, %v7479_v62  ;;  %v2951_v27 = vrot.slane %v2863_v5, %v7502_v51  ;;  %v2972_v39 = vmul.f32 %v6519_v11, %v2935_v37 }
 0x636   : > { %v2899_v56 = vcombine.high %v2897_v55, %v2897_v55  ;;  %v2913_v32 = vrot.slane %v2897_v55, %v7479_v62  ;;  %v7763_v10 = vrot.slane %v2898_v29, %v7479_v62  ;;  %v3084_v15 = vmul.f32 %v7465_v41, %v2935_v37  ;;  %v3033_v46 = vpop.permute.xlu0 %3032  ;;  %v6521_v40 = vld [vmem:[%s7190_s12 + $0x60] sm:$0xff] }
 0x637   : > { %v3420_v33 = vpop.f32.mrf.mxu0  ;;  %v3490_v30 = vpop.f32.mrf.mxu1  ;;  %v2983_v47 = vrot.slane %v2906_v31, %v7502_v51  ;;  %v2928_v25 = vcombine.high %v2906_v31, %v2906_v31  ;;  %v2955_v45 = vrot.slane %v7756_v53, %v7502_v51  ;;  %v7781_v61 = vrot.slane %v2879_v54, %v7502_v51 }
 0x638   : > { %v7772_v13 = vrot.slane %v2899_v56, %v7479_v62  ;;  %v2987_v9 = vrot.slane %v7763_v10, %v7502_v51  ;;  %v2973_v21 = vmul.f32 %v6520_v8, %v2939_v16  ;;  %v2929_v34 = vcombine.high %v2913_v32, %v2913_v32 }
 0x639   : > { %v6200_v20 = vpop.f32.mrf.mxu0  ;;  %v6205_v52 = vpop.f32.mrf.mxu1  ;;  %v2943_v29 = vrot.slane %v2878_v22, %v7502_v51  ;;  %v7787_v37 = vmul.f32 %v6521_v40, %v2951_v27  ;;  %v3085_v56 = vmul.f32 %v7467_v44, %v2939_v16  ;;  %v3052_v31 = vmul.f32 %v7465_v41, %v2983_v47 }
 0x63a   : > { %v3053_v5 = vmul.f32 %v7467_v44, %v2987_v9  ;;  %v3093_v55 = vmul.f32 %v6520_v8, %v2987_v9  ;;  %v3092_v54 = vmul.f32 %v6519_v11, %v2983_v47  ;;  %v2999_v20 = vrot.slane %v2913_v32, %v7502_v51  ;;  %v6522_v8 = vld [vmem:[%s7190_s12 + $0x68] sm:$0xff] }
 0x63b   : > { %v3003_v52 = vrot.slane %v7772_v13, %v7502_v51  ;;  %v2991_v18 = vrot.slane %v2928_v25, %v7502_v51  ;;  %v3491_v9 = vadd.f32 %v3490_v30, %v3420_v33  ;;  %v2977_v22 = vmul.f32 %v6522_v8, %v2955_v45 }
 0x63c   : > { %v3088_v48 = vmul.f32 %v7481_v3, %v2951_v27  ;;  %v3061_v63 = vsub.f32 %v2973_v21, %v3053_v5  ;;  %v3101_v28 = vadd.f32 %v3093_v55, %v3085_v56  ;;  %v7799_v44 = vmul.f32 %v6523_v19, %v7781_v61  ;;  %v7809_v5 = vpop.permute.xlu0 %4215 }
 0x63d   : > { %v7802_v41 = vmul.f32 %v7506_v7, %v2955_v45  ;;  %v3007_v16 = vrot.slane %v2929_v34, %v7502_v51  ;;  %v2974_v32 = vmul.f32 %v7593_v23, %v2943_v29  ;;  %v3060_v11 = vsub.f32 %v2972_v39, %v3052_v31 }
 0x63e   : > { %v3100_v47 = vadd.f32 %v3092_v54, %v3084_v15  ;;  %v3094_v33 = vmul.f32 %v7593_v23, %v2991_v18  ;;  %v3054_v30 = vmul.f32 %v3033_v46, %v2991_v18  ;;  %v3056_v27 = vmul.f32 %v7481_v3, %v2999_v20 }
 0x63f   : > { %v3057_v25 = vmul.f32 %v7506_v7, %v3003_v52  ;;  %v3086_v21 = vmul.f32 %v3033_v46, %v2943_v29  ;;  %v7811_v55 = vmul.f32 2.0, %v3491_v9  ;;  %v3069_v45 = vsel %vm792_vm2, %v3061_v63, 0.0 }
 0x640   : > { %v3109_v34 = vsel %vm792_vm2, %v3101_v28, 0.0  ;;  %v2880_v39 = vcombine.high %v7751_v26, %v7751_v26  ;;  %v2930_v23 = vcombine.high %v7763_v10, %v7763_v10  ;;  %v7820_v18 = vmul.f32 %v7565_v50, %v3007_v16 }
 0x641   : > { %v3096_v3 = vmul.f32 %v6521_v40, %v2999_v20  ;;  %v3505_v7 = vand.u32 2147483647, %v7811_v55  ;;  %v3508_v15 = vand.u32 2139095040, %v7811_v55  ;;  %v3068_v29 = vsel %vm792_vm2, %v3060_v11, 0.0 }
 0x642   : > { %v3108_v63 = vsel %vm792_vm2, %v3100_v47, 0.0  ;;  %v3062_v46 = vsub.f32 %v2974_v32, %v3054_v30  ;;  %v3102_v28 = vadd.f32 %v3094_v33, %v3086_v21  ;;  %v3070_v56 = vadd.f32 %v3069_v45, %v3068_v29  ;;  %v3035_v30 = vpop.permute.xlu0 %3034 }
 0x643   : > { %v3110_v31 = vadd.f32 %v3109_v34, %v3108_v63  ;;  %v3509_v26 = vshrl.u32 %v3508_v15, 23  ;;  %v3512_v10 = vand.u32 8388607, %v3505_v7  ;;  %v2931_v54 = vcombine.high %v7772_v13, %v7772_v13 }
 0x644   : > { %v3097_v40 = vmul.f32 %v6522_v8, %v3003_v52  ;;  %v2947_v20 = vrot.slane %v2880_v39, %v7502_v51  ;;  %v2995_v9 = vrot.slane %v2930_v23, %v7502_v51  ;;  %v3066_v11 = vsub.f32 %v7799_v44, %v7820_v18 }
 0x645   : > { %v5913_v47 = vadd.s32 4294967169, %v3509_v26  ;;  %v3513_v32 = vor.u32 8388608, %v3512_v10  ;;  %v3064_v33 = vsub.f32 %v7787_v37, %v3056_v27  ;;  %v3071_v21 = vsel %vm792_vm2, %v3062_v46, 0.0 }
 0x646   : > { %v3111_v45 = vsel %vm792_vm2, %v3102_v28, 0.0  ;;  %v3065_v34 = vsub.f32 %v2977_v22, %v3057_v25  ;;  %v3095_v13 = vmul.f32 %v7615_v12, %v2995_v9  ;;  %v3072_v52 = vadd.f32 %v3071_v21, %v3070_v56 }
 0x647   : > { %v3112_v8 = vadd.f32 %v3111_v45, %v3110_v31  ;;  %v3515_v39 = vadd.s32 1, %v5913_v47  ;;  %v3104_v15 = vadd.f32 %v3096_v3, %v3088_v48  ;;  %v2975_v23 = vmul.f32 %v7615_v12, %v2947_v20 }
 0x648   : > { %v3055_v29 = vmul.f32 %v3035_v30, %v2995_v9  ;;  %v3087_v63 = vmul.f32 %v3035_v30, %v2947_v20  ;;  %v8444_v37 = vcombine.high %v7756_v53, %v7756_v53  ;;  %v7843_v46 = vshll.u32 %v3513_v32, 8 }
 0x649   : > { %vm3516_vm10 = vcmp.gt.s32.totalorder %v3515_v39, 0  ;;  %v3075_v22 = vsel %vm792_vm2, %v3064_v33, 0.0  ;;  %v3011_v25 = vrot.slane %v2931_v54, %v7502_v51  ;;  %v3077_v56 = vsel %vm792_vm2, %v3065_v34, 0.0 }
 0x64a   : > { %v2963_v27 = vrot.slane %v8444_v37, %v7502_v51  ;;  %v3517_v28 = vsel %vm3516_vm10, %v3515_v39, 0  ;;  %v3063_v48 = vsub.f32 %v2975_v23, %v3055_v29  ;;  %v3103_v3 = vadd.f32 %v3095_v13, %v3087_v63 }
 0x64b   : > { %v3519_v12 = vand.u32 31, %v3517_v28  ;;  %v3115_v31 = vsel %vm792_vm2, %v3104_v15, 0.0  ;;  %v3090_v26 = vmul.f32 %v7565_v50, %v7781_v61  ;;  %v3098_v53 = vmul.f32 %v6523_v19, %v3007_v16 }
 0x64c   : > { %v3518_v10 = vshrl.u32 %v3517_v28, 5  ;;  %v7852_v20 = vmul.f32 %v7447_v36, %v2963_v27  ;;  %v3059_v9 = vmul.f32 %v7699_v2, %v3011_v25  ;;  %v3091_v54 = vmul.f32 %v7699_v2, %v2963_v27 }
 0x64d   : > { %v3520_v47 = vsub.s32 32, %v3519_v12  ;;  %v3073_v32 = vsel %vm792_vm2, %v3063_v48, 0.0  ;;  %v3113_v33 = vsel %vm792_vm2, %v3103_v3, 0.0  ;;  %v3099_v30 = vmul.f32 %v7447_v36, %v3011_v25 }
 0x64e   : > { %v3522_v21 = vshll.u32 %v8433_v1, %v3519_v12  ;;  %v3525_v50 = vshll.u32 %v8434_v57, %v3519_v12  ;;  %v3528_v19 = vshll.u32 %v8435_v17, %v3519_v12  ;;  %v3105_v61 = vadd.f32 %v3097_v40, %v7802_v41 }
 0x64f   : > { %v3523_v16 = vshrl.u32 %v8434_v57, %v3520_v47  ;;  %v3526_v45 = vshrl.u32 %v8435_v17, %v3520_v47  ;;  %v3529_v2 = vshrl.u32 %v8436_v49, %v3520_v47  ;;  %v3531_v34 = vshll.u32 %v8436_v49, %v3519_v12 }
 0x650   : > { %v3532_v13 = vshrl.u32 %v8437_v35, %v3520_v47  ;;  %v3534_v36 = vshll.u32 %v8437_v35, %v3519_v12  ;;  %v3535_v39 = vshrl.u32 %v8438_v43, %v3520_v47  ;;  %vm3537_vm11 = vcmp.lt.s32.totalorder %v3518_v10, 1 }
 0x651   : > { %v3524_v15 = vor.u32 %v3523_v16, %v3522_v21  ;;  %v3527_v23 = vor.u32 %v3526_v45, %v3525_v50  ;;  %v3530_v29 = vor.u32 %v3529_v2, %v3528_v19  ;;  %v3074_v63 = vadd.f32 %v3073_v32, %v3072_v52 }
 0x652   : > { %v3533_v41 = vor.u32 %v3532_v13, %v3531_v34  ;;  %v3536_v40 = vor.u32 %v3535_v39, %v3534_v36  ;;  %vm3540_vm12 = vcmp.lt.s32.totalorder %v3518_v10, 4  ;;  %v3114_v37 = vadd.f32 %v3113_v33, %v3112_v8 }
 0x653   : > { %v3521_v27 = vshrl.u32 %v8433_v1, %v3520_v47  ;;  %v3542_v25 = vsel %vm3540_vm12, %v3530_v29, 2102212464  ;;  %v3545_v28 = vsel %vm3537_vm11, %v3524_v15, %v3527_v23  ;;  %v3549_v48 = vsel %vm3537_vm11, %v3527_v23, %v3530_v29 }
 0x654   : > { %vm3538_vm13 = vcmp.lt.s32.totalorder %v3518_v10, 2  ;;  %vm3539_vm14 = vcmp.lt.s32.totalorder %v3518_v10, 3  ;;  %v3546_v3 = vsel %vm3540_vm12, %v3533_v41, 920167782  ;;  %v3550_v12 = vsel %vm3540_vm12, %v3536_v40, 1326507024 }
 0x655   : > { %v3541_v21 = vsel %vm3537_vm11, %v3521_v27, %v3524_v15  ;;  %v3547_v50 = vsel %vm3539_vm14, %v3530_v29, %v3546_v3  ;;  %v3551_v19 = vsel %vm3539_vm14, %v3533_v41, %v3550_v12  ;;  %v3076_v52 = vadd.f32 %v3075_v22, %v3074_v63 }
 0x656   : > { %v3543_v32 = vsel %vm3539_vm14, %v3527_v23, %v3542_v25  ;;  %v3548_v16 = vsel %vm3538_vm13, %v3545_v28, %v3547_v50  ;;  %v3552_v8 = vsel %vm3538_vm13, %v3549_v48, %v3551_v19  ;;  %v3116_v47 = vadd.f32 %v3115_v31, %v3114_v37 }
 0x657   : > { %v7877_v33 = vmul.u32.u64.low %v7843_v46, %v3552_v8  ;;  %v7878_v45 = vmul.u32.u64.high %v7843_v46, %v3552_v8, %v7877_v33  ;;  %v7881_v2 = vmul.u32.u64.low %v7843_v46, %v3548_v16  ;;  %v7882_v34 = vmul.u32.u64.high %v7843_v46, %v3548_v16, %v7881_v2 }
 0x658   : > { %v3078_v13 = vadd.f32 %v3077_v56, %v3076_v52  ;;  %v3106_v36 = vadd.f32 %v3098_v53, %v3090_v26  ;;  %v3107_v39 = vadd.f32 %v3099_v30, %v3091_v54  ;;  %v3117_v15 = vsel %vm792_vm2, %v3105_v61, 0.0 }
 0x659   : > { %v3544_v22 = vsel %vm3538_vm13, %v3541_v21, %v3543_v32  ;;  %v3079_v31 = vsel %vm792_vm2, %v3066_v11, 0.0  ;;  %v3118_v23 = vadd.f32 %v3117_v15, %v3116_v47  ;;  %v3067_v29 = vsub.f32 %v7852_v20, %v3059_v9 }
 0x65a   : > { %v3080_v63 = vadd.f32 %v3079_v31, %v3078_v13  ;;  %v3119_v41 = vsel %vm792_vm2, %v3106_v36, 0.0  ;;  %vm3562_vm15 = vc.u32 %v7878_v45, %v7881_v2  ;;  %v3563_v56 = vadd.s32 1, %v7882_v34 }
 0x65b   : > { %v3120_v26 = vadd.f32 %v3119_v41, %v3118_v23  ;;  %v3560_v53 = vmul.u32 %v7843_v46, %v3544_v22  ;;  %v3121_v10 = vsel %vm792_vm2, %v3107_v39, 0.0  ;;  %v3081_v54 = vsel %vm792_vm2, %v3067_v29, 0.0 }
 0x65c   : > { %v3564_v44 = vsel %vm3562_vm15, %v3563_v56, %v7882_v34  ;;  %v3082_v11 = vadd.f32 %v3081_v54, %v3080_v63  ;;  %v8445_v28 = vsub.f32 %v7745_v0, %v7747_v24  ;;  %v3561_v12 = vadd.s32 %v7881_v2, %v7878_v45 }
 0x65d   : > { %v3122_v18 = vadd.f32 %v3121_v10, %v3120_v26  ;;  %v3565_v30 = vadd.s32 %v3564_v44, %v3560_v53  ;;  %vm3507_vm4 = vcmp.lt.s32.totalorder %v7811_v55, 0  ;;  %vm3506_vm5 = vcmp.le.f32.partialorder %v3505_v7, 0.7853982  ;;  %v7908_v26 = vpop.permute.xlu0 %5404 }
 0x65e   : > { %3124 = vst.msk [vmem:[#allocation4 + $0x8] sm:$0xff] %vm792_vm2, %v3082_v11  ;;  %v3494_v48 = vmul.f32 2.0, %v8445_v28  ;;  %vm3597_vm10 = vweird.f32 %v7811_v55 }
 0x65f   : > { %3126 = vrot.lane.b32.xlu0 %v3122_v18, %s6880_s27  ;;  %v3566_v20 = vadd.s32 536870912, %v3565_v30 }
 0x660   : > { %v5912_v19 = vclamps-f32 %v3494_v48, 30.0 }
 0x661   : > { %v3567_v9 = vshrl.u32 %v3566_v20, 30 }
 0x662   : > { %v3499_v33 = vsub.f32 0.0, %v5912_v19  ;;  %v3497_v0 = vmul.f32 1.442695, %v5912_v19 }
 0x663   : > { %v3568_v61 = vshll.u32 %v3567_v9, 30  ;;  %v3591_v22 = vsub.s32 4, %v3567_v9 }
 0x664   : > { %v3500_v39 = vmul.f32 1.442695, %v3499_v33 }
 0x665   : > { %v3569_v40 = vsub.s32 %v3565_v30, %v3568_v61  ;;  %v3592_v31 = vsel %vm3507_vm4, %v3591_v22, %v3567_v9  ;;  %v7913_v9 = vpop.permute.xlu0 %4219 }
 0x666   : > { %6497 = vpow2.f32 %v3500_v39  ;;  %v3594_v23 = vsel %vm3506_vm5, 0, %v3592_v31 }
 0x667   : > { %v3571_v37 = vsub.s32 0, %v3569_v40  ;;  %6499 = vpow2.f32 %v3497_v0  ;;  %v3598_v63 = vand.u32 3, %v3594_v23 }
 0x669   : > { %v5914_v27 = vmin.u32 %v3571_v37, %v3569_v40  ;;  %vm3603_vm6 = vcmp.eq.s32.totalorder %v3598_v63, 2  ;;  %vm3600_vm7 = vcmp.eq.s32.totalorder %v3598_v63, 0  ;;  %vm3599_vm8 = vcmp.lt.s32.totalorder %v3598_v63, 2 }
 0x66b   : > { %v3573_v46 = vclz %v5914_v27  ;;  %v7915_v27 = vpop.permute.xlu0 %5406 }
 0x66d   : > { %v5915_v25 = vadd.s32 4294967294, %v3573_v46 }
 0x66f   : > { %vm5916_vm3 = vcmp.lt.s32.totalorder %v5915_v25, 0  ;;  %v7917_v48 = vpop.permute.xlu0 %4221 }
 0x670   : > { %v3576_v3 = vsel %vm5916_vm3, 0, %v5915_v25 }
 0x671   : > { %v3577_v21 = vsub.s32 32, %v3576_v3  ;;  %v3581_v50 = vsub.s32 4294967266, %v3576_v3  ;;  %v3578_v52 = vshll.u32 %v3569_v40, %v3576_v3  ;;  %v3707_v40 = vadd.s32 3, %v3594_v23 }
 0x673   : > { %v3579_v32 = vshrl.u32 %v3561_v12, %v3577_v21  ;;  %v3582_v16 = vadd.s32 127, %v3581_v50  ;;  %v6498_v29 = vpop.eup %6497  ;;  %v3708_v37 = vand.u32 3, %v3707_v40 }
 0x674   : > { %v6500_v41 = vpop.eup %6499 }
 0x675   : > { %v3580_v8 = vor.u32 %v3579_v32, %v3578_v52  ;;  %v3583_v47 = vshll.u32 %v3582_v16, 23  ;;  %v3502_v10 = vadd.f32 %v6500_v41, %v6498_v29  ;;  %vm3710_vm11 = vcmp.eq.s32.totalorder %v3708_v37, 0  ;;  %v7921_v32 = vpop.permute.xlu0 %5408  ;;  %v7946_v16 = vld [vmem:[%s7243_s18 + $0x18] sm:$0xff]  ;;  %s6704_s18 = sshll.u32 %s6881_s6, 4  ;;  %s6705_s18 = int_to_ptr.vmem [resolvable:$false] %s6704_s18 }
 0x676   : > { %vm3713_vm12 = vcmp.eq.s32.totalorder %v3708_v37, 2  ;;  %v3611_v28 = vsub.f32 %v6500_v41, %v6498_v29  ;;  %vm3709_vm13 = vcmp.lt.s32.totalorder %v3708_v37, 2  ;;  %s6706_s30 = scalar_lea.vmem %s6705_s18, 1024  ;;  %p6707_p1 = scmp.lt.s32.totalorder %s8246_s1, %s6705_s18 }
 0x677   : > { %v3584_v34 = vor.u32 4788187, %v3583_v47  ;;  %v3587_v36 = vcvt.s32.f32 %v3580_v8  ;;  %v3503_v11 = vmul.f32 0.5, %v3502_v10  ;;  %p6708_p10 = scmp.lt.s32.totalorder %s6706_s30, %s6700_s20 }
 0x678   : > { %v3612_v12 = vmul.f32 0.5, %v3611_v28 }
 0x679   : > { %v3585_v13 = vand.u32 2147483647, %v3584_v34  ;;  %p6709_p0 = por %p6708_p10, %p6707_p1 }
 0x67b   : > { %v3588_v15 = vmul.f32 %v3587_v36, %v3585_v13  ;;  %p6710_p11 = pnand %p6709_p0, %p6703_p2 }
 0x67d   : > { %v3589_v24 = vxor.u32 2147483648, %v3588_v15 }
 0x67f   : > { %v3590_v45 = vsel %vm3507_vm4, %v3589_v24, %v3588_v15 }
 0x680   : > { %v3593_v2 = vsel %vm3506_vm5, %v7811_v55, %v3590_v45  ;;  %v7937_v55 = vpop.permute.xlu0 %4223 }
 0x681   : > { %6501 = vcosq.f32 %v3593_v2 }
 0x682   : > { %6503 = vsinq.f32 %v3593_v2 }
 0x68e   : > { %v6502_v56 = vpop.eup %6501 }
 0x68f   : > { %v6504_v53 = vpop.eup %6503  ;;  %v3604_v54 = vxor.u32 2147483648, %v6502_v56 }
 0x690   : > { %v3601_v44 = vxor.u32 2147483648, %v6504_v53 }
 0x691   : > { %v3605_v7 = vsel %vm3603_vm6, %v3604_v54, %v6504_v53  ;;  %v3715_v25 = vsel %vm3713_vm12, %v3604_v54, %v6504_v53 }
 0x692   : > { %v3602_v18 = vsel %vm3600_vm7, %v6502_v56, %v3601_v44  ;;  %v3712_v46 = vsel %vm3710_vm11, %v6502_v56, %v3601_v44 }
 0x693   : > { %v3606_v30 = vsel %vm3599_vm8, %v3602_v18, %v3605_v7  ;;  %v3716_v3 = vsel %vm3709_vm13, %v3712_v46, %v3715_v25 }
 0x694   : > { %v3607_v20 = vsel %vm3597_vm10, nan, %v3606_v30  ;;  %v3717_v50 = vsel %vm3597_vm10, nan, %v3716_v3 }
 0x695   : > { %v3608_v61 = vadd.f32 %v3607_v20, %v3503_v11 }
 0x697   : > { %6505 = vrcp.f32 %v3608_v61 }
 0x6a4   : > { %v6506_v21 = vpop.eup %6505 }
 0x6a5   : > { %v3613_v19 = vmul.f32 %v6506_v21, %v3612_v12  ;;  %v3718_v52 = vmul.f32 %v6506_v21, %v3717_v50 }
 0x6a7   : > { %6207 = vmatpush3.xpose.msk.msra.mxu0 %vm792_vm2, %v3613_v19  ;;  %6212 = vmatpush3.xpose.msk.msra.mxu1 %vm792_vm2, %v3718_v52 }
 0x6a8   : > { %6216 = vmatprep.subr.mxu0 %v8440_v59  ;;  %6221 = vmatprep.subr.mxu1 %v8440_v59 }
 0x6aa   : > { %6209 = vmatmul.mubr.msk.f32.vlgmr.msra.gmra.mxu0 %vm792_vm2, %v7679_v6  ;;  %6214 = vmatmul.mubr.msk.f32.vlgmr.msra.gmra.mxu1 %vm792_vm2, %v7455_v38 }
 0x6ab   : > { %6217 = vmatpush3.xpose.msk.msra.mxu0 %vm792_vm2, %v3613_v19  ;;  %6222 = vmatpush3.xpose.msk.msra.mxu1 %vm792_vm2, %v3718_v52 }
 0x6ac   : > { %6218 = vmatprep.mubr.msk.f32.mxu0 %vm6872_vm1, %v8440_v59  ;;  %6223 = vmatprep.mubr.msk.f32.mxu1 %vm6872_vm1, %v8440_v59 }
 0x6ad   : > { %6226 = vmatprep.subr.mxu0 %v8440_v59  ;;  %6231 = vmatprep.subr.mxu1 %v8440_v59 }
 0x6ae   : > { %6219 = vmatmul.mubr.msk.f32.vlgmr.msra.gmra.mxu0 %vm792_vm2, %v7455_v38  ;;  %6224 = vmatmul.mubr.msk.f32.vlgmr.msra.gmra.mxu1 %vm792_vm2, %v7679_v6  ;;  %v7956_v38 = vpop.permute.xlu0 %5410  ;;  %v8446_v6 = vld [vmem:[#allocation37_spill] sm:$0xff] }
 0x6af   : > { %6227 = vmatpush3.msra.mxu0 %v7946_v16  ;;  %6232 = vmatpush3.msra.mxu1 %v7459_v58 }
 0x6b0   : > { %6228 = vmatprep.mubr.msk.f32.mxu0 %vm6872_vm1, %v8440_v59  ;;  %6233 = vmatprep.mubr.msk.f32.mxu1 %vm6872_vm1, %v8440_v59 }
 0x6b1   : > { %6236 = vmatprep.subr.mxu0 %v8440_v59  ;;  %6241 = vmatprep.subr.mxu1 %v8440_v59 }
 0x6b2   : > { %6229 = vmatmul.mubr.msk.f32.vlgmr.msra.gmra.mxu0 %vm792_vm2, %v7461_v60  ;;  %6234 = vmatmul.mubr.msk.f32.vlgmr.msra.gmra.mxu1 %vm792_vm2, %v8446_v6  ;;  %v7978_v8 = vpop.permute.xlu0 %4225 }
 0x6b3   : > { %6237 = vmatpush3.msra.mxu0 %v7946_v16  ;;  %6242 = vmatpush3.msra.mxu1 %v7459_v58 }
 0x6b4   : > { %6238 = vmatprep.mubr.msk.f32.mxu0 %vm6872_vm1, %v8440_v59  ;;  %6243 = vmatprep.mubr.msk.f32.mxu1 %vm6872_vm1, %v8440_v59 }
 0x6b5   : > { %6246 = vmatprep.subr.mxu0 %v8440_v59  ;;  %6251 = vmatprep.subr.mxu1 %v8440_v59 }
 0x6b6   : > { %6239 = vmatmul.mubr.msk.f32.vlgmr.msra.gmra.mxu0 %vm792_vm2, %v8446_v6  ;;  %6244 = vmatmul.mubr.msk.f32.vlgmr.msra.gmra.mxu1 %vm792_vm2, %v7461_v60  ;;  %v7980_v47 = vpop.permute.xlu0 %5412 }
 0x6b7   : > { %6248 = vmatprep.mubr.msk.f32.mxu0 %vm6872_vm1, %v8440_v59  ;;  %6253 = vmatprep.mubr.msk.f32.mxu1 %vm6872_vm1, %v8440_v59  ;;  %8447 = vst [vmem:[#allocation37_spill] sm:$0xff] %v7980_v47 }
 0x6ba   : > { %v7982_v33 = vpop.permute.xlu0 %5414 }
 0x6bb   : > { %8448 = vst [vmem:[#allocation41_spill] sm:$0xff] %v7982_v33 }
 0x6be   : > { %v7984_v34 = vpop.permute.xlu0 %5416 }
 0x6bf   : > { %8449 = vst [vmem:[#allocation42_spill] sm:$0xff] %v7984_v34 }
 0x6d1   : > { %v3127_v13 = vpop.permute.xlu0 %3126 }
 0x6d2   : > { %3129 = vst.msk [vmem:[#allocation4 + $0x8] sm:$0xff] %vm1941_vm9, %v3127_v13 }
 0x76a   : > { %v3790_v36 = vpop.f32.mrf.mxu0  ;;  %v3865_v39 = vpop.f32.mrf.mxu1 }
 0x76b   : > { %v3869_v60 = vsub.f32 %v3790_v36, %v3865_v39 }
 0x76c   : > { %v6210_v15 = vpop.f32.mrf.mxu0  ;;  %v6215_v0 = vpop.f32.mrf.mxu1 }
 0x76d   : > { %v4020_v24 = vcombine.high %v3869_v60, %v3869_v60  ;;  %v4027_v45 = vrot.slane %v3869_v60, %v7479_v62  ;;  %v6525_v15 = vld [vmem:[%s7190_s12 + $0x80] sm:$0xff] }
 0x76e   : > { %v3936_v2 = vpop.f32.mrf.mxu0  ;;  %v4006_v22 = vpop.f32.mrf.mxu1 }
 0x76f   : > { %v4034_v31 = vrot.slane %v4020_v24, %v7479_v62  ;;  %v4035_v23 = vcombine.high %v4027_v45, %v4027_v45  ;;  %v4043_v29 = vrot.slane %v4027_v45, %v7479_v62  ;;  %v4007_v63 = vadd.f32 %v4006_v22, %v3936_v2 }
 0x770   : > { %v6220_v41 = vpop.f32.mrf.mxu0  ;;  %v6225_v56 = vpop.f32.mrf.mxu1 }
 0x771   : > { %v4036_v53 = vcombine.high %v4034_v31, %v4034_v31  ;;  %v4057_v44 = vrot.slane %v4035_v23, %v7479_v62  ;;  %v4050_v7 = vrot.slane %v4034_v31, %v7479_v62  ;;  %v4065_v18 = vcombine.high %v4043_v29, %v4043_v29  ;;  %v6526_v41 = vld [vmem:[%s7190_s12 + $0x88] sm:$0xff] }
 0x772   : > { %v7990_v10 = vpop.f32.mrf.mxu0  ;;  %v7992_v54 = vpop.f32.mrf.mxu1  ;;  %v4070_v11 = vcombine.high %v4007_v63, %v4007_v63  ;;  %v4077_v61 = vrot.slane %v4007_v63, %v7479_v62  ;;  %v4122_v37 = vrot.slane %v4043_v29, %v7502_v51 }
 0x773   : > { %v7998_v40 = vrot.slane %v4036_v53, %v7479_v62  ;;  %v4067_v28 = vcombine.high %v4057_v44, %v4057_v44  ;;  %v4066_v3 = vcombine.high %v4050_v7, %v4050_v7  ;;  %v4126_v12 = vrot.slane %v4057_v44, %v7502_v51 }
 0x774   : > { %v6230_v30 = vpop.f32.mrf.mxu0  ;;  %v6235_v20 = vpop.f32.mrf.mxu1  ;;  %v4130_v21 = vrot.slane %v4065_v18, %v7502_v51  ;;  %v4084_v50 = vrot.slane %v4070_v11, %v7479_v62  ;;  %v4138_v6 = vrot.slane %v4050_v7, %v7502_v51  ;;  %v4085_v13 = vcombine.high %v4077_v61, %v4077_v61 }
 0x775   : > { %v4093_v36 = vrot.slane %v4077_v61, %v7479_v62  ;;  %v4159_v0 = vmul.f32 %v6525_v15, %v4122_v37  ;;  %v4271_v24 = vmul.f32 %v7809_v5, %v4122_v37  ;;  %v4134_v2 = vrot.slane %v4067_v28, %v7502_v51 }
 0x776   : > { %v4607_v46 = vpop.f32.mrf.mxu0  ;;  %v4677_v25 = vpop.f32.mrf.mxu1  ;;  %v4086_v45 = vcombine.high %v4084_v50, %v4084_v50  ;;  %v4107_v22 = vrot.slane %v4085_v13, %v7479_v62  ;;  %v4142_v29 = vrot.slane %v7998_v40, %v7502_v51  ;;  %v8018_v63 = vrot.slane %v4066_v3, %v7502_v51  ;;  %v8450_v3 = vld [vmem:[#allocation35_spill] sm:$0xff] }
 0x777   : > { %v4115_v31 = vcombine.high %v4093_v36, %v4093_v36  ;;  %v4170_v23 = vrot.slane %v4093_v36, %v7502_v51  ;;  %v4160_v56 = vmul.f32 %v6526_v41, %v4126_v12  ;;  %v4100_v53 = vrot.slane %v4084_v50, %v7479_v62  ;;  %v8451_v36 = vld [vmem:[#allocation40_spill] sm:$0xff] }
 0x778   : > { %v6240_v19 = vpop.f32.mrf.mxu0  ;;  %v6245_v52 = vpop.f32.mrf.mxu1  ;;  %v4117_v44 = vcombine.high %v4107_v22, %v4107_v22  ;;  %v4174_v7 = vrot.slane %v4107_v22, %v7502_v51  ;;  %v4161_v30 = vmul.f32 %v7637_v4, %v4130_v21  ;;  %v4163_v20 = vmul.f32 %v7724_v14, %v4138_v6 }
 0x779   : > { %v4178_v18 = vrot.slane %v4115_v31, %v7502_v51  ;;  %v4239_v11 = vmul.f32 %v7809_v5, %v4170_v23  ;;  %v4114_v61 = vrot.slane %v4086_v45, %v7479_v62  ;;  %v4678_v37 = vadd.f32 %v4677_v25, %v4607_v46  ;;  %v6527_v25 = vld [vmem:[%s7190_s12 + $0xb0] sm:$0xff] }
 0x77a   : > { %v4182_v28 = vrot.slane %v4117_v44, %v7502_v51  ;;  %v4240_v19 = vmul.f32 %v8450_v3, %v4174_v7  ;;  %v4162_v13 = vmul.f32 %v7717_v42, %v4134_v2  ;;  %v4164_v22 = vmul.f32 %v8451_v36, %v4142_v29 }
 0x77b   : > { %v4241_v50 = vmul.f32 %v7913_v9, %v4178_v18  ;;  %v4247_v52 = vsub.f32 %v4159_v0, %v4239_v11  ;;  %v4272_v5 = vmul.f32 %v8450_v3, %v4126_v12  ;;  %v4186_v4 = vrot.slane %v4100_v53, %v7502_v51 }
 0x77c   : > { %v4242_v31 = vmul.f32 %v7917_v48, %v4182_v28  ;;  %v4248_v39 = vsub.f32 %v4160_v56, %v4240_v19  ;;  %v4279_v46 = vmul.f32 %v6525_v15, %v4170_v23  ;;  %v8038_v44 = vmul.f32 %v6527_v25, %v8018_v63 }
 0x77d   : > { %v4249_v45 = vsub.f32 %v4161_v30, %v4241_v50  ;;  %v4116_v60 = vcombine.high %v4100_v53, %v4100_v53  ;;  %v4190_v0 = vrot.slane %v4114_v61, %v7502_v51  ;;  %v4280_v11 = vmul.f32 %v6526_v41, %v4174_v7  ;;  %v6528_v53 = vld [vmem:[%s7190_s12 + $0x90] sm:$0xff] }
 0x77e   : > { %v4273_v34 = vmul.f32 %v7913_v9, %v4130_v21  ;;  %v4255_v12 = vsel %vm792_vm2, %v4247_v52, 0.0  ;;  %v4256_v3 = vsel %vm792_vm2, %v4248_v39, 0.0  ;;  %v8044_v33 = vmul.f32 2.0, %v4678_v37 }
 0x77f   : > { %v4274_v56 = vmul.f32 %v7917_v48, %v4134_v2  ;;  %v4243_v15 = vmul.f32 %v7937_v55, %v4186_v4  ;;  %v4250_v23 = vsub.f32 %v4162_v13, %v4242_v31  ;;  %v4257_v30 = vadd.f32 %v4256_v3, %v4255_v12 }
 0x780   : > { %v4258_v19 = vsel %vm792_vm2, %v4249_v45, 0.0  ;;  %v4281_v50 = vmul.f32 %v6528_v53, %v4178_v18  ;;  %v4287_v47 = vadd.f32 %v4279_v46, %v4271_v24  ;;  %v4288_v41 = vadd.f32 %v4280_v11, %v4272_v5 }
 0x781   : > { %v4275_v9 = vmul.f32 %v7937_v55, %v4138_v6  ;;  %v4194_v21 = vrot.slane %v4116_v60, %v7502_v51  ;;  %v4244_v39 = vmul.f32 %v7978_v8, %v4190_v0  ;;  %v4259_v7 = vadd.f32 %v4258_v19, %v4257_v30 }
 0x782   : > { %v4118_v37 = vcombine.high %v4114_v61, %v4114_v61  ;;  %v4282_v48 = vmul.f32 %v7717_v42, %v4182_v28  ;;  %v4296_v2 = vsel %vm792_vm2, %v4288_v41, 0.0  ;;  %v4692_v52 = vand.u32 2147483647, %v8044_v33  ;;  %v8452_v61 = vld [vmem:[#allocation38_spill] sm:$0xff] }
 0x783   : > { %v4276_v13 = vmul.f32 %v7978_v8, %v4142_v29  ;;  %v4251_v31 = vsub.f32 %v4163_v20, %v4243_v15  ;;  %v4260_v24 = vsel %vm792_vm2, %v4250_v23, 0.0  ;;  %v4283_v18 = vmul.f32 %v7724_v14, %v4186_v4 }
 0x784   : > { %v4261_v55 = vadd.f32 %v4260_v24, %v4259_v7  ;;  %v4289_v6 = vadd.f32 %v4281_v50, %v4273_v34  ;;  %v4295_v60 = vsel %vm792_vm2, %v4287_v47, 0.0  ;;  %v4695_v5 = vand.u32 2139095040, %v8044_v33 }
 0x785   : > { %v4245_v45 = vmul.f32 %v8452_v61, %v4194_v21  ;;  %v4252_v42 = vsub.f32 %v4164_v22, %v4244_v39  ;;  %v4297_v28 = vadd.f32 %v4296_v2, %v4295_v60  ;;  %v8453_v46 = vcombine.high %v7998_v40, %v7998_v40  ;;  %v8454_v40 = vld [vmem:[#allocation39_spill] sm:$0xff]  ;;  %v6529_v39 = vld [vmem:[%s7190_s12 + $0xb8] sm:$0xff] }
 0x786   : > { %v4290_v29 = vadd.f32 %v4282_v48, %v4274_v56  ;;  %v4696_v20 = vshrl.u32 %v4695_v5, 23  ;;  %v4699_v14 = vand.u32 8388607, %v4692_v52  ;;  %v4198_v34 = vrot.slane %v4118_v37, %v7502_v51 }
 0x787   : > { %v4150_v8 = vrot.slane %v8453_v46, %v7502_v51  ;;  %v4262_v47 = vsel %vm792_vm2, %v4251_v31, 0.0  ;;  %v4284_v4 = vmul.f32 %v8451_v36, %v4190_v0  ;;  %v4291_v11 = vadd.f32 %v4283_v18, %v4275_v9 }
 0x788   : > { %v4285_v22 = vmul.f32 %v6527_v25, %v4194_v21  ;;  %v4263_v12 = vadd.f32 %v4262_v47, %v4261_v55  ;;  %v4298_v3 = vsel %vm792_vm2, %v4289_v6, 0.0  ;;  %v5946_v15 = vadd.s32 4294967169, %v4696_v20 }
 0x789   : > { %v4246_v23 = vmul.f32 %v8454_v40, %v4198_v34  ;;  %v4253_v56 = vsub.f32 %v8038_v44, %v4245_v45  ;;  %v4264_v30 = vsel %vm792_vm2, %v4252_v42, 0.0  ;;  %v4277_v19 = vmul.f32 %v8452_v61, %v8018_v63 }
 0x78a   : > { %v4299_v53 = vadd.f32 %v4298_v3, %v4297_v28  ;;  %v4700_v50 = vor.u32 8388608, %v4699_v14  ;;  %v4702_v41 = vadd.s32 1, %v5946_v15  ;;  %v4166_v36 = vmul.f32 %v6529_v39, %v4150_v8 }
 0x78b   : > { %v4300_v25 = vsel %vm792_vm2, %v4290_v29, 0.0  ;;  %v4286_v0 = vmul.f32 %v6529_v39, %v4198_v34  ;;  %v4292_v9 = vadd.f32 %v4284_v4, %v4276_v13  ;;  %v4293_v21 = vadd.f32 %v4285_v22, %v4277_v19 }
 0x78c   : > { %v4301_v7 = vadd.f32 %v4300_v25, %v4299_v53  ;;  %vm4703_vm14 = vcmp.gt.s32.totalorder %v4702_v41, 0  ;;  %v4302_v37 = vsel %vm792_vm2, %v4291_v11, 0.0  ;;  %v4254_v44 = vsub.f32 %v4166_v36, %v4246_v23 }
 0x78d   : > { %v4265_v48 = vadd.f32 %v4264_v30, %v4263_v12  ;;  %v4704_v2 = vsel %vm4703_vm14, %v4702_v41, 0  ;;  %v4278_v31 = vmul.f32 %v8454_v40, %v4150_v8  ;;  %v4740_v18 = vshll.u32 %v4700_v50, 8 }
 0x78e   : > { %v4303_v63 = vadd.f32 %v4302_v37, %v4301_v7  ;;  %v4706_v24 = vand.u32 31, %v4704_v2  ;;  %v4705_v55 = vshrl.u32 %v4704_v2, 5  ;;  %v4304_v60 = vsel %vm792_vm2, %v4292_v9, 0.0 }
 0x78f   : > { %v4294_v6 = vadd.f32 %v4286_v0, %v4278_v31  ;;  %v4266_v5 = vsel %vm792_vm2, %v4253_v56, 0.0  ;;  %v4306_v61 = vsel %vm792_vm2, %v4293_v21, 0.0  ;;  %v4268_v45 = vsel %vm792_vm2, %v4254_v44, 0.0 }
 0x790   : > { %v4707_v13 = vsub.s32 32, %v4706_v24  ;;  %v4267_v42 = vadd.f32 %v4266_v5, %v4265_v48  ;;  %v4709_v28 = vshll.u32 %v8433_v1, %v4706_v24  ;;  %v4712_v46 = vshll.u32 %v8434_v57, %v4706_v24 }
 0x791   : > { %v4715_v8 = vshll.u32 %v8435_v17, %v4706_v24  ;;  %v4305_v29 = vadd.f32 %v4304_v60, %v4303_v63  ;;  %v4718_v47 = vshll.u32 %v8436_v49, %v4706_v24  ;;  %v4721_v11 = vshll.u32 %v8437_v35, %v4706_v24 }
 0x792   : > { %v4710_v20 = vshrl.u32 %v8434_v57, %v4707_v13  ;;  %v4713_v14 = vshrl.u32 %v8435_v17, %v4707_v13  ;;  %v4716_v34 = vshrl.u32 %v8436_v49, %v4707_v13  ;;  %v4719_v4 = vshrl.u32 %v8437_v35, %v4707_v13 }
 0x793   : > { %v4722_v22 = vshrl.u32 %v8438_v43, %v4707_v13  ;;  %vm4724_vm15 = vcmp.lt.s32.totalorder %v4705_v55, 1  ;;  %vm4727_vm3 = vcmp.lt.s32.totalorder %v4705_v55, 4  ;;  %v4307_v57 = vadd.f32 %v4306_v61, %v4305_v29 }
 0x794   : > { %v4711_v12 = vor.u32 %v4710_v20, %v4709_v28  ;;  %v4714_v3 = vor.u32 %v4713_v14, %v4712_v46  ;;  %v4717_v15 = vor.u32 %v4716_v34, %v4715_v8  ;;  %v4720_v40 = vor.u32 %v4719_v4, %v4718_v47 }
 0x795   : > { %v4723_v23 = vor.u32 %v4722_v22, %v4721_v11  ;;  %v4269_v56 = vadd.f32 %v4268_v45, %v4267_v42  ;;  %v4708_v17 = vshrl.u32 %v8433_v1, %v4707_v13  ;;  %v4308_v19 = vsel %vm792_vm2, %v4294_v6, 0.0 }
 0x796   : > { %v4729_v30 = vsel %vm4727_vm3, %v4717_v15, 2102212464  ;;  %v4732_v49 = vsel %vm4724_vm15, %v4711_v12, %v4714_v3  ;;  %vm4726_vm4 = vcmp.lt.s32.totalorder %v4705_v55, 3  ;;  %v4733_v35 = vsel %vm4727_vm3, %v4720_v40, 920167782 }
 0x797   : > { %v4736_v43 = vsel %vm4724_vm15, %v4714_v3, %v4717_v15  ;;  %v4737_v53 = vsel %vm4727_vm3, %v4723_v23, 1326507024  ;;  %4311 = vst.msk [vmem:[#allocation4 + $0x10] sm:$0xff] %vm792_vm2, %v4269_v56  ;;  %vm4725_vm5 = vcmp.lt.s32.totalorder %v4705_v55, 2  ;;  %v4728_v50 = vsel %vm4724_vm15, %v4708_v17, %v4711_v12 }
 0x798   : > { %v4734_v41 = vsel %vm4726_vm4, %v4717_v15, %v4733_v35  ;;  %v4738_v39 = vsel %vm4726_vm4, %v4720_v40, %v4737_v53  ;;  %v4730_v36 = vsel %vm4726_vm4, %v4714_v3, %v4729_v30  ;;  %v4309_v0 = vadd.f32 %v4308_v19, %v4307_v57 }
 0x799   : > { %v4735_v25 = vsel %vm4725_vm5, %v4732_v49, %v4734_v41  ;;  %v4739_v1 = vsel %vm4725_vm5, %v4736_v43, %v4738_v39  ;;  %v4731_v44 = vsel %vm4725_vm5, %v4728_v50, %v4730_v36  ;;  %v8455_v42 = vsub.f32 %v7990_v10, %v7992_v54 }
 0x79a   : > { %v8101_v9 = vmul.u32.u64.low %v4740_v18, %v4739_v1  ;;  %v8102_v21 = vmul.u32.u64.high %v4740_v18, %v4739_v1, %v8101_v9  ;;  %v8104_v7 = vmul.u32.u64.low %v4740_v18, %v4735_v25  ;;  %v8105_v37 = vmul.u32.u64.high %v4740_v18, %v4735_v25, %v8104_v7  ;;  %4313 = vrot.lane.b32.xlu1 %v4309_v0, %s6880_s27 }
 0x79b   : > { %v4747_v2 = vmul.u32 %v4740_v18, %v4731_v44  ;;  %v4681_v28 = vmul.f32 2.0, %v8455_v42  ;;  %vm4694_vm8 = vcmp.lt.s32.totalorder %v8044_v33, 0  ;;  %vm4693_vm10 = vcmp.le.f32.partialorder %v4692_v52, 0.7853982 }
 0x79c   : > { %vm4749_vm6 = vc.u32 %v8102_v21, %v8104_v7  ;;  %v4750_v48 = vadd.s32 1, %v8105_v37  ;;  %v4748_v8 = vadd.s32 %v8104_v7, %v8102_v21  ;;  %vm4784_vm14 = vweird.f32 %v8044_v33 }
 0x79d   : > { %v5945_v20 = vclamps-f32 %v4681_v28, 30.0 }
 0x79e   : > { %v4751_v31 = vsel %vm4749_vm6, %v4750_v48, %v8105_v37 }
 0x79f   : > { %v4752_v63 = vadd.s32 %v4751_v31, %v4747_v2  ;;  %v4686_v22 = vsub.f32 0.0, %v5945_v20  ;;  %v4684_v10 = vmul.f32 1.442695, %v5945_v20 }
 0x7a1   : > { %v4753_v24 = vadd.s32 536870912, %v4752_v63  ;;  %v4687_v40 = vmul.f32 1.442695, %v4686_v22 }
 0x7a3   : > { %v4754_v55 = vshrl.u32 %v4753_v24, 30  ;;  %6507 = vpow2.f32 %v4687_v40 }
 0x7a4   : > { %6509 = vpow2.f32 %v4684_v10 }
 0x7a5   : > { %v4755_v6 = vshll.u32 %v4754_v55, 30  ;;  %v4778_v17 = vsub.s32 4, %v4754_v55 }
 0x7a7   : > { %v4756_v60 = vsub.s32 %v4752_v63, %v4755_v6  ;;  %v4779_v30 = vsel %vm4694_vm8, %v4778_v17, %v4754_v55 }
 0x7a8   : > { %v4781_v49 = vsel %vm4693_vm10, 0, %v4779_v30 }
 0x7a9   : > { %v4758_v5 = vsub.s32 0, %v4756_v60  ;;  %v4785_v35 = vand.u32 3, %v4781_v49  ;;  %v4894_v7 = vadd.s32 3, %v4781_v49 }
 0x7ab   : > { %v5947_v13 = vmin.u32 %v4758_v5, %v4756_v60  ;;  %vm4790_vm11 = vcmp.eq.s32.totalorder %v4785_v35, 2  ;;  %vm4787_vm12 = vcmp.eq.s32.totalorder %v4785_v35, 0  ;;  %vm4786_vm13 = vcmp.lt.s32.totalorder %v4785_v35, 2  ;;  %v5509_v5 = vld [vmem:[#allocation14 + $0x8] sm:$0xff] }
 0x7ac   : > { %v4895_v37 = vand.u32 3, %v4894_v7  ;;  %v6532_v7 = vld [vmem:[%s7190_s12 + $0xd0] sm:$0xff] }
 0x7ad   : > { %v4760_v61 = vclz %v5947_v13  ;;  %v5504_v13 = vld [vmem:[#allocation4] sm:$0xff] }
 0x7ae   : > { %vm4897_vm15 = vcmp.eq.s32.totalorder %v4895_v37, 0  ;;  %vm4900_vm3 = vcmp.eq.s32.totalorder %v4895_v37, 2  ;;  %vm4896_vm4 = vcmp.lt.s32.totalorder %v4895_v37, 2 }
 0x7af   : > { %v5948_v45 = vadd.s32 4294967294, %v4760_v61  ;;  %v5505_v61 = vld [vmem:[#allocation4 + $0x8] sm:$0xff] }
 0x7b0   : > { %v6508_v19 = vpop.eup %6507 }
 0x7b1   : > { %vm5949_vm7 = vcmp.lt.s32.totalorder %v5948_v45, 0  ;;  %v6510_v43 = vpop.eup %6509 }
 0x7b2   : > { %v4763_v46 = vsel %vm5949_vm7, 0, %v5948_v45  ;;  %v4689_v41 = vadd.f32 %v6510_v43, %v6508_v19  ;;  %v4798_v2 = vsub.f32 %v6510_v43, %v6508_v19 }
 0x7b3   : > { %v4764_v18 = vsub.s32 32, %v4763_v46  ;;  %v4768_v29 = vsub.s32 4294967266, %v4763_v46  ;;  %v4765_v14 = vshll.u32 %v4756_v60, %v4763_v46 }
 0x7b4   : > { %v4690_v1 = vmul.f32 0.5, %v4689_v41  ;;  %v4799_v63 = vmul.f32 0.5, %v4798_v2  ;;  %v6530_v41 = vld [vmem:[%s7190_s12 + $0xc0] sm:$0xff] }
 0x7b5   : > { %v4766_v34 = vshrl.u32 %v4748_v8, %v4764_v18  ;;  %v4769_v47 = vadd.s32 127, %v4768_v29 }
 0x7b7   : > { %v4767_v4 = vor.u32 %v4766_v34, %v4765_v14  ;;  %v4770_v11 = vshll.u32 %v4769_v47, 23 }
 0x7b9   : > { %v4771_v12 = vor.u32 4788187, %v4770_v11  ;;  %v4774_v15 = vcvt.s32.f32 %v4767_v4 }
 0x7bb   : > { %v4772_v3 = vand.u32 2147483647, %v4771_v12 }
 0x7bd   : > { %v4775_v23 = vmul.f32 %v4774_v15, %v4772_v3 }
 0x7bf   : > { %v4776_v54 = vxor.u32 2147483648, %v4775_v23 }
 0x7c1   : > { %v4777_v57 = vsel %vm4694_vm8, %v4776_v54, %v4775_v23 }
 0x7c2   : > { %v4780_v56 = vsel %vm4693_vm10, %v8044_v33, %v4777_v57  ;;  %v5508_v33 = vld [vmem:[#allocation14] sm:$0xff] }
 0x7c3   : > { %6511 = vcosq.f32 %v4780_v56 }
 0x7c4   : > { %6513 = vsinq.f32 %v4780_v56 }
 0x7d0   : > { %v6512_v53 = vpop.eup %6511 }
 0x7d1   : > { %v6514_v50 = vpop.eup %6513  ;;  %v4791_v39 = vxor.u32 2147483648, %v6512_v53 }
 0x7d2   : > { %v4788_v36 = vxor.u32 2147483648, %v6514_v50 }
 0x7d3   : > { %v4792_v52 = vsel %vm4790_vm11, %v4791_v39, %v6514_v50  ;;  %v4902_v48 = vsel %vm4900_vm3, %v4791_v39, %v6514_v50 }
 0x7d4   : > { %v4789_v25 = vsel %vm4787_vm12, %v6512_v53, %v4788_v36  ;;  %v4899_v44 = vsel %vm4897_vm15, %v6512_v53, %v4788_v36  ;;  %v8457_v36 = vld [vmem:[#allocation36_spill] sm:$0xff] }
 0x7d5   : > { %v4793_v0 = vsel %vm4786_vm13, %v4789_v25, %v4792_v52  ;;  %v4903_v31 = vsel %vm4896_vm4, %v4899_v44, %v4902_v48  ;;  %v6533_v44 = vld [vmem:[%s7190_s12 + $0xe0] sm:$0xff] }
 0x7d6   : > { %v4794_v9 = vsel %vm4784_vm14, nan, %v4793_v0  ;;  %v4904_v55 = vsel %vm4784_vm14, nan, %v4903_v31  ;;  %v6531_v0 = vld [vmem:[%s7190_s12 + $0xc8] sm:$0xff] }
 0x7d7   : > { %v4795_v21 = vadd.f32 %v4794_v9, %v4690_v1 }
 0x7d9   : > { %6515 = vrcp.f32 %v4795_v21 }
 0x7e6   : > { %v6516_v24 = vpop.eup %6515 }
 0x7e7   : > { %v4800_v6 = vmul.f32 %v6516_v24, %v4799_v63  ;;  %v4905_v60 = vmul.f32 %v6516_v24, %v4904_v55  ;;  %v6534_v63 = vld [vmem:[%s7190_s12 + $0xd8] sm:$0xff] }
 0x7e9   : > { %6247 = vmatpush3.xpose.msk.msra.mxu0 %vm792_vm2, %v4800_v6  ;;  %6252 = vmatpush3.xpose.msk.msra.mxu1 %vm792_vm2, %v4905_v60 }
 0x7ea   : > { %6256 = vmatprep.subr.mxu0 %v8440_v59  ;;  %6261 = vmatprep.subr.mxu1 %v8440_v59 }
 0x7ec   : > { %6249 = vmatmul.mubr.msk.f32.vlgmr.msra.gmra.mxu0 %vm792_vm2, %v7946_v16  ;;  %6254 = vmatmul.mubr.msk.f32.vlgmr.msra.gmra.mxu1 %vm792_vm2, %v7459_v58 }
 0x7ed   : > { %6257 = vmatpush3.xpose.msk.msra.mxu0 %vm792_vm2, %v4800_v6  ;;  %6262 = vmatpush3.xpose.msk.msra.mxu1 %vm792_vm2, %v4905_v60 }
 0x7ee   : > { %6258 = vmatprep.mubr.msk.f32.mxu0 %vm6872_vm1, %v8440_v59  ;;  %6263 = vmatprep.mubr.msk.f32.mxu1 %vm6872_vm1, %v8440_v59 }
 0x7ef   : > { %6266 = vmatprep.subr.mxu0 %v5509_v5 }
 0x7f0   : > { %6259 = vmatmul.mubr.msk.f32.vlgmr.msra.gmra.mxu0 %vm792_vm2, %v7459_v58  ;;  %6264 = vmatmul.mubr.msk.f32.vlgmr.msra.gmra.mxu1 %vm792_vm2, %v7946_v16 }
 0x7f1   : > { %6267 = vmatpush3.msra.mxu0 %v5509_v5  ;;  %6270 = vmatprep.mubr.msk.f32.mxu0 %vm446_vm0, %v5504_v13  ;;  %v6535_v5 = vld [vmem:[%s7190_s12 + $0xe8] sm:$0xff] }
 0x7f2   : > { %6268 = vmatprep.subr.mxu0 %v5508_v33 }
 0x7f3   : > { %6269 = vmatpush3.msra.mxu0 %v5508_v33 }
 0x7f4   : > { %6271 = vmatmul.mubr.msk.f32.vlgmr.msra.gmra.mxu0 %vm446_vm0, %v5505_v61 }
 0x80c   : > { %v4314_v59 = vpop.permute.xlu1 %4313 }
 0x80d   : > { %4316 = vst.msk [vmem:[#allocation4 + $0x10] sm:$0xff] %vm1941_vm9, %v4314_v59 }
 0x814   : > { %v5506_v45 = vld [vmem:[#allocation4 + $0x10] sm:$0xff] }
 0x815   : > { %6273 = vmatprep.mubr.msk.f32.mxu0 %vm446_vm0, %v5506_v45  ;;  %v6536_v45 = vld [vmem:[%s7190_s12 + $0xf0] sm:$0xff] }
 0x8ac   : > { %v4977_v58 = vpop.f32.mrf.mxu0  ;;  %v5052_v42 = vpop.f32.mrf.mxu1 }
 0x8ad   : > { %v5056_v16 = vsub.f32 %v4977_v58, %v5052_v42 }
 0x8ae   : > { %v6250_v28 = vpop.f32.mrf.mxu0  ;;  %v6255_v46 = vpop.f32.mrf.mxu1 }
 0x8af   : > { %v5207_v8 = vcombine.high %v5056_v16, %v5056_v16  ;;  %v5214_v18 = vrot.slane %v5056_v16, %v7479_v62 }
 0x8b0   : > { %v5123_v29 = vpop.f32.mrf.mxu0  ;;  %v5193_v20 = vpop.f32.mrf.mxu1 }
 0x8b1   : > { %v5221_v14 = vrot.slane %v5207_v8, %v7479_v62  ;;  %v5222_v34 = vcombine.high %v5214_v18, %v5214_v18  ;;  %v5230_v47 = vrot.slane %v5214_v18, %v7479_v62  ;;  %v5194_v4 = vadd.f32 %v5193_v20, %v5123_v29 }
 0x8b2   : > { %v6260_v11 = vpop.f32.mrf.mxu0  ;;  %v6265_v22 = vpop.f32.mrf.mxu1 }
 0x8b3   : > { %v5223_v12 = vcombine.high %v5221_v14, %v5221_v14  ;;  %v5237_v3 = vrot.slane %v5221_v14, %v7479_v62  ;;  %v5244_v15 = vrot.slane %v5222_v34, %v7479_v62  ;;  %v5252_v40 = vcombine.high %v5230_v47, %v5230_v47 }
 0x8b4   : > { %v6272_v23 = vpop.f32.mrf.mxu0  ;;  %v5309_v57 = vrot.slane %v5230_v47, %v7502_v51  ;;  %v5257_v30 = vcombine.high %v5194_v4, %v5194_v4  ;;  %v5264_v43 = vrot.slane %v5194_v4, %v7479_v62 }
 0x8b5   : > { %v8155_v10 = vrot.slane %v5223_v12, %v7479_v62  ;;  %v5254_v54 = vcombine.high %v5244_v15, %v5244_v15  ;;  %5608 = vst [vmem:[%s8158_s16 + $0x8] sm:$0xff] %v6272_v23  ;;  %v5253_v56 = vcombine.high %v5237_v3, %v5237_v3  ;;  %v5313_v17 = vrot.slane %v5244_v15, %v7502_v51 }
 0x8b6   : > { %v5588_v49 = vpop.f32.mrf.mxu0  ;;  %v5317_v19 = vrot.slane %v5252_v40, %v7502_v51  ;;  %v5325_v35 = vrot.slane %v5237_v3, %v7502_v51  ;;  %v5346_v39 = vmul.f32 %v6530_v41, %v5309_v57  ;;  %v5458_v52 = vmul.f32 %v8457_v36, %v5309_v57  ;;  %v8458_v3 = vld [vmem:[#allocation37_spill] sm:$0xff] }
 0x8b7   : > { %5607 = vst [vmem:[%s8158_s16] sm:$0xff] %v5588_v49  ;;  %v5321_v53 = vrot.slane %v5254_v54, %v7502_v51  ;;  %v5329_v50 = vrot.slane %v8155_v10, %v7502_v51  ;;  %v5255_v25 = vcombine.high %v8155_v10, %v8155_v10  ;;  %v8174_v1 = vrot.slane %v5253_v56, %v7502_v51 }
 0x8b8   : > { %v5347_v9 = vmul.f32 %v6531_v0, %v5313_v17  ;;  %v5271_v21 = vrot.slane %v5257_v30, %v7479_v62  ;;  %v5348_v37 = vmul.f32 %v6532_v7, %v5317_v19  ;;  %v8180_v48 = vmul.f32 %v6533_v44, %v5325_v35  ;;  %v8459_v30 = vld [vmem:[#allocation41_spill] sm:$0xff] }
 0x8b9   : > { %v5272_v2 = vcombine.high %v5264_v43, %v5264_v43  ;;  %v5280_v31 = vrot.slane %v5264_v43, %v7479_v62  ;;  %v5349_v24 = vmul.f32 %v6534_v63, %v5321_v53  ;;  %v5459_v55 = vmul.f32 %v7908_v26, %v5313_v17 }
 0x8ba   : > { %v5273_v6 = vcombine.high %v5271_v21, %v5271_v21  ;;  %v5287_v60 = vrot.slane %v5271_v21, %v7479_v62  ;;  %v8187_v33 = vmul.f32 %v6535_v5, %v5329_v50  ;;  %v8193_v58 = vmul.f32 %v6536_v45, %v8174_v1 }
 0x8bb   : > { %v5294_v13 = vrot.slane %v5272_v2, %v7479_v62  ;;  %v5302_v61 = vcombine.high %v5280_v31, %v5280_v31  ;;  %v5357_v59 = vrot.slane %v5280_v31, %v7502_v51  ;;  %v5460_v20 = vmul.f32 %v7915_v27, %v5317_v19 }
 0x8bc   : > { %v5301_v42 = vrot.slane %v5273_v6, %v7479_v62  ;;  %v5303_v16 = vcombine.high %v5287_v60, %v5287_v60  ;;  %v5373_v28 = vrot.slane %v5287_v60, %v7502_v51  ;;  %v5461_v14 = vmul.f32 %v7921_v32, %v5321_v53 }
 0x8bd   : > { %v5304_v46 = vcombine.high %v5294_v13, %v5294_v13  ;;  %v5361_v8 = vrot.slane %v5294_v13, %v7502_v51  ;;  %v5365_v18 = vrot.slane %v5302_v61, %v7502_v51  ;;  %v5426_v29 = vmul.f32 %v8457_v36, %v5357_v59  ;;  %v6537_v61 = vld [vmem:[%s7190_s12 + $0xf8] sm:$0xff]  ;;  %s8463_s12 = sld [smem:[#allocation46_spill]] }
 0x8be   : > { %v5377_v34 = vrot.slane %v5301_v42, %v7502_v51  ;;  %v5381_v47 = vrot.slane %v5303_v16, %v7502_v51  ;;  %v5462_v12 = vmul.f32 %v7956_v38, %v5325_v35  ;;  %v5463_v15 = vmul.f32 %v8458_v3, %v5329_v50  ;;  %v8460_v16 = vld [vmem:[#allocation42_spill] sm:$0xff] }
 0x8bf   : > { %v5369_v62 = vrot.slane %v5304_v46, %v7502_v51  ;;  %v5427_v4 = vmul.f32 %v7908_v26, %v5361_v8  ;;  %v5428_v11 = vmul.f32 %v7915_v27, %v5365_v18  ;;  %v5434_v22 = vsub.f32 %v5346_v39, %v5426_v29 }
 0x8c0   : > { %v5430_v40 = vmul.f32 %v7956_v38, %v5373_v28  ;;  %v5431_v23 = vmul.f32 %v8458_v3, %v5377_v34  ;;  %v5466_v56 = vmul.f32 %v6530_v41, %v5357_v59  ;;  %v5305_v17 = vcombine.high %v5301_v42, %v5301_v42 }
 0x8c1   : > { %v5429_v10 = vmul.f32 %v7921_v32, %v5369_v62  ;;  %v5435_v54 = vsub.f32 %v5347_v9, %v5427_v4  ;;  %v5436_v57 = vsub.f32 %v5348_v37, %v5428_v11  ;;  %v5432_v49 = vmul.f32 %v8459_v30, %v5381_v47 }
 0x8c2   : > { %v5467_v26 = vmul.f32 %v6531_v0, %v5361_v8  ;;  %v5337_v27 = vrot.slane %v5255_v25, %v7502_v51  ;;  %v5442_v35 = vsel %vm792_vm2, %v5434_v22, 0.0  ;;  %v5468_v53 = vmul.f32 %v6532_v7, %v5365_v18 }
 0x8c3   : > { %v5437_v19 = vsub.f32 %v5349_v24, %v5429_v10  ;;  %v5443_v43 = vsel %vm792_vm2, %v5435_v54, 0.0  ;;  %v5438_v38 = vsub.f32 %v8180_v48, %v5430_v40  ;;  %v5439_v50 = vsub.f32 %v8187_v33, %v5431_v23  ;;  %s8252_s13 = scalar_lea.hbm %s8463_s12, %s5977_s14 }
 0x8c4   : > { %v5444_v32 = vadd.f32 %v5443_v43, %v5442_v35  ;;  %v5469_v39 = vmul.f32 %v6534_v63, %v5369_v62  ;;  %v5445_v41 = vsel %vm792_vm2, %v5436_v57, 0.0  ;;  %v5470_v36 = vmul.f32 %v6533_v44, %v5373_v28 }
 0x8c5   : > { %v5474_v9 = vadd.f32 %v5466_v56, %v5458_v52  ;;  %v5475_v21 = vadd.f32 %v5467_v26, %v5459_v55  ;;  %v5447_v25 = vsel %vm792_vm2, %v5437_v19, 0.0  ;;  %v5471_v37 = vmul.f32 %v6535_v5, %v5377_v34 }
 0x8c6   : > { %v5446_v0 = vadd.f32 %v5445_v41, %v5444_v32  ;;  %v5476_v2 = vadd.f32 %v5468_v53, %v5460_v20  ;;  %v5477_v31 = vadd.f32 %v5469_v39, %v5461_v14  ;;  %v5385_v24 = vrot.slane %v5305_v17, %v7502_v51 }
 0x8c7   : > { %v5482_v7 = vsel %vm792_vm2, %v5474_v9, 0.0  ;;  %v5483_v48 = vsel %vm792_vm2, %v5475_v21, 0.0  ;;  %v5440_v63 = vsub.f32 %v8193_v58, %v5432_v49  ;;  %v5464_v52 = vmul.f32 %v8459_v30, %v8174_v1 }
 0x8c8   : > { %v5448_v6 = vadd.f32 %v5447_v25, %v5446_v0  ;;  %v5484_v60 = vadd.f32 %v5483_v48, %v5482_v7  ;;  %v5449_v44 = vsel %vm792_vm2, %v5438_v38, 0.0  ;;  %v5478_v55 = vadd.f32 %v5470_v36, %v5462_v12 }
 0x8c9   : > { %v5485_v5 = vsel %vm792_vm2, %v5476_v2, 0.0  ;;  %v5472_v33 = vmul.f32 %v6536_v45, %v5381_v47  ;;  %v5353_v59 = vmul.f32 %v6537_v61, %v5337_v27  ;;  %v5433_v28 = vmul.f32 %v8460_v16, %v5385_v24 }
 0x8ca   : > { %v5450_v13 = vadd.f32 %v5449_v44, %v5448_v6  ;;  %v5486_v42 = vadd.f32 %v5485_v5, %v5484_v60  ;;  %v5451_v51 = vsel %vm792_vm2, %v5439_v50, 0.0  ;;  %v5473_v58 = vmul.f32 %v6537_v61, %v5385_v24 }
 0x8cb   : > { %v5479_v46 = vadd.f32 %v5471_v37, %v5463_v15  ;;  %v5487_v8 = vsel %vm792_vm2, %v5477_v31, 0.0  ;;  %v5441_v1 = vsub.f32 %v5353_v59, %v5433_v28  ;;  %v5465_v20 = vmul.f32 %v8460_v16, %v5337_v27 }
 0x8cc   : > { %v5488_v18 = vadd.f32 %v5487_v8, %v5486_v42  ;;  %v5452_v29 = vadd.f32 %v5451_v51, %v5450_v13  ;;  %v5480_v14 = vadd.f32 %v5472_v33, %v5464_v52  ;;  %v5489_v45 = vsel %vm792_vm2, %v5478_v55, 0.0 }
 0x8cd   : > { %v5453_v34 = vsel %vm792_vm2, %v5440_v63, 0.0  ;;  %v5481_v4 = vadd.f32 %v5473_v58, %v5465_v20  ;;  %v5491_v11 = vsel %vm792_vm2, %v5479_v46, 0.0  ;;  %v5455_v22 = vsel %vm792_vm2, %v5441_v1, 0.0 }
 0x8ce   : > { %v5490_v47 = vadd.f32 %v5489_v45, %v5488_v18  ;;  %v5454_v62 = vadd.f32 %v5453_v34, %v5452_v29  ;;  %v5493_v15 = vsel %vm792_vm2, %v5480_v14, 0.0 }
 0x8cf   : > { %v5495_v23 = vsel %vm792_vm2, %v5481_v4, 0.0 }
 0x8d0   : > { %v5492_v12 = vadd.f32 %v5491_v11, %v5490_v47  ;;  %v5456_v3 = vadd.f32 %v5455_v22, %v5454_v62 }
 0x8d2   : > { %v5494_v40 = vadd.f32 %v5493_v15, %v5492_v12  ;;  %5498 = vst.msk [vmem:[#allocation4 + $0x18] sm:$0xff] %vm792_vm2, %v5456_v3 }
 0x8d4   : > { %v5496_v10 = vadd.f32 %v5495_v23, %v5494_v40 }
 0x8d6   : > { %5500 = vrot.lane.b32.xlu0 %v5496_v10, %s6880_s27 }
 0x948   : > { %v5501_v54 = vpop.permute.xlu0 %5500 }
 0x949   : > { %5503 = vst.msk [vmem:[#allocation4 + $0x18] sm:$0xff] %vm1941_vm9, %v5501_v54 }
 0x950   : > { %v5507_v57 = vld [vmem:[#allocation4 + $0x18] sm:$0xff] }
 0x951   : > { %6274 = vmatmul.mubr.msk.f32.gmra.mxu0 %vm446_vm0, %v5507_v57 }
 0xa11   : > { %v6275_v56 = vpop.f32.mrf.mxu0 }
 0xa12   : > { %5610 = vst [vmem:[%s8158_s16 + $0x18] sm:$0xff] %v6275_v56 }
 0xa13   : > { %v5598_v17 = vpop.f32.mrf.mxu0 }
 0xa14   : > { %5609 = vst [vmem:[%s8158_s16 + $0x10] sm:$0xff] %v5598_v17 }
 0xa15   : > { %6713 = shalt.err (!%p6710_p11)
}
 0xa16   : > { %s6714_s15 = scalar_lea.hbm %s8252_s13, 512  ;;  %s6718_s22 = scalar_lea.hbm %s8463_s12, 2048 }
 0xa17   : > { %p6715_p9 = scmp.ne.s32.totalorder %s8252_s13, %s6714_s15  ;;  %p6719_p5 = scmp.lt.s32.totalorder %s8252_s13, %s8463_s12 }
 0xa18   : > { %p6720_p8 = scmp.lt.s32.totalorder %s6718_s22, %s6714_s15 }
 0xa19   : > { %p6716_p3 = pnand %p6715_p9, %p8464_p7 }
 0xa1a   : > { %p6721_p4 = por %p6720_p8, %p6719_p5 }
 0xa1b   : > { %p6717_p13 = pneg %p6716_p3 }
 0xa1d   : > { %p6722_p6 = pnand %p6721_p4, %p6717_p13 }
 0xa1f   : > { %6725 = shalt.err (!%p6722_p6)
}
 0xa20   : > { %s6882_s23 = smov 128  }
 0xa21   : > { %6314 = dma.vmem_to_hbm [thread:$0]  (%p8464_p7), %s8246_s1, 512, %s8252_s13, %s8257_s11, %s6882_s23, %s6882_s23, %s6880_s27  }
 0xa22 PF: > { %s8465_s14 = sld [smem:[#allocation23_spill]]  ;;  %p6347_p12 = scmp.ge.s32.totalorder %s6860_s10, 2 }
 0xa23   : > { %s8466_s17 = sld [smem:[#allocation30_spill]] }
 0xa28   : > { %s5642_s21 = sand.u32 1, %s8465_s14  }
 0xa29   : > { %p8467_p2 = scmp.ne.s32.totalorder %s8466_s17, 0  ;;  %s5643_s20 = scalar_lea.sflag [#allocation7], %s5642_s21 }
 0xa2b   : > { %p6337_p1 = pnand %p6347_p12, %p8467_p2 }
 0xa2d   : > { %p6338_p10 = pneg %p6337_p1 }
 0xa2f   : > { %6803 = dma.done.wait (%p6338_p10), %s5643_s20, 512  }
 0xa30   : > { %6805 = vsyncadd (%p6338_p10), %s5643_s20, 4294966784  ;;  %s27_s10 = sadd.s32 1, %s6860_s10   ;;  %s8469_s21 = sld [smem:[#allocation24_spill]] }
 0xa31   : > { %p8286_p0 = scmp.ge.s32.totalorder %s27_s10, 6   ;;  %s8470_s22 = sld [smem:[#allocation25_spill]] }
 0xa32   : > { %s8471_s23 = sld [smem:[#allocation34_spill]]  ;;  %s8475_s24 = smov %s6824_s25 }
 0xa33   : > { %s8472_s1 = sld [smem:[#allocation33_spill]]  ;;  %s8476_s25 = smov %s6828_s26 }
 0xa34   : > { %s8473_s13 = sld [smem:[#allocation31_spill]]  ;;  %s8477_s26 = smov %s7154_s4 }
 0xa35   : > { %s8474_s11 = sld [smem:[#allocation32_spill]]  ;;  %s8478_s27 = smov %s6836_s28 }
 0xa36   : > { %s8479_s28 = smov %s6840_s29  ;;  %s8481_s30 = smov %s6852_s8 }
 0xa37   : > { %s8482_s7 = smov %s6856_s9  ;;  %26 = sbr.rel (!%p8286_p0) target bundleno = 19 (0x13), region = 136 }
 0xa39   : > { %s8480_s29 = smov %s8472_s1 }
 0xa3a   : > { %s8483_s8 = smov %s8473_s13 }
 0xa3b   : > { %s8484_s9 = smov %s8474_s11 }
 0xa3c   :  { %5648 = vsyncpa [#allocation6], 1 }
 0xa3d   :  { %5650 = vsyncpa [#allocation6 + $0x1], 1 }
 0xa3e   :  { %5651 = vsyncpa [#allocation9], 1 }
 0xa3f   :  { %5653 = vsyncpa [#allocation9 + $0x1], 1 }
 0xa40   :  { %5654 = vsyncpa [#allocation12], 1 }
 0xa41   :  { %5655 = vsyncpa [#allocation15], 1 }
 0xa42   :  { %5656 = vsyncpa [#allocation7], 1 }
 0xa43   :  { %5658 = vsyncpa [#allocation7 + $0x1], 1 }

</bundles_post_ra>
